<compile_context>
chip_gen: v7x
topology: tpu7x:2x2x1
jax: 0.10.0
libtpu: 0.0.40
codegen_flags: <defaults>
</compile_context>

<pallas_src>
import functools

import jax
import jax.numpy as jnp
from jax.experimental import pallas as pl
from jax.experimental.pallas import tpu as pltpu

MAX_PAD = 8                 # largest dilation padding
DILATIONS = (1, 2, 4, 8)
BN_EPS = 1e-5


def _nbytes(shape, dtype=jnp.float32):
    n = 1
    for s in shape:
        n *= int(s)
    return n * jnp.dtype(dtype).itemsize


# ----------------------------------------------------------------------------
# Fused kernel (per batch):
#   in-kernel zero pad -> 4 dilated 3x3 convs (one K=9C matmul each) + ReLU ->
#   5C concat in VMEM -> cSE gate (GAP -> FC -> ReLU -> FC -> sigmoid) ->
#   gated 1x1 conv (5C -> Cout) -> per-batch BatchNorm partial sums.
# ----------------------------------------------------------------------------
def _dblock_fused_kernel(x_ref, wdil_ref, w1_ref, w2_ref, wc_ref,
                         oc_ref, ssum_ref, ssq_ref,
                         xpad_sc, slab_sc, y_sc,
                         *, H, W, C):
    HW = H * W

    # In-kernel zero padding (avoids materializing a padded copy of x in HBM).
    xpad_sc[...] = jnp.zeros_like(xpad_sc)
    xpad_sc[MAX_PAD:MAX_PAD + H, MAX_PAD:MAX_PAD + W, :] = x_ref[0]

    # Concat piece 0: the identity branch (direct slice store, no jnp.concatenate).
    y_sc[:, 0:C] = x_ref[0].reshape(HW, C)

    # Four dilated 3x3 convs, each as one (HW, 9C) x (9C, C) matmul on the MXU.
    for di, d in enumerate(DILATIONS):
        for ky in range(3):
            for kx in range(3):
                t = ky * 3 + kx
                r0 = MAX_PAD + (ky - 1) * d
                c0 = MAX_PAD + (kx - 1) * d
                slab_sc[:, t * C:(t + 1) * C] = (
                    xpad_sc[r0:r0 + H, c0:c0 + W, :].reshape(HW, C))
        conv = jnp.dot(slab_sc[...], wdil_ref[di],
                       preferred_element_type=jnp.float32)
        y_sc[:, (di + 1) * C:(di + 2) * C] = jnp.maximum(conv, 0.0)

    # cSE channel gate: global avg pool -> FC -> ReLU -> FC -> sigmoid.
    y = y_sc[...]                                             # (HW, 5C), VMEM only
    s = jnp.mean(y, axis=0, keepdims=True)                    # (1, 5C)
    z = jnp.maximum(
        jnp.dot(s, w1_ref[...], preferred_element_type=jnp.float32), 0.0)
    g = jax.nn.sigmoid(
        jnp.dot(z, w2_ref[...], preferred_element_type=jnp.float32))  # (1, 5C)

    # Gated 1x1 conv (5C -> Cout).
    o = jnp.dot(y * g, wc_ref[...], preferred_element_type=jnp.float32)  # (HW, Cout)
    oc_ref[0] = o

    # Per-batch BatchNorm partial statistics.
    ssum_ref[0] = jnp.sum(o, axis=0, keepdims=True)
    ssq_ref[0] = jnp.sum(o * o, axis=0, keepdims=True)


# ----------------------------------------------------------------------------
# BatchNorm apply: lane-dense elementwise scale/shift, tiled over (batch, row-blocks).
# ----------------------------------------------------------------------------
def _bn_apply_kernel(x_ref, scale_ref, shift_ref, out_ref):
    out_ref[...] = x_ref[...] * scale_ref[...] + shift_ref[...]


# ----------------------------------------------------------------------------
# Wrapper
# ----------------------------------------------------------------------------
def dblock_forward(x_nchw, params):
    x = jnp.transpose(x_nchw, (0, 2, 3, 1)).astype(jnp.float32)   # NCHW -> NHWC
    N, H, W, C = x.shape
    C5 = 5 * C
    Cmid = C5 // 2
    Cout = params["wc"].shape[-1]
    HW = H * W
    Hp, Wp = H + 2 * MAX_PAD, W + 2 * MAX_PAD

    # (4,3,3,Cin,Cout) -> (4, 9C, C): rows in (ky, kx, Cin) order, matching the tap slab.
    w_dil = params["w_dil"].reshape(4, 9 * C, C)

    # ---- fused dilated convs + cSE gate + 1x1 conv + BN partial sums -------------------
    block_bytes = 2 * (_nbytes((1, H, W, C)) + _nbytes((4, 9 * C, C))
                       + _nbytes((C5, Cmid)) + _nbytes((Cmid, C5))
                       + _nbytes((C5, Cout)) + _nbytes((1, HW, Cout))
                       + 2 * _nbytes((1, 1, Cout)))
    scratch_bytes = (_nbytes((Hp, Wp, C)) + _nbytes((HW, 9 * C)) + _nbytes((HW, C5)))
    vmem_fused = int(min(64 * 2**20,
                         max(32 * 2**20, block_bytes + scratch_bytes + (4 << 20))))

    oc, ssum, ssq = pl.pallas_call(
        functools.partial(_dblock_fused_kernel, H=H, W=W, C=C),
        out_shape=(
            jax.ShapeDtypeStruct((N, HW, Cout), jnp.float32),
            jax.ShapeDtypeStruct((N, 1, Cout), jnp.float32),
            jax.ShapeDtypeStruct((N, 1, Cout), jnp.float32),
        ),
        grid=(N,),
        in_specs=[
            pl.BlockSpec((1, H, W, C), lambda n: (n, 0, 0, 0)),
            pl.BlockSpec((4, 9 * C, C), lambda n: (0, 0, 0)),
            pl.BlockSpec((C5, Cmid), lambda n: (0, 0)),
            pl.BlockSpec((Cmid, C5), lambda n: (0, 0)),
            pl.BlockSpec((C5, Cout), lambda n: (0, 0)),
        ],
        out_specs=(
            pl.BlockSpec((1, HW, Cout), lambda n: (n, 0, 0)),
            pl.BlockSpec((1, 1, Cout), lambda n: (n, 0, 0)),
            pl.BlockSpec((1, 1, Cout), lambda n: (n, 0, 0)),
        ),
        scratch_shapes=[
            pltpu.VMEM((Hp, Wp, C), jnp.float32),    # zero-padded input
            pltpu.VMEM((HW, 9 * C), jnp.float32),    # 9-tap patch slab (one dilation at a time)
            pltpu.VMEM((HW, C5), jnp.float32),       # 5C concat (never written to HBM)
        ],
        compiler_params=pltpu.CompilerParams(
            dimension_semantics=("parallel",),
            vmem_limit_bytes=vmem_fused),
    )(x, w_dil, params["w1"], params["w2"], params["wc"])

    # ---- BatchNorm finalize: tiny scalar math in plain JAX (training-mode batch stats) --
    cnt = float(N * HW)
    mean = jnp.sum(ssum, axis=(0, 1)) / cnt
    var = jnp.sum(ssq, axis=(0, 1)) / cnt - mean * mean          # biased variance
    scale = params["gamma"].reshape(Cout) * jax.lax.rsqrt(var + BN_EPS)
    shift = params["beta"].reshape(Cout) - mean * scale

    # ---- tiled, lane-dense scale/shift kernel -------------------------------------------
    WC = W * Cout
    oc2 = oc.reshape(N, H, WC)                       # contiguous reshape (metadata only)
    scale_t = jnp.tile(scale, W).reshape(1, WC)      # per-channel params tiled over W
    shift_t = jnp.tile(shift, W).reshape(1, WC)
    HB = 8 if H % 8 == 0 else H

    vmem_bn = int(min(64 * 2**20,
                      max(32 * 2**20,
                          2 * (2 * _nbytes((1, HB, WC)) + 2 * _nbytes((1, WC))) + (2 << 20))))

    ob = pl.pallas_call(
        _bn_apply_kernel,
        out_shape=jax.ShapeDtypeStruct((N, H, WC), jnp.float32),
        grid=(N, H // HB),
        in_specs=[
            pl.BlockSpec((1, HB, WC), lambda n, h: (n, h, 0)),
            pl.BlockSpec((1, WC), lambda n, h: (0, 0)),
            pl.BlockSpec((1, WC), lambda n, h: (0, 0)),
        ],
        out_specs=pl.BlockSpec((1, HB, WC), lambda n, h: (n, h, 0)),
        compiler_params=pltpu.CompilerParams(
            dimension_semantics=("parallel", "parallel"),
            vmem_limit_bytes=vmem_bn),
    )(oc2, scale_t, shift_t)

    out = ob.reshape(N, H, W, Cout)
    return jnp.transpose(out, (0, 3, 1, 2))          # back to NCHW


# ----------------------------------------------------------------------------
# Deterministic parameter initialization (shapes from Dblock.__init__)
# ----------------------------------------------------------------------------
def init_params(key, in_channel, out_channel):
    C = in_channel
    C5 = 5 * C
    ks = jax.random.split(key, 7)
    # dilated conv weights: PyTorch layout (Cout, Cin, 3, 3) -> kernel layout (ky, kx, Cin, Cout)
    w_dil = []
    for i in range(4):
        w = jax.random.normal(ks[i], (C, C, 3, 3), jnp.float32) / (3 * 3 * C) ** 0.5
        w_dil.append(jnp.transpose(w, (2, 3, 1, 0)))
    w_dil = jnp.stack(w_dil, axis=0)                                  # (4,3,3,C,C)
    # cSE 1x1 convs (bias-free): (C5//2, C5) and (C5, C5//2) in PyTorch layout
    w1 = jax.random.normal(ks[4], (C5 // 2, C5), jnp.float32) / C5 ** 0.5
    w2 = jax.random.normal(ks[5], (C5, C5 // 2), jnp.float32) / (C5 // 2) ** 0.5
    # final 1x1 conv (bias=False): (Cout, C5)
    wc = jax.random.normal(ks[6], (out_channel, C5), jnp.float32) / C5 ** 0.5
    return dict(
        w_dil=w_dil,
        w1=jnp.transpose(w1),                       # (C5, C5//2)  for x @ W
        w2=jnp.transpose(w2),                       # (C5//2, C5)
        wc=jnp.transpose(wc),                       # (C5, Cout)
        gamma=jnp.ones((1, out_channel), jnp.float32),   # BatchNorm2d defaults
        beta=jnp.zeros((1, out_channel), jnp.float32),
    )


# ----------------------------------------------------------------------------
# Pure-JAX reference (for correctness check)
# ----------------------------------------------------------------------------
def ref_forward(x_nchw, params):
    x = jnp.transpose(x_nchw, (0, 2, 3, 1)).astype(jnp.float32)

    def conv3(xx, w, d):
        return jax.lax.conv_general_dilated(
            xx, w, window_strides=(1, 1), padding=((d, d), (d, d)),
            rhs_dilation=(d, d), dimension_numbers=("NHWC", "HWIO", "NHWC"))

    outs = [x]
    for i, d in enumerate(DILATIONS):
        outs.append(jax.nn.relu(conv3(x, params["w_dil"][i], d)))
    y = jnp.concatenate(outs, axis=-1)
    s = jnp.mean(y, axis=(1, 2), keepdims=True)
    z = jax.nn.relu(jnp.einsum("nhwc,cd->nhwd", s, params["w1"]))
    g = jax.nn.sigmoid(jnp.einsum("nhwd,dc->nhwc", z, params["w2"]))
    yg = y * g
    oc = jnp.einsum("nhwc,co->nhwo", yg, params["wc"])
    mean = jnp.mean(oc, axis=(0, 1, 2), keepdims=True)
    var = jnp.mean((oc - mean) ** 2, axis=(0, 1, 2), keepdims=True)
    out = ((oc - mean) / jnp.sqrt(var + BN_EPS)
           * params["gamma"].reshape(1, 1, 1, -1)
           + params["beta"].reshape(1, 1, 1, -1))
    return jnp.transpose(out, (0, 3, 1, 2))


if __name__ == "__main__":
    key = jax.random.PRNGKey(0)
    kx, kp = jax.random.split(key)
    N, C, H, W = 2, 4, 16, 16
    Cout = 8
    x = jax.random.normal(kx, (N, C, H, W), jnp.float32)   # PyTorch-style NCHW input
    params = init_params(kp, C, Cout)

    out = jax.block_until_ready(dblock_forward(x, params))
    assert out.shape == (N, Cout, H, W), out.shape

    ref = ref_forward(x, params)
    err = float(jnp.max(jnp.abs(out - ref)))
    assert err < 1e-3, f"max abs error {err}"

    print("KERNEL_OK")
</pallas_src>

<mosaic_0001>
module attributes {stable_mosaic.version = 11 : i64} {
  func.func @_dblock_fused_kernel(%arg0: i32, %arg1: memref<1x16x16x4xf32, #tpu.memory_space<vmem>>, %arg2: memref<4x36x4xf32, #tpu.memory_space<vmem>>, %arg3: memref<20x10xf32, #tpu.memory_space<vmem>>, %arg4: memref<10x20xf32, #tpu.memory_space<vmem>>, %arg5: memref<20x8xf32, #tpu.memory_space<vmem>>, %arg6: memref<1x256x8xf32, #tpu.memory_space<vmem>>, %arg7: memref<1x1x8xf32, #tpu.memory_space<vmem>>, %arg8: memref<1x1x8xf32, #tpu.memory_space<vmem>>, %arg9: memref<32x32x4xf32, #tpu.memory_space<vmem>>, %arg10: memref<256x36xf32, #tpu.memory_space<vmem>>, %arg11: memref<256x20xf32, #tpu.memory_space<vmem>>) attributes {dimension_semantics = [#tpu.dimension_semantics<parallel>], iteration_bounds = array<i64: 2>, scalar_prefetch = 0 : i64, scratch_operands = 3 : i64, tpu.core_type = #tpu.core_type<tc>, window_params = [{transform_indices = @transform_0, window_bounds = array<i64: 1, 16, 16, 4>}, {pipeline_mode = #tpu.pipeline_mode<synchronous>, transform_indices = @transform_1, window_bounds = array<i64: 4, 36, 4>}, {pipeline_mode = #tpu.pipeline_mode<synchronous>, transform_indices = @transform_2, window_bounds = array<i64: 20, 10>}, {pipeline_mode = #tpu.pipeline_mode<synchronous>, transform_indices = @transform_3, window_bounds = array<i64: 10, 20>}, {pipeline_mode = #tpu.pipeline_mode<synchronous>, transform_indices = @transform_4, window_bounds = array<i64: 20, 8>}, {transform_indices = @transform_5, window_bounds = array<i64: 1, 256, 8>}, {transform_indices = @transform_6, window_bounds = array<i64: 1, 1, 8>}, {transform_indices = @transform_7, window_bounds = array<i64: 1, 1, 8>}]} {
    %cst = arith.constant 0.000000e+00 : f32
    %0 = vector.broadcast %cst : f32 to vector<32x32x4xf32>
    %c0 = arith.constant 0 : index
    %c0_0 = arith.constant 0 : index
    %c0_1 = arith.constant 0 : index
    %1 = vector.load %arg9[%c0, %c0_0, %c0_1] : memref<32x32x4xf32, #tpu.memory_space<vmem>>, vector<32x32x4xf32>
    tpu.vector_store %arg9[%c0, %c0_0, %c0_1], %0 {strides = array<i32>} : memref<32x32x4xf32, #tpu.memory_space<vmem>>, vector<32x32x4xf32>,
    %c0_2 = arith.constant 0 : index
    %c0_3 = arith.constant 0 : index
    %c0_4 = arith.constant 0 : index
    %c0_5 = arith.constant 0 : index
    %2 = vector.load %arg1[%c0_2, %c0_3, %c0_4, %c0_5] : memref<1x16x16x4xf32, #tpu.memory_space<vmem>>, vector<1x16x16x4xf32>
    %3 = vector.shape_cast %2 : vector<1x16x16x4xf32> to vector<16x16x4xf32>
    %c8 = arith.constant 8 : index
    %c8_6 = arith.constant 8 : index
    %c0_7 = arith.constant 0 : index
    %4 = vector.load %arg9[%c8, %c8_6, %c0_7] : memref<32x32x4xf32, #tpu.memory_space<vmem>>, vector<16x16x4xf32>
    tpu.vector_store %arg9[%c8, %c8_6, %c0_7], %3 {strides = array<i32>} : memref<32x32x4xf32, #tpu.memory_space<vmem>>, vector<16x16x4xf32>,
    %c0_8 = arith.constant 0 : index
    %c0_9 = arith.constant 0 : index
    %c0_10 = arith.constant 0 : index
    %c0_11 = arith.constant 0 : index
    %5 = vector.load %arg1[%c0_8, %c0_9, %c0_10, %c0_11] : memref<1x16x16x4xf32, #tpu.memory_space<vmem>>, vector<1x16x16x4xf32>
    %6 = vector.shape_cast %5 : vector<1x16x16x4xf32> to vector<16x16x4xf32>
    %7 = vector.shape_cast %6 : vector<16x16x4xf32> to vector<256x4xf32>
    %c0_12 = arith.constant 0 : index
    %c0_13 = arith.constant 0 : index
    %8 = vector.load %arg11[%c0_12, %c0_13] : memref<256x20xf32, #tpu.memory_space<vmem>>, vector<256x4xf32>
    tpu.vector_store %arg11[%c0_12, %c0_13], %7 {strides = array<i32>} : memref<256x20xf32, #tpu.memory_space<vmem>>, vector<256x4xf32>,
    %c7 = arith.constant 7 : index
    %c7_14 = arith.constant 7 : index
    %c0_15 = arith.constant 0 : index
    %9 = vector.load %arg9[%c7, %c7_14, %c0_15] : memref<32x32x4xf32, #tpu.memory_space<vmem>>, vector<16x16x4xf32>
    %10 = vector.shape_cast %9 : vector<16x16x4xf32> to vector<256x4xf32>
    %c0_16 = arith.constant 0 : index
    %c0_17 = arith.constant 0 : index
    %11 = vector.load %arg10[%c0_16, %c0_17] : memref<256x36xf32, #tpu.memory_space<vmem>>, vector<256x4xf32>
    tpu.vector_store %arg10[%c0_16, %c0_17], %10 {strides = array<i32>} : memref<256x36xf32, #tpu.memory_space<vmem>>, vector<256x4xf32>,
    %c7_18 = arith.constant 7 : index
    %c8_19 = arith.constant 8 : index
    %c0_20 = arith.constant 0 : index
    %12 = vector.load %arg9[%c7_18, %c8_19, %c0_20] : memref<32x32x4xf32, #tpu.memory_space<vmem>>, vector<16x16x4xf32>
    %13 = vector.shape_cast %12 : vector<16x16x4xf32> to vector<256x4xf32>
    %c0_21 = arith.constant 0 : index
    %c4 = arith.constant 4 : index
    %14 = vector.load %arg10[%c0_21, %c4] : memref<256x36xf32, #tpu.memory_space<vmem>>, vector<256x4xf32>
    tpu.vector_store %arg10[%c0_21, %c4], %13 {strides = array<i32>} : memref<256x36xf32, #tpu.memory_space<vmem>>, vector<256x4xf32>,
    %c7_22 = arith.constant 7 : index
    %c9 = arith.constant 9 : index
    %c0_23 = arith.constant 0 : index
    %15 = vector.load %arg9[%c7_22, %c9, %c0_23] : memref<32x32x4xf32, #tpu.memory_space<vmem>>, vector<16x16x4xf32>
    %16 = vector.shape_cast %15 : vector<16x16x4xf32> to vector<256x4xf32>
    %c0_24 = arith.constant 0 : index
    %c8_25 = arith.constant 8 : index
    %17 = vector.load %arg10[%c0_24, %c8_25] : memref<256x36xf32, #tpu.memory_space<vmem>>, vector<256x4xf32>
    tpu.vector_store %arg10[%c0_24, %c8_25], %16 {strides = array<i32>} : memref<256x36xf32, #tpu.memory_space<vmem>>, vector<256x4xf32>,
    %c8_26 = arith.constant 8 : index
    %c7_27 = arith.constant 7 : index
    %c0_28 = arith.constant 0 : index
    %18 = vector.load %arg9[%c8_26, %c7_27, %c0_28] : memref<32x32x4xf32, #tpu.memory_space<vmem>>, vector<16x16x4xf32>
    %19 = vector.shape_cast %18 : vector<16x16x4xf32> to vector<256x4xf32>
    %c0_29 = arith.constant 0 : index
    %c12 = arith.constant 12 : index
    %20 = vector.load %arg10[%c0_29, %c12] : memref<256x36xf32, #tpu.memory_space<vmem>>, vector<256x4xf32>
    tpu.vector_store %arg10[%c0_29, %c12], %19 {strides = array<i32>} : memref<256x36xf32, #tpu.memory_space<vmem>>, vector<256x4xf32>,
    %c8_30 = arith.constant 8 : index
    %c8_31 = arith.constant 8 : index
    %c0_32 = arith.constant 0 : index
    %21 = vector.load %arg9[%c8_30, %c8_31, %c0_32] : memref<32x32x4xf32, #tpu.memory_space<vmem>>, vector<16x16x4xf32>
    %22 = vector.shape_cast %21 : vector<16x16x4xf32> to vector<256x4xf32>
    %c0_33 = arith.constant 0 : index
    %c16 = arith.constant 16 : index
    %23 = vector.load %arg10[%c0_33, %c16] : memref<256x36xf32, #tpu.memory_space<vmem>>, vector<256x4xf32>
    tpu.vector_store %arg10[%c0_33, %c16], %22 {strides = array<i32>} : memref<256x36xf32, #tpu.memory_space<vmem>>, vector<256x4xf32>,
    %c8_34 = arith.constant 8 : index
    %c9_35 = arith.constant 9 : index
    %c0_36 = arith.constant 0 : index
    %24 = vector.load %arg9[%c8_34, %c9_35, %c0_36] : memref<32x32x4xf32, #tpu.memory_space<vmem>>, vector<16x16x4xf32>
    %25 = vector.shape_cast %24 : vector<16x16x4xf32> to vector<256x4xf32>
    %c0_37 = arith.constant 0 : index
    %c20 = arith.constant 20 : index
    %26 = vector.load %arg10[%c0_37, %c20] : memref<256x36xf32, #tpu.memory_space<vmem>>, vector<256x4xf32>
    tpu.vector_store %arg10[%c0_37, %c20], %25 {strides = array<i32>} : memref<256x36xf32, #tpu.memory_space<vmem>>, vector<256x4xf32>,
    %c9_38 = arith.constant 9 : index
    %c7_39 = arith.constant 7 : index
    %c0_40 = arith.constant 0 : index
    %27 = vector.load %arg9[%c9_38, %c7_39, %c0_40] : memref<32x32x4xf32, #tpu.memory_space<vmem>>, vector<16x16x4xf32>
    %28 = vector.shape_cast %27 : vector<16x16x4xf32> to vector<256x4xf32>
    %c0_41 = arith.constant 0 : index
    %c24 = arith.constant 24 : index
    %29 = vector.load %arg10[%c0_41, %c24] : memref<256x36xf32, #tpu.memory_space<vmem>>, vector<256x4xf32>
    tpu.vector_store %arg10[%c0_41, %c24], %28 {strides = array<i32>} : memref<256x36xf32, #tpu.memory_space<vmem>>, vector<256x4xf32>,
    %c9_42 = arith.constant 9 : index
    %c8_43 = arith.constant 8 : index
    %c0_44 = arith.constant 0 : index
    %30 = vector.load %arg9[%c9_42, %c8_43, %c0_44] : memref<32x32x4xf32, #tpu.memory_space<vmem>>, vector<16x16x4xf32>
    %31 = vector.shape_cast %30 : vector<16x16x4xf32> to vector<256x4xf32>
    %c0_45 = arith.constant 0 : index
    %c28 = arith.constant 28 : index
    %32 = vector.load %arg10[%c0_45, %c28] : memref<256x36xf32, #tpu.memory_space<vmem>>, vector<256x4xf32>
    tpu.vector_store %arg10[%c0_45, %c28], %31 {strides = array<i32>} : memref<256x36xf32, #tpu.memory_space<vmem>>, vector<256x4xf32>,
    %c9_46 = arith.constant 9 : index
    %c9_47 = arith.constant 9 : index
    %c0_48 = arith.constant 0 : index
    %33 = vector.load %arg9[%c9_46, %c9_47, %c0_48] : memref<32x32x4xf32, #tpu.memory_space<vmem>>, vector<16x16x4xf32>
    %34 = vector.shape_cast %33 : vector<16x16x4xf32> to vector<256x4xf32>
    %c0_49 = arith.constant 0 : index
    %c32 = arith.constant 32 : index
    %35 = vector.load %arg10[%c0_49, %c32] : memref<256x36xf32, #tpu.memory_space<vmem>>, vector<256x4xf32>
    tpu.vector_store %arg10[%c0_49, %c32], %34 {strides = array<i32>} : memref<256x36xf32, #tpu.memory_space<vmem>>, vector<256x4xf32>,
    %c0_50 = arith.constant 0 : index
    %c0_51 = arith.constant 0 : index
    %36 = vector.load %arg10[%c0_50, %c0_51] : memref<256x36xf32, #tpu.memory_space<vmem>>, vector<256x36xf32>
    %c0_52 = arith.constant 0 : index
    %c0_53 = arith.constant 0 : index
    %c0_54 = arith.constant 0 : index
    %37 = vector.load %arg2[%c0_52, %c0_53, %c0_54] : memref<4x36x4xf32, #tpu.memory_space<vmem>>, vector<1x36x4xf32>
    %38 = vector.shape_cast %37 : vector<1x36x4xf32> to vector<36x4xf32>
    %cst_55 = arith.constant dense<0.000000e+00> : vector<256x4xf32>
    %39 = tpu.matmul %36, %38, %cst_55 {dimension_numbers = #tpu.dot_dimension_numbers<[1], [0], [0], [1], [0, 0, 1, 1], [], []>} : vector<256x36xf32>, vector<36x4xf32>, vector<256x4xf32> -> vector<256x4xf32>
    %cst_56 = arith.constant 0.000000e+00 : f32
    %40 = vector.broadcast %cst_56 : f32 to vector<256x4xf32>
    %41 = arith.maximumf %39, %40 : vector<256x4xf32>
    %c0_57 = arith.constant 0 : index
    %c4_58 = arith.constant 4 : index
    %42 = vector.load %arg11[%c0_57, %c4_58] : memref<256x20xf32, #tpu.memory_space<vmem>>, vector<256x4xf32>
    tpu.vector_store %arg11[%c0_57, %c4_58], %41 {strides = array<i32>} : memref<256x20xf32, #tpu.memory_space<vmem>>, vector<256x4xf32>,
    %c6 = arith.constant 6 : index
    %c6_59 = arith.constant 6 : index
    %c0_60 = arith.constant 0 : index
    %43 = vector.load %arg9[%c6, %c6_59, %c0_60] : memref<32x32x4xf32, #tpu.memory_space<vmem>>, vector<16x16x4xf32>
    %44 = vector.shape_cast %43 : vector<16x16x4xf32> to vector<256x4xf32>
    %c0_61 = arith.constant 0 : index
    %c0_62 = arith.constant 0 : index
    %45 = vector.load %arg10[%c0_61, %c0_62] : memref<256x36xf32, #tpu.memory_space<vmem>>, vector<256x4xf32>
    tpu.vector_store %arg10[%c0_61, %c0_62], %44 {strides = array<i32>} : memref<256x36xf32, #tpu.memory_space<vmem>>, vector<256x4xf32>,
    %c6_63 = arith.constant 6 : index
    %c8_64 = arith.constant 8 : index
    %c0_65 = arith.constant 0 : index
    %46 = vector.load %arg9[%c6_63, %c8_64, %c0_65] : memref<32x32x4xf32, #tpu.memory_space<vmem>>, vector<16x16x4xf32>
    %47 = vector.shape_cast %46 : vector<16x16x4xf32> to vector<256x4xf32>
    %c0_66 = arith.constant 0 : index
    %c4_67 = arith.constant 4 : index
    %48 = vector.load %arg10[%c0_66, %c4_67] : memref<256x36xf32, #tpu.memory_space<vmem>>, vector<256x4xf32>
    tpu.vector_store %arg10[%c0_66, %c4_67], %47 {strides = array<i32>} : memref<256x36xf32, #tpu.memory_space<vmem>>, vector<256x4xf32>,
    %c6_68 = arith.constant 6 : index
    %c10 = arith.constant 10 : index
    %c0_69 = arith.constant 0 : index
    %49 = vector.load %arg9[%c6_68, %c10, %c0_69] : memref<32x32x4xf32, #tpu.memory_space<vmem>>, vector<16x16x4xf32>
    %50 = vector.shape_cast %49 : vector<16x16x4xf32> to vector<256x4xf32>
    %c0_70 = arith.constant 0 : index
    %c8_71 = arith.constant 8 : index
    %51 = vector.load %arg10[%c0_70, %c8_71] : memref<256x36xf32, #tpu.memory_space<vmem>>, vector<256x4xf32>
    tpu.vector_store %arg10[%c0_70, %c8_71], %50 {strides = array<i32>} : memref<256x36xf32, #tpu.memory_space<vmem>>, vector<256x4xf32>,
    %c8_72 = arith.constant 8 : index
    %c6_73 = arith.constant 6 : index
    %c0_74 = arith.constant 0 : index
    %52 = vector.load %arg9[%c8_72, %c6_73, %c0_74] : memref<32x32x4xf32, #tpu.memory_space<vmem>>, vector<16x16x4xf32>
    %53 = vector.shape_cast %52 : vector<16x16x4xf32> to vector<256x4xf32>
    %c0_75 = arith.constant 0 : index
    %c12_76 = arith.constant 12 : index
    %54 = vector.load %arg10[%c0_75, %c12_76] : memref<256x36xf32, #tpu.memory_space<vmem>>, vector<256x4xf32>
    tpu.vector_store %arg10[%c0_75, %c12_76], %53 {strides = array<i32>} : memref<256x36xf32, #tpu.memory_space<vmem>>, vector<256x4xf32>,
    %c8_77 = arith.constant 8 : index
    %c8_78 = arith.constant 8 : index
    %c0_79 = arith.constant 0 : index
    %55 = vector.load %arg9[%c8_77, %c8_78, %c0_79] : memref<32x32x4xf32, #tpu.memory_space<vmem>>, vector<16x16x4xf32>
    %56 = vector.shape_cast %55 : vector<16x16x4xf32> to vector<256x4xf32>
    %c0_80 = arith.constant 0 : index
    %c16_81 = arith.constant 16 : index
    %57 = vector.load %arg10[%c0_80, %c16_81] : memref<256x36xf32, #tpu.memory_space<vmem>>, vector<256x4xf32>
    tpu.vector_store %arg10[%c0_80, %c16_81], %56 {strides = array<i32>} : memref<256x36xf32, #tpu.memory_space<vmem>>, vector<256x4xf32>,
    %c8_82 = arith.constant 8 : index
    %c10_83 = arith.constant 10 : index
    %c0_84 = arith.constant 0 : index
    %58 = vector.load %arg9[%c8_82, %c10_83, %c0_84] : memref<32x32x4xf32, #tpu.memory_space<vmem>>, vector<16x16x4xf32>
    %59 = vector.shape_cast %58 : vector<16x16x4xf32> to vector<256x4xf32>
    %c0_85 = arith.constant 0 : index
    %c20_86 = arith.constant 20 : index
    %60 = vector.load %arg10[%c0_85, %c20_86] : memref<256x36xf32, #tpu.memory_space<vmem>>, vector<256x4xf32>
    tpu.vector_store %arg10[%c0_85, %c20_86], %59 {strides = array<i32>} : memref<256x36xf32, #tpu.memory_space<vmem>>, vector<256x4xf32>,
    %c10_87 = arith.constant 10 : index
    %c6_88 = arith.constant 6 : index
    %c0_89 = arith.constant 0 : index
    %61 = vector.load %arg9[%c10_87, %c6_88, %c0_89] : memref<32x32x4xf32, #tpu.memory_space<vmem>>, vector<16x16x4xf32>
    %62 = vector.shape_cast %61 : vector<16x16x4xf32> to vector<256x4xf32>
    %c0_90 = arith.constant 0 : index
    %c24_91 = arith.constant 24 : index
    %63 = vector.load %arg10[%c0_90, %c24_91] : memref<256x36xf32, #tpu.memory_space<vmem>>, vector<256x4xf32>
    tpu.vector_store %arg10[%c0_90, %c24_91], %62 {strides = array<i32>} : memref<256x36xf32, #tpu.memory_space<vmem>>, vector<256x4xf32>,
    %c10_92 = arith.constant 10 : index
    %c8_93 = arith.constant 8 : index
    %c0_94 = arith.constant 0 : index
    %64 = vector.load %arg9[%c10_92, %c8_93, %c0_94] : memref<32x32x4xf32, #tpu.memory_space<vmem>>, vector<16x16x4xf32>
    %65 = vector.shape_cast %64 : vector<16x16x4xf32> to vector<256x4xf32>
    %c0_95 = arith.constant 0 : index
    %c28_96 = arith.constant 28 : index
    %66 = vector.load %arg10[%c0_95, %c28_96] : memref<256x36xf32, #tpu.memory_space<vmem>>, vector<256x4xf32>
    tpu.vector_store %arg10[%c0_95, %c28_96], %65 {strides = array<i32>} : memref<256x36xf32, #tpu.memory_space<vmem>>, vector<256x4xf32>,
    %c10_97 = arith.constant 10 : index
    %c10_98 = arith.constant 10 : index
    %c0_99 = arith.constant 0 : index
    %67 = vector.load %arg9[%c10_97, %c10_98, %c0_99] : memref<32x32x4xf32, #tpu.memory_space<vmem>>, vector<16x16x4xf32>
    %68 = vector.shape_cast %67 : vector<16x16x4xf32> to vector<256x4xf32>
    %c0_100 = arith.constant 0 : index
    %c32_101 = arith.constant 32 : index
    %69 = vector.load %arg10[%c0_100, %c32_101] : memref<256x36xf32, #tpu.memory_space<vmem>>, vector<256x4xf32>
    tpu.vector_store %arg10[%c0_100, %c32_101], %68 {strides = array<i32>} : memref<256x36xf32, #tpu.memory_space<vmem>>, vector<256x4xf32>,
    %c0_102 = arith.constant 0 : index
    %c0_103 = arith.constant 0 : index
    %70 = vector.load %arg10[%c0_102, %c0_103] : memref<256x36xf32, #tpu.memory_space<vmem>>, vector<256x36xf32>
    %c1 = arith.constant 1 : index
    %c0_104 = arith.constant 0 : index
    %c0_105 = arith.constant 0 : index
    %71 = vector.load %arg2[%c1, %c0_104, %c0_105] : memref<4x36x4xf32, #tpu.memory_space<vmem>>, vector<1x36x4xf32>
    %72 = vector.shape_cast %71 : vector<1x36x4xf32> to vector<36x4xf32>
    %cst_106 = arith.constant dense<0.000000e+00> : vector<256x4xf32>
    %73 = tpu.matmul %70, %72, %cst_106 {dimension_numbers = #tpu.dot_dimension_numbers<[1], [0], [0], [1], [0, 0, 1, 1], [], []>} : vector<256x36xf32>, vector<36x4xf32>, vector<256x4xf32> -> vector<256x4xf32>
    %cst_107 = arith.constant 0.000000e+00 : f32
    %74 = vector.broadcast %cst_107 : f32 to vector<256x4xf32>
    %75 = arith.maximumf %73, %74 : vector<256x4xf32>
    %c0_108 = arith.constant 0 : index
    %c8_109 = arith.constant 8 : index
    %76 = vector.load %arg11[%c0_108, %c8_109] : memref<256x20xf32, #tpu.memory_space<vmem>>, vector<256x4xf32>
    tpu.vector_store %arg11[%c0_108, %c8_109], %75 {strides = array<i32>} : memref<256x20xf32, #tpu.memory_space<vmem>>, vector<256x4xf32>,
    %c4_110 = arith.constant 4 : index
    %c4_111 = arith.constant 4 : index
    %c0_112 = arith.constant 0 : index
    %77 = vector.load %arg9[%c4_110, %c4_111, %c0_112] : memref<32x32x4xf32, #tpu.memory_space<vmem>>, vector<16x16x4xf32>
    %78 = vector.shape_cast %77 : vector<16x16x4xf32> to vector<256x4xf32>
    %c0_113 = arith.constant 0 : index
    %c0_114 = arith.constant 0 : index
    %79 = vector.load %arg10[%c0_113, %c0_114] : memref<256x36xf32, #tpu.memory_space<vmem>>, vector<256x4xf32>
    tpu.vector_store %arg10[%c0_113, %c0_114], %78 {strides = array<i32>} : memref<256x36xf32, #tpu.memory_space<vmem>>, vector<256x4xf32>,
    %c4_115 = arith.constant 4 : index
    %c8_116 = arith.constant 8 : index
    %c0_117 = arith.constant 0 : index
    %80 = vector.load %arg9[%c4_115, %c8_116, %c0_117] : memref<32x32x4xf32, #tpu.memory_space<vmem>>, vector<16x16x4xf32>
    %81 = vector.shape_cast %80 : vector<16x16x4xf32> to vector<256x4xf32>
    %c0_118 = arith.constant 0 : index
    %c4_119 = arith.constant 4 : index
    %82 = vector.load %arg10[%c0_118, %c4_119] : memref<256x36xf32, #tpu.memory_space<vmem>>, vector<256x4xf32>
    tpu.vector_store %arg10[%c0_118, %c4_119], %81 {strides = array<i32>} : memref<256x36xf32, #tpu.memory_space<vmem>>, vector<256x4xf32>,
    %c4_120 = arith.constant 4 : index
    %c12_121 = arith.constant 12 : index
    %c0_122 = arith.constant 0 : index
    %83 = vector.load %arg9[%c4_120, %c12_121, %c0_122] : memref<32x32x4xf32, #tpu.memory_space<vmem>>, vector<16x16x4xf32>
    %84 = vector.shape_cast %83 : vector<16x16x4xf32> to vector<256x4xf32>
    %c0_123 = arith.constant 0 : index
    %c8_124 = arith.constant 8 : index
    %85 = vector.load %arg10[%c0_123, %c8_124] : memref<256x36xf32, #tpu.memory_space<vmem>>, vector<256x4xf32>
    tpu.vector_store %arg10[%c0_123, %c8_124], %84 {strides = array<i32>} : memref<256x36xf32, #tpu.memory_space<vmem>>, vector<256x4xf32>,
    %c8_125 = arith.constant 8 : index
    %c4_126 = arith.constant 4 : index
    %c0_127 = arith.constant 0 : index
    %86 = vector.load %arg9[%c8_125, %c4_126, %c0_127] : memref<32x32x4xf32, #tpu.memory_space<vmem>>, vector<16x16x4xf32>
    %87 = vector.shape_cast %86 : vector<16x16x4xf32> to vector<256x4xf32>
    %c0_128 = arith.constant 0 : index
    %c12_129 = arith.constant 12 : index
    %88 = vector.load %arg10[%c0_128, %c12_129] : memref<256x36xf32, #tpu.memory_space<vmem>>, vector<256x4xf32>
    tpu.vector_store %arg10[%c0_128, %c12_129], %87 {strides = array<i32>} : memref<256x36xf32, #tpu.memory_space<vmem>>, vector<256x4xf32>,
    %c8_130 = arith.constant 8 : index
    %c8_131 = arith.constant 8 : index
    %c0_132 = arith.constant 0 : index
    %89 = vector.load %arg9[%c8_130, %c8_131, %c0_132] : memref<32x32x4xf32, #tpu.memory_space<vmem>>, vector<16x16x4xf32>
    %90 = vector.shape_cast %89 : vector<16x16x4xf32> to vector<256x4xf32>
    %c0_133 = arith.constant 0 : index
    %c16_134 = arith.constant 16 : index
    %91 = vector.load %arg10[%c0_133, %c16_134] : memref<256x36xf32, #tpu.memory_space<vmem>>, vector<256x4xf32>
    tpu.vector_store %arg10[%c0_133, %c16_134], %90 {strides = array<i32>} : memref<256x36xf32, #tpu.memory_space<vmem>>, vector<256x4xf32>,
    %c8_135 = arith.constant 8 : index
    %c12_136 = arith.constant 12 : index
    %c0_137 = arith.constant 0 : index
    %92 = vector.load %arg9[%c8_135, %c12_136, %c0_137] : memref<32x32x4xf32, #tpu.memory_space<vmem>>, vector<16x16x4xf32>
    %93 = vector.shape_cast %92 : vector<16x16x4xf32> to vector<256x4xf32>
    %c0_138 = arith.constant 0 : index
    %c20_139 = arith.constant 20 : index
    %94 = vector.load %arg10[%c0_138, %c20_139] : memref<256x36xf32, #tpu.memory_space<vmem>>, vector<256x4xf32>
    tpu.vector_store %arg10[%c0_138, %c20_139], %93 {strides = array<i32>} : memref<256x36xf32, #tpu.memory_space<vmem>>, vector<256x4xf32>,
    %c12_140 = arith.constant 12 : index
    %c4_141 = arith.constant 4 : index
    %c0_142 = arith.constant 0 : index
    %95 = vector.load %arg9[%c12_140, %c4_141, %c0_142] : memref<32x32x4xf32, #tpu.memory_space<vmem>>, vector<16x16x4xf32>
    %96 = vector.shape_cast %95 : vector<16x16x4xf32> to vector<256x4xf32>
    %c0_143 = arith.constant 0 : index
    %c24_144 = arith.constant 24 : index
    %97 = vector.load %arg10[%c0_143, %c24_144] : memref<256x36xf32, #tpu.memory_space<vmem>>, vector<256x4xf32>
    tpu.vector_store %arg10[%c0_143, %c24_144], %96 {strides = array<i32>} : memref<256x36xf32, #tpu.memory_space<vmem>>, vector<256x4xf32>,
    %c12_145 = arith.constant 12 : index
    %c8_146 = arith.constant 8 : index
    %c0_147 = arith.constant 0 : index
    %98 = vector.load %arg9[%c12_145, %c8_146, %c0_147] : memref<32x32x4xf32, #tpu.memory_space<vmem>>, vector<16x16x4xf32>
    %99 = vector.shape_cast %98 : vector<16x16x4xf32> to vector<256x4xf32>
    %c0_148 = arith.constant 0 : index
    %c28_149 = arith.constant 28 : index
    %100 = vector.load %arg10[%c0_148, %c28_149] : memref<256x36xf32, #tpu.memory_space<vmem>>, vector<256x4xf32>
    tpu.vector_store %arg10[%c0_148, %c28_149], %99 {strides = array<i32>} : memref<256x36xf32, #tpu.memory_space<vmem>>, vector<256x4xf32>,
    %c12_150 = arith.constant 12 : index
    %c12_151 = arith.constant 12 : index
    %c0_152 = arith.constant 0 : index
    %101 = vector.load %arg9[%c12_150, %c12_151, %c0_152] : memref<32x32x4xf32, #tpu.memory_space<vmem>>, vector<16x16x4xf32>
    %102 = vector.shape_cast %101 : vector<16x16x4xf32> to vector<256x4xf32>
    %c0_153 = arith.constant 0 : index
    %c32_154 = arith.constant 32 : index
    %103 = vector.load %arg10[%c0_153, %c32_154] : memref<256x36xf32, #tpu.memory_space<vmem>>, vector<256x4xf32>
    tpu.vector_store %arg10[%c0_153, %c32_154], %102 {strides = array<i32>} : memref<256x36xf32, #tpu.memory_space<vmem>>, vector<256x4xf32>,
    %c0_155 = arith.constant 0 : index
    %c0_156 = arith.constant 0 : index
    %104 = vector.load %arg10[%c0_155, %c0_156] : memref<256x36xf32, #tpu.memory_space<vmem>>, vector<256x36xf32>
    %c2 = arith.constant 2 : index
    %c0_157 = arith.constant 0 : index
    %c0_158 = arith.constant 0 : index
    %105 = vector.load %arg2[%c2, %c0_157, %c0_158] : memref<4x36x4xf32, #tpu.memory_space<vmem>>, vector<1x36x4xf32>
    %106 = vector.shape_cast %105 : vector<1x36x4xf32> to vector<36x4xf32>
    %cst_159 = arith.constant dense<0.000000e+00> : vector<256x4xf32>
    %107 = tpu.matmul %104, %106, %cst_159 {dimension_numbers = #tpu.dot_dimension_numbers<[1], [0], [0], [1], [0, 0, 1, 1], [], []>} : vector<256x36xf32>, vector<36x4xf32>, vector<256x4xf32> -> vector<256x4xf32>
    %cst_160 = arith.constant 0.000000e+00 : f32
    %108 = vector.broadcast %cst_160 : f32 to vector<256x4xf32>
    %109 = arith.maximumf %107, %108 : vector<256x4xf32>
    %c0_161 = arith.constant 0 : index
    %c12_162 = arith.constant 12 : index
    %110 = vector.load %arg11[%c0_161, %c12_162] : memref<256x20xf32, #tpu.memory_space<vmem>>, vector<256x4xf32>
    tpu.vector_store %arg11[%c0_161, %c12_162], %109 {strides = array<i32>} : memref<256x20xf32, #tpu.memory_space<vmem>>, vector<256x4xf32>,
    %c0_163 = arith.constant 0 : index
    %c0_164 = arith.constant 0 : index
    %c0_165 = arith.constant 0 : index
    %111 = vector.load %arg9[%c0_163, %c0_164, %c0_165] : memref<32x32x4xf32, #tpu.memory_space<vmem>>, vector<16x16x4xf32>
    %112 = vector.shape_cast %111 : vector<16x16x4xf32> to vector<256x4xf32>
    %c0_166 = arith.constant 0 : index
    %c0_167 = arith.constant 0 : index
    %113 = vector.load %arg10[%c0_166, %c0_167] : memref<256x36xf32, #tpu.memory_space<vmem>>, vector<256x4xf32>
    tpu.vector_store %arg10[%c0_166, %c0_167], %112 {strides = array<i32>} : memref<256x36xf32, #tpu.memory_space<vmem>>, vector<256x4xf32>,
    %c0_168 = arith.constant 0 : index
    %c8_169 = arith.constant 8 : index
    %c0_170 = arith.constant 0 : index
    %114 = vector.load %arg9[%c0_168, %c8_169, %c0_170] : memref<32x32x4xf32, #tpu.memory_space<vmem>>, vector<16x16x4xf32>
    %115 = vector.shape_cast %114 : vector<16x16x4xf32> to vector<256x4xf32>
    %c0_171 = arith.constant 0 : index
    %c4_172 = arith.constant 4 : index
    %116 = vector.load %arg10[%c0_171, %c4_172] : memref<256x36xf32, #tpu.memory_space<vmem>>, vector<256x4xf32>
    tpu.vector_store %arg10[%c0_171, %c4_172], %115 {strides = array<i32>} : memref<256x36xf32, #tpu.memory_space<vmem>>, vector<256x4xf32>,
    %c0_173 = arith.constant 0 : index
    %c16_174 = arith.constant 16 : index
    %c0_175 = arith.constant 0 : index
    %117 = vector.load %arg9[%c0_173, %c16_174, %c0_175] : memref<32x32x4xf32, #tpu.memory_space<vmem>>, vector<16x16x4xf32>
    %118 = vector.shape_cast %117 : vector<16x16x4xf32> to vector<256x4xf32>
    %c0_176 = arith.constant 0 : index
    %c8_177 = arith.constant 8 : index
    %119 = vector.load %arg10[%c0_176, %c8_177] : memref<256x36xf32, #tpu.memory_space<vmem>>, vector<256x4xf32>
    tpu.vector_store %arg10[%c0_176, %c8_177], %118 {strides = array<i32>} : memref<256x36xf32, #tpu.memory_space<vmem>>, vector<256x4xf32>,
    %c8_178 = arith.constant 8 : index
    %c0_179 = arith.constant 0 : index
    %c0_180 = arith.constant 0 : index
    %120 = vector.load %arg9[%c8_178, %c0_179, %c0_180] : memref<32x32x4xf32, #tpu.memory_space<vmem>>, vector<16x16x4xf32>
    %121 = vector.shape_cast %120 : vector<16x16x4xf32> to vector<256x4xf32>
    %c0_181 = arith.constant 0 : index
    %c12_182 = arith.constant 12 : index
    %122 = vector.load %arg10[%c0_181, %c12_182] : memref<256x36xf32, #tpu.memory_space<vmem>>, vector<256x4xf32>
    tpu.vector_store %arg10[%c0_181, %c12_182], %121 {strides = array<i32>} : memref<256x36xf32, #tpu.memory_space<vmem>>, vector<256x4xf32>,
    %c8_183 = arith.constant 8 : index
    %c8_184 = arith.constant 8 : index
    %c0_185 = arith.constant 0 : index
    %123 = vector.load %arg9[%c8_183, %c8_184, %c0_185] : memref<32x32x4xf32, #tpu.memory_space<vmem>>, vector<16x16x4xf32>
    %124 = vector.shape_cast %123 : vector<16x16x4xf32> to vector<256x4xf32>
    %c0_186 = arith.constant 0 : index
    %c16_187 = arith.constant 16 : index
    %125 = vector.load %arg10[%c0_186, %c16_187] : memref<256x36xf32, #tpu.memory_space<vmem>>, vector<256x4xf32>
    tpu.vector_store %arg10[%c0_186, %c16_187], %124 {strides = array<i32>} : memref<256x36xf32, #tpu.memory_space<vmem>>, vector<256x4xf32>,
    %c8_188 = arith.constant 8 : index
    %c16_189 = arith.constant 16 : index
    %c0_190 = arith.constant 0 : index
    %126 = vector.load %arg9[%c8_188, %c16_189, %c0_190] : memref<32x32x4xf32, #tpu.memory_space<vmem>>, vector<16x16x4xf32>
    %127 = vector.shape_cast %126 : vector<16x16x4xf32> to vector<256x4xf32>
    %c0_191 = arith.constant 0 : index
    %c20_192 = arith.constant 20 : index
    %128 = vector.load %arg10[%c0_191, %c20_192] : memref<256x36xf32, #tpu.memory_space<vmem>>, vector<256x4xf32>
    tpu.vector_store %arg10[%c0_191, %c20_192], %127 {strides = array<i32>} : memref<256x36xf32, #tpu.memory_space<vmem>>, vector<256x4xf32>,
    %c16_193 = arith.constant 16 : index
    %c0_194 = arith.constant 0 : index
    %c0_195 = arith.constant 0 : index
    %129 = vector.load %arg9[%c16_193, %c0_194, %c0_195] : memref<32x32x4xf32, #tpu.memory_space<vmem>>, vector<16x16x4xf32>
    %130 = vector.shape_cast %129 : vector<16x16x4xf32> to vector<256x4xf32>
    %c0_196 = arith.constant 0 : index
    %c24_197 = arith.constant 24 : index
    %131 = vector.load %arg10[%c0_196, %c24_197] : memref<256x36xf32, #tpu.memory_space<vmem>>, vector<256x4xf32>
    tpu.vector_store %arg10[%c0_196, %c24_197], %130 {strides = array<i32>} : memref<256x36xf32, #tpu.memory_space<vmem>>, vector<256x4xf32>,
    %c16_198 = arith.constant 16 : index
    %c8_199 = arith.constant 8 : index
    %c0_200 = arith.constant 0 : index
    %132 = vector.load %arg9[%c16_198, %c8_199, %c0_200] : memref<32x32x4xf32, #tpu.memory_space<vmem>>, vector<16x16x4xf32>
    %133 = vector.shape_cast %132 : vector<16x16x4xf32> to vector<256x4xf32>
    %c0_201 = arith.constant 0 : index
    %c28_202 = arith.constant 28 : index
    %134 = vector.load %arg10[%c0_201, %c28_202] : memref<256x36xf32, #tpu.memory_space<vmem>>, vector<256x4xf32>
    tpu.vector_store %arg10[%c0_201, %c28_202], %133 {strides = array<i32>} : memref<256x36xf32, #tpu.memory_space<vmem>>, vector<256x4xf32>,
    %c16_203 = arith.constant 16 : index
    %c16_204 = arith.constant 16 : index
    %c0_205 = arith.constant 0 : index
    %135 = vector.load %arg9[%c16_203, %c16_204, %c0_205] : memref<32x32x4xf32, #tpu.memory_space<vmem>>, vector<16x16x4xf32>
    %136 = vector.shape_cast %135 : vector<16x16x4xf32> to vector<256x4xf32>
    %c0_206 = arith.constant 0 : index
    %c32_207 = arith.constant 32 : index
    %137 = vector.load %arg10[%c0_206, %c32_207] : memref<256x36xf32, #tpu.memory_space<vmem>>, vector<256x4xf32>
    tpu.vector_store %arg10[%c0_206, %c32_207], %136 {strides = array<i32>} : memref<256x36xf32, #tpu.memory_space<vmem>>, vector<256x4xf32>,
    %c0_208 = arith.constant 0 : index
    %c0_209 = arith.constant 0 : index
    %138 = vector.load %arg10[%c0_208, %c0_209] : memref<256x36xf32, #tpu.memory_space<vmem>>, vector<256x36xf32>
    %c3 = arith.constant 3 : index
    %c0_210 = arith.constant 0 : index
    %c0_211 = arith.constant 0 : index
    %139 = vector.load %arg2[%c3, %c0_210, %c0_211] : memref<4x36x4xf32, #tpu.memory_space<vmem>>, vector<1x36x4xf32>
    %140 = vector.shape_cast %139 : vector<1x36x4xf32> to vector<36x4xf32>
    %cst_212 = arith.constant dense<0.000000e+00> : vector<256x4xf32>
    %141 = tpu.matmul %138, %140, %cst_212 {dimension_numbers = #tpu.dot_dimension_numbers<[1], [0], [0], [1], [0, 0, 1, 1], [], []>} : vector<256x36xf32>, vector<36x4xf32>, vector<256x4xf32> -> vector<256x4xf32>
    %cst_213 = arith.constant 0.000000e+00 : f32
    %142 = vector.broadcast %cst_213 : f32 to vector<256x4xf32>
    %143 = arith.maximumf %141, %142 : vector<256x4xf32>
    %c0_214 = arith.constant 0 : index
    %c16_215 = arith.constant 16 : index
    %144 = vector.load %arg11[%c0_214, %c16_215] : memref<256x20xf32, #tpu.memory_space<vmem>>, vector<256x4xf32>
    tpu.vector_store %arg11[%c0_214, %c16_215], %143 {strides = array<i32>} : memref<256x20xf32, #tpu.memory_space<vmem>>, vector<256x4xf32>,
    %c0_216 = arith.constant 0 : index
    %c0_217 = arith.constant 0 : index
    %145 = vector.load %arg11[%c0_216, %c0_217] : memref<256x20xf32, #tpu.memory_space<vmem>>, vector<256x20xf32>
    %cst_218 = arith.constant dense<0.000000e+00> : vector<20xf32>
    %146 = vector.multi_reduction <add>, %145, %cst_218 [0] : vector<256x20xf32> to vector<20xf32>
    %147 = vector.shape_cast %146 : vector<20xf32> to vector<1x20xf32>
    %cst_219 = arith.constant 2.560000e+02 : f32
    %148 = vector.broadcast %cst_219 : f32 to vector<1x20xf32>
    %149 = arith.divf %147, %148 : vector<1x20xf32>
    %c0_220 = arith.constant 0 : index
    %c0_221 = arith.constant 0 : index
    %150 = vector.load %arg3[%c0_220, %c0_221] : memref<20x10xf32, #tpu.memory_space<vmem>>, vector<20x10xf32>
    %cst_222 = arith.constant dense<0.000000e+00> : vector<1x10xf32>
    %151 = tpu.matmul %149, %150, %cst_222 {dimension_numbers = #tpu.dot_dimension_numbers<[1], [0], [0], [1], [0, 0, 1, 1], [], []>} : vector<1x20xf32>, vector<20x10xf32>, vector<1x10xf32> -> vector<1x10xf32>
    %cst_223 = arith.constant 0.000000e+00 : f32
    %152 = vector.broadcast %cst_223 : f32 to vector<1x10xf32>
    %153 = arith.maximumf %151, %152 : vector<1x10xf32>
    %c0_224 = arith.constant 0 : index
    %c0_225 = arith.constant 0 : index
    %154 = vector.load %arg4[%c0_224, %c0_225] : memref<10x20xf32, #tpu.memory_space<vmem>>, vector<10x20xf32>
    %cst_226 = arith.constant dense<0.000000e+00> : vector<1x20xf32>
    %155 = tpu.matmul %153, %154, %cst_226 {dimension_numbers = #tpu.dot_dimension_numbers<[1], [0], [0], [1], [0, 0, 1, 1], [], []>} : vector<1x10xf32>, vector<10x20xf32>, vector<1x20xf32> -> vector<1x20xf32>
    %156 = arith.negf %155 : vector<1x20xf32>
    %157 = math.exp %156 : vector<1x20xf32>
    %cst_227 = arith.constant 1.000000e+00 : f32
    %158 = vector.broadcast %cst_227 : f32 to vector<1x20xf32>
    %159 = arith.addf %158, %157 : vector<1x20xf32>
    %160 = arith.divf %158, %159 : vector<1x20xf32>
    %161 = vector.broadcast %160 : vector<1x20xf32> to vector<256x20xf32>
    %162 = arith.mulf %145, %161 : vector<256x20xf32>
    %c0_228 = arith.constant 0 : index
    %c0_229 = arith.constant 0 : index
    %163 = vector.load %arg5[%c0_228, %c0_229] : memref<20x8xf32, #tpu.memory_space<vmem>>, vector<20x8xf32>
    %cst_230 = arith.constant dense<0.000000e+00> : vector<256x8xf32>
    %164 = tpu.matmul %162, %163, %cst_230 {dimension_numbers = #tpu.dot_dimension_numbers<[1], [0], [0], [1], [0, 0, 1, 1], [], []>} : vector<256x20xf32>, vector<20x8xf32>, vector<256x8xf32> -> vector<256x8xf32>
    %c0_231 = arith.constant 0 : index
    %c0_232 = arith.constant 0 : index
    %c0_233 = arith.constant 0 : index
    %165 = vector.load %arg6[%c0_231, %c0_232, %c0_233] : memref<1x256x8xf32, #tpu.memory_space<vmem>>, vector<1x256x8xf32>
    %166 = vector.shape_cast %165 : vector<1x256x8xf32> to vector<256x8xf32>
    %167 = vector.shape_cast %164 : vector<256x8xf32> to vector<1x256x8xf32>
    tpu.vector_store %arg6[%c0_231, %c0_232, %c0_233], %167 {strides = array<i32>} : memref<1x256x8xf32, #tpu.memory_space<vmem>>, vector<1x256x8xf32>,
    %cst_234 = arith.constant dense<0.000000e+00> : vector<8xf32>
    %168 = vector.multi_reduction <add>, %164, %cst_234 [0] : vector<256x8xf32> to vector<8xf32>
    %169 = vector.shape_cast %168 : vector<8xf32> to vector<1x8xf32>
    %c0_235 = arith.constant 0 : index
    %c0_236 = arith.constant 0 : index
    %c0_237 = arith.constant 0 : index
    %170 = vector.load %arg7[%c0_235, %c0_236, %c0_237] : memref<1x1x8xf32, #tpu.memory_space<vmem>>, vector<1x1x8xf32>
    %171 = vector.shape_cast %170 : vector<1x1x8xf32> to vector<1x8xf32>
    %172 = vector.shape_cast %169 : vector<1x8xf32> to vector<1x1x8xf32>
    tpu.vector_store %arg7[%c0_235, %c0_236, %c0_237], %172 {strides = array<i32>} : memref<1x1x8xf32, #tpu.memory_space<vmem>>, vector<1x1x8xf32>,
    %173 = arith.mulf %164, %164 : vector<256x8xf32>
    %cst_238 = arith.constant dense<0.000000e+00> : vector<8xf32>
    %174 = vector.multi_reduction <add>, %173, %cst_238 [0] : vector<256x8xf32> to vector<8xf32>
    %175 = vector.shape_cast %174 : vector<8xf32> to vector<1x8xf32>
    %c0_239 = arith.constant 0 : index
    %c0_240 = arith.constant 0 : index
    %c0_241 = arith.constant 0 : index
    %176 = vector.load %arg8[%c0_239, %c0_240, %c0_241] : memref<1x1x8xf32, #tpu.memory_space<vmem>>, vector<1x1x8xf32>
    %177 = vector.shape_cast %176 : vector<1x1x8xf32> to vector<1x8xf32>
    %178 = vector.shape_cast %175 : vector<1x8xf32> to vector<1x1x8xf32>
    tpu.vector_store %arg8[%c0_239, %c0_240, %c0_241], %178 {strides = array<i32>} : memref<1x1x8xf32, #tpu.memory_space<vmem>>, vector<1x1x8xf32>,
    return
  }
  func.func @transform_0(%arg0: i32) -> (i32, i32, i32, i32) {
    %c0_i32 = arith.constant 0 : i32
    %c0_i32_0 = arith.constant 0 : i32
    %c0_i32_1 = arith.constant 0 : i32
    %c0_i32_2 = arith.constant 0 : i32
    return %arg0, %c0_i32, %c0_i32_0, %c0_i32_1 : i32, i32, i32, i32
  }
  func.func @transform_1(%arg0: i32) -> (i32, i32, i32) {
    %c0_i32 = arith.constant 0 : i32
    %c0_i32_0 = arith.constant 0 : i32
    %c0_i32_1 = arith.constant 0 : i32
    %c0_i32_2 = arith.constant 0 : i32
    return %c0_i32, %c0_i32_0, %c0_i32_1 : i32, i32, i32
  }
  func.func @transform_2(%arg0: i32) -> (i32, i32) {
    %c0_i32 = arith.constant 0 : i32
    %c0_i32_0 = arith.constant 0 : i32
    %c0_i32_1 = arith.constant 0 : i32
    return %c0_i32, %c0_i32_0 : i32, i32
  }
  func.func @transform_3(%arg0: i32) -> (i32, i32) {
    %c0_i32 = arith.constant 0 : i32
    %c0_i32_0 = arith.constant 0 : i32
    %c0_i32_1 = arith.constant 0 : i32
    return %c0_i32, %c0_i32_0 : i32, i32
  }
  func.func @transform_4(%arg0: i32) -> (i32, i32) {
    %c0_i32 = arith.constant 0 : i32
    %c0_i32_0 = arith.constant 0 : i32
    %c0_i32_1 = arith.constant 0 : i32
    return %c0_i32, %c0_i32_0 : i32, i32
  }
  func.func @transform_5(%arg0: i32) -> (i32, i32, i32) {
    %c0_i32 = arith.constant 0 : i32
    %c0_i32_0 = arith.constant 0 : i32
    %c0_i32_1 = arith.constant 0 : i32
    return %arg0, %c0_i32, %c0_i32_0 : i32, i32, i32
  }
  func.func @transform_6(%arg0: i32) -> (i32, i32, i32) {
    %c0_i32 = arith.constant 0 : i32
    %c0_i32_0 = arith.constant 0 : i32
    %c0_i32_1 = arith.constant 0 : i32
    return %arg0, %c0_i32, %c0_i32_0 : i32, i32, i32
  }
  func.func @transform_7(%arg0: i32) -> (i32, i32, i32) {
    %c0_i32 = arith.constant 0 : i32
    %c0_i32_0 = arith.constant 0 : i32
    %c0_i32_1 = arith.constant 0 : i32
    return %arg0, %c0_i32, %c0_i32_0 : i32, i32, i32
  }
}

</mosaic_0001>

<bundles_post_ra>
// kernel: tpu_custom_call.1
= control target key start
LH: loop header
LB: loop body
LE: loop exit
PB: predicated region body
PF: predicated region fallthrough
CT: control target
= control target key end

     0   :  { %13 = vsyncpa [#allocation6], 0  ;;  %s16176_s0 = inlined_call_operand.vmem [shape: f32[2,16,16,4], index: 0, kind: input, shape index: {}]   ;;  %s16177_s1 = inlined_call_operand.vmem [shape: f32[4,36,4], index: 1, kind: input, shape index: {}]   ;;  %s16178_s2 = inlined_call_operand.vmem [shape: f32[20,10], index: 2, kind: input, shape index: {}]   ;;  %s16179_s3 = inlined_call_operand.vmem [shape: f32[10,20], index: 3, kind: input, shape index: {}]   ;;  %s16180_s4 = inlined_call_operand.vmem [shape: f32[20,8], index: 4, kind: input, shape index: {}]   ;;  %s16181_s5 = inlined_call_operand.vmem [shape: f32[2,256,8], index: 5, kind: output, shape index: {0}]   ;;  %s16182_s6 = inlined_call_operand.hbm [shape: f32[2,1,8], index: 6, kind: output, shape index: {1}]   ;;  %s16183_s7 = inlined_call_operand.hbm [shape: f32[2,1,8], index: 7, kind: output, shape index: {2}]  }
   0x1   :  { %15 = vsyncpa [#allocation6 + $0x1], 0 }
   0x2   :  { %16 = vsyncpa [#allocation8], 0 }
   0x3   :  { %18 = vsyncpa [#allocation8 + $0x1], 0  ;;  %s11128_s24 = smov 0   ;;  %s11130_s25 = smov 0  }
   0x4   :  { %s11132_s26 = smov 0   ;;  %s11134_s27 = smov 0  }
   0x5 LB: > { %s11149_s28 = sadd.s32 4294967295, %s11072_s27   ;;  %s10173_s29 = sadd.s32 4294967294, %s11072_s27   ;;  %s11072_s27 = sphi %s11134_s27, %s16378_s27   ;;  %s11068_s26 = sphi %s11132_s26, %s16377_s26   ;;  %s11064_s25 = sphi %s11130_s25, %s16376_s25   ;;  %s11060_s24 = sphi %s11128_s24, %s16375_s24  }
   0x6   : > { %s11153_s30 = sadd.s32 1, %s11072_s27   ;;  %s167_s8 = sadd.s32 1, %s11068_s26 }
   0x7   : > { %s164_s9 = ssub.s32 %s11072_s27, %s11153_s30  ;;  %p177_p0 = scmp.ne.s32.totalorder %s11068_s26, %s11064_s25 }
   0x8   : > { %p165_p1 = scmp.eq.s32.totalorder %s164_s9, 0  ;;  %p178_p2 = scmp.eq.s32.totalorder %s11149_s28, 1 }
   0x9   : > { %p183_p3 = scmp.ne.s32.totalorder %s11064_s25, %s11060_s24  ;;  %p184_p4 = scmp.eq.s32.totalorder %s10173_s29, 1 }
   0xa   : > { %s11164_s10 = scalar_select %p165_p1, %s11068_s26, %s167_s8  }
   0xb   : > { %p11166_p5 = por %p178_p2, %p177_p0  ;;  %p11170_p6 = por %p184_p4, %p183_p3 }
   0xc   : > { %p10176_p7 = scmp.ge.s32.totalorder %s11072_s27, 1  ;;  %p248_p8 = scmp.lt.s32.totalorder %s11072_s27, 3 }
   0xe   : > { %p249_p9 = pnand %p10176_p7, %p248_p8 }
  0x10   : > { %252 = sbr.rel (%p249_p9) target bundleno = 4036 (0xfc4), region = 40 }
  0x17   : > { %vm298_vm0 = vcmask 31744   ;;  %p288_p10 = scmp.lt.s32.totalorder %s11149_s28, 1  ;;  %v16184_v0 = vmov 0.0   ;;  %s11075_s18 = smov 4   ;;  %vm781_vm1 = vcmask 64544   ;;  %vm974_vm2 = vcmask 97344  }
  0x18   : > { %328 = vst.msk [vmem:[#allocation2 + $0xe8] sm:$0xff] %vm298_vm0, %v16184_v0  ;;  %299 = vst.msk [vmem:[#allocation2] sm:$0xff] %vm298_vm0, %v16184_v0  ;;  %s11076_s19 = smov 8   ;;  %s11077_s20 = smov 12   ;;  %vm1167_vm3 = vcmask 130144   ;;  %vm1360_vm4 = vcmask 162944  }
  0x19   : > { %300 = vst.msk [vmem:[#allocation2 + $0x8] sm:$0xff] %vm298_vm0, %v16184_v0  ;;  %301 = vst.msk [vmem:[#allocation2 + $0x10] sm:$0xff] %vm298_vm0, %v16184_v0  ;;  %s11436_s13 = scalar_select %p288_p10, %s11149_s28, 1  ;;  %vm1553_vm5 = vcmask 195744   ;;  %vm1747_vm6 = vcmask 228544   ;;  %vm2300_vm7 = vcmask 1043456  }
  0x1a   : > { %302 = vst.msk [vmem:[#allocation2 + $0x18] sm:$0xff] %vm298_vm0, %v16184_v0  ;;  %303 = vst.msk [vmem:[#allocation2 + $0x20] sm:$0xff] %vm298_vm0, %v16184_v0  ;;  %s11078_s21 = smov 16   ;;  %s11079_s22 = smov 20   ;;  %vm1940_vm8 = vcmask 261344   ;;  %vm2133_vm9 = vcmask 294144  }
  0x1b   : > { %304 = vst.msk [vmem:[#allocation2 + $0x28] sm:$0xff] %vm298_vm0, %v16184_v0  ;;  %305 = vst.msk [vmem:[#allocation2 + $0x30] sm:$0xff] %vm298_vm0, %v16184_v0  ;;  %s16240_s14 = sshll.u32 %s11436_s13, 8  ;;  %s11080_s23 = smov 24   ;;  %vm2203_vm10 = vcmask 293888   ;;  %vm11084_vm11 = vmmov 0  }
  0x1c   : > { %306 = vst.msk [vmem:[#allocation2 + $0x38] sm:$0xff] %vm298_vm0, %v16184_v0  ;;  %307 = vst.msk [vmem:[#allocation2 + $0x40] sm:$0xff] %vm298_vm0, %v16184_v0  ;;  %s11444_s17 = scalar_lea.vmem %s16176_s0, %s16240_s14  ;;  %s11081_s29 = smov 28   ;;  %vm9378_vm12 = vcmask 1041408   ;;  %vm11085_vm13 = vmmov 1   ;;  %vm9220_vm15 = vcmask 162816  }
  0x1d   : > { %308 = vst.msk [vmem:[#allocation2 + $0x48] sm:$0xff] %vm298_vm0, %v16184_v0  ;;  %309 = vst.msk [vmem:[#allocation2 + $0x50] sm:$0xff] %vm298_vm0, %v16184_v0  ;;  %v427_v1 = vld [vmem:[%s11444_s17] sm:$0xff]  ;;  %v428_v2 = vld [vmem:[%s11444_s17 + $0x8] sm:$0xff]  ;;  %s11082_s15 = smov 32  }
  0x1e   : > { %310 = vst.msk [vmem:[#allocation2 + $0x58] sm:$0xff] %vm298_vm0, %v16184_v0  ;;  %311 = vst.msk [vmem:[#allocation2 + $0x60] sm:$0xff] %vm298_vm0, %v16184_v0  ;;  %v429_v3 = vld [vmem:[%s11444_s17 + $0x10] sm:$0xff]  ;;  %v430_v4 = vld [vmem:[%s11444_s17 + $0x18] sm:$0xff] }
  0x1f   : > { %312 = vst.msk [vmem:[#allocation2 + $0x68] sm:$0xff] %vm298_vm0, %v16184_v0  ;;  %313 = vst.msk [vmem:[#allocation2 + $0x70] sm:$0xff] %vm298_vm0, %v16184_v0  ;;  %v431_v5 = vld [vmem:[%s11444_s17 + $0x20] sm:$0xff]  ;;  %v432_v6 = vld [vmem:[%s11444_s17 + $0x28] sm:$0xff] }
  0x20   : > { %314 = vst.msk [vmem:[#allocation2 + $0x78] sm:$0xff] %vm298_vm0, %v16184_v0  ;;  %315 = vst.msk [vmem:[#allocation2 + $0x80] sm:$0xff] %vm298_vm0, %v16184_v0  ;;  %v621_v7 = vld [vmem:[#allocation2 + $0xe8] sm:$0xff]  ;;  %v433_v9 = vld [vmem:[%s11444_s17 + $0x30] sm:$0xff] }
  0x21   : > { %316 = vst.msk [vmem:[#allocation2 + $0x88] sm:$0xff] %vm298_vm0, %v16184_v0  ;;  %317 = vst.msk [vmem:[#allocation2 + $0x90] sm:$0xff] %vm298_vm0, %v16184_v0  ;;  %685 = vrot.lane.b32.xlu0 %v621_v7, %s11075_s18  ;;  %v434_v10 = vld [vmem:[%s11444_s17 + $0x38] sm:$0xff]  ;;  %v435_v11 = vld [vmem:[%s11444_s17 + $0x40] sm:$0xff] }
  0x22   : > { %318 = vst.msk [vmem:[#allocation2 + $0x98] sm:$0xff] %vm298_vm0, %v16184_v0  ;;  %319 = vst.msk [vmem:[#allocation2 + $0xa0] sm:$0xff] %vm298_vm0, %v16184_v0  ;;  %v436_v12 = vld [vmem:[%s11444_s17 + $0x48] sm:$0xff]  ;;  %v437_v13 = vld [vmem:[%s11444_s17 + $0x50] sm:$0xff] }
  0x23   : > { %320 = vst.msk [vmem:[#allocation2 + $0xa8] sm:$0xff] %vm298_vm0, %v16184_v0  ;;  %321 = vst.msk [vmem:[#allocation2 + $0xb0] sm:$0xff] %vm298_vm0, %v16184_v0  ;;  %v438_v14 = vld [vmem:[%s11444_s17 + $0x58] sm:$0xff]  ;;  %v439_v15 = vld [vmem:[%s11444_s17 + $0x60] sm:$0xff] }
  0x24   : > { %322 = vst.msk [vmem:[#allocation2 + $0xb8] sm:$0xff] %vm298_vm0, %v16184_v0  ;;  %323 = vst.msk [vmem:[#allocation2 + $0xc0] sm:$0xff] %vm298_vm0, %v16184_v0  ;;  %v440_v16 = vld [vmem:[%s11444_s17 + $0x68] sm:$0xff]  ;;  %v441_v17 = vld [vmem:[%s11444_s17 + $0x70] sm:$0xff] }
  0x25   : > { %324 = vst.msk [vmem:[#allocation2 + $0xc8] sm:$0xff] %vm298_vm0, %v16184_v0  ;;  %325 = vst.msk [vmem:[#allocation2 + $0xd0] sm:$0xff] %vm298_vm0, %v16184_v0  ;;  %v442_v18 = vld [vmem:[%s11444_s17 + $0x78] sm:$0xff]  ;;  %v443_v19 = vld [vmem:[%s11444_s17 + $0x80] sm:$0xff] }
  0x26   : > { %326 = vst.msk [vmem:[#allocation2 + $0xd8] sm:$0xff] %vm298_vm0, %v16184_v0  ;;  %327 = vst.msk [vmem:[#allocation2 + $0xe0] sm:$0xff] %vm298_vm0, %v16184_v0  ;;  %v444_v20 = vld [vmem:[%s11444_s17 + $0x88] sm:$0xff]  ;;  %v445_v21 = vld [vmem:[%s11444_s17 + $0x90] sm:$0xff] }
  0x27   : > { %329 = vst.msk [vmem:[#allocation2 + $0xf0] sm:$0xff] %vm298_vm0, %v16184_v0  ;;  %330 = vst.msk [vmem:[#allocation2 + $0xf8] sm:$0xff] %vm298_vm0, %v16184_v0  ;;  %v446_v22 = vld [vmem:[%s11444_s17 + $0x98] sm:$0xff]  ;;  %v447_v23 = vld [vmem:[%s11444_s17 + $0xa0] sm:$0xff] }
  0x28   : > { %331 = vst.msk [vmem:[#allocation2 + $0x100] sm:$0xff] %vm298_vm0, %v16184_v0  ;;  %332 = vst.msk [vmem:[#allocation2 + $0x108] sm:$0xff] %vm298_vm0, %v16184_v0  ;;  %v448_v24 = vld [vmem:[%s11444_s17 + $0xa8] sm:$0xff]  ;;  %v449_v28 = vld [vmem:[%s11444_s17 + $0xb0] sm:$0xff] }
  0x29   : > { %333 = vst.msk [vmem:[#allocation2 + $0x110] sm:$0xff] %vm298_vm0, %v16184_v0  ;;  %334 = vst.msk [vmem:[#allocation2 + $0x118] sm:$0xff] %vm298_vm0, %v16184_v0  ;;  %v450_v29 = vld [vmem:[%s11444_s17 + $0xb8] sm:$0xff]  ;;  %v451_v33 = vld [vmem:[%s11444_s17 + $0xc0] sm:$0xff] }
  0x2a   : > { %335 = vst.msk [vmem:[#allocation2 + $0x120] sm:$0xff] %vm298_vm0, %v16184_v0  ;;  %336 = vst.msk [vmem:[#allocation2 + $0x128] sm:$0xff] %vm298_vm0, %v16184_v0  ;;  %v452_v34 = vld [vmem:[%s11444_s17 + $0xc8] sm:$0xff]  ;;  %v453_v35 = vld [vmem:[%s11444_s17 + $0xd0] sm:$0xff] }
  0x2b   : > { %337 = vst.msk [vmem:[#allocation2 + $0x130] sm:$0xff] %vm298_vm0, %v16184_v0  ;;  %338 = vst.msk [vmem:[#allocation2 + $0x138] sm:$0xff] %vm298_vm0, %v16184_v0  ;;  %v454_v36 = vld [vmem:[%s11444_s17 + $0xd8] sm:$0xff]  ;;  %v455_v37 = vld [vmem:[%s11444_s17 + $0xe0] sm:$0xff] }
  0x2c   : > { %339 = vst.msk [vmem:[#allocation2 + $0x140] sm:$0xff] %vm298_vm0, %v16184_v0  ;;  %340 = vst.msk [vmem:[#allocation2 + $0x148] sm:$0xff] %vm298_vm0, %v16184_v0  ;;  %v456_v38 = vld [vmem:[%s11444_s17 + $0xe8] sm:$0xff] }
  0x2d   : > { %341 = vst.msk [vmem:[#allocation2 + $0x150] sm:$0xff] %vm298_vm0, %v16184_v0  ;;  %342 = vst.msk [vmem:[#allocation2 + $0x158] sm:$0xff] %vm298_vm0, %v16184_v0  ;;  %v557_v45 = vld [vmem:[#allocation2 + $0xe7] sm:$0xff] }
  0x2e   : > { %343 = vst.msk [vmem:[#allocation2 + $0x160] sm:$0xff] %vm298_vm0, %v16184_v0  ;;  %344 = vst.msk [vmem:[#allocation2 + $0x168] sm:$0xff] %vm298_vm0, %v16184_v0  ;;  %v622_v8 = vld [vmem:[#allocation2 + $0xf0] sm:$0xff] }
  0x2f   : > { %345 = vst.msk [vmem:[#allocation2 + $0x170] sm:$0xff] %vm298_vm0, %v16184_v0  ;;  %346 = vst.msk [vmem:[#allocation2 + $0x178] sm:$0xff] %vm298_vm0, %v16184_v0  ;;  %687 = vrot.lane.b32.xlu0 %v622_v8, %s11075_s18  ;;  %v558_v48 = vld [vmem:[#allocation2 + $0xef] sm:$0xff] }
  0x30   : > { %347 = vst.msk [vmem:[#allocation2 + $0x180] sm:$0xff] %vm298_vm0, %v16184_v0  ;;  %348 = vst.msk [vmem:[#allocation2 + $0x188] sm:$0xff] %vm298_vm0, %v16184_v0 }
  0x31   : > { %349 = vst.msk [vmem:[#allocation2 + $0x190] sm:$0xff] %vm298_vm0, %v16184_v0  ;;  %350 = vst.msk [vmem:[#allocation2 + $0x198] sm:$0xff] %vm298_vm0, %v16184_v0 }
  0x32   : > { %351 = vst.msk [vmem:[#allocation2 + $0x1a0] sm:$0xff] %vm298_vm0, %v16184_v0  ;;  %352 = vst.msk [vmem:[#allocation2 + $0x1a8] sm:$0xff] %vm298_vm0, %v16184_v0 }
  0x33   : > { %353 = vst.msk [vmem:[#allocation2 + $0x1b0] sm:$0xff] %vm298_vm0, %v16184_v0  ;;  %354 = vst.msk [vmem:[#allocation2 + $0x1b8] sm:$0xff] %vm298_vm0, %v16184_v0 }
  0x34   : > { %355 = vst.msk [vmem:[#allocation2 + $0x1c0] sm:$0xff] %vm298_vm0, %v16184_v0  ;;  %356 = vst.msk [vmem:[#allocation2 + $0x1c8] sm:$0xff] %vm298_vm0, %v16184_v0 }
  0x35   : > { %357 = vst.msk [vmem:[#allocation2 + $0x1d0] sm:$0xff] %vm298_vm0, %v16184_v0  ;;  %358 = vst.msk [vmem:[#allocation2 + $0x1d8] sm:$0xff] %vm298_vm0, %v16184_v0 }
  0x36   : > { %359 = vst.msk [vmem:[#allocation2 + $0x1e0] sm:$0xff] %vm298_vm0, %v16184_v0  ;;  %360 = vst.msk [vmem:[#allocation2 + $0x1e8] sm:$0xff] %vm298_vm0, %v16184_v0 }
  0x37   : > { %361 = vst.msk [vmem:[#allocation2 + $0x1f0] sm:$0xff] %vm298_vm0, %v16184_v0  ;;  %362 = vst.msk [vmem:[#allocation2 + $0x1f8] sm:$0xff] %vm298_vm0, %v16184_v0 }
  0x38   : > { %363 = vst.msk [vmem:[#allocation2 + $0x200] sm:$0xff] %vm298_vm0, %v16184_v0  ;;  %364 = vst.msk [vmem:[#allocation2 + $0x208] sm:$0xff] %vm298_vm0, %v16184_v0 }
  0x39   : > { %365 = vst.msk [vmem:[#allocation2 + $0x210] sm:$0xff] %vm298_vm0, %v16184_v0  ;;  %366 = vst.msk [vmem:[#allocation2 + $0x218] sm:$0xff] %vm298_vm0, %v16184_v0 }
  0x3a   : > { %367 = vst.msk [vmem:[#allocation2 + $0x220] sm:$0xff] %vm298_vm0, %v16184_v0  ;;  %368 = vst.msk [vmem:[#allocation2 + $0x228] sm:$0xff] %vm298_vm0, %v16184_v0 }
  0x3b   : > { %369 = vst.msk [vmem:[#allocation2 + $0x230] sm:$0xff] %vm298_vm0, %v16184_v0  ;;  %370 = vst.msk [vmem:[#allocation2 + $0x238] sm:$0xff] %vm298_vm0, %v16184_v0 }
  0x3c   : > { %371 = vst.msk [vmem:[#allocation2 + $0x240] sm:$0xff] %vm298_vm0, %v16184_v0  ;;  %372 = vst.msk [vmem:[#allocation2 + $0x248] sm:$0xff] %vm298_vm0, %v16184_v0 }
  0x3d   : > { %373 = vst.msk [vmem:[#allocation2 + $0x250] sm:$0xff] %vm298_vm0, %v16184_v0  ;;  %374 = vst.msk [vmem:[#allocation2 + $0x258] sm:$0xff] %vm298_vm0, %v16184_v0 }
  0x3e   : > { %375 = vst.msk [vmem:[#allocation2 + $0x260] sm:$0xff] %vm298_vm0, %v16184_v0  ;;  %376 = vst.msk [vmem:[#allocation2 + $0x268] sm:$0xff] %vm298_vm0, %v16184_v0 }
  0x3f   : > { %377 = vst.msk [vmem:[#allocation2 + $0x270] sm:$0xff] %vm298_vm0, %v16184_v0  ;;  %378 = vst.msk [vmem:[#allocation2 + $0x278] sm:$0xff] %vm298_vm0, %v16184_v0 }
  0x40   : > { %379 = vst.msk [vmem:[#allocation2 + $0x280] sm:$0xff] %vm298_vm0, %v16184_v0  ;;  %380 = vst.msk [vmem:[#allocation2 + $0x288] sm:$0xff] %vm298_vm0, %v16184_v0 }
  0x41   : > { %381 = vst.msk [vmem:[#allocation2 + $0x290] sm:$0xff] %vm298_vm0, %v16184_v0  ;;  %382 = vst.msk [vmem:[#allocation2 + $0x298] sm:$0xff] %vm298_vm0, %v16184_v0 }
  0x42   : > { %383 = vst.msk [vmem:[#allocation2 + $0x2a0] sm:$0xff] %vm298_vm0, %v16184_v0  ;;  %384 = vst.msk [vmem:[#allocation2 + $0x2a8] sm:$0xff] %vm298_vm0, %v16184_v0 }
  0x43   : > { %385 = vst.msk [vmem:[#allocation2 + $0x2b0] sm:$0xff] %vm298_vm0, %v16184_v0  ;;  %386 = vst.msk [vmem:[#allocation2 + $0x2b8] sm:$0xff] %vm298_vm0, %v16184_v0 }
  0x44   : > { %387 = vst.msk [vmem:[#allocation2 + $0x2c0] sm:$0xff] %vm298_vm0, %v16184_v0  ;;  %388 = vst.msk [vmem:[#allocation2 + $0x2c8] sm:$0xff] %vm298_vm0, %v16184_v0 }
  0x45   : > { %389 = vst.msk [vmem:[#allocation2 + $0x2d0] sm:$0xff] %vm298_vm0, %v16184_v0  ;;  %390 = vst.msk [vmem:[#allocation2 + $0x2d8] sm:$0xff] %vm298_vm0, %v16184_v0 }
  0x46   : > { %391 = vst.msk [vmem:[#allocation2 + $0x2e0] sm:$0xff] %vm298_vm0, %v16184_v0  ;;  %392 = vst.msk [vmem:[#allocation2 + $0x2e8] sm:$0xff] %vm298_vm0, %v16184_v0 }
  0x47   : > { %393 = vst.msk [vmem:[#allocation2 + $0x2f0] sm:$0xff] %vm298_vm0, %v16184_v0  ;;  %394 = vst.msk [vmem:[#allocation2 + $0x2f8] sm:$0xff] %vm298_vm0, %v16184_v0 }
  0x48   : > { %395 = vst.msk [vmem:[#allocation2 + $0x300] sm:$0xff] %vm298_vm0, %v16184_v0  ;;  %396 = vst.msk [vmem:[#allocation2 + $0x308] sm:$0xff] %vm298_vm0, %v16184_v0 }
  0x49   : > { %397 = vst.msk [vmem:[#allocation2 + $0x310] sm:$0xff] %vm298_vm0, %v16184_v0  ;;  %398 = vst.msk [vmem:[#allocation2 + $0x318] sm:$0xff] %vm298_vm0, %v16184_v0 }
  0x4a   : > { %399 = vst.msk [vmem:[#allocation2 + $0x320] sm:$0xff] %vm298_vm0, %v16184_v0  ;;  %400 = vst.msk [vmem:[#allocation2 + $0x328] sm:$0xff] %vm298_vm0, %v16184_v0 }
  0x4b   : > { %401 = vst.msk [vmem:[#allocation2 + $0x330] sm:$0xff] %vm298_vm0, %v16184_v0  ;;  %402 = vst.msk [vmem:[#allocation2 + $0x338] sm:$0xff] %vm298_vm0, %v16184_v0 }
  0x4c   : > { %403 = vst.msk [vmem:[#allocation2 + $0x340] sm:$0xff] %vm298_vm0, %v16184_v0  ;;  %404 = vst.msk [vmem:[#allocation2 + $0x348] sm:$0xff] %vm298_vm0, %v16184_v0 }
  0x4d   : > { %405 = vst.msk [vmem:[#allocation2 + $0x350] sm:$0xff] %vm298_vm0, %v16184_v0  ;;  %406 = vst.msk [vmem:[#allocation2 + $0x358] sm:$0xff] %vm298_vm0, %v16184_v0 }
  0x4e   : > { %407 = vst.msk [vmem:[#allocation2 + $0x360] sm:$0xff] %vm298_vm0, %v16184_v0  ;;  %408 = vst.msk [vmem:[#allocation2 + $0x368] sm:$0xff] %vm298_vm0, %v16184_v0 }
  0x4f   : > { %409 = vst.msk [vmem:[#allocation2 + $0x370] sm:$0xff] %vm298_vm0, %v16184_v0  ;;  %410 = vst.msk [vmem:[#allocation2 + $0x378] sm:$0xff] %vm298_vm0, %v16184_v0 }
  0x50   : > { %411 = vst.msk [vmem:[#allocation2 + $0x380] sm:$0xff] %vm298_vm0, %v16184_v0  ;;  %412 = vst.msk [vmem:[#allocation2 + $0x388] sm:$0xff] %vm298_vm0, %v16184_v0 }
  0x51   : > { %413 = vst.msk [vmem:[#allocation2 + $0x390] sm:$0xff] %vm298_vm0, %v16184_v0  ;;  %414 = vst.msk [vmem:[#allocation2 + $0x398] sm:$0xff] %vm298_vm0, %v16184_v0 }
  0x52   : > { %415 = vst.msk [vmem:[#allocation2 + $0x3a0] sm:$0xff] %vm298_vm0, %v16184_v0  ;;  %416 = vst.msk [vmem:[#allocation2 + $0x3a8] sm:$0xff] %vm298_vm0, %v16184_v0 }
  0x53   : > { %417 = vst.msk [vmem:[#allocation2 + $0x3b0] sm:$0xff] %vm298_vm0, %v16184_v0  ;;  %418 = vst.msk [vmem:[#allocation2 + $0x3b8] sm:$0xff] %vm298_vm0, %v16184_v0 }
  0x54   : > { %419 = vst.msk [vmem:[#allocation2 + $0x3c0] sm:$0xff] %vm298_vm0, %v16184_v0  ;;  %420 = vst.msk [vmem:[#allocation2 + $0x3c8] sm:$0xff] %vm298_vm0, %v16184_v0 }
  0x55   : > { %421 = vst.msk [vmem:[#allocation2 + $0x3d0] sm:$0xff] %vm298_vm0, %v16184_v0  ;;  %422 = vst.msk [vmem:[#allocation2 + $0x3d8] sm:$0xff] %vm298_vm0, %v16184_v0 }
  0x56   : > { %423 = vst.msk [vmem:[#allocation2 + $0x3e0] sm:$0xff] %vm298_vm0, %v16184_v0  ;;  %424 = vst.msk [vmem:[#allocation2 + $0x3e8] sm:$0xff] %vm298_vm0, %v16184_v0 }
  0x57   : > { %425 = vst.msk [vmem:[#allocation2 + $0x3f0] sm:$0xff] %vm298_vm0, %v16184_v0  ;;  %426 = vst.msk [vmem:[#allocation2 + $0x3f8] sm:$0xff] %vm298_vm0, %v16184_v0 }
  0x58   : > { %460 = vst.msk [vmem:[#allocation2 + $0x108] sm:$0xff] %vm298_vm0, %v427_v1  ;;  %461 = vst.msk [vmem:[#allocation2 + $0x110] sm:$0xff] %vm298_vm0, %v428_v2 }
  0x59   : > { %462 = vst.msk [vmem:[#allocation2 + $0x128] sm:$0xff] %vm298_vm0, %v429_v3  ;;  %463 = vst.msk [vmem:[#allocation2 + $0x130] sm:$0xff] %vm298_vm0, %v430_v4 }
  0x5a   : > { %464 = vst.msk [vmem:[#allocation2 + $0x148] sm:$0xff] %vm298_vm0, %v431_v5  ;;  %465 = vst.msk [vmem:[#allocation2 + $0x150] sm:$0xff] %vm298_vm0, %v432_v6 }
  0x5b   : > { %466 = vst.msk [vmem:[#allocation2 + $0x168] sm:$0xff] %vm298_vm0, %v433_v9  ;;  %467 = vst.msk [vmem:[#allocation2 + $0x170] sm:$0xff] %vm298_vm0, %v434_v10 }
  0x5c   : > { %468 = vst.msk [vmem:[#allocation2 + $0x188] sm:$0xff] %vm298_vm0, %v435_v11  ;;  %469 = vst.msk [vmem:[#allocation2 + $0x190] sm:$0xff] %vm298_vm0, %v436_v12 }
  0x5d   : > { %470 = vst.msk [vmem:[#allocation2 + $0x1a8] sm:$0xff] %vm298_vm0, %v437_v13  ;;  %471 = vst.msk [vmem:[#allocation2 + $0x1b0] sm:$0xff] %vm298_vm0, %v438_v14 }
  0x5e   : > { %472 = vst.msk [vmem:[#allocation2 + $0x1c8] sm:$0xff] %vm298_vm0, %v439_v15  ;;  %473 = vst.msk [vmem:[#allocation2 + $0x1d0] sm:$0xff] %vm298_vm0, %v440_v16 }
  0x5f   : > { %474 = vst.msk [vmem:[#allocation2 + $0x1e8] sm:$0xff] %vm298_vm0, %v441_v17  ;;  %475 = vst.msk [vmem:[#allocation2 + $0x1f0] sm:$0xff] %vm298_vm0, %v442_v18  ;;  %v11489_v25 = vld [vmem:[#allocation2 + $0x108] sm:$0xff]  ;;  %v11498_v27 = vld [vmem:[#allocation2 + $0x110] sm:$0xff] }
  0x60   : > { %476 = vst.msk [vmem:[#allocation2 + $0x208] sm:$0xff] %vm298_vm0, %v443_v19  ;;  %477 = vst.msk [vmem:[#allocation2 + $0x210] sm:$0xff] %vm298_vm0, %v444_v20  ;;  %v11491_v26 = vld [vmem:[#allocation2 + $0x128] sm:$0xff]  ;;  %689 = vrot.lane.b32.xlu1 %v11489_v25, %s11075_s18  ;;  %v11510_v31 = vld [vmem:[#allocation2 + $0x130] sm:$0xff] }
  0x61   : > { %478 = vst.msk [vmem:[#allocation2 + $0x228] sm:$0xff] %vm298_vm0, %v445_v21  ;;  %479 = vst.msk [vmem:[#allocation2 + $0x230] sm:$0xff] %vm298_vm0, %v446_v22  ;;  %693 = vrot.lane.b32.xlu0 %v11491_v26, %s11075_s18  ;;  %v11506_v30 = vld [vmem:[#allocation2 + $0x148] sm:$0xff]  ;;  %v11527_v39 = vld [vmem:[#allocation2 + $0x150] sm:$0xff] }
  0x62   : > { %480 = vst.msk [vmem:[#allocation2 + $0x248] sm:$0xff] %vm298_vm0, %v447_v23  ;;  %481 = vst.msk [vmem:[#allocation2 + $0x250] sm:$0xff] %vm298_vm0, %v448_v24  ;;  %v11514_v32 = vld [vmem:[#allocation2 + $0x168] sm:$0xff]  ;;  %v11538_v41 = vld [vmem:[#allocation2 + $0x170] sm:$0xff] }
  0x63   : > { %482 = vst.msk [vmem:[#allocation2 + $0x268] sm:$0xff] %vm298_vm0, %v449_v28  ;;  %483 = vst.msk [vmem:[#allocation2 + $0x270] sm:$0xff] %vm298_vm0, %v450_v29  ;;  %v11534_v40 = vld [vmem:[#allocation2 + $0x188] sm:$0xff]  ;;  %v11546_v43 = vld [vmem:[#allocation2 + $0x190] sm:$0xff] }
  0x64   : > { %691 = vrot.lane.b32.xlu1 %v11498_v27, %s11075_s18  ;;  %484 = vst.msk [vmem:[#allocation2 + $0x288] sm:$0xff] %vm298_vm0, %v451_v33  ;;  %485 = vst.msk [vmem:[#allocation2 + $0x290] sm:$0xff] %vm298_vm0, %v452_v34  ;;  %v11542_v42 = vld [vmem:[#allocation2 + $0x1a8] sm:$0xff]  ;;  %v11556_v47 = vld [vmem:[#allocation2 + $0x1b0] sm:$0xff] }
  0x65   : > { %697 = vrot.lane.b32.xlu0 %v11506_v30, %s11075_s18  ;;  %486 = vst.msk [vmem:[#allocation2 + $0x2a8] sm:$0xff] %vm298_vm0, %v453_v35  ;;  %487 = vst.msk [vmem:[#allocation2 + $0x2b0] sm:$0xff] %vm298_vm0, %v454_v36  ;;  %v11550_v44 = vld [vmem:[#allocation2 + $0x1c8] sm:$0xff]  ;;  %v11576_v53 = vld [vmem:[#allocation2 + $0x1d0] sm:$0xff] }
  0x66   : > { %488 = vst.msk [vmem:[#allocation2 + $0x2c8] sm:$0xff] %vm298_vm0, %v455_v37  ;;  %489 = vst.msk [vmem:[#allocation2 + $0x2d0] sm:$0xff] %vm298_vm0, %v456_v38  ;;  %v11554_v46 = vld [vmem:[#allocation2 + $0x107] sm:$0xff]  ;;  %v11564_v49 = vld [vmem:[#allocation2 + $0x10f] sm:$0xff] }
  0x67   : > { %589 = vst.msk [vmem:[#allocation3] sm:$0xff] %vm298_vm0, %v557_v45  ;;  %591 = vst.msk [vmem:[#allocation3 + $0x10] sm:$0xff] %vm298_vm0, %v11554_v46  ;;  %v11566_v50 = vld [vmem:[#allocation2 + $0x1e8] sm:$0xff]  ;;  %v11612_v63 = vld [vmem:[#allocation2 + $0x1f0] sm:$0xff] }
  0x68   : > { %695 = vrot.lane.b32.xlu1 %v11510_v31, %s11075_s18  ;;  %590 = vst.msk [vmem:[#allocation3 + $0x8] sm:$0xff] %vm298_vm0, %v558_v48  ;;  %592 = vst.msk [vmem:[#allocation3 + $0x18] sm:$0xff] %vm298_vm0, %v11564_v49  ;;  %v11570_v51 = vld [vmem:[#allocation2 + $0x127] sm:$0xff]  ;;  %v11572_v52 = vld [vmem:[#allocation2 + $0x12f] sm:$0xff] }
  0x69   : > { %701 = vrot.lane.b32.xlu0 %v11514_v32, %s11075_s18  ;;  %593 = vst.msk [vmem:[#allocation3 + $0x20] sm:$0xff] %vm298_vm0, %v11570_v51  ;;  %594 = vst.msk [vmem:[#allocation3 + $0x28] sm:$0xff] %vm298_vm0, %v11572_v52  ;;  %v11582_v54 = vld [vmem:[#allocation2 + $0x147] sm:$0xff]  ;;  %v11584_v55 = vld [vmem:[#allocation2 + $0x14f] sm:$0xff] }
  0x6a   : > { %v11586_v56 = vld [vmem:[#allocation2 + $0x208] sm:$0xff]  ;;  %595 = vst.msk [vmem:[#allocation3 + $0x30] sm:$0xff] %vm298_vm0, %v11582_v54  ;;  %596 = vst.msk [vmem:[#allocation3 + $0x38] sm:$0xff] %vm298_vm0, %v11584_v55  ;;  %v11672_v14 = vld [vmem:[#allocation2 + $0x210] sm:$0xff] }
  0x6b   : > { %v11592_v57 = vld [vmem:[#allocation2 + $0x167] sm:$0xff]  ;;  %v11594_v58 = vld [vmem:[#allocation2 + $0x16f] sm:$0xff]  ;;  %v458_v37 = vld [vmem:[%s11444_s17 + $0xf8] sm:$0xff] }
  0x6c   : > { %699 = vrot.lane.b32.xlu1 %v11527_v39, %s11075_s18  ;;  %v11596_v59 = vld [vmem:[#allocation2 + $0x187] sm:$0xff]  ;;  %597 = vst.msk [vmem:[#allocation3 + $0x40] sm:$0xff] %vm298_vm0, %v11592_v57  ;;  %598 = vst.msk [vmem:[#allocation3 + $0x48] sm:$0xff] %vm298_vm0, %v11594_v58  ;;  %v11606_v60 = vld [vmem:[#allocation2 + $0x18f] sm:$0xff] }
  0x6d   : > { %705 = vrot.lane.b32.xlu0 %v11534_v40, %s11075_s18  ;;  %599 = vst.msk [vmem:[#allocation3 + $0x50] sm:$0xff] %vm298_vm0, %v11596_v59  ;;  %v11608_v61 = vld [vmem:[#allocation2 + $0x1a7] sm:$0xff]  ;;  %v11610_v62 = vld [vmem:[#allocation2 + $0x1af] sm:$0xff]  ;;  %600 = vst.msk [vmem:[#allocation3 + $0x58] sm:$0xff] %vm298_vm0, %v11606_v60 }
  0x6e   : > { %601 = vst.msk [vmem:[#allocation3 + $0x60] sm:$0xff] %vm298_vm0, %v11608_v61  ;;  %602 = vst.msk [vmem:[#allocation3 + $0x68] sm:$0xff] %vm298_vm0, %v11610_v62  ;;  %v11620_v1 = vld [vmem:[#allocation2 + $0x1c7] sm:$0xff]  ;;  %v11622_v2 = vld [vmem:[#allocation2 + $0x1cf] sm:$0xff] }
  0x6f   : > { %v11624_v3 = vld [vmem:[#allocation2 + $0x1e7] sm:$0xff]  ;;  %603 = vst.msk [vmem:[#allocation3 + $0x70] sm:$0xff] %vm298_vm0, %v11620_v1  ;;  %604 = vst.msk [vmem:[#allocation3 + $0x78] sm:$0xff] %vm298_vm0, %v11622_v2  ;;  %v11634_v4 = vld [vmem:[#allocation2 + $0x1ef] sm:$0xff] }
  0x70   : > { %703 = vrot.lane.b32.xlu1 %v11538_v41, %s11075_s18  ;;  %605 = vst.msk [vmem:[#allocation3 + $0x80] sm:$0xff] %vm298_vm0, %v11624_v3  ;;  %v11636_v5 = vld [vmem:[#allocation2 + $0x207] sm:$0xff]  ;;  %v11638_v6 = vld [vmem:[#allocation2 + $0x20f] sm:$0xff]  ;;  %606 = vst.msk [vmem:[#allocation3 + $0x88] sm:$0xff] %vm298_vm0, %v11634_v4 }
  0x71   : > { %709 = vrot.lane.b32.xlu0 %v11542_v42, %s11075_s18  ;;  %607 = vst.msk [vmem:[#allocation3 + $0x90] sm:$0xff] %vm298_vm0, %v11636_v5  ;;  %608 = vst.msk [vmem:[#allocation3 + $0x98] sm:$0xff] %vm298_vm0, %v11638_v6  ;;  %v11646_v7 = vld [vmem:[#allocation2 + $0x227] sm:$0xff]  ;;  %v11648_v8 = vld [vmem:[#allocation2 + $0x22f] sm:$0xff] }
  0x72   : > { %v11650_v9 = vld [vmem:[#allocation2 + $0x247] sm:$0xff]  ;;  %609 = vst.msk [vmem:[#allocation3 + $0xa0] sm:$0xff] %vm298_vm0, %v11646_v7  ;;  %610 = vst.msk [vmem:[#allocation3 + $0xa8] sm:$0xff] %vm298_vm0, %v11648_v8  ;;  %v11660_v10 = vld [vmem:[#allocation2 + $0x24f] sm:$0xff] }
  0x73   : > { %611 = vst.msk [vmem:[#allocation3 + $0xb0] sm:$0xff] %vm298_vm0, %v11650_v9  ;;  %v11662_v11 = vld [vmem:[#allocation2 + $0x228] sm:$0xff]  ;;  %612 = vst.msk [vmem:[#allocation3 + $0xb8] sm:$0xff] %vm298_vm0, %v11660_v10  ;;  %v11688_v18 = vld [vmem:[#allocation2 + $0x230] sm:$0xff] }
  0x74   : > { %707 = vrot.lane.b32.xlu1 %v11546_v43, %s11075_s18  ;;  %v11668_v12 = vld [vmem:[#allocation2 + $0x267] sm:$0xff]  ;;  %v11670_v13 = vld [vmem:[#allocation2 + $0x26f] sm:$0xff]  ;;  %491 = vst.msk [vmem:[#allocation2 + $0x2f0] sm:$0xff] %vm298_vm0, %v458_v37  ;;  %vm10901_vm14 = vmpackc.low %vm9378_vm12, %vm11085_vm13 }
  0x75   : > { %713 = vrot.lane.b32.xlu0 %v11550_v44, %s11075_s18  ;;  %613 = vst.msk [vmem:[#allocation3 + $0xc0] sm:$0xff] %vm298_vm0, %v11668_v12  ;;  %614 = vst.msk [vmem:[#allocation3 + $0xc8] sm:$0xff] %vm298_vm0, %v11670_v13  ;;  %v11680_v15 = vld [vmem:[#allocation2 + $0x248] sm:$0xff]  ;;  %v11704_v22 = vld [vmem:[#allocation2 + $0x250] sm:$0xff] }
  0x76   : > { %v11684_v16 = vld [vmem:[#allocation2 + $0x287] sm:$0xff]  ;;  %v11686_v17 = vld [vmem:[#allocation2 + $0x28f] sm:$0xff] }
  0x77   : > { %615 = vst.msk [vmem:[#allocation3 + $0xd0] sm:$0xff] %vm298_vm0, %v11684_v16  ;;  %616 = vst.msk [vmem:[#allocation3 + $0xd8] sm:$0xff] %vm298_vm0, %v11686_v17  ;;  %v11696_v19 = vld [vmem:[#allocation2 + $0x268] sm:$0xff]  ;;  %v11720_v29 = vld [vmem:[#allocation2 + $0x270] sm:$0xff] }
  0x78   : > { %711 = vrot.lane.b32.xlu1 %v11556_v47, %s11075_s18  ;;  %v11700_v20 = vld [vmem:[#allocation2 + $0x2a7] sm:$0xff]  ;;  %v11702_v21 = vld [vmem:[#allocation2 + $0x2af] sm:$0xff] }
  0x79   : > { %717 = vrot.lane.b32.xlu0 %v11566_v50, %s11075_s18  ;;  %617 = vst.msk [vmem:[#allocation3 + $0xe0] sm:$0xff] %vm298_vm0, %v11700_v20  ;;  %618 = vst.msk [vmem:[#allocation3 + $0xe8] sm:$0xff] %vm298_vm0, %v11702_v21  ;;  %v11712_v23 = vld [vmem:[#allocation2 + $0x288] sm:$0xff]  ;;  %v11732_v34 = vld [vmem:[#allocation2 + $0x290] sm:$0xff] }
  0x7a   : > { %v11716_v24 = vld [vmem:[#allocation2 + $0x2c7] sm:$0xff]  ;;  %v11718_v28 = vld [vmem:[#allocation2 + $0x2cf] sm:$0xff]  ;;  %16243 = vst [vmem:[#allocation11_spill] sm:$0xff] %v11732_v34 }
  0x7b   : > { %619 = vst.msk [vmem:[#allocation3 + $0xf0] sm:$0xff] %vm298_vm0, %v11716_v24  ;;  %620 = vst.msk [vmem:[#allocation3 + $0xf8] sm:$0xff] %vm298_vm0, %v11718_v28  ;;  %v11728_v33 = vld [vmem:[#allocation2 + $0x2a8] sm:$0xff]  ;;  %v457_v35 = vld [vmem:[%s11444_s17 + $0xf0] sm:$0xff] }
  0x7c   : > { %715 = vrot.lane.b32.xlu1 %v11576_v53, %s11075_s18  ;;  %v11737_v36 = vld [vmem:[#allocation2 + $0x2c8] sm:$0xff]  ;;  %490 = vst.msk [vmem:[#allocation2 + $0x2e8] sm:$0xff] %vm298_vm0, %v457_v35  ;;  %v11744_v38 = vld [vmem:[#allocation2 + $0x2b0] sm:$0xff] }
  0x7d   : > { %721 = vrot.lane.b32.xlu0 %v11586_v56, %s11075_s18  ;;  %16244 = vst [vmem:[#allocation12_spill] sm:$0xff] %v11737_v36  ;;  %16245 = vst [vmem:[#allocation13_spill] sm:$0xff] %v11744_v38  ;;  %v814_v45 = vld [vmem:[#allocation2 + $0xe9] sm:$0xff]  ;;  %v815_v37 = vld [vmem:[#allocation2 + $0xf1] sm:$0xff] }
  0x7e   : > { %v11750_v48 = vld [vmem:[#allocation2 + $0x2d0] sm:$0xff] }
  0x7f   : > { %16246 = vst [vmem:[#allocation14_spill] sm:$0xff] %v11750_v48  ;;  %v11753_v35 = vld [vmem:[#allocation2 + $0x109] sm:$0xff] }
  0x80   : > { %719 = vrot.lane.b32.xlu1 %v11612_v63, %s11075_s18  ;;  %16247 = vst [vmem:[#allocation15_spill] sm:$0xff] %v11753_v35  ;;  %v11759_v0 = vld [vmem:[#allocation2 + $0x129] sm:$0xff] }
  0x81   : > { %725 = vrot.lane.b32.xlu0 %v11662_v11, %s11075_s18  ;;  %16248 = vst [vmem:[#allocation16_spill] sm:$0xff] %v11759_v0 }
  0x84   : > { %723 = vrot.lane.b32.xlu1 %v11672_v14, %s11075_s18 }
  0x85   : > { %729 = vrot.lane.b32.xlu0 %v11680_v15, %s11075_s18 }
  0x88   : > { %727 = vrot.lane.b32.xlu1 %v11688_v18, %s11075_s18 }
  0x89   : > { %733 = vrot.lane.b32.xlu0 %v11696_v19, %s11075_s18 }
  0x8c   : > { %731 = vrot.lane.b32.xlu1 %v11704_v22, %s11075_s18 }
  0x8d   : > { %737 = vrot.lane.b32.xlu0 %v11712_v23, %s11075_s18 }
  0x90   : > { %735 = vrot.lane.b32.xlu1 %v11720_v29, %s11075_s18 }
  0x91   : > { %741 = vrot.lane.b32.xlu0 %v11728_v33, %s11075_s18 }
  0x94   : > { %739 = vrot.lane.b32.xlu1 %v11732_v34, %s11075_s18 }
  0x95   : > { %745 = vrot.lane.b32.xlu0 %v11737_v36, %s11075_s18  ;;  %v11762_v36 = vld [vmem:[#allocation2 + $0x111] sm:$0xff] }
  0x96   : > { %16249 = vst [vmem:[#allocation17_spill] sm:$0xff] %v11762_v36 }
  0x98   : > { %743 = vrot.lane.b32.xlu1 %v11744_v38, %s11075_s18  ;;  %v11766_v38 = vld [vmem:[#allocation2 + $0x149] sm:$0xff] }
  0x99   : > { %878 = vrot.lane.b32.xlu0 %v814_v45, %s11076_s19  ;;  %16250 = vst [vmem:[#allocation18_spill] sm:$0xff] %v11766_v38  ;;  %v11770_v45 = vld [vmem:[#allocation2 + $0x131] sm:$0xff] }
  0x9a   : > { %16251 = vst [vmem:[#allocation19_spill] sm:$0xff] %v11770_v45 }
  0x9c   : > { %747 = vrot.lane.b32.xlu1 %v11750_v48, %s11075_s18  ;;  %v11850_v48 = vld [vmem:[#allocation2 + $0x271] sm:$0xff] }
  0x9d   : > { %882 = vrot.lane.b32.xlu0 %v11753_v35, %s11076_s19  ;;  %v11774_v35 = vld [vmem:[#allocation2 + $0x169] sm:$0xff]  ;;  %16271 = vst [vmem:[#allocation39_spill] sm:$0xff] %v11850_v48 }
  0x9e   : > { %16252 = vst [vmem:[#allocation20_spill] sm:$0xff] %v11774_v35 }
  0xa0   : > { %880 = vrot.lane.b32.xlu1 %v815_v37, %s11076_s19  ;;  %v11778_v37 = vld [vmem:[#allocation2 + $0x151] sm:$0xff] }
  0xa1   : > { %886 = vrot.lane.b32.xlu0 %v11759_v0, %s11076_s19  ;;  %16253 = vst [vmem:[#allocation21_spill] sm:$0xff] %v11778_v37  ;;  %v11782_v0 = vld [vmem:[#allocation2 + $0x189] sm:$0xff] }
  0xa2   : > { %16254 = vst [vmem:[#allocation22_spill] sm:$0xff] %v11782_v0 }
  0xa4   : > { %884 = vrot.lane.b32.xlu1 %v11762_v36, %s11076_s19  ;;  %v11786_v36 = vld [vmem:[#allocation2 + $0x171] sm:$0xff] }
  0xa5   : > { %890 = vrot.lane.b32.xlu0 %v11766_v38, %s11076_s19  ;;  %16255 = vst [vmem:[#allocation23_spill] sm:$0xff] %v11786_v36  ;;  %v11790_v38 = vld [vmem:[#allocation2 + $0x1a9] sm:$0xff] }
  0xa6   : > { %16256 = vst [vmem:[#allocation24_spill] sm:$0xff] %v11790_v38 }
  0xa8   : > { %888 = vrot.lane.b32.xlu1 %v11770_v45, %s11076_s19  ;;  %v11794_v45 = vld [vmem:[#allocation2 + $0x191] sm:$0xff] }
  0xa9   : > { %894 = vrot.lane.b32.xlu0 %v11774_v35, %s11076_s19  ;;  %16257 = vst [vmem:[#allocation25_spill] sm:$0xff] %v11794_v45  ;;  %v11798_v35 = vld [vmem:[#allocation2 + $0x1c9] sm:$0xff] }
  0xaa   : > { %16258 = vst [vmem:[#allocation26_spill] sm:$0xff] %v11798_v35 }
  0xac   : > { %892 = vrot.lane.b32.xlu1 %v11778_v37, %s11076_s19  ;;  %v11802_v37 = vld [vmem:[#allocation2 + $0x1b1] sm:$0xff] }
  0xad   : > { %898 = vrot.lane.b32.xlu0 %v11782_v0, %s11076_s19  ;;  %16259 = vst [vmem:[#allocation27_spill] sm:$0xff] %v11802_v37  ;;  %v11806_v0 = vld [vmem:[#allocation2 + $0x1e9] sm:$0xff] }
  0xae   : > { %16260 = vst [vmem:[#allocation28_spill] sm:$0xff] %v11806_v0 }
  0xb0   : > { %896 = vrot.lane.b32.xlu1 %v11786_v36, %s11076_s19  ;;  %v11810_v36 = vld [vmem:[#allocation2 + $0x1d1] sm:$0xff] }
  0xb1   : > { %902 = vrot.lane.b32.xlu0 %v11790_v38, %s11076_s19  ;;  %16261 = vst [vmem:[#allocation29_spill] sm:$0xff] %v11810_v36  ;;  %v11814_v38 = vld [vmem:[#allocation2 + $0x209] sm:$0xff] }
  0xb2   : > { %16262 = vst [vmem:[#allocation30_spill] sm:$0xff] %v11814_v38 }
  0xb4   : > { %900 = vrot.lane.b32.xlu1 %v11794_v45, %s11076_s19  ;;  %v11818_v45 = vld [vmem:[#allocation2 + $0x1f1] sm:$0xff] }
  0xb5   : > { %906 = vrot.lane.b32.xlu0 %v11798_v35, %s11076_s19  ;;  %16263 = vst [vmem:[#allocation31_spill] sm:$0xff] %v11818_v45  ;;  %v11822_v35 = vld [vmem:[#allocation2 + $0x229] sm:$0xff] }
  0xb6   : > { %16264 = vst [vmem:[#allocation32_spill] sm:$0xff] %v11822_v35 }
  0xb8   : > { %904 = vrot.lane.b32.xlu1 %v11802_v37, %s11076_s19  ;;  %v11826_v37 = vld [vmem:[#allocation2 + $0x211] sm:$0xff] }
  0xb9   : > { %910 = vrot.lane.b32.xlu0 %v11806_v0, %s11076_s19  ;;  %16265 = vst [vmem:[#allocation33_spill] sm:$0xff] %v11826_v37  ;;  %v11830_v0 = vld [vmem:[#allocation2 + $0x249] sm:$0xff] }
  0xba   : > { %16266 = vst [vmem:[#allocation34_spill] sm:$0xff] %v11830_v0 }
  0xbc   : > { %908 = vrot.lane.b32.xlu1 %v11810_v36, %s11076_s19  ;;  %v11834_v36 = vld [vmem:[#allocation2 + $0x231] sm:$0xff] }
  0xbd   : > { %914 = vrot.lane.b32.xlu0 %v11814_v38, %s11076_s19  ;;  %16267 = vst [vmem:[#allocation35_spill] sm:$0xff] %v11834_v36  ;;  %v11838_v38 = vld [vmem:[#allocation2 + $0x269] sm:$0xff] }
  0xbe   : > { %16268 = vst [vmem:[#allocation36_spill] sm:$0xff] %v11838_v38 }
  0xc0   : > { %912 = vrot.lane.b32.xlu1 %v11818_v45, %s11076_s19  ;;  %v11842_v45 = vld [vmem:[#allocation2 + $0x251] sm:$0xff] }
  0xc1   : > { %918 = vrot.lane.b32.xlu0 %v11822_v35, %s11076_s19  ;;  %16269 = vst [vmem:[#allocation37_spill] sm:$0xff] %v11842_v45  ;;  %v11846_v35 = vld [vmem:[#allocation2 + $0x289] sm:$0xff] }
  0xc2   : > { %16270 = vst [vmem:[#allocation38_spill] sm:$0xff] %v11846_v35 }
  0xc4   : > { %916 = vrot.lane.b32.xlu1 %v11826_v37, %s11076_s19  ;;  %v686_v37 = vpop.permute.xlu0 %685 }
  0xc5   : > { %922 = vrot.lane.b32.xlu0 %v11830_v0, %s11076_s19  ;;  %782 = vst.msk [vmem:[#allocation3] sm:$0xff] %vm781_vm1, %v686_v37  ;;  %v11859_v0 = vld [vmem:[#allocation2 + $0x291] sm:$0xff]  ;;  %v11865_v37 = vld [vmem:[#allocation2 + $0x2c9] sm:$0xff] }
  0xc6   : > { %16272 = vst [vmem:[#allocation40_spill] sm:$0xff] %v11859_v0 }
  0xc8   : > { %920 = vrot.lane.b32.xlu1 %v11834_v36, %s11076_s19  ;;  %v11855_v36 = vld [vmem:[#allocation2 + $0x2a9] sm:$0xff] }
  0xc9   : > { %926 = vrot.lane.b32.xlu0 %v11838_v38, %s11076_s19  ;;  %v688_v38 = vpop.permute.xlu0 %687 }
  0xca   : > { %783 = vst.msk [vmem:[#allocation3 + $0x8] sm:$0xff] %vm781_vm1, %v688_v38  ;;  %v11877_v38 = vld [vmem:[#allocation2 + $0x2d1] sm:$0xff] }
  0xcc   : > { %924 = vrot.lane.b32.xlu1 %v11842_v45, %s11076_s19  ;;  %v11869_v45 = vld [vmem:[#allocation2 + $0x2b1] sm:$0xff] }
  0xcd   : > { %930 = vrot.lane.b32.xlu0 %v11846_v35, %s11076_s19 }
  0xd0   : > { %928 = vrot.lane.b32.xlu1 %v11850_v48, %s11076_s19 }
  0xd1   : > { %934 = vrot.lane.b32.xlu0 %v11855_v36, %s11076_s19 }
  0xd2   : > { %v690_v34 = vpop.permute.xlu1 %689 }
  0xd3   : > { %784 = vst.msk [vmem:[#allocation3 + $0x10] sm:$0xff] %vm781_vm1, %v690_v34  ;;  %v694_v35 = vpop.permute.xlu0 %693 }
  0xd4   : > { %932 = vrot.lane.b32.xlu1 %v11859_v0, %s11076_s19  ;;  %786 = vst.msk [vmem:[#allocation3 + $0x20] sm:$0xff] %vm781_vm1, %v694_v35 }
  0xd5   : > { %938 = vrot.lane.b32.xlu0 %v11865_v37, %s11076_s19 }
  0xd6   : > { %v692_v48 = vpop.permute.xlu1 %691 }
  0xd7   : > { %785 = vst.msk [vmem:[#allocation3 + $0x18] sm:$0xff] %vm781_vm1, %v692_v48  ;;  %v698_v34 = vpop.permute.xlu0 %697 }
  0xd8   : > { %936 = vrot.lane.b32.xlu1 %v11869_v45, %s11076_s19  ;;  %788 = vst.msk [vmem:[#allocation3 + $0x30] sm:$0xff] %vm781_vm1, %v698_v34 }
  0xd9   : > { %1071 = vrot.lane.b32.xlu0 %v11554_v46, %s11077_s20 }
  0xda   : > { %v696_v0 = vpop.permute.xlu1 %695 }
  0xdb   : > { %787 = vst.msk [vmem:[#allocation3 + $0x28] sm:$0xff] %vm781_vm1, %v696_v0  ;;  %v702_v35 = vpop.permute.xlu0 %701 }
  0xdc   : > { %940 = vrot.lane.b32.xlu1 %v11877_v38, %s11076_s19  ;;  %790 = vst.msk [vmem:[#allocation3 + $0x40] sm:$0xff] %vm781_vm1, %v702_v35 }
  0xdd   : > { %1075 = vrot.lane.b32.xlu0 %v11570_v51, %s11077_s20 }
  0xde   : > { %v700_v48 = vpop.permute.xlu1 %699 }
  0xdf   : > { %789 = vst.msk [vmem:[#allocation3 + $0x38] sm:$0xff] %vm781_vm1, %v700_v48  ;;  %v706_v34 = vpop.permute.xlu0 %705 }
  0xe0   : > { %1073 = vrot.lane.b32.xlu1 %v11564_v49, %s11077_s20  ;;  %792 = vst.msk [vmem:[#allocation3 + $0x50] sm:$0xff] %vm781_vm1, %v706_v34 }
  0xe1   : > { %1079 = vrot.lane.b32.xlu0 %v11582_v54, %s11077_s20 }
  0xe2   : > { %v704_v46 = vpop.permute.xlu1 %703 }
  0xe3   : > { %791 = vst.msk [vmem:[#allocation3 + $0x48] sm:$0xff] %vm781_vm1, %v704_v46  ;;  %v710_v0 = vpop.permute.xlu0 %709 }
  0xe4   : > { %1077 = vrot.lane.b32.xlu1 %v11572_v52, %s11077_s20  ;;  %794 = vst.msk [vmem:[#allocation3 + $0x60] sm:$0xff] %vm781_vm1, %v710_v0 }
  0xe5   : > { %1083 = vrot.lane.b32.xlu0 %v11592_v57, %s11077_s20 }
  0xe6   : > { %v708_v35 = vpop.permute.xlu1 %707 }
  0xe7   : > { %793 = vst.msk [vmem:[#allocation3 + $0x58] sm:$0xff] %vm781_vm1, %v708_v35  ;;  %v714_v49 = vpop.permute.xlu0 %713 }
  0xe8   : > { %1081 = vrot.lane.b32.xlu1 %v11584_v55, %s11077_s20  ;;  %796 = vst.msk [vmem:[#allocation3 + $0x70] sm:$0xff] %vm781_vm1, %v714_v49 }
  0xe9   : > { %1087 = vrot.lane.b32.xlu0 %v11596_v59, %s11077_s20 }
  0xea   : > { %v712_v48 = vpop.permute.xlu1 %711 }
  0xeb   : > { %795 = vst.msk [vmem:[#allocation3 + $0x68] sm:$0xff] %vm781_vm1, %v712_v48  ;;  %v718_v34 = vpop.permute.xlu0 %717 }
  0xec   : > { %1085 = vrot.lane.b32.xlu1 %v11594_v58, %s11077_s20  ;;  %798 = vst.msk [vmem:[#allocation3 + $0x80] sm:$0xff] %vm781_vm1, %v718_v34 }
  0xed   : > { %1091 = vrot.lane.b32.xlu0 %v11608_v61, %s11077_s20 }
  0xee   : > { %v716_v46 = vpop.permute.xlu1 %715 }
  0xef   : > { %797 = vst.msk [vmem:[#allocation3 + $0x78] sm:$0xff] %vm781_vm1, %v716_v46  ;;  %v722_v0 = vpop.permute.xlu0 %721 }
  0xf0   : > { %1089 = vrot.lane.b32.xlu1 %v11606_v60, %s11077_s20  ;;  %800 = vst.msk [vmem:[#allocation3 + $0x90] sm:$0xff] %vm781_vm1, %v722_v0 }
  0xf1   : > { %1095 = vrot.lane.b32.xlu0 %v11620_v1, %s11077_s20 }
  0xf2   : > { %v720_v35 = vpop.permute.xlu1 %719 }
  0xf3   : > { %799 = vst.msk [vmem:[#allocation3 + $0x88] sm:$0xff] %vm781_vm1, %v720_v35  ;;  %v726_v49 = vpop.permute.xlu0 %725 }
  0xf4   : > { %1093 = vrot.lane.b32.xlu1 %v11610_v62, %s11077_s20  ;;  %802 = vst.msk [vmem:[#allocation3 + $0xa0] sm:$0xff] %vm781_vm1, %v726_v49 }
  0xf5   : > { %1099 = vrot.lane.b32.xlu0 %v11624_v3, %s11077_s20 }
  0xf6   : > { %v724_v48 = vpop.permute.xlu1 %723 }
  0xf7   : > { %801 = vst.msk [vmem:[#allocation3 + $0x98] sm:$0xff] %vm781_vm1, %v724_v48  ;;  %v730_v34 = vpop.permute.xlu0 %729 }
  0xf8   : > { %1097 = vrot.lane.b32.xlu1 %v11622_v2, %s11077_s20  ;;  %804 = vst.msk [vmem:[#allocation3 + $0xb0] sm:$0xff] %vm781_vm1, %v730_v34 }
  0xf9   : > { %1103 = vrot.lane.b32.xlu0 %v11636_v5, %s11077_s20 }
  0xfa   : > { %v728_v46 = vpop.permute.xlu1 %727 }
  0xfb   : > { %803 = vst.msk [vmem:[#allocation3 + $0xa8] sm:$0xff] %vm781_vm1, %v728_v46  ;;  %v734_v0 = vpop.permute.xlu0 %733 }
  0xfc   : > { %1101 = vrot.lane.b32.xlu1 %v11634_v4, %s11077_s20  ;;  %806 = vst.msk [vmem:[#allocation3 + $0xc0] sm:$0xff] %vm781_vm1, %v734_v0 }
  0xfd   : > { %1107 = vrot.lane.b32.xlu0 %v11646_v7, %s11077_s20 }
  0xfe   : > { %v732_v35 = vpop.permute.xlu1 %731 }
  0xff   : > { %805 = vst.msk [vmem:[#allocation3 + $0xb8] sm:$0xff] %vm781_vm1, %v732_v35  ;;  %v738_v49 = vpop.permute.xlu0 %737 }
 0x100   : > { %1105 = vrot.lane.b32.xlu1 %v11638_v6, %s11077_s20  ;;  %808 = vst.msk [vmem:[#allocation3 + $0xd0] sm:$0xff] %vm781_vm1, %v738_v49 }
 0x101   : > { %1111 = vrot.lane.b32.xlu0 %v11650_v9, %s11077_s20 }
 0x102   : > { %v736_v48 = vpop.permute.xlu1 %735 }
 0x103   : > { %807 = vst.msk [vmem:[#allocation3 + $0xc8] sm:$0xff] %vm781_vm1, %v736_v48  ;;  %v742_v34 = vpop.permute.xlu0 %741 }
 0x104   : > { %1109 = vrot.lane.b32.xlu1 %v11648_v8, %s11077_s20  ;;  %810 = vst.msk [vmem:[#allocation3 + $0xe0] sm:$0xff] %vm781_vm1, %v742_v34 }
 0x105   : > { %1115 = vrot.lane.b32.xlu0 %v11668_v12, %s11077_s20 }
 0x106   : > { %v740_v46 = vpop.permute.xlu1 %739 }
 0x107   : > { %809 = vst.msk [vmem:[#allocation3 + $0xd8] sm:$0xff] %vm781_vm1, %v740_v46  ;;  %v746_v0 = vpop.permute.xlu0 %745 }
 0x108   : > { %1113 = vrot.lane.b32.xlu1 %v11660_v10, %s11077_s20  ;;  %812 = vst.msk [vmem:[#allocation3 + $0xf0] sm:$0xff] %vm781_vm1, %v746_v0  ;;  %v11967_v0 = vld [vmem:[#allocation2 + $0x2e7] sm:$0xff] }
 0x109   : > { %1119 = vrot.lane.b32.xlu0 %v11684_v16, %s11077_s20 }
 0x10a   : > { %v744_v35 = vpop.permute.xlu1 %743 }
 0x10b   : > { %811 = vst.msk [vmem:[#allocation3 + $0xe8] sm:$0xff] %vm781_vm1, %v744_v35  ;;  %v879_v49 = vpop.permute.xlu0 %878 }
 0x10c   : > { %1117 = vrot.lane.b32.xlu1 %v11670_v13, %s11077_s20  ;;  %975 = vst.msk [vmem:[#allocation3] sm:$0xff] %vm974_vm2, %v879_v49 }
 0x10d   : > { %1123 = vrot.lane.b32.xlu0 %v11700_v20, %s11077_s20 }
 0x10e   : > { %v748_v48 = vpop.permute.xlu1 %747 }
 0x10f   : > { %813 = vst.msk [vmem:[#allocation3 + $0xf8] sm:$0xff] %vm781_vm1, %v748_v48  ;;  %v883_v34 = vpop.permute.xlu0 %882 }
 0x110   : > { %1121 = vrot.lane.b32.xlu1 %v11686_v17, %s11077_s20  ;;  %977 = vst.msk [vmem:[#allocation3 + $0x10] sm:$0xff] %vm974_vm2, %v883_v34  ;;  %v11977_v34 = vld [vmem:[#allocation2 + $0x2ef] sm:$0xff] }
 0x111   : > { %1127 = vrot.lane.b32.xlu0 %v11716_v24, %s11077_s20 }
 0x112   : > { %v881_v46 = vpop.permute.xlu1 %880 }
 0x113   : > { %976 = vst.msk [vmem:[#allocation3 + $0x8] sm:$0xff] %vm974_vm2, %v881_v46  ;;  %v887_v35 = vpop.permute.xlu0 %886 }
 0x114   : > { %1125 = vrot.lane.b32.xlu1 %v11702_v21, %s11077_s20  ;;  %979 = vst.msk [vmem:[#allocation3 + $0x20] sm:$0xff] %vm974_vm2, %v887_v35 }
 0x115   : > { %1131 = vrot.lane.b32.xlu0 %v11967_v0, %s11077_s20 }
 0x116   : > { %v885_v49 = vpop.permute.xlu1 %884 }
 0x117   : > { %978 = vst.msk [vmem:[#allocation3 + $0x18] sm:$0xff] %vm974_vm2, %v885_v49  ;;  %v891_v48 = vpop.permute.xlu0 %890 }
 0x118   : > { %1129 = vrot.lane.b32.xlu1 %v11718_v28, %s11077_s20  ;;  %981 = vst.msk [vmem:[#allocation3 + $0x30] sm:$0xff] %vm974_vm2, %v891_v48 }
 0x119   : > { %1264 = vrot.lane.b32.xlu0 %v11489_v25, %s11078_s21 }
 0x11a   : > { %v889_v46 = vpop.permute.xlu1 %888 }
 0x11b   : > { %980 = vst.msk [vmem:[#allocation3 + $0x28] sm:$0xff] %vm974_vm2, %v889_v46  ;;  %v895_v35 = vpop.permute.xlu0 %894 }
 0x11c   : > { %1133 = vrot.lane.b32.xlu1 %v11977_v34, %s11077_s20  ;;  %983 = vst.msk [vmem:[#allocation3 + $0x40] sm:$0xff] %vm974_vm2, %v895_v35 }
 0x11d   : > { %1268 = vrot.lane.b32.xlu0 %v11491_v26, %s11078_s21 }
 0x11e   : > { %v893_v49 = vpop.permute.xlu1 %892 }
 0x11f   : > { %982 = vst.msk [vmem:[#allocation3 + $0x38] sm:$0xff] %vm974_vm2, %v893_v49  ;;  %v899_v48 = vpop.permute.xlu0 %898  ;;  %v16274_v49 = vld [vmem:[#allocation12_spill] sm:$0xff] }
 0x120   : > { %1266 = vrot.lane.b32.xlu1 %v11498_v27, %s11078_s21  ;;  %985 = vst.msk [vmem:[#allocation3 + $0x50] sm:$0xff] %vm974_vm2, %v899_v48  ;;  %v16275_v48 = vld [vmem:[#allocation13_spill] sm:$0xff] }
 0x121   : > { %1272 = vrot.lane.b32.xlu0 %v11506_v30, %s11078_s21 }
 0x122   : > { %v897_v25 = vpop.permute.xlu1 %896 }
 0x123   : > { %984 = vst.msk [vmem:[#allocation3 + $0x48] sm:$0xff] %vm974_vm2, %v897_v25  ;;  %v903_v46 = vpop.permute.xlu0 %902 }
 0x124   : > { %1270 = vrot.lane.b32.xlu1 %v11510_v31, %s11078_s21  ;;  %987 = vst.msk [vmem:[#allocation3 + $0x60] sm:$0xff] %vm974_vm2, %v903_v46  ;;  %v16276_v46 = vld [vmem:[#allocation14_spill] sm:$0xff] }
 0x125   : > { %1276 = vrot.lane.b32.xlu0 %v11514_v32, %s11078_s21 }
 0x126   : > { %v901_v26 = vpop.permute.xlu1 %900 }
 0x127   : > { %986 = vst.msk [vmem:[#allocation3 + $0x58] sm:$0xff] %vm974_vm2, %v901_v26  ;;  %v907_v27 = vpop.permute.xlu0 %906 }
 0x128   : > { %1274 = vrot.lane.b32.xlu1 %v11527_v39, %s11078_s21  ;;  %989 = vst.msk [vmem:[#allocation3 + $0x70] sm:$0xff] %vm974_vm2, %v907_v27  ;;  %v12077_v27 = vld [vmem:[#allocation2 + $0x2f0] sm:$0xff] }
 0x129   : > { %1280 = vrot.lane.b32.xlu0 %v11534_v40, %s11078_s21 }
 0x12a   : > { %v905_v30 = vpop.permute.xlu1 %904 }
 0x12b   : > { %988 = vst.msk [vmem:[#allocation3 + $0x68] sm:$0xff] %vm974_vm2, %v905_v30  ;;  %v911_v31 = vpop.permute.xlu0 %910 }
 0x12c   : > { %1278 = vrot.lane.b32.xlu1 %v11538_v41, %s11078_s21  ;;  %991 = vst.msk [vmem:[#allocation3 + $0x80] sm:$0xff] %vm974_vm2, %v911_v31  ;;  %v16277_v31 = vld [vmem:[#allocation15_spill] sm:$0xff] }
 0x12d   : > { %1284 = vrot.lane.b32.xlu0 %v11542_v42, %s11078_s21 }
 0x12e   : > { %v909_v32 = vpop.permute.xlu1 %908 }
 0x12f   : > { %990 = vst.msk [vmem:[#allocation3 + $0x78] sm:$0xff] %vm974_vm2, %v909_v32  ;;  %v915_v39 = vpop.permute.xlu0 %914 }
 0x130   : > { %1282 = vrot.lane.b32.xlu1 %v11546_v43, %s11078_s21  ;;  %993 = vst.msk [vmem:[#allocation3 + $0x90] sm:$0xff] %vm974_vm2, %v915_v39 }
 0x131   : > { %1288 = vrot.lane.b32.xlu0 %v11550_v44, %s11078_s21 }
 0x132   : > { %v913_v40 = vpop.permute.xlu1 %912 }
 0x133   : > { %992 = vst.msk [vmem:[#allocation3 + $0x88] sm:$0xff] %vm974_vm2, %v913_v40  ;;  %v919_v41 = vpop.permute.xlu0 %918  ;;  %v16278_v40 = vld [vmem:[#allocation16_spill] sm:$0xff] }
 0x134   : > { %1286 = vrot.lane.b32.xlu1 %v11556_v47, %s11078_s21  ;;  %995 = vst.msk [vmem:[#allocation3 + $0xa0] sm:$0xff] %vm974_vm2, %v919_v41  ;;  %v16279_v41 = vld [vmem:[#allocation17_spill] sm:$0xff] }
 0x135   : > { %1292 = vrot.lane.b32.xlu0 %v11566_v50, %s11078_s21 }
 0x136   : > { %v917_v42 = vpop.permute.xlu1 %916 }
 0x137   : > { %994 = vst.msk [vmem:[#allocation3 + $0x98] sm:$0xff] %vm974_vm2, %v917_v42  ;;  %v923_v43 = vpop.permute.xlu0 %922 }
 0x138   : > { %1290 = vrot.lane.b32.xlu1 %v11576_v53, %s11078_s21  ;;  %997 = vst.msk [vmem:[#allocation3 + $0xb0] sm:$0xff] %vm974_vm2, %v923_v43 }
 0x139   : > { %1296 = vrot.lane.b32.xlu0 %v11586_v56, %s11078_s21 }
 0x13a   : > { %v921_v44 = vpop.permute.xlu1 %920 }
 0x13b   : > { %996 = vst.msk [vmem:[#allocation3 + $0xa8] sm:$0xff] %vm974_vm2, %v921_v44  ;;  %v927_v47 = vpop.permute.xlu0 %926  ;;  %v16280_v44 = vld [vmem:[#allocation18_spill] sm:$0xff] }
 0x13c   : > { %1294 = vrot.lane.b32.xlu1 %v11612_v63, %s11078_s21  ;;  %999 = vst.msk [vmem:[#allocation3 + $0xc0] sm:$0xff] %vm974_vm2, %v927_v47  ;;  %v16281_v47 = vld [vmem:[#allocation19_spill] sm:$0xff] }
 0x13d   : > { %1300 = vrot.lane.b32.xlu0 %v11662_v11, %s11078_s21 }
 0x13e   : > { %v925_v50 = vpop.permute.xlu1 %924 }
 0x13f   : > { %998 = vst.msk [vmem:[#allocation3 + $0xb8] sm:$0xff] %vm974_vm2, %v925_v50  ;;  %v931_v53 = vpop.permute.xlu0 %930 }
 0x140   : > { %1298 = vrot.lane.b32.xlu1 %v11672_v14, %s11078_s21  ;;  %1001 = vst.msk [vmem:[#allocation3 + $0xd0] sm:$0xff] %vm974_vm2, %v931_v53 }
 0x141   : > { %1304 = vrot.lane.b32.xlu0 %v11680_v15, %s11078_s21 }
 0x142   : > { %v929_v56 = vpop.permute.xlu1 %928 }
 0x143   : > { %1000 = vst.msk [vmem:[#allocation3 + $0xc8] sm:$0xff] %vm974_vm2, %v929_v56  ;;  %v935_v63 = vpop.permute.xlu0 %934  ;;  %v16282_v56 = vld [vmem:[#allocation20_spill] sm:$0xff] }
 0x144   : > { %1302 = vrot.lane.b32.xlu1 %v11688_v18, %s11078_s21  ;;  %1003 = vst.msk [vmem:[#allocation3 + $0xe0] sm:$0xff] %vm974_vm2, %v935_v63  ;;  %v16283_v63 = vld [vmem:[#allocation21_spill] sm:$0xff] }
 0x145   : > { %1308 = vrot.lane.b32.xlu0 %v11696_v19, %s11078_s21 }
 0x146   : > { %v933_v11 = vpop.permute.xlu1 %932 }
 0x147   : > { %1002 = vst.msk [vmem:[#allocation3 + $0xd8] sm:$0xff] %vm974_vm2, %v933_v11  ;;  %v939_v14 = vpop.permute.xlu0 %938 }
 0x148   : > { %1306 = vrot.lane.b32.xlu1 %v11704_v22, %s11078_s21  ;;  %1005 = vst.msk [vmem:[#allocation3 + $0xf0] sm:$0xff] %vm974_vm2, %v939_v14  ;;  %v16273_v22 = vld [vmem:[#allocation11_spill] sm:$0xff] }
 0x149   : > { %1312 = vrot.lane.b32.xlu0 %v11712_v23, %s11078_s21 }
 0x14a   : > { %v937_v15 = vpop.permute.xlu1 %936 }
 0x14b   : > { %1004 = vst.msk [vmem:[#allocation3 + $0xe8] sm:$0xff] %vm974_vm2, %v937_v15  ;;  %v1072_v18 = vpop.permute.xlu0 %1071  ;;  %v16284_v15 = vld [vmem:[#allocation22_spill] sm:$0xff] }
 0x14c   : > { %1310 = vrot.lane.b32.xlu1 %v11720_v29, %s11078_s21  ;;  %1168 = vst.msk [vmem:[#allocation3] sm:$0xff] %vm1167_vm3, %v1072_v18  ;;  %v12067_v29 = vld [vmem:[#allocation2 + $0x2e8] sm:$0xff] }
 0x14d   : > { %1316 = vrot.lane.b32.xlu0 %v11728_v33, %s11078_s21  ;;  %v16285_v18 = vld [vmem:[#allocation23_spill] sm:$0xff] }
 0x14e   : > { %v941_v19 = vpop.permute.xlu1 %940 }
 0x14f   : > { %1006 = vst.msk [vmem:[#allocation3 + $0xf8] sm:$0xff] %vm974_vm2, %v941_v19  ;;  %v1076_v35 = vpop.permute.xlu0 %1075 }
 0x150   : > { %1314 = vrot.lane.b32.xlu1 %v16273_v22, %s11078_s21  ;;  %1170 = vst.msk [vmem:[#allocation3 + $0x10] sm:$0xff] %vm1167_vm3, %v1076_v35  ;;  %v16286_v35 = vld [vmem:[#allocation24_spill] sm:$0xff] }
 0x151   : > { %1320 = vrot.lane.b32.xlu0 %v16274_v49, %s11078_s21 }
 0x152   : > { %v1074_v23 = vpop.permute.xlu1 %1073 }
 0x153   : > { %1169 = vst.msk [vmem:[#allocation3 + $0x8] sm:$0xff] %vm1167_vm3, %v1074_v23  ;;  %v1080_v33 = vpop.permute.xlu0 %1079  ;;  %v16287_v23 = vld [vmem:[#allocation25_spill] sm:$0xff] }
 0x154   : > { %1318 = vrot.lane.b32.xlu1 %v16275_v48, %s11078_s21  ;;  %1172 = vst.msk [vmem:[#allocation3 + $0x20] sm:$0xff] %vm1167_vm3, %v1080_v33  ;;  %v16288_v33 = vld [vmem:[#allocation26_spill] sm:$0xff] }
 0x155   : > { %1324 = vrot.lane.b32.xlu0 %v12067_v29, %s11078_s21 }
 0x156   : > { %v1078_v25 = vpop.permute.xlu1 %1077 }
 0x157   : > { %1171 = vst.msk [vmem:[#allocation3 + $0x18] sm:$0xff] %vm1167_vm3, %v1078_v25  ;;  %v1084_v26 = vpop.permute.xlu0 %1083  ;;  %v16289_v25 = vld [vmem:[#allocation27_spill] sm:$0xff] }
 0x158   : > { %1322 = vrot.lane.b32.xlu1 %v16276_v46, %s11078_s21  ;;  %1174 = vst.msk [vmem:[#allocation3 + $0x30] sm:$0xff] %vm1167_vm3, %v1084_v26 }
 0x159   : > { %1457 = vrot.lane.b32.xlu0 %v16277_v31, %s11079_s22  ;;  %v16291_v31 = vld [vmem:[#allocation29_spill] sm:$0xff] }
 0x15a   : > { %v1082_v30 = vpop.permute.xlu1 %1081 }
 0x15b   : > { %1173 = vst.msk [vmem:[#allocation3 + $0x28] sm:$0xff] %vm1167_vm3, %v1082_v30  ;;  %v1088_v32 = vpop.permute.xlu0 %1087  ;;  %v16290_v30 = vld [vmem:[#allocation28_spill] sm:$0xff] }
 0x15c   : > { %1326 = vrot.lane.b32.xlu1 %v12077_v27, %s11078_s21  ;;  %1176 = vst.msk [vmem:[#allocation3 + $0x40] sm:$0xff] %vm1167_vm3, %v1088_v32 }
 0x15d   : > { %1461 = vrot.lane.b32.xlu0 %v16278_v40, %s11079_s22  ;;  %v16292_v40 = vld [vmem:[#allocation30_spill] sm:$0xff] }
 0x15e   : > { %v1086_v39 = vpop.permute.xlu1 %1085 }
 0x15f   : > { %1175 = vst.msk [vmem:[#allocation3 + $0x38] sm:$0xff] %vm1167_vm3, %v1086_v39  ;;  %v1092_v42 = vpop.permute.xlu0 %1091 }
 0x160   : > { %1459 = vrot.lane.b32.xlu1 %v16279_v41, %s11079_s22  ;;  %1178 = vst.msk [vmem:[#allocation3 + $0x50] sm:$0xff] %vm1167_vm3, %v1092_v42  ;;  %v16293_v41 = vld [vmem:[#allocation31_spill] sm:$0xff] }
 0x161   : > { %1465 = vrot.lane.b32.xlu0 %v16280_v44, %s11079_s22  ;;  %v16294_v44 = vld [vmem:[#allocation32_spill] sm:$0xff] }
 0x162   : > { %v1090_v43 = vpop.permute.xlu1 %1089 }
 0x163   : > { %1177 = vst.msk [vmem:[#allocation3 + $0x48] sm:$0xff] %vm1167_vm3, %v1090_v43  ;;  %v1096_v50 = vpop.permute.xlu0 %1095 }
 0x164   : > { %1463 = vrot.lane.b32.xlu1 %v16281_v47, %s11079_s22  ;;  %1180 = vst.msk [vmem:[#allocation3 + $0x60] sm:$0xff] %vm1167_vm3, %v1096_v50  ;;  %v16295_v47 = vld [vmem:[#allocation33_spill] sm:$0xff] }
 0x165   : > { %1469 = vrot.lane.b32.xlu0 %v16282_v56, %s11079_s22  ;;  %v16296_v56 = vld [vmem:[#allocation34_spill] sm:$0xff] }
 0x166   : > { %v1094_v53 = vpop.permute.xlu1 %1093 }
 0x167   : > { %1179 = vst.msk [vmem:[#allocation3 + $0x58] sm:$0xff] %vm1167_vm3, %v1094_v53  ;;  %v1100_v11 = vpop.permute.xlu0 %1099 }
 0x168   : > { %1467 = vrot.lane.b32.xlu1 %v16283_v63, %s11079_s22  ;;  %1182 = vst.msk [vmem:[#allocation3 + $0x70] sm:$0xff] %vm1167_vm3, %v1100_v11  ;;  %v16297_v63 = vld [vmem:[#allocation35_spill] sm:$0xff] }
 0x169   : > { %1473 = vrot.lane.b32.xlu0 %v16284_v15, %s11079_s22  ;;  %v16298_v15 = vld [vmem:[#allocation36_spill] sm:$0xff] }
 0x16a   : > { %v1098_v14 = vpop.permute.xlu1 %1097 }
 0x16b   : > { %1181 = vst.msk [vmem:[#allocation3 + $0x68] sm:$0xff] %vm1167_vm3, %v1098_v14  ;;  %v1104_v19 = vpop.permute.xlu0 %1103 }
 0x16c   : > { %1471 = vrot.lane.b32.xlu1 %v16285_v18, %s11079_s22  ;;  %1184 = vst.msk [vmem:[#allocation3 + $0x80] sm:$0xff] %vm1167_vm3, %v1104_v19  ;;  %v16299_v18 = vld [vmem:[#allocation37_spill] sm:$0xff] }
 0x16d   : > { %1477 = vrot.lane.b32.xlu0 %v16286_v35, %s11079_s22  ;;  %v16300_v35 = vld [vmem:[#allocation38_spill] sm:$0xff] }
 0x16e   : > { %v1102_v22 = vpop.permute.xlu1 %1101 }
 0x16f   : > { %1183 = vst.msk [vmem:[#allocation3 + $0x78] sm:$0xff] %vm1167_vm3, %v1102_v22  ;;  %v1108_v49 = vpop.permute.xlu0 %1107 }
 0x170   : > { %1475 = vrot.lane.b32.xlu1 %v16287_v23, %s11079_s22  ;;  %1186 = vst.msk [vmem:[#allocation3 + $0x90] sm:$0xff] %vm1167_vm3, %v1108_v49  ;;  %v16301_v23 = vld [vmem:[#allocation39_spill] sm:$0xff] }
 0x171   : > { %1481 = vrot.lane.b32.xlu0 %v16288_v33, %s11079_s22  ;;  %v16302_v33 = vld [vmem:[#allocation40_spill] sm:$0xff] }
 0x172   : > { %v1106_v48 = vpop.permute.xlu1 %1105 }
 0x173   : > { %1185 = vst.msk [vmem:[#allocation3 + $0x88] sm:$0xff] %vm1167_vm3, %v1106_v48  ;;  %v1112_v46 = vpop.permute.xlu0 %1111 }
 0x174   : > { %1479 = vrot.lane.b32.xlu1 %v16289_v25, %s11079_s22  ;;  %1188 = vst.msk [vmem:[#allocation3 + $0xa0] sm:$0xff] %vm1167_vm3, %v1112_v46 }
 0x175   : > { %1485 = vrot.lane.b32.xlu0 %v16290_v30, %s11079_s22 }
 0x176   : > { %v1110_v26 = vpop.permute.xlu1 %1109 }
 0x177   : > { %1187 = vst.msk [vmem:[#allocation3 + $0x98] sm:$0xff] %vm1167_vm3, %v1110_v26  ;;  %v1116_v32 = vpop.permute.xlu0 %1115  ;;  %v12167_v26 = vld [vmem:[#allocation2 + $0x2e9] sm:$0xff] }
 0x178   : > { %1483 = vrot.lane.b32.xlu1 %v16291_v31, %s11079_s22  ;;  %1190 = vst.msk [vmem:[#allocation3 + $0xb0] sm:$0xff] %vm1167_vm3, %v1116_v32  ;;  %v12177_v31 = vld [vmem:[#allocation2 + $0x2f1] sm:$0xff] }
 0x179   : > { %1489 = vrot.lane.b32.xlu0 %v16292_v40, %s11079_s22 }
 0x17a   : > { %v1114_v39 = vpop.permute.xlu1 %1113 }
 0x17b   : > { %1189 = vst.msk [vmem:[#allocation3 + $0xa8] sm:$0xff] %vm1167_vm3, %v1114_v39  ;;  %v1120_v42 = vpop.permute.xlu0 %1119 }
 0x17c   : > { %1487 = vrot.lane.b32.xlu1 %v16293_v41, %s11079_s22  ;;  %1192 = vst.msk [vmem:[#allocation3 + $0xc0] sm:$0xff] %vm1167_vm3, %v1120_v42 }
 0x17d   : > { %1493 = vrot.lane.b32.xlu0 %v16294_v44, %s11079_s22 }
 0x17e   : > { %v1118_v43 = vpop.permute.xlu1 %1117 }
 0x17f   : > { %1191 = vst.msk [vmem:[#allocation3 + $0xb8] sm:$0xff] %vm1167_vm3, %v1118_v43  ;;  %v1124_v50 = vpop.permute.xlu0 %1123 }
 0x180   : > { %1491 = vrot.lane.b32.xlu1 %v16295_v47, %s11079_s22  ;;  %1194 = vst.msk [vmem:[#allocation3 + $0xd0] sm:$0xff] %vm1167_vm3, %v1124_v50  ;;  %v1781_v47 = vld [vmem:[#allocation2 + $0x130] sm:$0xff] }
 0x181   : > { %1497 = vrot.lane.b32.xlu0 %v16296_v56, %s11079_s22  ;;  %v1783_v56 = vld [vmem:[#allocation2 + $0x150] sm:$0xff] }
 0x182   : > { %v1122_v53 = vpop.permute.xlu1 %1121 }
 0x183   : > { %1193 = vst.msk [vmem:[#allocation3 + $0xc8] sm:$0xff] %vm1167_vm3, %v1122_v53  ;;  %v1128_v11 = vpop.permute.xlu0 %1127 }
 0x184   : > { %1495 = vrot.lane.b32.xlu1 %v16297_v63, %s11079_s22  ;;  %1196 = vst.msk [vmem:[#allocation3 + $0xe0] sm:$0xff] %vm1167_vm3, %v1128_v11  ;;  %v1786_v11 = vld [vmem:[#allocation2 + $0x188] sm:$0xff] }
 0x185   : > { %1501 = vrot.lane.b32.xlu0 %v16298_v15, %s11079_s22  ;;  %v1785_v15 = vld [vmem:[#allocation2 + $0x170] sm:$0xff] }
 0x186   : > { %v1126_v14 = vpop.permute.xlu1 %1125 }
 0x187   : > { %1195 = vst.msk [vmem:[#allocation3 + $0xd8] sm:$0xff] %vm1167_vm3, %v1126_v14  ;;  %v1132_v19 = vpop.permute.xlu0 %1131 }
 0x188   : > { %1499 = vrot.lane.b32.xlu1 %v16299_v18, %s11079_s22  ;;  %1198 = vst.msk [vmem:[#allocation3 + $0xf0] sm:$0xff] %vm1167_vm3, %v1132_v19  ;;  %v1788_v19 = vld [vmem:[#allocation2 + $0x1a8] sm:$0xff] }
 0x189   : > { %1505 = vrot.lane.b32.xlu0 %v16300_v35, %s11079_s22  ;;  %v1787_v35 = vld [vmem:[#allocation2 + $0x190] sm:$0xff] }
 0x18a   : > { %v1130_v22 = vpop.permute.xlu1 %1129 }
 0x18b   : > { %1197 = vst.msk [vmem:[#allocation3 + $0xe8] sm:$0xff] %vm1167_vm3, %v1130_v22  ;;  %v1265_v49 = vpop.permute.xlu0 %1264 }
 0x18c   : > { %1503 = vrot.lane.b32.xlu1 %v16301_v23, %s11079_s22  ;;  %1361 = vst.msk [vmem:[#allocation3] sm:$0xff] %vm1360_vm4, %v1265_v49  ;;  %v1790_v49 = vld [vmem:[#allocation2 + $0x1c8] sm:$0xff] }
 0x18d   : > { %1509 = vrot.lane.b32.xlu0 %v11855_v36, %s11079_s22 }
 0x18e   : > { %v1134_v48 = vpop.permute.xlu1 %1133 }
 0x18f   : > { %1199 = vst.msk [vmem:[#allocation3 + $0xf8] sm:$0xff] %vm1167_vm3, %v1134_v48  ;;  %v1269_v25 = vpop.permute.xlu0 %1268 }
 0x190   : > { %1507 = vrot.lane.b32.xlu1 %v16302_v33, %s11079_s22  ;;  %1363 = vst.msk [vmem:[#allocation3 + $0x10] sm:$0xff] %vm1360_vm4, %v1269_v25  ;;  %v1789_v33 = vld [vmem:[#allocation2 + $0x1b0] sm:$0xff] }
 0x191   : > { %1513 = vrot.lane.b32.xlu0 %v11865_v37, %s11079_s22 }
 0x192   : > { %v1267_v46 = vpop.permute.xlu1 %1266 }
 0x193   : > { %1362 = vst.msk [vmem:[#allocation3 + $0x8] sm:$0xff] %vm1360_vm4, %v1267_v46  ;;  %v1273_v36 = vpop.permute.xlu0 %1272  ;;  %v1792_v46 = vld [vmem:[#allocation2 + $0x1e8] sm:$0xff] }
 0x194   : > { %1511 = vrot.lane.b32.xlu1 %v11869_v45, %s11079_s22  ;;  %1365 = vst.msk [vmem:[#allocation3 + $0x20] sm:$0xff] %vm1360_vm4, %v1273_v36 }
 0x195   : > { %1517 = vrot.lane.b32.xlu0 %v12167_v26, %s11079_s22 }
 0x196   : > { %v1271_v30 = vpop.permute.xlu1 %1270 }
 0x197   : > { %1364 = vst.msk [vmem:[#allocation3 + $0x18] sm:$0xff] %vm1360_vm4, %v1271_v30  ;;  %v1277_v37 = vpop.permute.xlu0 %1276  ;;  %v1791_v30 = vld [vmem:[#allocation2 + $0x1d0] sm:$0xff] }
 0x198   : > { %1515 = vrot.lane.b32.xlu1 %v11877_v38, %s11079_s22  ;;  %1367 = vst.msk [vmem:[#allocation3 + $0x30] sm:$0xff] %vm1360_vm4, %v1277_v37 }
 0x199   : > { %1651 = vrot.lane.b32.xlu0 %v11570_v51, %s11080_s23 }
 0x19a   : > { %v1275_v32 = vpop.permute.xlu1 %1274 }
 0x19b   : > { %1366 = vst.msk [vmem:[#allocation3 + $0x28] sm:$0xff] %vm1360_vm4, %v1275_v32  ;;  %v1281_v45 = vpop.permute.xlu0 %1280  ;;  %v1794_v32 = vld [vmem:[#allocation2 + $0x208] sm:$0xff] }
 0x19c   : > { %1519 = vrot.lane.b32.xlu1 %v12177_v31, %s11079_s22  ;;  %1369 = vst.msk [vmem:[#allocation3 + $0x40] sm:$0xff] %vm1360_vm4, %v1281_v45 }
 0x19d   : > { %1655 = vrot.lane.b32.xlu0 %v11582_v54, %s11080_s23 }
 0x19e   : > { %v1279_v39 = vpop.permute.xlu1 %1278 }
 0x19f   : > { %1368 = vst.msk [vmem:[#allocation3 + $0x38] sm:$0xff] %vm1360_vm4, %v1279_v39  ;;  %v1285_v38 = vpop.permute.xlu0 %1284  ;;  %v1793_v39 = vld [vmem:[#allocation2 + $0x1f0] sm:$0xff] }
 0x1a0   : > { %1653 = vrot.lane.b32.xlu1 %v11572_v52, %s11080_s23  ;;  %1371 = vst.msk [vmem:[#allocation3 + $0x50] sm:$0xff] %vm1360_vm4, %v1285_v38 }
 0x1a1   : > { %1659 = vrot.lane.b32.xlu0 %v11592_v57, %s11080_s23 }
 0x1a2   : > { %v1283_v51 = vpop.permute.xlu1 %1282 }
 0x1a3   : > { %1370 = vst.msk [vmem:[#allocation3 + $0x48] sm:$0xff] %vm1360_vm4, %v1283_v51  ;;  %v1289_v40 = vpop.permute.xlu0 %1288  ;;  %v1796_v51 = vld [vmem:[#allocation2 + $0x228] sm:$0xff] }
 0x1a4   : > { %1657 = vrot.lane.b32.xlu1 %v11584_v55, %s11080_s23  ;;  %1373 = vst.msk [vmem:[#allocation3 + $0x60] sm:$0xff] %vm1360_vm4, %v1289_v40 }
 0x1a5   : > { %1663 = vrot.lane.b32.xlu0 %v11596_v59, %s11080_s23 }
 0x1a6   : > { %v1287_v54 = vpop.permute.xlu1 %1286 }
 0x1a7   : > { %1372 = vst.msk [vmem:[#allocation3 + $0x58] sm:$0xff] %vm1360_vm4, %v1287_v54  ;;  %v1293_v52 = vpop.permute.xlu0 %1292  ;;  %v1795_v54 = vld [vmem:[#allocation2 + $0x210] sm:$0xff] }
 0x1a8   : > { %1661 = vrot.lane.b32.xlu1 %v11594_v58, %s11080_s23  ;;  %1375 = vst.msk [vmem:[#allocation3 + $0x70] sm:$0xff] %vm1360_vm4, %v1293_v52 }
 0x1a9   : > { %1667 = vrot.lane.b32.xlu0 %v11608_v61, %s11080_s23 }
 0x1aa   : > { %v1291_v57 = vpop.permute.xlu1 %1290 }
 0x1ab   : > { %1374 = vst.msk [vmem:[#allocation3 + $0x68] sm:$0xff] %vm1360_vm4, %v1291_v57  ;;  %v1297_v55 = vpop.permute.xlu0 %1296  ;;  %v1798_v57 = vld [vmem:[#allocation2 + $0x248] sm:$0xff] }
 0x1ac   : > { %1665 = vrot.lane.b32.xlu1 %v11606_v60, %s11080_s23  ;;  %1377 = vst.msk [vmem:[#allocation3 + $0x80] sm:$0xff] %vm1360_vm4, %v1297_v55 }
 0x1ad   : > { %1671 = vrot.lane.b32.xlu0 %v11620_v1, %s11080_s23 }
 0x1ae   : > { %v1295_v59 = vpop.permute.xlu1 %1294 }
 0x1af   : > { %1376 = vst.msk [vmem:[#allocation3 + $0x78] sm:$0xff] %vm1360_vm4, %v1295_v59  ;;  %v1301_v58 = vpop.permute.xlu0 %1300  ;;  %v1797_v59 = vld [vmem:[#allocation2 + $0x230] sm:$0xff] }
 0x1b0   : > { %1669 = vrot.lane.b32.xlu1 %v11610_v62, %s11080_s23  ;;  %1379 = vst.msk [vmem:[#allocation3 + $0x90] sm:$0xff] %vm1360_vm4, %v1301_v58 }
 0x1b1   : > { %1675 = vrot.lane.b32.xlu0 %v11624_v3, %s11080_s23 }
 0x1b2   : > { %v1299_v61 = vpop.permute.xlu1 %1298 }
 0x1b3   : > { %1378 = vst.msk [vmem:[#allocation3 + $0x88] sm:$0xff] %vm1360_vm4, %v1299_v61  ;;  %v1305_v60 = vpop.permute.xlu0 %1304  ;;  %v1800_v61 = vld [vmem:[#allocation2 + $0x268] sm:$0xff] }
 0x1b4   : > { %1673 = vrot.lane.b32.xlu1 %v11622_v2, %s11080_s23  ;;  %1381 = vst.msk [vmem:[#allocation3 + $0xa0] sm:$0xff] %vm1360_vm4, %v1305_v60 }
 0x1b5   : > { %1679 = vrot.lane.b32.xlu0 %v11636_v5, %s11080_s23 }
 0x1b6   : > { %v1303_v1 = vpop.permute.xlu1 %1302 }
 0x1b7   : > { %1380 = vst.msk [vmem:[#allocation3 + $0x98] sm:$0xff] %vm1360_vm4, %v1303_v1  ;;  %v1309_v62 = vpop.permute.xlu0 %1308  ;;  %v1799_v1 = vld [vmem:[#allocation2 + $0x250] sm:$0xff] }
 0x1b8   : > { %1677 = vrot.lane.b32.xlu1 %v11634_v4, %s11080_s23  ;;  %1383 = vst.msk [vmem:[#allocation3 + $0xb0] sm:$0xff] %vm1360_vm4, %v1309_v62 }
 0x1b9   : > { %1683 = vrot.lane.b32.xlu0 %v11646_v7, %s11080_s23 }
 0x1ba   : > { %v1307_v3 = vpop.permute.xlu1 %1306 }
 0x1bb   : > { %1382 = vst.msk [vmem:[#allocation3 + $0xa8] sm:$0xff] %vm1360_vm4, %v1307_v3  ;;  %v1313_v2 = vpop.permute.xlu0 %1312  ;;  %v1802_v3 = vld [vmem:[#allocation2 + $0x288] sm:$0xff] }
 0x1bc   : > { %1681 = vrot.lane.b32.xlu1 %v11638_v6, %s11080_s23  ;;  %1385 = vst.msk [vmem:[#allocation3 + $0xc0] sm:$0xff] %vm1360_vm4, %v1313_v2 }
 0x1bd   : > { %1687 = vrot.lane.b32.xlu0 %v11650_v9, %s11080_s23 }
 0x1be   : > { %v1311_v5 = vpop.permute.xlu1 %1310 }
 0x1bf   : > { %1384 = vst.msk [vmem:[#allocation3 + $0xb8] sm:$0xff] %vm1360_vm4, %v1311_v5  ;;  %v1317_v4 = vpop.permute.xlu0 %1316  ;;  %v1801_v5 = vld [vmem:[#allocation2 + $0x270] sm:$0xff] }
 0x1c0   : > { %1685 = vrot.lane.b32.xlu1 %v11648_v8, %s11080_s23  ;;  %1387 = vst.msk [vmem:[#allocation3 + $0xd0] sm:$0xff] %vm1360_vm4, %v1317_v4 }
 0x1c1   : > { %1691 = vrot.lane.b32.xlu0 %v11668_v12, %s11080_s23 }
 0x1c2   : > { %v1315_v7 = vpop.permute.xlu1 %1314 }
 0x1c3   : > { %1386 = vst.msk [vmem:[#allocation3 + $0xc8] sm:$0xff] %vm1360_vm4, %v1315_v7  ;;  %v1321_v6 = vpop.permute.xlu0 %1320  ;;  %v1804_v7 = vld [vmem:[#allocation2 + $0x2a8] sm:$0xff] }
 0x1c4   : > { %1689 = vrot.lane.b32.xlu1 %v11660_v10, %s11080_s23  ;;  %1389 = vst.msk [vmem:[#allocation3 + $0xe0] sm:$0xff] %vm1360_vm4, %v1321_v6 }
 0x1c5   : > { %1695 = vrot.lane.b32.xlu0 %v11684_v16, %s11080_s23 }
 0x1c6   : > { %v1319_v9 = vpop.permute.xlu1 %1318 }
 0x1c7   : > { %1388 = vst.msk [vmem:[#allocation3 + $0xd8] sm:$0xff] %vm1360_vm4, %v1319_v9  ;;  %v1325_v8 = vpop.permute.xlu0 %1324  ;;  %v1803_v9 = vld [vmem:[#allocation2 + $0x290] sm:$0xff] }
 0x1c8   : > { %1693 = vrot.lane.b32.xlu1 %v11670_v13, %s11080_s23  ;;  %1391 = vst.msk [vmem:[#allocation3 + $0xf0] sm:$0xff] %vm1360_vm4, %v1325_v8 }
 0x1c9   : > { %1699 = vrot.lane.b32.xlu0 %v11700_v20, %s11080_s23 }
 0x1ca   : > { %v1323_v12 = vpop.permute.xlu1 %1322 }
 0x1cb   : > { %1390 = vst.msk [vmem:[#allocation3 + $0xe8] sm:$0xff] %vm1360_vm4, %v1323_v12  ;;  %v1458_v10 = vpop.permute.xlu0 %1457  ;;  %v1806_v12 = vld [vmem:[#allocation2 + $0x2c8] sm:$0xff] }
 0x1cc   : > { %1697 = vrot.lane.b32.xlu1 %v11686_v17, %s11080_s23  ;;  %1554 = vst.msk [vmem:[#allocation3] sm:$0xff] %vm1553_vm5, %v1458_v10  ;;  %v1617_v17 = vld [vmem:[#allocation2 + $0x307] sm:$0xff] }
 0x1cd   : > { %1703 = vrot.lane.b32.xlu0 %v11716_v24, %s11080_s23 }
 0x1ce   : > { %v1327_v16 = vpop.permute.xlu1 %1326 }
 0x1cf   : > { %1392 = vst.msk [vmem:[#allocation3 + $0xf8] sm:$0xff] %vm1360_vm4, %v1327_v16  ;;  %v1462_v13 = vpop.permute.xlu0 %1461  ;;  %v1805_v16 = vld [vmem:[#allocation2 + $0x2b0] sm:$0xff] }
 0x1d0   : > { %1701 = vrot.lane.b32.xlu1 %v11702_v21, %s11080_s23  ;;  %1556 = vst.msk [vmem:[#allocation3 + $0x10] sm:$0xff] %vm1553_vm5, %v1462_v13  ;;  %v1780_v21 = vld [vmem:[#allocation2 + $0x128] sm:$0xff] }
 0x1d1   : > { %1707 = vrot.lane.b32.xlu0 %v11967_v0, %s11080_s23  ;;  %v1618_v0 = vld [vmem:[#allocation2 + $0x30f] sm:$0xff] }
 0x1d2   : > { %v1460_v20 = vpop.permute.xlu1 %1459 }
 0x1d3   : > { %1555 = vst.msk [vmem:[#allocation3 + $0x8] sm:$0xff] %vm1553_vm5, %v1460_v20  ;;  %v1466_v41 = vpop.permute.xlu0 %1465  ;;  %v2198_v20 = vld [vmem:[%s16177_s1] sm:$0xff] }
 0x1d4   : > { %1705 = vrot.lane.b32.xlu1 %v11718_v28, %s11080_s23  ;;  %1558 = vst.msk [vmem:[#allocation3 + $0x20] sm:$0xff] %vm1553_vm5, %v1466_v41  ;;  %v1782_v28 = vld [vmem:[#allocation2 + $0x148] sm:$0xff] }
 0x1d5   : > { %1711 = vrot.lane.b32.xlu0 %v1617_v17, %s11080_s23  ;;  %v2199_v17 = vld [vmem:[%s16177_s1 + $0x8] sm:$0xff] }
 0x1d6   : > { %v1464_v24 = vpop.permute.xlu1 %1463  ;;  %v10864_v41 = vpack.c.bf16 %v2199_v17, %v2198_v20  ;;  %v1996_v17 = vld [vmem:[#allocation2 + $0x291] sm:$0xff] }
 0x1d7   : > { %1557 = vst.msk [vmem:[#allocation3 + $0x18] sm:$0xff] %vm1553_vm5, %v1464_v24  ;;  %v1470_v42 = vpop.permute.xlu0 %1469 }
 0x1d8   : > { %1709 = vrot.lane.b32.xlu1 %v11977_v34, %s11080_s23  ;;  %1560 = vst.msk [vmem:[#allocation3 + $0x30] sm:$0xff] %vm1553_vm5, %v1470_v42  ;;  %v1784_v34 = vld [vmem:[#allocation2 + $0x168] sm:$0xff]  ;;  %10865 = vmatprep.subr.bf16.mxu0 %v10864_v41 }
 0x1d9   : > { %1844 = vrot.lane.b32.xlu0 %v1780_v21, %s11081_s29  ;;  %v1807_v21 = vld [vmem:[#allocation2 + $0x2d0] sm:$0xff]  ;;  %10907 = vmatprep.subr.bf16.mxu1 %v10864_v41 }
 0x1da   : > { %v1468_v43 = vpop.permute.xlu1 %1467  ;;  %10867 = vmatpush3.bf16.msra.mxu0 %v10864_v41  ;;  %10910 = vmatpush3.bf16.msra.mxu1 %v10864_v41 }
 0x1db   : > { %1559 = vst.msk [vmem:[#allocation3 + $0x28] sm:$0xff] %vm1553_vm5, %v1468_v43  ;;  %v1474_v44 = vpop.permute.xlu0 %1473  ;;  %v2201_v43 = vld [vmem:[%s16177_s1 + $0x18] sm:$0xff] }
 0x1dc   : > { %1713 = vrot.lane.b32.xlu1 %v1618_v0, %s11080_s23  ;;  %1562 = vst.msk [vmem:[#allocation3 + $0x40] sm:$0xff] %vm1553_vm5, %v1474_v44  ;;  %v2200_v0 = vld [vmem:[%s16177_s1 + $0x10] sm:$0xff] }
 0x1dd   : > { %1848 = vrot.lane.b32.xlu0 %v1782_v28, %s11081_s29  ;;  %v1810_v28 = vld [vmem:[#allocation2 + $0x308] sm:$0xff]  ;;  %v10868_v44 = vpack.c.bf16 %v2201_v43, %v2200_v0 }
 0x1de   : > { %v1472_v50 = vpop.permute.xlu1 %1471 }
 0x1df   : > { %1561 = vst.msk [vmem:[#allocation3 + $0x38] sm:$0xff] %vm1553_vm5, %v1472_v50  ;;  %v1478_v53 = vpop.permute.xlu0 %1477  ;;  %10869 = vmatprep.subr.bf16.mxu0 %v10868_v44  ;;  %10908 = vmatprep.subr.bf16.mxu1 %v10868_v44  ;;  %v1973_v50 = vld [vmem:[#allocation2 + $0x129] sm:$0xff] }
 0x1e0   : > { %1846 = vrot.lane.b32.xlu1 %v1781_v47, %s11081_s29  ;;  %1564 = vst.msk [vmem:[#allocation3 + $0x50] sm:$0xff] %vm1553_vm5, %v1478_v53  ;;  %10871 = vmatpush3.bf16.msra.mxu0 %v10868_v44 }
 0x1e1   : > { %1852 = vrot.lane.b32.xlu0 %v1784_v34, %s11081_s29  ;;  %v2202_v34 = vld [vmem:[%s16177_s1 + $0x20] sm:$0xf]  ;;  %10911 = vmatpush3.bf16.msra.mxu1 %v10868_v44 }
 0x1e2   : > { %v1476_v63 = vpop.permute.xlu1 %1475  ;;  %10570 = vmatprep.subr.msk.mxu0 %vm2300_vm7, %v2202_v34  ;;  %10909 = vmatprep.subr.msk.mxu1 %vm2300_vm7, %v2202_v34 }
 0x1e3   : > { %1563 = vst.msk [vmem:[#allocation3 + $0x48] sm:$0xff] %vm1553_vm5, %v1476_v63  ;;  %v1482_v14 = vpop.permute.xlu0 %1481 }
 0x1e4   : > { %1850 = vrot.lane.b32.xlu1 %v1783_v56, %s11081_s29  ;;  %1566 = vst.msk [vmem:[#allocation3 + $0x60] sm:$0xff] %vm1553_vm5, %v1482_v14  ;;  %v1811_v56 = vld [vmem:[#allocation2 + $0x310] sm:$0xff]  ;;  %10571 = vmatpush3.msk.msra.mxu0 %vm2300_vm7, %v2202_v34 }
 0x1e5   : > { %1856 = vrot.lane.b32.xlu0 %v1786_v11, %s11081_s29  ;;  %v1975_v11 = vld [vmem:[#allocation2 + $0x149] sm:$0xff]  ;;  %10912 = vmatpush3.msk.msra.mxu1 %vm2300_vm7, %v2202_v34  ;;  %v1974_v14 = vld [vmem:[#allocation2 + $0x131] sm:$0xff] }
 0x1e6   : > { %v1480_v18 = vpop.permute.xlu1 %1479 }
 0x1e7   : > { %1565 = vst.msk [vmem:[#allocation3 + $0x58] sm:$0xff] %vm1553_vm5, %v1480_v18  ;;  %v1486_v22 = vpop.permute.xlu0 %1485  ;;  %v1977_v18 = vld [vmem:[#allocation2 + $0x169] sm:$0xff] }
 0x1e8   : > { %1854 = vrot.lane.b32.xlu1 %v1785_v15, %s11081_s29  ;;  %1568 = vst.msk [vmem:[#allocation3 + $0x70] sm:$0xff] %vm1553_vm5, %v1486_v22  ;;  %v1976_v22 = vld [vmem:[#allocation2 + $0x151] sm:$0xff] }
 0x1e9   : > { %1860 = vrot.lane.b32.xlu0 %v1788_v19, %s11081_s29 }
 0x1ea   : > { %v1484_v23 = vpop.permute.xlu1 %1483 }
 0x1eb   : > { %1567 = vst.msk [vmem:[#allocation3 + $0x68] sm:$0xff] %vm1553_vm5, %v1484_v23  ;;  %v1490_v48 = vpop.permute.xlu0 %1489  ;;  %v1979_v23 = vld [vmem:[#allocation2 + $0x189] sm:$0xff] }
 0x1ec   : > { %1858 = vrot.lane.b32.xlu1 %v1787_v35, %s11081_s29  ;;  %1570 = vst.msk [vmem:[#allocation3 + $0x80] sm:$0xff] %vm1553_vm5, %v1490_v48  ;;  %v1978_v48 = vld [vmem:[#allocation2 + $0x171] sm:$0xff] }
 0x1ed   : > { %1864 = vrot.lane.b32.xlu0 %v1790_v49, %s11081_s29 }
 0x1ee   : > { %v1488_v25 = vpop.permute.xlu1 %1487 }
 0x1ef   : > { %1569 = vst.msk [vmem:[#allocation3 + $0x78] sm:$0xff] %vm1553_vm5, %v1488_v25  ;;  %v1494_v36 = vpop.permute.xlu0 %1493  ;;  %v1981_v25 = vld [vmem:[#allocation2 + $0x1a9] sm:$0xff] }
 0x1f0   : > { %1862 = vrot.lane.b32.xlu1 %v1789_v33, %s11081_s29  ;;  %1572 = vst.msk [vmem:[#allocation3 + $0x90] sm:$0xff] %vm1553_vm5, %v1494_v36  ;;  %v1980_v36 = vld [vmem:[#allocation2 + $0x191] sm:$0xff] }
 0x1f1   : > { %1868 = vrot.lane.b32.xlu0 %v1792_v46, %s11081_s29 }
 0x1f2   : > { %v1492_v37 = vpop.permute.xlu1 %1491 }
 0x1f3   : > { %1571 = vst.msk [vmem:[#allocation3 + $0x88] sm:$0xff] %vm1553_vm5, %v1492_v37  ;;  %v1498_v45 = vpop.permute.xlu0 %1497  ;;  %v1983_v37 = vld [vmem:[#allocation2 + $0x1c9] sm:$0xff] }
 0x1f4   : > { %1866 = vrot.lane.b32.xlu1 %v1791_v30, %s11081_s29  ;;  %1574 = vst.msk [vmem:[#allocation3 + $0xa0] sm:$0xff] %vm1553_vm5, %v1498_v45  ;;  %v1982_v45 = vld [vmem:[#allocation2 + $0x1b1] sm:$0xff] }
 0x1f5   : > { %1872 = vrot.lane.b32.xlu0 %v1794_v32, %s11081_s29 }
 0x1f6   : > { %v1496_v38 = vpop.permute.xlu1 %1495 }
 0x1f7   : > { %1573 = vst.msk [vmem:[#allocation3 + $0x98] sm:$0xff] %vm1553_vm5, %v1496_v38  ;;  %v1502_v40 = vpop.permute.xlu0 %1501  ;;  %v1985_v38 = vld [vmem:[#allocation2 + $0x1e9] sm:$0xff] }
 0x1f8   : > { %1870 = vrot.lane.b32.xlu1 %v1793_v39, %s11081_s29  ;;  %1576 = vst.msk [vmem:[#allocation3 + $0xb0] sm:$0xff] %vm1553_vm5, %v1502_v40  ;;  %v1984_v40 = vld [vmem:[#allocation2 + $0x1d1] sm:$0xff] }
 0x1f9   : > { %1876 = vrot.lane.b32.xlu0 %v1796_v51, %s11081_s29 }
 0x1fa   : > { %v1500_v52 = vpop.permute.xlu1 %1499 }
 0x1fb   : > { %1575 = vst.msk [vmem:[#allocation3 + $0xa8] sm:$0xff] %vm1553_vm5, %v1500_v52  ;;  %v1506_v55 = vpop.permute.xlu0 %1505  ;;  %v1987_v52 = vld [vmem:[#allocation2 + $0x209] sm:$0xff] }
 0x1fc   : > { %1874 = vrot.lane.b32.xlu1 %v1795_v54, %s11081_s29  ;;  %1578 = vst.msk [vmem:[#allocation3 + $0xc0] sm:$0xff] %vm1553_vm5, %v1506_v55  ;;  %v1986_v55 = vld [vmem:[#allocation2 + $0x1f1] sm:$0xff] }
 0x1fd   : > { %1880 = vrot.lane.b32.xlu0 %v1798_v57, %s11081_s29 }
 0x1fe   : > { %v1504_v58 = vpop.permute.xlu1 %1503 }
 0x1ff   : > { %1577 = vst.msk [vmem:[#allocation3 + $0xb8] sm:$0xff] %vm1553_vm5, %v1504_v58  ;;  %v1510_v60 = vpop.permute.xlu0 %1509  ;;  %v1989_v58 = vld [vmem:[#allocation2 + $0x229] sm:$0xff] }
 0x200   : > { %1878 = vrot.lane.b32.xlu1 %v1797_v59, %s11081_s29  ;;  %1580 = vst.msk [vmem:[#allocation3 + $0xd0] sm:$0xff] %vm1553_vm5, %v1510_v60  ;;  %v1988_v60 = vld [vmem:[#allocation2 + $0x211] sm:$0xff] }
 0x201   : > { %1884 = vrot.lane.b32.xlu0 %v1800_v61, %s11081_s29 }
 0x202   : > { %v1508_v62 = vpop.permute.xlu1 %1507 }
 0x203   : > { %1579 = vst.msk [vmem:[#allocation3 + $0xc8] sm:$0xff] %vm1553_vm5, %v1508_v62  ;;  %v1514_v2 = vpop.permute.xlu0 %1513  ;;  %v1991_v62 = vld [vmem:[#allocation2 + $0x249] sm:$0xff] }
 0x204   : > { %1882 = vrot.lane.b32.xlu1 %v1799_v1, %s11081_s29  ;;  %1582 = vst.msk [vmem:[#allocation3 + $0xe0] sm:$0xff] %vm1553_vm5, %v1514_v2  ;;  %v1990_v2 = vld [vmem:[#allocation2 + $0x231] sm:$0xff] }
 0x205   : > { %1888 = vrot.lane.b32.xlu0 %v1802_v3, %s11081_s29 }
 0x206   : > { %v1512_v4 = vpop.permute.xlu1 %1511 }
 0x207   : > { %1581 = vst.msk [vmem:[#allocation3 + $0xd8] sm:$0xff] %vm1553_vm5, %v1512_v4  ;;  %v1518_v6 = vpop.permute.xlu0 %1517  ;;  %v1993_v4 = vld [vmem:[#allocation2 + $0x269] sm:$0xff] }
 0x208   : > { %1886 = vrot.lane.b32.xlu1 %v1801_v5, %s11081_s29  ;;  %1584 = vst.msk [vmem:[#allocation3 + $0xf0] sm:$0xff] %vm1553_vm5, %v1518_v6  ;;  %v1992_v6 = vld [vmem:[#allocation2 + $0x251] sm:$0xff] }
 0x209   : > { %1892 = vrot.lane.b32.xlu0 %v1804_v7, %s11081_s29 }
 0x20a   : > { %v1516_v8 = vpop.permute.xlu1 %1515 }
 0x20b   : > { %1583 = vst.msk [vmem:[#allocation3 + $0xe8] sm:$0xff] %vm1553_vm5, %v1516_v8  ;;  %v1652_v10 = vpop.permute.xlu0 %1651  ;;  %v1995_v8 = vld [vmem:[#allocation2 + $0x289] sm:$0xff] }
 0x20c   : > { %1890 = vrot.lane.b32.xlu1 %v1803_v9, %s11081_s29  ;;  %1748 = vst.msk [vmem:[#allocation3] sm:$0xff] %vm1747_vm6, %v1652_v10  ;;  %v1994_v10 = vld [vmem:[#allocation2 + $0x271] sm:$0xff] }
 0x20d   : > { %1896 = vrot.lane.b32.xlu0 %v1806_v12, %s11081_s29 }
 0x20e   : > { %v1520_v13 = vpop.permute.xlu1 %1519 }
 0x20f   : > { %1585 = vst.msk [vmem:[#allocation3 + $0xf8] sm:$0xff] %vm1553_vm5, %v1520_v13  ;;  %v1656_v24 = vpop.permute.xlu0 %1655  ;;  %v1997_v13 = vld [vmem:[#allocation2 + $0x2a9] sm:$0xff] }
 0x210   : > { %1894 = vrot.lane.b32.xlu1 %v1805_v16, %s11081_s29  ;;  %1750 = vst.msk [vmem:[#allocation3 + $0x10] sm:$0xff] %vm1747_vm6, %v1656_v24  ;;  %v1999_v24 = vld [vmem:[#allocation2 + $0x2c9] sm:$0xff] }
 0x211   : > { %1900 = vrot.lane.b32.xlu0 %v12067_v29, %s11081_s29 }
 0x212   : > { %v1654_v42 = vpop.permute.xlu1 %1653 }
 0x213   : > { %1749 = vst.msk [vmem:[#allocation3 + $0x8] sm:$0xff] %vm1747_vm6, %v1654_v42  ;;  %v1660_v47 = vpop.permute.xlu0 %1659  ;;  %v1998_v42 = vld [vmem:[#allocation2 + $0x2b1] sm:$0xff] }
 0x214   : > { %1898 = vrot.lane.b32.xlu1 %v1807_v21, %s11081_s29  ;;  %1752 = vst.msk [vmem:[#allocation3 + $0x20] sm:$0xff] %vm1747_vm6, %v1660_v47  ;;  %v2003_v47 = vld [vmem:[#allocation2 + $0x309] sm:$0xff] }
 0x215   : > { %1904 = vrot.lane.b32.xlu0 %v1810_v28, %s11081_s29  ;;  %v2000_v28 = vld [vmem:[#allocation2 + $0x2d1] sm:$0xff] }
 0x216   : > { %v1658_v29 = vpop.permute.xlu1 %1657 }
 0x217   : > { %1751 = vst.msk [vmem:[#allocation3 + $0x18] sm:$0xff] %vm1747_vm6, %v1658_v29  ;;  %v1664_v53 = vpop.permute.xlu0 %1663 }
 0x218   : > { %1902 = vrot.lane.b32.xlu1 %v12077_v27, %s11081_s29  ;;  %1754 = vst.msk [vmem:[#allocation3 + $0x30] sm:$0xff] %vm1747_vm6, %v1664_v53  ;;  %v2004_v53 = vld [vmem:[#allocation2 + $0x311] sm:$0xff] }
 0x219   : > { %2037 = vrot.lane.b32.xlu0 %v1973_v50, %s11082_s15 }
 0x21a   : > { %v1662_v63 = vpop.permute.xlu1 %1661 }
 0x21b   : > { %1753 = vst.msk [vmem:[#allocation3 + $0x28] sm:$0xff] %vm1747_vm6, %v1662_v63  ;;  %v1668_v27 = vpop.permute.xlu0 %1667 }
 0x21c   : > { %1906 = vrot.lane.b32.xlu1 %v1811_v56, %s11081_s29  ;;  %1756 = vst.msk [vmem:[#allocation3 + $0x40] sm:$0xff] %vm1747_vm6, %v1668_v27 }
 0x21d   : > { %2041 = vrot.lane.b32.xlu0 %v1975_v11, %s11082_s15 }
 0x21e   : > { %v1666_v15 = vpop.permute.xlu1 %1665 }
 0x21f   : > { %1755 = vst.msk [vmem:[#allocation3 + $0x38] sm:$0xff] %vm1747_vm6, %v1666_v15  ;;  %v1672_v19 = vpop.permute.xlu0 %1671 }
 0x220   : > { %2039 = vrot.lane.b32.xlu1 %v1974_v14, %s11082_s15  ;;  %1758 = vst.msk [vmem:[#allocation3 + $0x50] sm:$0xff] %vm1747_vm6, %v1672_v19 }
 0x221   : > { %2045 = vrot.lane.b32.xlu0 %v1977_v18, %s11082_s15 }
 0x222   : > { %v1670_v35 = vpop.permute.xlu1 %1669 }
 0x223   : > { %1757 = vst.msk [vmem:[#allocation3 + $0x48] sm:$0xff] %vm1747_vm6, %v1670_v35  ;;  %v1676_v49 = vpop.permute.xlu0 %1675 }
 0x224   : > { %2043 = vrot.lane.b32.xlu1 %v1976_v22, %s11082_s15  ;;  %1760 = vst.msk [vmem:[#allocation3 + $0x60] sm:$0xff] %vm1747_vm6, %v1676_v49 }
 0x225   : > { %2049 = vrot.lane.b32.xlu0 %v1979_v23, %s11082_s15 }
 0x226   : > { %v1674_v33 = vpop.permute.xlu1 %1673 }
 0x227   : > { %1759 = vst.msk [vmem:[#allocation3 + $0x58] sm:$0xff] %vm1747_vm6, %v1674_v33  ;;  %v1680_v46 = vpop.permute.xlu0 %1679 }
 0x228   : > { %2047 = vrot.lane.b32.xlu1 %v1978_v48, %s11082_s15  ;;  %1762 = vst.msk [vmem:[#allocation3 + $0x70] sm:$0xff] %vm1747_vm6, %v1680_v46 }
 0x229   : > { %2053 = vrot.lane.b32.xlu0 %v1981_v25, %s11082_s15 }
 0x22a   : > { %v1678_v30 = vpop.permute.xlu1 %1677 }
 0x22b   : > { %1761 = vst.msk [vmem:[#allocation3 + $0x68] sm:$0xff] %vm1747_vm6, %v1678_v30  ;;  %v1684_v32 = vpop.permute.xlu0 %1683 }
 0x22c   : > { %2051 = vrot.lane.b32.xlu1 %v1980_v36, %s11082_s15  ;;  %1764 = vst.msk [vmem:[#allocation3 + $0x80] sm:$0xff] %vm1747_vm6, %v1684_v32 }
 0x22d   : > { %2057 = vrot.lane.b32.xlu0 %v1983_v37, %s11082_s15 }
 0x22e   : > { %v1682_v39 = vpop.permute.xlu1 %1681 }
 0x22f   : > { %1763 = vst.msk [vmem:[#allocation3 + $0x78] sm:$0xff] %vm1747_vm6, %v1682_v39  ;;  %v1688_v51 = vpop.permute.xlu0 %1687 }
 0x230   : > { %2055 = vrot.lane.b32.xlu1 %v1982_v45, %s11082_s15  ;;  %1766 = vst.msk [vmem:[#allocation3 + $0x90] sm:$0xff] %vm1747_vm6, %v1688_v51 }
 0x231   : > { %2061 = vrot.lane.b32.xlu0 %v1985_v38, %s11082_s15 }
 0x232   : > { %v1686_v54 = vpop.permute.xlu1 %1685 }
 0x233   : > { %1765 = vst.msk [vmem:[#allocation3 + $0x88] sm:$0xff] %vm1747_vm6, %v1686_v54  ;;  %v1692_v57 = vpop.permute.xlu0 %1691 }
 0x234   : > { %2059 = vrot.lane.b32.xlu1 %v1984_v40, %s11082_s15  ;;  %1768 = vst.msk [vmem:[#allocation3 + $0xa0] sm:$0xff] %vm1747_vm6, %v1692_v57 }
 0x235   : > { %2065 = vrot.lane.b32.xlu0 %v1987_v52, %s11082_s15 }
 0x236   : > { %v1690_v59 = vpop.permute.xlu1 %1689 }
 0x237   : > { %1767 = vst.msk [vmem:[#allocation3 + $0x98] sm:$0xff] %vm1747_vm6, %v1690_v59  ;;  %v1696_v61 = vpop.permute.xlu0 %1695 }
 0x238   : > { %2063 = vrot.lane.b32.xlu1 %v1986_v55, %s11082_s15  ;;  %1770 = vst.msk [vmem:[#allocation3 + $0xb0] sm:$0xff] %vm1747_vm6, %v1696_v61 }
 0x239   : > { %2069 = vrot.lane.b32.xlu0 %v1989_v58, %s11082_s15 }
 0x23a   : > { %v1694_v1 = vpop.permute.xlu1 %1693 }
 0x23b   : > { %1769 = vst.msk [vmem:[#allocation3 + $0xa8] sm:$0xff] %vm1747_vm6, %v1694_v1  ;;  %v1700_v3 = vpop.permute.xlu0 %1699 }
 0x23c   : > { %2067 = vrot.lane.b32.xlu1 %v1988_v60, %s11082_s15  ;;  %1772 = vst.msk [vmem:[#allocation3 + $0xc0] sm:$0xff] %vm1747_vm6, %v1700_v3 }
 0x23d   : > { %2073 = vrot.lane.b32.xlu0 %v1991_v62, %s11082_s15 }
 0x23e   : > { %v1698_v5 = vpop.permute.xlu1 %1697 }
 0x23f   : > { %1771 = vst.msk [vmem:[#allocation3 + $0xb8] sm:$0xff] %vm1747_vm6, %v1698_v5  ;;  %v1704_v7 = vpop.permute.xlu0 %1703 }
 0x240   : > { %2071 = vrot.lane.b32.xlu1 %v1990_v2, %s11082_s15  ;;  %1774 = vst.msk [vmem:[#allocation3 + $0xd0] sm:$0xff] %vm1747_vm6, %v1704_v7 }
 0x241   : > { %2077 = vrot.lane.b32.xlu0 %v1993_v4, %s11082_s15 }
 0x242   : > { %v1702_v9 = vpop.permute.xlu1 %1701 }
 0x243   : > { %1773 = vst.msk [vmem:[#allocation3 + $0xc8] sm:$0xff] %vm1747_vm6, %v1702_v9  ;;  %v1708_v12 = vpop.permute.xlu0 %1707 }
 0x244   : > { %2075 = vrot.lane.b32.xlu1 %v1992_v6, %s11082_s15  ;;  %1776 = vst.msk [vmem:[#allocation3 + $0xe0] sm:$0xff] %vm1747_vm6, %v1708_v12 }
 0x245   : > { %2081 = vrot.lane.b32.xlu0 %v1995_v8, %s11082_s15 }
 0x246   : > { %v1706_v16 = vpop.permute.xlu1 %1705 }
 0x247   : > { %1775 = vst.msk [vmem:[#allocation3 + $0xd8] sm:$0xff] %vm1747_vm6, %v1706_v16  ;;  %v1712_v20 = vpop.permute.xlu0 %1711 }
 0x248   : > { %2079 = vrot.lane.b32.xlu1 %v1994_v10, %s11082_s15  ;;  %1778 = vst.msk [vmem:[#allocation3 + $0xf0] sm:$0xff] %vm1747_vm6, %v1712_v20 }
 0x249   : > { %2085 = vrot.lane.b32.xlu0 %v1997_v13, %s11082_s15 }
 0x24a   : > { %v1710_v41 = vpop.permute.xlu1 %1709 }
 0x24b   : > { %1777 = vst.msk [vmem:[#allocation3 + $0xe8] sm:$0xff] %vm1747_vm6, %v1710_v41  ;;  %v1845_v21 = vpop.permute.xlu0 %1844 }
 0x24c   : > { %2083 = vrot.lane.b32.xlu1 %v1996_v17, %s11082_s15  ;;  %1941 = vst.msk [vmem:[#allocation3] sm:$0xff] %vm1940_vm8, %v1845_v21 }
 0x24d   : > { %2089 = vrot.lane.b32.xlu0 %v1999_v24, %s11082_s15 }
 0x24e   : > { %v1714_v0 = vpop.permute.xlu1 %1713 }
 0x24f   : > { %1779 = vst.msk [vmem:[#allocation3 + $0xf8] sm:$0xff] %vm1747_vm6, %v1714_v0  ;;  %v1849_v43 = vpop.permute.xlu0 %1848 }
 0x250   : > { %2087 = vrot.lane.b32.xlu1 %v1998_v42, %s11082_s15  ;;  %1943 = vst.msk [vmem:[#allocation3 + $0x10] sm:$0xff] %vm1940_vm8, %v1849_v43 }
 0x251   : > { %2093 = vrot.lane.b32.xlu0 %v12167_v26, %s11082_s15 }
 0x252   : > { %v1847_v44 = vpop.permute.xlu1 %1846 }
 0x253   : > { %1942 = vst.msk [vmem:[#allocation3 + $0x8] sm:$0xff] %vm1940_vm8, %v1847_v44  ;;  %v1853_v29 = vpop.permute.xlu0 %1852 }
 0x254   : > { %2091 = vrot.lane.b32.xlu1 %v2000_v28, %s11082_s15  ;;  %1945 = vst.msk [vmem:[#allocation3 + $0x20] sm:$0xff] %vm1940_vm8, %v1853_v29 }
 0x255   : > { %2097 = vrot.lane.b32.xlu0 %v2003_v47, %s11082_s15 }
 0x256   : > { %v1851_v50 = vpop.permute.xlu1 %1850 }
 0x257   : > { %1944 = vst.msk [vmem:[#allocation3 + $0x18] sm:$0xff] %vm1940_vm8, %v1851_v50  ;;  %v1857_v34 = vpop.permute.xlu0 %1856 }
 0x258   : > { %2095 = vrot.lane.b32.xlu1 %v12177_v31, %s11082_s15  ;;  %1947 = vst.msk [vmem:[#allocation3 + $0x30] sm:$0xff] %vm1940_vm8, %v1857_v34 }
 0x25a   : > { %v1855_v26 = vpop.permute.xlu1 %1854 }
 0x25b   : > { %1946 = vst.msk [vmem:[#allocation3 + $0x28] sm:$0xff] %vm1940_vm8, %v1855_v26  ;;  %v1861_v56 = vpop.permute.xlu0 %1860 }
 0x25c   : > { %2099 = vrot.lane.b32.xlu1 %v2004_v53, %s11082_s15  ;;  %1949 = vst.msk [vmem:[#allocation3 + $0x40] sm:$0xff] %vm1940_vm8, %v1861_v56 }
 0x25e   : > { %v1859_v63 = vpop.permute.xlu1 %1858 }
 0x25f   : > { %1948 = vst.msk [vmem:[#allocation3 + $0x38] sm:$0xff] %vm1940_vm8, %v1859_v63  ;;  %v1865_v11 = vpop.permute.xlu0 %1864 }
 0x260   : > { %1951 = vst.msk [vmem:[#allocation3 + $0x50] sm:$0xff] %vm1940_vm8, %v1865_v11 }
 0x262   : > { %v1863_v27 = vpop.permute.xlu1 %1862 }
 0x263   : > { %1950 = vst.msk [vmem:[#allocation3 + $0x48] sm:$0xff] %vm1940_vm8, %v1863_v27  ;;  %v1869_v31 = vpop.permute.xlu0 %1868 }
 0x264   : > { %1953 = vst.msk [vmem:[#allocation3 + $0x60] sm:$0xff] %vm1940_vm8, %v1869_v31 }
 0x266   : > { %v1867_v14 = vpop.permute.xlu1 %1866 }
 0x267   : > { %1952 = vst.msk [vmem:[#allocation3 + $0x58] sm:$0xff] %vm1940_vm8, %v1867_v14  ;;  %v1873_v15 = vpop.permute.xlu0 %1872 }
 0x268   : > { %1955 = vst.msk [vmem:[#allocation3 + $0x70] sm:$0xff] %vm1940_vm8, %v1873_v15 }
 0x26a   : > { %v1871_v18 = vpop.permute.xlu1 %1870 }
 0x26b   : > { %1954 = vst.msk [vmem:[#allocation3 + $0x68] sm:$0xff] %vm1940_vm8, %v1871_v18  ;;  %v1877_v19 = vpop.permute.xlu0 %1876 }
 0x26c   : > { %1957 = vst.msk [vmem:[#allocation3 + $0x80] sm:$0xff] %vm1940_vm8, %v1877_v19 }
 0x26e   : > { %v1875_v22 = vpop.permute.xlu1 %1874 }
 0x26f   : > { %1956 = vst.msk [vmem:[#allocation3 + $0x78] sm:$0xff] %vm1940_vm8, %v1875_v22  ;;  %v1881_v35 = vpop.permute.xlu0 %1880 }
 0x270   : > { %1959 = vst.msk [vmem:[#allocation3 + $0x90] sm:$0xff] %vm1940_vm8, %v1881_v35 }
 0x272   : > { %v1879_v23 = vpop.permute.xlu1 %1878 }
 0x273   : > { %1958 = vst.msk [vmem:[#allocation3 + $0x88] sm:$0xff] %vm1940_vm8, %v1879_v23  ;;  %v1885_v49 = vpop.permute.xlu0 %1884 }
 0x274   : > { %1961 = vst.msk [vmem:[#allocation3 + $0xa0] sm:$0xff] %vm1940_vm8, %v1885_v49 }
 0x276   : > { %v1883_v48 = vpop.permute.xlu1 %1882 }
 0x277   : > { %1960 = vst.msk [vmem:[#allocation3 + $0x98] sm:$0xff] %vm1940_vm8, %v1883_v48  ;;  %v1889_v33 = vpop.permute.xlu0 %1888 }
 0x278   : > { %1963 = vst.msk [vmem:[#allocation3 + $0xb0] sm:$0xff] %vm1940_vm8, %v1889_v33 }
 0x27a   : > { %v1887_v25 = vpop.permute.xlu1 %1886 }
 0x27b   : > { %1962 = vst.msk [vmem:[#allocation3 + $0xa8] sm:$0xff] %vm1940_vm8, %v1887_v25  ;;  %v1893_v46 = vpop.permute.xlu0 %1892 }
 0x27c   : > { %1965 = vst.msk [vmem:[#allocation3 + $0xc0] sm:$0xff] %vm1940_vm8, %v1893_v46 }
 0x27e   : > { %v1891_v36 = vpop.permute.xlu1 %1890 }
 0x27f   : > { %1964 = vst.msk [vmem:[#allocation3 + $0xb8] sm:$0xff] %vm1940_vm8, %v1891_v36  ;;  %v1897_v30 = vpop.permute.xlu0 %1896 }
 0x280   : > { %1967 = vst.msk [vmem:[#allocation3 + $0xd0] sm:$0xff] %vm1940_vm8, %v1897_v30 }
 0x282   : > { %v1895_v37 = vpop.permute.xlu1 %1894 }
 0x283   : > { %1966 = vst.msk [vmem:[#allocation3 + $0xc8] sm:$0xff] %vm1940_vm8, %v1895_v37  ;;  %v1901_v32 = vpop.permute.xlu0 %1900 }
 0x284   : > { %1969 = vst.msk [vmem:[#allocation3 + $0xe0] sm:$0xff] %vm1940_vm8, %v1901_v32 }
 0x286   : > { %v1899_v45 = vpop.permute.xlu1 %1898 }
 0x287   : > { %1968 = vst.msk [vmem:[#allocation3 + $0xd8] sm:$0xff] %vm1940_vm8, %v1899_v45  ;;  %v1905_v39 = vpop.permute.xlu0 %1904 }
 0x288   : > { %1971 = vst.msk [vmem:[#allocation3 + $0xf0] sm:$0xff] %vm1940_vm8, %v1905_v39 }
 0x28a   : > { %v1903_v38 = vpop.permute.xlu1 %1902 }
 0x28b   : > { %1970 = vst.msk [vmem:[#allocation3 + $0xe8] sm:$0xff] %vm1940_vm8, %v1903_v38  ;;  %v2038_v51 = vpop.permute.xlu0 %2037 }
 0x28c   : > { %2134 = vst.msk [vmem:[#allocation3] sm:$0xff] %vm2133_vm9, %v2038_v51 }
 0x28e   : > { %v1907_v40 = vpop.permute.xlu1 %1906 }
 0x28f   : > { %1972 = vst.msk [vmem:[#allocation3 + $0xf8] sm:$0xff] %vm1940_vm8, %v1907_v40  ;;  %v2042_v54 = vpop.permute.xlu0 %2041  ;;  %v493_v40 = vld [vmem:[%s11444_s17 + $0x8] sm:$0xff] }
 0x290   : > { %2136 = vst.msk [vmem:[#allocation3 + $0x10] sm:$0xff] %vm2133_vm9, %v2042_v54  ;;  %v492_v54 = vld [vmem:[%s11444_s17] sm:$0xff] }
 0x291   : > { %525 = vst.msk [vmem:[#allocation4 + $0x8] sm:$0xff] %vm298_vm0, %v493_v40  ;;  %524 = vst.msk [vmem:[#allocation4] sm:$0xff] %vm298_vm0, %v492_v54  ;;  %v516_v40 = vld [vmem:[%s11444_s17 + $0xc0] sm:$0xff] }
 0x292   : > { %v2040_v52 = vpop.permute.xlu1 %2039  ;;  %548 = vst.msk [vmem:[#allocation4 + $0xc0] sm:$0xff] %vm298_vm0, %v516_v40  ;;  %v12713_v40 = vld [vmem:[#allocation2 + $0x188] sm:$0xff] }
 0x293   : > { %2135 = vst.msk [vmem:[#allocation3 + $0x8] sm:$0xff] %vm2133_vm9, %v2040_v52  ;;  %v2046_v57 = vpop.permute.xlu0 %2045  ;;  %v2166_v55 = vld [vmem:[#allocation3] sm:$0xff]  ;;  %v495_v52 = vld [vmem:[%s11444_s17 + $0x18] sm:$0xff] }
 0x294   : > { %2138 = vst.msk [vmem:[#allocation3 + $0x20] sm:$0xff] %vm2133_vm9, %v2046_v57  ;;  %10572 = vmatprep.mubr.msk.f32.mxu0 %vm2203_vm10, %v2166_v55  ;;  %v494_v57 = vld [vmem:[%s11444_s17 + $0x10] sm:$0xff]  ;;  %v497_v55 = vld [vmem:[%s11444_s17 + $0x28] sm:$0xff] }
 0x295   : > { %527 = vst.msk [vmem:[#allocation4 + $0x18] sm:$0xff] %vm298_vm0, %v495_v52  ;;  %526 = vst.msk [vmem:[#allocation4 + $0x10] sm:$0xff] %vm298_vm0, %v494_v57  ;;  %v519_v57 = vld [vmem:[%s11444_s17 + $0xd8] sm:$0xff] }
 0x296   : > { %v2044_v59 = vpop.permute.xlu1 %2043  ;;  %529 = vst.msk [vmem:[#allocation4 + $0x28] sm:$0xff] %vm298_vm0, %v497_v55  ;;  %551 = vst.msk [vmem:[#allocation4 + $0xd8] sm:$0xff] %vm298_vm0, %v519_v57  ;;  %v12727_v57 = vld [vmem:[#allocation2 + $0x206] sm:$0xff] }
 0x297   : > { %2137 = vst.msk [vmem:[#allocation3 + $0x18] sm:$0xff] %vm2133_vm9, %v2044_v59  ;;  %v2050_v58 = vpop.permute.xlu0 %2049  ;;  %v2168_v61 = vld [vmem:[#allocation3 + $0x10] sm:$0xff]  ;;  %v496_v59 = vld [vmem:[%s11444_s17 + $0x20] sm:$0xff] }
 0x298   : > { %2140 = vst.msk [vmem:[#allocation3 + $0x30] sm:$0xff] %vm2133_vm9, %v2050_v58 }
 0x299   : > { %528 = vst.msk [vmem:[#allocation4 + $0x20] sm:$0xff] %vm298_vm0, %v496_v59 }
 0x29a   : > { %v2048_v60 = vpop.permute.xlu1 %2047  ;;  %v2167_v1 = vld [vmem:[#allocation3 + $0x8] sm:$0xff] }
 0x29b   : > { %2139 = vst.msk [vmem:[#allocation3 + $0x28] sm:$0xff] %vm2133_vm9, %v2048_v60  ;;  %10573 = vmatmul.mubr.msk.f32.vlgmr.msra.gmra.mrb[0].mxu0 %vm2203_vm10, %v2167_v1  ;;  %v2054_v62 = vpop.permute.xlu0 %2053  ;;  %v2170_v3 = vld [vmem:[#allocation3 + $0x20] sm:$0xff] }
 0x29c   : > { %10575 = vmatprep.mubr.msk.f32.mxu0 %vm2203_vm10, %v2168_v61  ;;  %2142 = vst.msk [vmem:[#allocation3 + $0x40] sm:$0xff] %vm2133_vm9, %v2054_v62  ;;  %v499_v61 = vld [vmem:[%s11444_s17 + $0x38] sm:$0xff]  ;;  %v498_v62 = vld [vmem:[%s11444_s17 + $0x30] sm:$0xff] }
 0x29d   : > { %531 = vst.msk [vmem:[#allocation4 + $0x38] sm:$0xff] %vm298_vm0, %v499_v61  ;;  %530 = vst.msk [vmem:[#allocation4 + $0x30] sm:$0xff] %vm298_vm0, %v498_v62 }
 0x29e   : > { %v2052_v2 = vpop.permute.xlu1 %2051  ;;  %v2169_v5 = vld [vmem:[#allocation3 + $0x18] sm:$0xff] }
 0x29f   : > { %2141 = vst.msk [vmem:[#allocation3 + $0x38] sm:$0xff] %vm2133_vm9, %v2052_v2  ;;  %10576 = vmatmul.mubr.msk.f32.gmra.mrb[2].mxu0 %vm2203_vm10, %v2169_v5  ;;  %v2058_v4 = vpop.permute.xlu0 %2057  ;;  %v2172_v7 = vld [vmem:[#allocation3 + $0x30] sm:$0xff]  ;;  %v501_v5 = vld [vmem:[%s11444_s17 + $0x48] sm:$0xff] }
 0x2a0   : > { %10578 = vmatprep.mubr.msk.f32.mxu0 %vm2203_vm10, %v2170_v3  ;;  %2144 = vst.msk [vmem:[#allocation3 + $0x50] sm:$0xff] %vm2133_vm9, %v2058_v4 }
 0x2a1   : > { %533 = vst.msk [vmem:[#allocation4 + $0x48] sm:$0xff] %vm298_vm0, %v501_v5 }
 0x2a2   : > { %v2056_v6 = vpop.permute.xlu1 %2055  ;;  %v2171_v9 = vld [vmem:[#allocation3 + $0x28] sm:$0xff] }
 0x2a3   : > { %2143 = vst.msk [vmem:[#allocation3 + $0x48] sm:$0xff] %vm2133_vm9, %v2056_v6  ;;  %10579 = vmatmul.mubr.msk.f32.gmra.mrb[4].mxu0 %vm2203_vm10, %v2171_v9  ;;  %v2062_v8 = vpop.permute.xlu0 %2061  ;;  %v2174_v12 = vld [vmem:[#allocation3 + $0x40] sm:$0xff] }
 0x2a4   : > { %10581 = vmatprep.mubr.msk.f32.mxu0 %vm2203_vm10, %v2172_v7  ;;  %2146 = vst.msk [vmem:[#allocation3 + $0x60] sm:$0xff] %vm2133_vm9, %v2062_v8  ;;  %v500_v6 = vld [vmem:[%s11444_s17 + $0x40] sm:$0xff] }
 0x2a5   : > { %532 = vst.msk [vmem:[#allocation4 + $0x40] sm:$0xff] %vm298_vm0, %v500_v6 }
 0x2a6   : > { %v2060_v10 = vpop.permute.xlu1 %2059  ;;  %v2173_v16 = vld [vmem:[#allocation3 + $0x38] sm:$0xff] }
 0x2a7   : > { %2145 = vst.msk [vmem:[#allocation3 + $0x58] sm:$0xff] %vm2133_vm9, %v2060_v10  ;;  %10582 = vmatmul.mubr.msk.f32.gmra.mrb[6].mxu0 %vm2203_vm10, %v2173_v16  ;;  %v2066_v13 = vpop.permute.xlu0 %2065  ;;  %v2176_v20 = vld [vmem:[#allocation3 + $0x50] sm:$0xff] }
 0x2a8   : > { %10584 = vmatprep.mubr.msk.f32.mxu0 %vm2203_vm10, %v2174_v12  ;;  %2148 = vst.msk [vmem:[#allocation3 + $0x70] sm:$0xff] %vm2133_vm9, %v2066_v13  ;;  %v503_v12 = vld [vmem:[%s11444_s17 + $0x58] sm:$0xff]  ;;  %v502_v13 = vld [vmem:[%s11444_s17 + $0x50] sm:$0xff] }
 0x2a9   : > { %535 = vst.msk [vmem:[#allocation4 + $0x58] sm:$0xff] %vm298_vm0, %v503_v12  ;;  %534 = vst.msk [vmem:[#allocation4 + $0x50] sm:$0xff] %vm298_vm0, %v502_v13 }
 0x2aa   : > { %v2064_v17 = vpop.permute.xlu1 %2063  ;;  %v2175_v41 = vld [vmem:[#allocation3 + $0x48] sm:$0xff] }
 0x2ab   : > { %2147 = vst.msk [vmem:[#allocation3 + $0x68] sm:$0xff] %vm2133_vm9, %v2064_v17  ;;  %10585 = vmatmul.mubr.msk.f32.gmra.mrb[8].mxu0 %vm2203_vm10, %v2175_v41  ;;  %v2070_v24 = vpop.permute.xlu0 %2069  ;;  %v2178_v21 = vld [vmem:[#allocation3 + $0x60] sm:$0xff]  ;;  %v505_v41 = vld [vmem:[%s11444_s17 + $0x68] sm:$0xff] }
 0x2ac   : > { %10587 = vmatprep.mubr.msk.f32.mxu0 %vm2203_vm10, %v2176_v20  ;;  %2150 = vst.msk [vmem:[#allocation3 + $0x80] sm:$0xff] %vm2133_vm9, %v2070_v24 }
 0x2ad   : > { %537 = vst.msk [vmem:[#allocation4 + $0x68] sm:$0xff] %vm298_vm0, %v505_v41  ;;  %v2723_v41 = vld [vmem:[#allocation2 + $0xce] sm:$0xff] }
 0x2ae   : > { %v2068_v42 = vpop.permute.xlu1 %2067  ;;  %v2177_v0 = vld [vmem:[#allocation3 + $0x58] sm:$0xff]  ;;  %2755 = vst.msk [vmem:[#allocation3 + $0x8] sm:$0xff] %vm298_vm0, %v2723_v41  ;;  %v12813_v41 = vld [vmem:[#allocation2 + $0x2ae] sm:$0xff] }
 0x2af   : > { %2149 = vst.msk [vmem:[#allocation3 + $0x78] sm:$0xff] %vm2133_vm9, %v2068_v42  ;;  %10588 = vmatmul.mubr.msk.f32.gmra.mrb[10].mxu0 %vm2203_vm10, %v2177_v0  ;;  %v2074_v43 = vpop.permute.xlu0 %2073  ;;  %v2180_v28 = vld [vmem:[#allocation3 + $0x70] sm:$0xff]  ;;  %v504_v42 = vld [vmem:[%s11444_s17 + $0x60] sm:$0xff] }
 0x2b0   : > { %10590 = vmatprep.mubr.msk.f32.mxu0 %vm2203_vm10, %v2178_v21  ;;  %2152 = vst.msk [vmem:[#allocation3 + $0x90] sm:$0xff] %vm2133_vm9, %v2074_v43 }
 0x2b1   : > { %536 = vst.msk [vmem:[#allocation4 + $0x60] sm:$0xff] %vm298_vm0, %v504_v42 }
 0x2b2   : > { %v2072_v44 = vpop.permute.xlu1 %2071  ;;  %v2179_v47 = vld [vmem:[#allocation3 + $0x68] sm:$0xff] }
 0x2b3   : > { %2151 = vst.msk [vmem:[#allocation3 + $0x88] sm:$0xff] %vm2133_vm9, %v2072_v44  ;;  %10591 = vmatmul.mubr.msk.f32.gmra.mrb[12].mxu0 %vm2203_vm10, %v2179_v47  ;;  %v2078_v29 = vpop.permute.xlu0 %2077  ;;  %v2182_v50 = vld [vmem:[#allocation3 + $0x80] sm:$0xff] }
 0x2b4   : > { %10593 = vmatprep.mubr.msk.f32.mxu0 %vm2203_vm10, %v2180_v28  ;;  %2154 = vst.msk [vmem:[#allocation3 + $0xa0] sm:$0xff] %vm2133_vm9, %v2078_v29  ;;  %10596 = vmatprep.mubr.msk.f32.mxu1 %vm2203_vm10, %v2182_v50  ;;  %v507_v28 = vld [vmem:[%s11444_s17 + $0x78] sm:$0xff]  ;;  %v506_v29 = vld [vmem:[%s11444_s17 + $0x70] sm:$0xff] }
 0x2b5   : > { %539 = vst.msk [vmem:[#allocation4 + $0x78] sm:$0xff] %vm298_vm0, %v507_v28  ;;  %538 = vst.msk [vmem:[#allocation4 + $0x70] sm:$0xff] %vm298_vm0, %v506_v29  ;;  %v2725_v28 = vld [vmem:[#allocation2 + $0xee] sm:$0xff] }
 0x2b6   : > { %v2076_v34 = vpop.permute.xlu1 %2075  ;;  %v2181_v53 = vld [vmem:[#allocation3 + $0x78] sm:$0xff]  ;;  %2757 = vst.msk [vmem:[#allocation3 + $0x18] sm:$0xff] %vm298_vm0, %v2725_v28 }
 0x2b7   : > { %2153 = vst.msk [vmem:[#allocation3 + $0x98] sm:$0xff] %vm2133_vm9, %v2076_v34  ;;  %10594 = vmatmul.mubr.msk.f32.gmra.mrb[14].mxu0 %vm2203_vm10, %v2181_v53  ;;  %v2082_v26 = vpop.permute.xlu0 %2081  ;;  %v2184_v56 = vld [vmem:[#allocation3 + $0x90] sm:$0xff]  ;;  %v509_v53 = vld [vmem:[%s11444_s17 + $0x88] sm:$0xff] }
 0x2b8   : > { %2156 = vst.msk [vmem:[#allocation3 + $0xb0] sm:$0xff] %vm2133_vm9, %v2082_v26 }
 0x2b9   : > { %541 = vst.msk [vmem:[#allocation4 + $0x88] sm:$0xff] %vm298_vm0, %v509_v53  ;;  %v12619_v53 = vld [vmem:[#allocation2 + $0x10e] sm:$0xff] }
 0x2ba   : > { %v2080_v63 = vpop.permute.xlu1 %2079  ;;  %v2183_v11 = vld [vmem:[#allocation3 + $0x88] sm:$0xff]  ;;  %2759 = vst.msk [vmem:[#allocation3 + $0x28] sm:$0xff] %vm298_vm0, %v12619_v53 }
 0x2bb   : > { %2155 = vst.msk [vmem:[#allocation3 + $0xa8] sm:$0xff] %vm2133_vm9, %v2080_v63  ;;  %10597 = vmatmul.mubr.msk.f32.vlgmr.msra.gmra.mrb[0].mxu1 %vm2203_vm10, %v2183_v11  ;;  %v2086_v27 = vpop.permute.xlu0 %2085  ;;  %v2186_v31 = vld [vmem:[#allocation3 + $0xa0] sm:$0xff] }
 0x2bc   : > { %10599 = vmatprep.mubr.msk.f32.mxu1 %vm2203_vm10, %v2184_v56  ;;  %2158 = vst.msk [vmem:[#allocation3 + $0xc0] sm:$0xff] %vm2133_vm9, %v2086_v27  ;;  %v508_v63 = vld [vmem:[%s11444_s17 + $0x80] sm:$0xff] }
 0x2bd   : > { %540 = vst.msk [vmem:[#allocation4 + $0x80] sm:$0xff] %vm298_vm0, %v508_v63  ;;  %v2786_v63 = vld [vmem:[#allocation2 + $0xc8] sm:$0xff]  ;;  %2774 = vst.msk [vmem:[#allocation3 + $0xa0] sm:$0xff] %vm298_vm0, %v12727_v57 }
 0x2be   : > { %v2084_v14 = vpop.permute.xlu1 %2083  ;;  %v2185_v15 = vld [vmem:[#allocation3 + $0x98] sm:$0xff] }
 0x2bf   : > { %2157 = vst.msk [vmem:[#allocation3 + $0xb8] sm:$0xff] %vm2133_vm9, %v2084_v14  ;;  %10600 = vmatmul.mubr.msk.f32.gmra.mrb[2].mxu1 %vm2203_vm10, %v2185_v15  ;;  %v2090_v18 = vpop.permute.xlu0 %2089  ;;  %v2188_v19 = vld [vmem:[#allocation3 + $0xb0] sm:$0xff] }
 0x2c0   : > { %10602 = vmatprep.mubr.msk.f32.mxu1 %vm2203_vm10, %v2186_v31  ;;  %2160 = vst.msk [vmem:[#allocation3 + $0xd0] sm:$0xff] %vm2133_vm9, %v2090_v18  ;;  %v511_v31 = vld [vmem:[%s11444_s17 + $0x98] sm:$0xff]  ;;  %v510_v18 = vld [vmem:[%s11444_s17 + $0x90] sm:$0xff] }
 0x2c1   : > { %543 = vst.msk [vmem:[#allocation4 + $0x98] sm:$0xff] %vm298_vm0, %v511_v31  ;;  %542 = vst.msk [vmem:[#allocation4 + $0x90] sm:$0xff] %vm298_vm0, %v510_v18  ;;  %v12635_v31 = vld [vmem:[#allocation2 + $0x146] sm:$0xff]  ;;  %v12645_v18 = vld [vmem:[#allocation2 + $0x110] sm:$0xff] }
 0x2c2   : > { %v2088_v22 = vpop.permute.xlu1 %2087  ;;  %v2187_v35 = vld [vmem:[#allocation3 + $0xa8] sm:$0xff]  ;;  %2762 = vst.msk [vmem:[#allocation3 + $0x40] sm:$0xff] %vm298_vm0, %v12635_v31 }
 0x2c3   : > { %2159 = vst.msk [vmem:[#allocation3 + $0xc8] sm:$0xff] %vm2133_vm9, %v2088_v22  ;;  %10603 = vmatmul.mubr.msk.f32.gmra.mrb[4].mxu1 %vm2203_vm10, %v2187_v35  ;;  %v2094_v23 = vpop.permute.xlu0 %2093  ;;  %v2190_v49 = vld [vmem:[#allocation3 + $0xc0] sm:$0xff]  ;;  %v513_v35 = vld [vmem:[%s11444_s17 + $0xa8] sm:$0xff] }
 0x2c4   : > { %10605 = vmatprep.mubr.msk.f32.mxu1 %vm2203_vm10, %v2188_v19  ;;  %2162 = vst.msk [vmem:[#allocation3 + $0xe0] sm:$0xff] %vm2133_vm9, %v2094_v23 }
 0x2c5   : > { %545 = vst.msk [vmem:[#allocation4 + $0xa8] sm:$0xff] %vm298_vm0, %v513_v35  ;;  %v12653_v35 = vld [vmem:[#allocation2 + $0x16e] sm:$0xff] }
 0x2c6   : > { %v2092_v48 = vpop.permute.xlu1 %2091  ;;  %v2189_v33 = vld [vmem:[#allocation3 + $0xb8] sm:$0xff]  ;;  %2765 = vst.msk [vmem:[#allocation3 + $0x58] sm:$0xff] %vm298_vm0, %v12653_v35 }
 0x2c7   : > { %2161 = vst.msk [vmem:[#allocation3 + $0xd8] sm:$0xff] %vm2133_vm9, %v2092_v48  ;;  %10606 = vmatmul.mubr.msk.f32.gmra.mrb[6].mxu1 %vm2203_vm10, %v2189_v33  ;;  %v2098_v25 = vpop.permute.xlu0 %2097  ;;  %v2192_v46 = vld [vmem:[#allocation3 + $0xd0] sm:$0xff]  ;;  %v512_v48 = vld [vmem:[%s11444_s17 + $0xa0] sm:$0xff] }
 0x2c8   : > { %10608 = vmatprep.mubr.msk.f32.mxu1 %vm2203_vm10, %v2190_v49  ;;  %2164 = vst.msk [vmem:[#allocation3 + $0xf0] sm:$0xff] %vm2133_vm9, %v2098_v25 }
 0x2c9   : > { %544 = vst.msk [vmem:[#allocation4 + $0xa0] sm:$0xff] %vm298_vm0, %v512_v48  ;;  %v12665_v48 = vld [vmem:[#allocation2 + $0x128] sm:$0xff] }
 0x2ca   : > { %v2096_v36 = vpop.permute.xlu1 %2095  ;;  %v2191_v30 = vld [vmem:[#allocation3 + $0xc8] sm:$0xff] }
 0x2cb   : > { %2163 = vst.msk [vmem:[#allocation3 + $0xe8] sm:$0xff] %vm2133_vm9, %v2096_v36  ;;  %10609 = vmatmul.mubr.msk.f32.gmra.mrb[8].mxu1 %vm2203_vm10, %v2191_v30  ;;  %v2194_v37 = vld [vmem:[#allocation3 + $0xe0] sm:$0xff] }
 0x2cc   : > { %10611 = vmatprep.mubr.msk.f32.mxu1 %vm2203_vm10, %v2192_v46  ;;  %v515_v46 = vld [vmem:[%s11444_s17 + $0xb8] sm:$0xff] }
 0x2cd   : > { %547 = vst.msk [vmem:[#allocation4 + $0xb8] sm:$0xff] %vm298_vm0, %v515_v46  ;;  %v12679_v46 = vld [vmem:[#allocation2 + $0x1a6] sm:$0xff] }
 0x2ce   : > { %v2100_v32 = vpop.permute.xlu1 %2099  ;;  %v2193_v45 = vld [vmem:[#allocation3 + $0xd8] sm:$0xff]  ;;  %2768 = vst.msk [vmem:[#allocation3 + $0x70] sm:$0xff] %vm298_vm0, %v12679_v46 }
 0x2cf   : > { %2165 = vst.msk [vmem:[#allocation3 + $0xf8] sm:$0xff] %vm2133_vm9, %v2100_v32  ;;  %10612 = vmatmul.mubr.msk.f32.gmra.mrb[10].mxu1 %vm2203_vm10, %v2193_v45  ;;  %v2196_v39 = vld [vmem:[#allocation3 + $0xf0] sm:$0xff] }
 0x2d0   : > { %10614 = vmatprep.mubr.msk.f32.mxu1 %vm2203_vm10, %v2194_v37  ;;  %v514_v37 = vld [vmem:[%s11444_s17 + $0xb0] sm:$0xff] }
 0x2d1   : > { %546 = vst.msk [vmem:[#allocation4 + $0xb0] sm:$0xff] %vm298_vm0, %v514_v37  ;;  %v12693_v37 = vld [vmem:[#allocation2 + $0x170] sm:$0xff] }
 0x2d2   : > { %v2195_v38 = vld [vmem:[#allocation3 + $0xe8] sm:$0xff] }
 0x2d3   : > { %10615 = vmatmul.mubr.msk.f32.gmra.mrb[12].mxu1 %vm2203_vm10, %v2195_v38 }
 0x2d4   : > { %10617 = vmatprep.mubr.msk.f32.mxu1 %vm2203_vm10, %v2196_v39  ;;  %v517_v39 = vld [vmem:[%s11444_s17 + $0xc8] sm:$0xff] }
 0x2d5   : > { %549 = vst.msk [vmem:[#allocation4 + $0xc8] sm:$0xff] %vm298_vm0, %v517_v39  ;;  %v12701_v39 = vld [vmem:[#allocation2 + $0x1ce] sm:$0xff] }
 0x2d6   : > { %v2197_v51 = vld [vmem:[#allocation3 + $0xf8] sm:$0xff]  ;;  %2771 = vst.msk [vmem:[#allocation3 + $0x88] sm:$0xff] %vm298_vm0, %v12701_v39 }
 0x2d7   : > { %10618 = vmatmul.mubr.msk.f32.gmra.mrb[14].mxu1 %vm2203_vm10, %v2197_v51  ;;  %2785 = vst.msk [vmem:[#allocation3 + $0xf8] sm:$0xff] %vm298_vm0, %v12813_v41 }
 0x36e   : > { %v10574_v58 = vpop.f32.mrb[0].mxu0 }
 0x36f   : > { %v2530_v60 = vmax.f32 %v10574_v58, 0.0  ;;  %v2370_v1 = vpop.f32.mrb[1].mxu0  ;;  %v518_v58 = vld [vmem:[%s11444_s17 + $0xd0] sm:$0xff] }
 0x370   : > { %v2529_v3 = vmax.f32 %v2370_v1, 0.0  ;;  %550 = vst.msk [vmem:[#allocation4 + $0xd0] sm:$0xff] %vm298_vm0, %v518_v58  ;;  %v521_v1 = vld [vmem:[%s11444_s17 + $0xe8] sm:$0xff]  ;;  %v12741_v58 = vld [vmem:[#allocation2 + $0x1d0] sm:$0xff] }
 0x371   : > { %2595 = vrot.lane.b32.xlu1 %v2530_v60, %s11075_s18  ;;  %553 = vst.msk [vmem:[#allocation4 + $0xe8] sm:$0xff] %vm298_vm0, %v521_v1  ;;  %v12749_v1 = vld [vmem:[#allocation2 + $0x22e] sm:$0xff] }
 0x372   : > { %2593 = vrot.lane.b32.xlu0 %v2529_v3, %s11075_s18  ;;  %v10577_v2 = vpop.f32.mrb[2].mxu0  ;;  %2777 = vst.msk [vmem:[#allocation3 + $0xb8] sm:$0xff] %vm298_vm0, %v12749_v1 }
 0x373   : > { %v2532_v4 = vmax.f32 %v10577_v2, 0.0  ;;  %v2380_v7 = vpop.f32.mrb[3].mxu0  ;;  %v520_v2 = vld [vmem:[%s11444_s17 + $0xe0] sm:$0xff] }
 0x374   : > { %v2531_v9 = vmax.f32 %v2380_v7, 0.0  ;;  %552 = vst.msk [vmem:[#allocation4 + $0xe0] sm:$0xff] %vm298_vm0, %v520_v2  ;;  %v523_v7 = vld [vmem:[%s11444_s17 + $0xf8] sm:$0xff]  ;;  %v12761_v2 = vld [vmem:[#allocation2 + $0x1e8] sm:$0xff] }
 0x375   : > { %2599 = vrot.lane.b32.xlu1 %v2532_v4, %s11075_s18  ;;  %555 = vst.msk [vmem:[#allocation4 + $0xf8] sm:$0xff] %vm298_vm0, %v523_v7  ;;  %v12775_v7 = vld [vmem:[#allocation2 + $0x266] sm:$0xff] }
 0x376   : > { %2597 = vrot.lane.b32.xlu0 %v2531_v9, %s11075_s18  ;;  %v10580_v8 = vpop.f32.mrb[4].mxu0  ;;  %2780 = vst.msk [vmem:[#allocation3 + $0xd0] sm:$0xff] %vm298_vm0, %v12775_v7 }
 0x377   : > { %v2534_v10 = vmax.f32 %v10580_v8, 0.0  ;;  %v2390_v16 = vpop.f32.mrb[5].mxu0  ;;  %v522_v8 = vld [vmem:[%s11444_s17 + $0xf0] sm:$0xff] }
 0x378   : > { %v2533_v20 = vmax.f32 %v2390_v16, 0.0  ;;  %554 = vst.msk [vmem:[#allocation4 + $0xf0] sm:$0xff] %vm298_vm0, %v522_v8  ;;  %v2722_v16 = vld [vmem:[#allocation2 + $0xc6] sm:$0xff]  ;;  %v12789_v8 = vld [vmem:[#allocation2 + $0x230] sm:$0xff] }
 0x379   : > { %2603 = vrot.lane.b32.xlu1 %v2534_v10, %s11075_s18  ;;  %2754 = vst.msk [vmem:[#allocation3] sm:$0xff] %vm298_vm0, %v2722_v16  ;;  %v12797_v16 = vld [vmem:[#allocation2 + $0x28e] sm:$0xff] }
 0x37a   : > { %2601 = vrot.lane.b32.xlu0 %v2533_v20, %s11075_s18  ;;  %v10583_v17 = vpop.f32.mrb[6].mxu0  ;;  %2783 = vst.msk [vmem:[#allocation3 + $0xe8] sm:$0xff] %vm298_vm0, %v12797_v16 }
 0x37b   : > { %v2536_v24 = vmax.f32 %v10583_v17, 0.0  ;;  %v2400_v21 = vpop.f32.mrb[7].mxu0 }
 0x37c   : > { %v2535_v0 = vmax.f32 %v2400_v21, 0.0  ;;  %v2724_v21 = vld [vmem:[#allocation2 + $0xe6] sm:$0xff] }
 0x37d   : > { %2607 = vrot.lane.b32.xlu1 %v2536_v24, %s11075_s18  ;;  %2756 = vst.msk [vmem:[#allocation3 + $0x10] sm:$0xff] %vm298_vm0, %v2724_v21 }
 0x37e   : > { %2605 = vrot.lane.b32.xlu0 %v2535_v0, %s11075_s18  ;;  %v10586_v43 = vpop.f32.mrb[8].mxu0 }
 0x37f   : > { %v2538_v44 = vmax.f32 %v10586_v43, 0.0  ;;  %v2410_v47 = vpop.f32.mrb[9].mxu0 }
 0x380   : > { %v2537_v50 = vmax.f32 %v2410_v47, 0.0  ;;  %v12615_v47 = vld [vmem:[#allocation2 + $0x106] sm:$0xff] }
 0x381   : > { %2611 = vrot.lane.b32.xlu1 %v2538_v44, %s11075_s18  ;;  %2758 = vst.msk [vmem:[#allocation3 + $0x20] sm:$0xff] %vm298_vm0, %v12615_v47 }
 0x382   : > { %2609 = vrot.lane.b32.xlu0 %v2537_v50, %s11075_s18  ;;  %v10589_v34 = vpop.f32.mrb[10].mxu0 }
 0x383   : > { %v2540_v26 = vmax.f32 %v10589_v34, 0.0  ;;  %v2420_v56 = vpop.f32.mrb[11].mxu0 }
 0x384   : > { %v2539_v11 = vmax.f32 %v2420_v56, 0.0  ;;  %v12625_v56 = vld [vmem:[#allocation2 + $0x126] sm:$0xff] }
 0x385   : > { %2615 = vrot.lane.b32.xlu1 %v2540_v26, %s11075_s18  ;;  %v2787_v26 = vld [vmem:[#allocation2 + $0xd0] sm:$0xff]  ;;  %2760 = vst.msk [vmem:[#allocation3 + $0x30] sm:$0xff] %vm298_vm0, %v12625_v56 }
 0x386   : > { %2613 = vrot.lane.b32.xlu0 %v2539_v11, %s11075_s18  ;;  %v10592_v27 = vpop.f32.mrb[12].mxu0  ;;  %v12629_v11 = vld [vmem:[#allocation2 + $0x12e] sm:$0xff] }
 0x387   : > { %v2542_v14 = vmax.f32 %v10592_v27, 0.0  ;;  %v2430_v15 = vpop.f32.mrb[13].mxu0  ;;  %2761 = vst.msk [vmem:[#allocation3 + $0x38] sm:$0xff] %vm298_vm0, %v12629_v11  ;;  %v2789_v27 = vld [vmem:[#allocation2 + $0xf0] sm:$0xff] }
 0x388   : > { %v2541_v19 = vmax.f32 %v2430_v15, 0.0  ;;  %v12639_v15 = vld [vmem:[#allocation2 + $0x14e] sm:$0xff] }
 0x389   : > { %2619 = vrot.lane.b32.xlu1 %v2542_v14, %s11075_s18  ;;  %v2788_v14 = vld [vmem:[#allocation2 + $0xe8] sm:$0xff]  ;;  %2763 = vst.msk [vmem:[#allocation3 + $0x48] sm:$0xff] %vm298_vm0, %v12639_v15 }
 0x38a   : > { %2617 = vrot.lane.b32.xlu0 %v2541_v19, %s11075_s18  ;;  %v10595_v22 = vpop.f32.mrb[14].mxu0  ;;  %v12647_v19 = vld [vmem:[#allocation2 + $0x166] sm:$0xff] }
 0x38b   : > { %v2544_v23 = vmax.f32 %v10595_v22, 0.0  ;;  %v2440_v49 = vpop.f32.mrb[15].mxu0  ;;  %v12649_v22 = vld [vmem:[#allocation2 + $0x108] sm:$0xff]  ;;  %2764 = vst.msk [vmem:[#allocation3 + $0x50] sm:$0xff] %vm298_vm0, %v12647_v19 }
 0x38c   : > { %v2543_v33 = vmax.f32 %v2440_v49, 0.0  ;;  %v12663_v49 = vld [vmem:[#allocation2 + $0x186] sm:$0xff] }
 0x38d   : > { %2623 = vrot.lane.b32.xlu1 %v2544_v23, %s11075_s18  ;;  %v12661_v23 = vld [vmem:[#allocation2 + $0x130] sm:$0xff]  ;;  %2766 = vst.msk [vmem:[#allocation3 + $0x60] sm:$0xff] %vm298_vm0, %v12663_v49 }
 0x38e   : > { %v10598_v25 = vpop.f32.mrb[0].mxu1  ;;  %2621 = vrot.lane.b32.xlu0 %v2543_v33, %s11075_s18  ;;  %v12669_v33 = vld [vmem:[#allocation2 + $0x18e] sm:$0xff] }
 0x38f   : > { %v2546_v36 = vmax.f32 %v10598_v25, 0.0  ;;  %v2450_v30 = vpop.f32.mrb[1].mxu1  ;;  %2767 = vst.msk [vmem:[#allocation3 + $0x68] sm:$0xff] %vm298_vm0, %v12669_v33  ;;  %v12677_v25 = vld [vmem:[#allocation2 + $0x150] sm:$0xff] }
 0x390   : > { %v2545_v32 = vmax.f32 %v2450_v30, 0.0  ;;  %v12685_v30 = vld [vmem:[#allocation2 + $0x1ae] sm:$0xff] }
 0x391   : > { %2627 = vrot.lane.b32.xlu1 %v2546_v36, %s11075_s18  ;;  %v12681_v36 = vld [vmem:[#allocation2 + $0x148] sm:$0xff]  ;;  %2769 = vst.msk [vmem:[#allocation3 + $0x78] sm:$0xff] %vm298_vm0, %v12685_v30 }
 0x392   : > { %v10601_v45 = vpop.f32.mrb[2].mxu1  ;;  %2625 = vrot.lane.b32.xlu0 %v2545_v32, %s11075_s18  ;;  %v12695_v32 = vld [vmem:[#allocation2 + $0x1c6] sm:$0xff] }
 0x393   : > { %v2548_v38 = vmax.f32 %v10601_v45, 0.0  ;;  %v2460_v51 = vpop.f32.mrb[3].mxu1  ;;  %v12697_v45 = vld [vmem:[#allocation2 + $0x168] sm:$0xff]  ;;  %2770 = vst.msk [vmem:[#allocation3 + $0x80] sm:$0xff] %vm298_vm0, %v12695_v32 }
 0x394   : > { %v2547_v54 = vmax.f32 %v2460_v51, 0.0  ;;  %v12711_v51 = vld [vmem:[#allocation2 + $0x1e6] sm:$0xff] }
 0x395   : > { %2631 = vrot.lane.b32.xlu1 %v2548_v38, %s11075_s18  ;;  %v12709_v38 = vld [vmem:[#allocation2 + $0x190] sm:$0xff]  ;;  %2772 = vst.msk [vmem:[#allocation3 + $0x90] sm:$0xff] %vm298_vm0, %v12711_v51 }
 0x396   : > { %v10604_v52 = vpop.f32.mrb[4].mxu1  ;;  %2629 = vrot.lane.b32.xlu0 %v2547_v54, %s11075_s18  ;;  %v12717_v54 = vld [vmem:[#allocation2 + $0x1ee] sm:$0xff] }
 0x397   : > { %v2550_v55 = vmax.f32 %v10604_v52, 0.0  ;;  %v2470_v59 = vpop.f32.mrb[5].mxu1  ;;  %2773 = vst.msk [vmem:[#allocation3 + $0x98] sm:$0xff] %vm298_vm0, %v12717_v54  ;;  %v12725_v52 = vld [vmem:[#allocation2 + $0x1b0] sm:$0xff] }
 0x398   : > { %v2549_v61 = vmax.f32 %v2470_v59, 0.0  ;;  %v12733_v59 = vld [vmem:[#allocation2 + $0x20e] sm:$0xff] }
 0x399   : > { %2635 = vrot.lane.b32.xlu1 %v2550_v55, %s11075_s18  ;;  %v12729_v55 = vld [vmem:[#allocation2 + $0x1a8] sm:$0xff]  ;;  %2775 = vst.msk [vmem:[#allocation3 + $0xa8] sm:$0xff] %vm298_vm0, %v12733_v59 }
 0x39a   : > { %v10607_v60 = vpop.f32.mrb[6].mxu1  ;;  %2633 = vrot.lane.b32.xlu0 %v2549_v61, %s11075_s18  ;;  %v12743_v61 = vld [vmem:[#allocation2 + $0x226] sm:$0xff] }
 0x39b   : > { %v2552_v62 = vmax.f32 %v10607_v60, 0.0  ;;  %v2480_v3 = vpop.f32.mrb[7].mxu1  ;;  %v12745_v60 = vld [vmem:[#allocation2 + $0x1c8] sm:$0xff]  ;;  %2776 = vst.msk [vmem:[#allocation3 + $0xb0] sm:$0xff] %vm298_vm0, %v12743_v61 }
 0x39c   : > { %v2551_v5 = vmax.f32 %v2480_v3, 0.0  ;;  %v12759_v3 = vld [vmem:[#allocation2 + $0x246] sm:$0xff] }
 0x39d   : > { %2639 = vrot.lane.b32.xlu1 %v2552_v62, %s11075_s18  ;;  %v12757_v62 = vld [vmem:[#allocation2 + $0x1f0] sm:$0xff]  ;;  %2778 = vst.msk [vmem:[#allocation3 + $0xc0] sm:$0xff] %vm298_vm0, %v12759_v3 }
 0x39e   : > { %v10610_v4 = vpop.f32.mrb[8].mxu1  ;;  %2637 = vrot.lane.b32.xlu0 %v2551_v5, %s11075_s18  ;;  %v12765_v5 = vld [vmem:[#allocation2 + $0x24e] sm:$0xff] }
 0x39f   : > { %v2554_v6 = vmax.f32 %v10610_v4, 0.0  ;;  %v2490_v9 = vpop.f32.mrb[9].mxu1  ;;  %2779 = vst.msk [vmem:[#allocation3 + $0xc8] sm:$0xff] %vm298_vm0, %v12765_v5  ;;  %v12773_v4 = vld [vmem:[#allocation2 + $0x210] sm:$0xff] }
 0x3a0   : > { %v2553_v12 = vmax.f32 %v2490_v9, 0.0  ;;  %v12781_v9 = vld [vmem:[#allocation2 + $0x26e] sm:$0xff] }
 0x3a1   : > { %2643 = vrot.lane.b32.xlu1 %v2554_v6, %s11075_s18  ;;  %v12777_v6 = vld [vmem:[#allocation2 + $0x208] sm:$0xff]  ;;  %2781 = vst.msk [vmem:[#allocation3 + $0xd8] sm:$0xff] %vm298_vm0, %v12781_v9 }
 0x3a2   : > { %v10613_v10 = vpop.f32.mrb[10].mxu1  ;;  %2641 = vrot.lane.b32.xlu0 %v2553_v12, %s11075_s18  ;;  %v12791_v12 = vld [vmem:[#allocation2 + $0x286] sm:$0xff] }
 0x3a3   : > { %v2556_v13 = vmax.f32 %v10613_v10, 0.0  ;;  %v2500_v20 = vpop.f32.mrb[11].mxu1  ;;  %v12793_v10 = vld [vmem:[#allocation2 + $0x228] sm:$0xff]  ;;  %2782 = vst.msk [vmem:[#allocation3 + $0xe0] sm:$0xff] %vm298_vm0, %v12791_v12 }
 0x3a4   : > { %v2555_v17 = vmax.f32 %v2500_v20, 0.0  ;;  %v12807_v20 = vld [vmem:[#allocation2 + $0x2a6] sm:$0xff] }
 0x3a5   : > { %2647 = vrot.lane.b32.xlu1 %v2556_v13, %s11075_s18  ;;  %v12805_v13 = vld [vmem:[#allocation2 + $0x250] sm:$0xff]  ;;  %2784 = vst.msk [vmem:[#allocation3 + $0xf0] sm:$0xff] %vm298_vm0, %v12807_v20 }
 0x3a6   : > { %v10616_v24 = vpop.f32.mrb[12].mxu1  ;;  %2645 = vrot.lane.b32.xlu0 %v2555_v17, %s11075_s18  ;;  %v12809_v17 = vld [vmem:[#allocation2 + $0x248] sm:$0xff] }
 0x3a7   : > { %v2558_v42 = vmax.f32 %v10616_v24, 0.0  ;;  %v2510_v0 = vpop.f32.mrb[13].mxu1  ;;  %v12821_v24 = vld [vmem:[#allocation2 + $0x270] sm:$0xff] }
 0x3a8   : > { %v2557_v43 = vmax.f32 %v2510_v0, 0.0 }
 0x3a9   : > { %2651 = vrot.lane.b32.xlu1 %v2558_v42, %s11075_s18  ;;  %v12823_v42 = vld [vmem:[#allocation2 + $0x268] sm:$0xff] }
 0x3aa   : > { %v10619_v44 = vpop.f32.mrb[14].mxu1  ;;  %2649 = vrot.lane.b32.xlu0 %v2557_v43, %s11075_s18  ;;  %v12831_v43 = vld [vmem:[#allocation2 + $0x290] sm:$0xff] }
 0x3ab   : > { %v2560_v29 = vmax.f32 %v10619_v44, 0.0  ;;  %v2520_v50 = vpop.f32.mrb[15].mxu1  ;;  %v12833_v44 = vld [vmem:[#allocation2 + $0x288] sm:$0xff] }
 0x3ac   : > { %v2559_v34 = vmax.f32 %v2520_v50, 0.0  ;;  %v12841_v50 = vld [vmem:[#allocation2 + $0x2b0] sm:$0xff] }
 0x3ad   : > { %2655 = vrot.lane.b32.xlu1 %v2560_v29, %s11075_s18 }
 0x3ae   : > { %2653 = vrot.lane.b32.xlu0 %v2559_v34, %s11075_s18 }
 0x3b1   : > { %2852 = vrot.lane.b32.xlu1 %v2787_v26, %s11075_s18  ;;  %v12843_v26 = vld [vmem:[#allocation2 + $0x2a8] sm:$0xff] }
 0x3b2   : > { %2850 = vrot.lane.b32.xlu0 %v2786_v63, %s11075_s18  ;;  %16303 = vst [vmem:[#allocation11_spill] sm:$0xff] %v12843_v26 }
 0x3b5   : > { %2856 = vrot.lane.b32.xlu1 %v2789_v27, %s11075_s18  ;;  %v2979_v27 = vld [vmem:[#allocation2 + $0xd2] sm:$0xff] }
 0x3b6   : > { %2854 = vrot.lane.b32.xlu0 %v2788_v14, %s11075_s18 }
 0x3b9   : > { %2860 = vrot.lane.b32.xlu1 %v12645_v18, %s11075_s18 }
 0x3ba   : > { %2858 = vrot.lane.b32.xlu0 %v12649_v22, %s11075_s18 }
 0x3bd   : > { %2864 = vrot.lane.b32.xlu1 %v12661_v23, %s11075_s18 }
 0x3be   : > { %2862 = vrot.lane.b32.xlu0 %v12665_v48, %s11075_s18 }
 0x3c1   : > { %2868 = vrot.lane.b32.xlu1 %v12677_v25, %s11075_s18 }
 0x3c2   : > { %2866 = vrot.lane.b32.xlu0 %v12681_v36, %s11075_s18 }
 0x3c5   : > { %2872 = vrot.lane.b32.xlu1 %v12693_v37, %s11075_s18 }
 0x3c6   : > { %2870 = vrot.lane.b32.xlu0 %v12697_v45, %s11075_s18 }
 0x3c9   : > { %2876 = vrot.lane.b32.xlu1 %v12709_v38, %s11075_s18 }
 0x3ca   : > { %2874 = vrot.lane.b32.xlu0 %v12713_v40, %s11075_s18 }
 0x3cd   : > { %2880 = vrot.lane.b32.xlu1 %v12725_v52, %s11075_s18 }
 0x3ce   : > { %2878 = vrot.lane.b32.xlu0 %v12729_v55, %s11075_s18 }
 0x3d1   : > { %2884 = vrot.lane.b32.xlu1 %v12741_v58, %s11075_s18 }
 0x3d2   : > { %2882 = vrot.lane.b32.xlu0 %v12745_v60, %s11075_s18 }
 0x3d5   : > { %2888 = vrot.lane.b32.xlu1 %v12757_v62, %s11075_s18 }
 0x3d6   : > { %2886 = vrot.lane.b32.xlu0 %v12761_v2, %s11075_s18 }
 0x3d9   : > { %2892 = vrot.lane.b32.xlu1 %v12773_v4, %s11075_s18 }
 0x3da   : > { %2890 = vrot.lane.b32.xlu0 %v12777_v6, %s11075_s18 }
 0x3dd   : > { %2896 = vrot.lane.b32.xlu1 %v12789_v8, %s11075_s18 }
 0x3de   : > { %2894 = vrot.lane.b32.xlu0 %v12793_v10, %s11075_s18 }
 0x3e1   : > { %2900 = vrot.lane.b32.xlu1 %v12805_v13, %s11075_s18 }
 0x3e2   : > { %2898 = vrot.lane.b32.xlu0 %v12809_v17, %s11075_s18 }
 0x3e3   : > { %v2596_v21 = vpop.permute.xlu1 %2595 }
 0x3e4   : > { %2690 = vst.msk [vmem:[#allocation4 + $0x8] sm:$0xff] %vm781_vm1, %v2596_v21  ;;  %v2594_v0 = vpop.permute.xlu0 %2593  ;;  %v2978_v21 = vld [vmem:[#allocation2 + $0xca] sm:$0xff] }
 0x3e5   : > { %2689 = vst.msk [vmem:[#allocation4] sm:$0xff] %vm781_vm1, %v2594_v0  ;;  %2904 = vrot.lane.b32.xlu1 %v12821_v24, %s11075_s18 }
 0x3e6   : > { %2902 = vrot.lane.b32.xlu0 %v12823_v42, %s11075_s18 }
 0x3e7   : > { %v2600_v28 = vpop.permute.xlu1 %2599 }
 0x3e8   : > { %2692 = vst.msk [vmem:[#allocation4 + $0x18] sm:$0xff] %vm781_vm1, %v2600_v28  ;;  %v2598_v29 = vpop.permute.xlu0 %2597  ;;  %v2981_v28 = vld [vmem:[#allocation2 + $0xf2] sm:$0xff] }
 0x3e9   : > { %2691 = vst.msk [vmem:[#allocation4 + $0x10] sm:$0xff] %vm781_vm1, %v2598_v29  ;;  %2908 = vrot.lane.b32.xlu1 %v12831_v43, %s11075_s18 }
 0x3ea   : > { %2906 = vrot.lane.b32.xlu0 %v12833_v44, %s11075_s18 }
 0x3eb   : > { %v2604_v34 = vpop.permute.xlu1 %2603 }
 0x3ec   : > { %2694 = vst.msk [vmem:[#allocation4 + $0x28] sm:$0xff] %vm781_vm1, %v2604_v34  ;;  %v2602_v63 = vpop.permute.xlu0 %2601  ;;  %v2980_v34 = vld [vmem:[#allocation2 + $0xea] sm:$0xff] }
 0x3ed   : > { %2693 = vst.msk [vmem:[#allocation4 + $0x20] sm:$0xff] %vm781_vm1, %v2602_v63  ;;  %2912 = vrot.lane.b32.xlu1 %v12841_v50, %s11075_s18 }
 0x3ee   : > { %2910 = vrot.lane.b32.xlu0 %v12843_v26, %s11075_s18 }
 0x3ef   : > { %v2608_v14 = vpop.permute.xlu1 %2607 }
 0x3f0   : > { %2696 = vst.msk [vmem:[#allocation4 + $0x38] sm:$0xff] %vm781_vm1, %v2608_v14  ;;  %v2606_v0 = vpop.permute.xlu0 %2605  ;;  %v12859_v14 = vld [vmem:[#allocation2 + $0x112] sm:$0xff] }
 0x3f1   : > { %2695 = vst.msk [vmem:[#allocation4 + $0x30] sm:$0xff] %vm781_vm1, %v2606_v0  ;;  %3044 = vrot.lane.b32.xlu1 %v2979_v27, %s11076_s19  ;;  %v12861_v0 = vld [vmem:[#allocation2 + $0x10a] sm:$0xff] }
 0x3f2   : > { %3042 = vrot.lane.b32.xlu0 %v2978_v21, %s11076_s19  ;;  %16304 = vst [vmem:[#allocation12_spill] sm:$0xff] %v12861_v0  ;;  %v12869_v21 = vld [vmem:[#allocation2 + $0x132] sm:$0xff] }
 0x3f3   : > { %v2612_v29 = vpop.permute.xlu1 %2611  ;;  %16305 = vst [vmem:[#allocation13_spill] sm:$0xff] %v12869_v21 }
 0x3f4   : > { %2698 = vst.msk [vmem:[#allocation4 + $0x48] sm:$0xff] %vm781_vm1, %v2612_v29  ;;  %v2610_v63 = vpop.permute.xlu0 %2609  ;;  %v12871_v29 = vld [vmem:[#allocation2 + $0x12a] sm:$0xff] }
 0x3f5   : > { %2697 = vst.msk [vmem:[#allocation4 + $0x40] sm:$0xff] %vm781_vm1, %v2610_v63  ;;  %3048 = vrot.lane.b32.xlu1 %v2981_v28, %s11076_s19  ;;  %16306 = vst [vmem:[#allocation14_spill] sm:$0xff] %v12871_v29 }
 0x3f6   : > { %3046 = vrot.lane.b32.xlu0 %v2980_v34, %s11076_s19 }
 0x3f7   : > { %v2616_v26 = vpop.permute.xlu1 %2615 }
 0x3f8   : > { %2700 = vst.msk [vmem:[#allocation4 + $0x58] sm:$0xff] %vm781_vm1, %v2616_v26  ;;  %v2614_v27 = vpop.permute.xlu0 %2613  ;;  %v12879_v26 = vld [vmem:[#allocation2 + $0x152] sm:$0xff] }
 0x3f9   : > { %2699 = vst.msk [vmem:[#allocation4 + $0x50] sm:$0xff] %vm781_vm1, %v2614_v27  ;;  %3052 = vrot.lane.b32.xlu1 %v12859_v14, %s11076_s19  ;;  %16307 = vst [vmem:[#allocation15_spill] sm:$0xff] %v12879_v26  ;;  %v12881_v27 = vld [vmem:[#allocation2 + $0x14a] sm:$0xff] }
 0x3fa   : > { %3050 = vrot.lane.b32.xlu0 %v12861_v0, %s11076_s19  ;;  %16308 = vst [vmem:[#allocation16_spill] sm:$0xff] %v12881_v27 }
 0x3fb   : > { %v2620_v28 = vpop.permute.xlu1 %2619 }
 0x3fc   : > { %2702 = vst.msk [vmem:[#allocation4 + $0x68] sm:$0xff] %vm781_vm1, %v2620_v28  ;;  %v2618_v34 = vpop.permute.xlu0 %2617  ;;  %v12889_v28 = vld [vmem:[#allocation2 + $0x172] sm:$0xff] }
 0x3fd   : > { %2701 = vst.msk [vmem:[#allocation4 + $0x60] sm:$0xff] %vm781_vm1, %v2618_v34  ;;  %3056 = vrot.lane.b32.xlu1 %v12869_v21, %s11076_s19  ;;  %16309 = vst [vmem:[#allocation17_spill] sm:$0xff] %v12889_v28 }
 0x3fe   : > { %3054 = vrot.lane.b32.xlu0 %v12871_v29, %s11076_s19  ;;  %v12891_v29 = vld [vmem:[#allocation2 + $0x16a] sm:$0xff] }
 0x3ff   : > { %v2624_v63 = vpop.permute.xlu1 %2623  ;;  %16310 = vst [vmem:[#allocation18_spill] sm:$0xff] %v12891_v29 }
 0x400   : > { %2704 = vst.msk [vmem:[#allocation4 + $0x78] sm:$0xff] %vm781_vm1, %v2624_v63  ;;  %v2622_v0 = vpop.permute.xlu0 %2621 }
 0x401   : > { %2703 = vst.msk [vmem:[#allocation4 + $0x70] sm:$0xff] %vm781_vm1, %v2622_v0  ;;  %3060 = vrot.lane.b32.xlu1 %v12879_v26, %s11076_s19  ;;  %v12899_v0 = vld [vmem:[#allocation2 + $0x192] sm:$0xff] }
 0x402   : > { %3058 = vrot.lane.b32.xlu0 %v12881_v27, %s11076_s19  ;;  %16311 = vst [vmem:[#allocation19_spill] sm:$0xff] %v12899_v0  ;;  %v12901_v27 = vld [vmem:[#allocation2 + $0x18a] sm:$0xff] }
 0x403   : > { %v2628_v34 = vpop.permute.xlu1 %2627  ;;  %16312 = vst [vmem:[#allocation20_spill] sm:$0xff] %v12901_v27 }
 0x404   : > { %2706 = vst.msk [vmem:[#allocation4 + $0x88] sm:$0xff] %vm781_vm1, %v2628_v34  ;;  %v2626_v21 = vpop.permute.xlu0 %2625 }
 0x405   : > { %2705 = vst.msk [vmem:[#allocation4 + $0x80] sm:$0xff] %vm781_vm1, %v2626_v21  ;;  %3064 = vrot.lane.b32.xlu1 %v12889_v28, %s11076_s19  ;;  %v12909_v21 = vld [vmem:[#allocation2 + $0x1b2] sm:$0xff] }
 0x406   : > { %3062 = vrot.lane.b32.xlu0 %v12891_v29, %s11076_s19  ;;  %16313 = vst [vmem:[#allocation21_spill] sm:$0xff] %v12909_v21  ;;  %v12911_v29 = vld [vmem:[#allocation2 + $0x1aa] sm:$0xff] }
 0x407   : > { %v2632_v63 = vpop.permute.xlu1 %2631  ;;  %16314 = vst [vmem:[#allocation22_spill] sm:$0xff] %v12911_v29 }
 0x408   : > { %2708 = vst.msk [vmem:[#allocation4 + $0x98] sm:$0xff] %vm781_vm1, %v2632_v63  ;;  %v2630_v26 = vpop.permute.xlu0 %2629 }
 0x409   : > { %2707 = vst.msk [vmem:[#allocation4 + $0x90] sm:$0xff] %vm781_vm1, %v2630_v26  ;;  %3068 = vrot.lane.b32.xlu1 %v12899_v0, %s11076_s19  ;;  %v12919_v26 = vld [vmem:[#allocation2 + $0x1d2] sm:$0xff] }
 0x40a   : > { %3066 = vrot.lane.b32.xlu0 %v12901_v27, %s11076_s19  ;;  %16315 = vst [vmem:[#allocation23_spill] sm:$0xff] %v12919_v26  ;;  %v12921_v27 = vld [vmem:[#allocation2 + $0x1ca] sm:$0xff] }
 0x40b   : > { %v2636_v34 = vpop.permute.xlu1 %2635  ;;  %16316 = vst [vmem:[#allocation24_spill] sm:$0xff] %v12921_v27 }
 0x40c   : > { %2710 = vst.msk [vmem:[#allocation4 + $0xa8] sm:$0xff] %vm781_vm1, %v2636_v34  ;;  %v2634_v28 = vpop.permute.xlu0 %2633 }
 0x40d   : > { %2709 = vst.msk [vmem:[#allocation4 + $0xa0] sm:$0xff] %vm781_vm1, %v2634_v28  ;;  %3072 = vrot.lane.b32.xlu1 %v12909_v21, %s11076_s19  ;;  %v12929_v28 = vld [vmem:[#allocation2 + $0x1f2] sm:$0xff] }
 0x40e   : > { %3070 = vrot.lane.b32.xlu0 %v12911_v29, %s11076_s19  ;;  %16317 = vst [vmem:[#allocation25_spill] sm:$0xff] %v12929_v28  ;;  %v12931_v29 = vld [vmem:[#allocation2 + $0x1ea] sm:$0xff] }
 0x40f   : > { %v2640_v63 = vpop.permute.xlu1 %2639  ;;  %16318 = vst [vmem:[#allocation26_spill] sm:$0xff] %v12931_v29 }
 0x410   : > { %2712 = vst.msk [vmem:[#allocation4 + $0xb8] sm:$0xff] %vm781_vm1, %v2640_v63  ;;  %v2638_v0 = vpop.permute.xlu0 %2637 }
 0x411   : > { %2711 = vst.msk [vmem:[#allocation4 + $0xb0] sm:$0xff] %vm781_vm1, %v2638_v0  ;;  %3076 = vrot.lane.b32.xlu1 %v12919_v26, %s11076_s19  ;;  %v12939_v0 = vld [vmem:[#allocation2 + $0x212] sm:$0xff] }
 0x412   : > { %3074 = vrot.lane.b32.xlu0 %v12921_v27, %s11076_s19  ;;  %16319 = vst [vmem:[#allocation27_spill] sm:$0xff] %v12939_v0  ;;  %v12941_v27 = vld [vmem:[#allocation2 + $0x20a] sm:$0xff] }
 0x413   : > { %v2644_v34 = vpop.permute.xlu1 %2643  ;;  %16320 = vst [vmem:[#allocation28_spill] sm:$0xff] %v12941_v27 }
 0x414   : > { %2714 = vst.msk [vmem:[#allocation4 + $0xc8] sm:$0xff] %vm781_vm1, %v2644_v34  ;;  %v2642_v21 = vpop.permute.xlu0 %2641 }
 0x415   : > { %2713 = vst.msk [vmem:[#allocation4 + $0xc0] sm:$0xff] %vm781_vm1, %v2642_v21  ;;  %3080 = vrot.lane.b32.xlu1 %v12929_v28, %s11076_s19  ;;  %v12949_v21 = vld [vmem:[#allocation2 + $0x232] sm:$0xff] }
 0x416   : > { %3078 = vrot.lane.b32.xlu0 %v12931_v29, %s11076_s19  ;;  %16321 = vst [vmem:[#allocation29_spill] sm:$0xff] %v12949_v21  ;;  %v12951_v29 = vld [vmem:[#allocation2 + $0x22a] sm:$0xff] }
 0x417   : > { %v2648_v63 = vpop.permute.xlu1 %2647  ;;  %16322 = vst [vmem:[#allocation30_spill] sm:$0xff] %v12951_v29 }
 0x418   : > { %2716 = vst.msk [vmem:[#allocation4 + $0xd8] sm:$0xff] %vm781_vm1, %v2648_v63  ;;  %v2646_v26 = vpop.permute.xlu0 %2645 }
 0x419   : > { %2715 = vst.msk [vmem:[#allocation4 + $0xd0] sm:$0xff] %vm781_vm1, %v2646_v26  ;;  %3084 = vrot.lane.b32.xlu1 %v12939_v0, %s11076_s19  ;;  %v12959_v26 = vld [vmem:[#allocation2 + $0x252] sm:$0xff] }
 0x41a   : > { %3082 = vrot.lane.b32.xlu0 %v12941_v27, %s11076_s19  ;;  %16323 = vst [vmem:[#allocation31_spill] sm:$0xff] %v12959_v26  ;;  %v12961_v27 = vld [vmem:[#allocation2 + $0x24a] sm:$0xff] }
 0x41b   : > { %v2652_v34 = vpop.permute.xlu1 %2651  ;;  %16324 = vst [vmem:[#allocation32_spill] sm:$0xff] %v12961_v27 }
 0x41c   : > { %2718 = vst.msk [vmem:[#allocation4 + $0xe8] sm:$0xff] %vm781_vm1, %v2652_v34  ;;  %v2650_v28 = vpop.permute.xlu0 %2649 }
 0x41d   : > { %2717 = vst.msk [vmem:[#allocation4 + $0xe0] sm:$0xff] %vm781_vm1, %v2650_v28  ;;  %3088 = vrot.lane.b32.xlu1 %v12949_v21, %s11076_s19  ;;  %v12969_v28 = vld [vmem:[#allocation2 + $0x272] sm:$0xff] }
 0x41e   : > { %3086 = vrot.lane.b32.xlu0 %v12951_v29, %s11076_s19  ;;  %16325 = vst [vmem:[#allocation33_spill] sm:$0xff] %v12969_v28  ;;  %v12971_v29 = vld [vmem:[#allocation2 + $0x26a] sm:$0xff] }
 0x41f   : > { %v2656_v63 = vpop.permute.xlu1 %2655  ;;  %16326 = vst [vmem:[#allocation34_spill] sm:$0xff] %v12971_v29 }
 0x420   : > { %2720 = vst.msk [vmem:[#allocation4 + $0xf8] sm:$0xff] %vm781_vm1, %v2656_v63  ;;  %v2654_v0 = vpop.permute.xlu0 %2653 }
 0x421   : > { %2719 = vst.msk [vmem:[#allocation4 + $0xf0] sm:$0xff] %vm781_vm1, %v2654_v0  ;;  %3092 = vrot.lane.b32.xlu1 %v12959_v26, %s11076_s19  ;;  %v12979_v0 = vld [vmem:[#allocation2 + $0x292] sm:$0xff] }
 0x422   : > { %3090 = vrot.lane.b32.xlu0 %v12961_v27, %s11076_s19  ;;  %v12981_v27 = vld [vmem:[#allocation2 + $0x28a] sm:$0xff] }
 0x423   : > { %v2853_v34 = vpop.permute.xlu1 %2852 }
 0x424   : > { %v2851_v21 = vpop.permute.xlu0 %2850  ;;  %2947 = vst.msk [vmem:[#allocation3 + $0x8] sm:$0xff] %vm781_vm1, %v2853_v34 }
 0x425   : > { %2946 = vst.msk [vmem:[#allocation3] sm:$0xff] %vm781_vm1, %v2851_v21  ;;  %3096 = vrot.lane.b32.xlu1 %v12969_v28, %s11076_s19  ;;  %v12989_v21 = vld [vmem:[#allocation2 + $0x2b2] sm:$0xff] }
 0x426   : > { %3094 = vrot.lane.b32.xlu0 %v12971_v29, %s11076_s19  ;;  %v12991_v29 = vld [vmem:[#allocation2 + $0x2aa] sm:$0xff] }
 0x427   : > { %v2857_v63 = vpop.permute.xlu1 %2856 }
 0x428   : > { %v2855_v26 = vpop.permute.xlu0 %2854  ;;  %2949 = vst.msk [vmem:[#allocation3 + $0x18] sm:$0xff] %vm781_vm1, %v2857_v63 }
 0x429   : > { %2948 = vst.msk [vmem:[#allocation3 + $0x10] sm:$0xff] %vm781_vm1, %v2855_v26  ;;  %3100 = vrot.lane.b32.xlu1 %v12979_v0, %s11076_s19 }
 0x42a   : > { %3098 = vrot.lane.b32.xlu0 %v12981_v27, %s11076_s19 }
 0x42b   : > { %v2861_v34 = vpop.permute.xlu1 %2860 }
 0x42c   : > { %v2859_v28 = vpop.permute.xlu0 %2858  ;;  %2951 = vst.msk [vmem:[#allocation3 + $0x28] sm:$0xff] %vm781_vm1, %v2861_v34 }
 0x42d   : > { %2950 = vst.msk [vmem:[#allocation3 + $0x20] sm:$0xff] %vm781_vm1, %v2859_v28  ;;  %3104 = vrot.lane.b32.xlu1 %v12989_v21, %s11076_s19 }
 0x42e   : > { %3102 = vrot.lane.b32.xlu0 %v12991_v29, %s11076_s19 }
 0x42f   : > { %v2865_v26 = vpop.permute.xlu1 %2864 }
 0x430   : > { %v2863_v63 = vpop.permute.xlu0 %2862  ;;  %2953 = vst.msk [vmem:[#allocation3 + $0x38] sm:$0xff] %vm781_vm1, %v2865_v26 }
 0x431   : > { %2952 = vst.msk [vmem:[#allocation3 + $0x30] sm:$0xff] %vm781_vm1, %v2863_v63  ;;  %3236 = vrot.lane.b32.xlu1 %v12619_v53, %s11077_s20 }
 0x432   : > { %3234 = vrot.lane.b32.xlu0 %v12615_v47, %s11077_s20 }
 0x433   : > { %v2869_v34 = vpop.permute.xlu1 %2868 }
 0x434   : > { %v2867_v28 = vpop.permute.xlu0 %2866  ;;  %2955 = vst.msk [vmem:[#allocation3 + $0x48] sm:$0xff] %vm781_vm1, %v2869_v34 }
 0x435   : > { %2954 = vst.msk [vmem:[#allocation3 + $0x40] sm:$0xff] %vm781_vm1, %v2867_v28  ;;  %3240 = vrot.lane.b32.xlu1 %v12629_v11, %s11077_s20 }
 0x436   : > { %3238 = vrot.lane.b32.xlu0 %v12625_v56, %s11077_s20 }
 0x437   : > { %v2873_v26 = vpop.permute.xlu1 %2872 }
 0x438   : > { %v2871_v63 = vpop.permute.xlu0 %2870  ;;  %2957 = vst.msk [vmem:[#allocation3 + $0x58] sm:$0xff] %vm781_vm1, %v2873_v26 }
 0x439   : > { %2956 = vst.msk [vmem:[#allocation3 + $0x50] sm:$0xff] %vm781_vm1, %v2871_v63  ;;  %3244 = vrot.lane.b32.xlu1 %v12639_v15, %s11077_s20 }
 0x43a   : > { %3242 = vrot.lane.b32.xlu0 %v12635_v31, %s11077_s20 }
 0x43b   : > { %v2877_v47 = vpop.permute.xlu1 %2876 }
 0x43c   : > { %v2875_v53 = vpop.permute.xlu0 %2874  ;;  %2959 = vst.msk [vmem:[#allocation3 + $0x68] sm:$0xff] %vm781_vm1, %v2877_v47 }
 0x43d   : > { %2958 = vst.msk [vmem:[#allocation3 + $0x60] sm:$0xff] %vm781_vm1, %v2875_v53  ;;  %3248 = vrot.lane.b32.xlu1 %v12653_v35, %s11077_s20 }
 0x43e   : > { %3246 = vrot.lane.b32.xlu0 %v12647_v19, %s11077_s20 }
 0x43f   : > { %v2881_v56 = vpop.permute.xlu1 %2880 }
 0x440   : > { %v2879_v11 = vpop.permute.xlu0 %2878  ;;  %2961 = vst.msk [vmem:[#allocation3 + $0x78] sm:$0xff] %vm781_vm1, %v2881_v56 }
 0x441   : > { %2960 = vst.msk [vmem:[#allocation3 + $0x70] sm:$0xff] %vm781_vm1, %v2879_v11  ;;  %3252 = vrot.lane.b32.xlu1 %v12669_v33, %s11077_s20 }
 0x442   : > { %3250 = vrot.lane.b32.xlu0 %v12663_v49, %s11077_s20 }
 0x443   : > { %v2885_v34 = vpop.permute.xlu1 %2884 }
 0x444   : > { %v2883_v28 = vpop.permute.xlu0 %2882  ;;  %2963 = vst.msk [vmem:[#allocation3 + $0x88] sm:$0xff] %vm781_vm1, %v2885_v34 }
 0x445   : > { %2962 = vst.msk [vmem:[#allocation3 + $0x80] sm:$0xff] %vm781_vm1, %v2883_v28  ;;  %3256 = vrot.lane.b32.xlu1 %v12685_v30, %s11077_s20 }
 0x446   : > { %3254 = vrot.lane.b32.xlu0 %v12679_v46, %s11077_s20 }
 0x447   : > { %v2889_v26 = vpop.permute.xlu1 %2888 }
 0x448   : > { %v2887_v63 = vpop.permute.xlu0 %2886  ;;  %2965 = vst.msk [vmem:[#allocation3 + $0x98] sm:$0xff] %vm781_vm1, %v2889_v26 }
 0x449   : > { %2964 = vst.msk [vmem:[#allocation3 + $0x90] sm:$0xff] %vm781_vm1, %v2887_v63  ;;  %3260 = vrot.lane.b32.xlu1 %v12701_v39, %s11077_s20 }
 0x44a   : > { %3258 = vrot.lane.b32.xlu0 %v12695_v32, %s11077_s20 }
 0x44b   : > { %v2893_v47 = vpop.permute.xlu1 %2892 }
 0x44c   : > { %v2891_v53 = vpop.permute.xlu0 %2890  ;;  %2967 = vst.msk [vmem:[#allocation3 + $0xa8] sm:$0xff] %vm781_vm1, %v2893_v47 }
 0x44d   : > { %2966 = vst.msk [vmem:[#allocation3 + $0xa0] sm:$0xff] %vm781_vm1, %v2891_v53  ;;  %3264 = vrot.lane.b32.xlu1 %v12717_v54, %s11077_s20 }
 0x44e   : > { %3262 = vrot.lane.b32.xlu0 %v12711_v51, %s11077_s20 }
 0x44f   : > { %v2897_v56 = vpop.permute.xlu1 %2896 }
 0x450   : > { %v2895_v11 = vpop.permute.xlu0 %2894  ;;  %2969 = vst.msk [vmem:[#allocation3 + $0xb8] sm:$0xff] %vm781_vm1, %v2897_v56 }
 0x451   : > { %2968 = vst.msk [vmem:[#allocation3 + $0xb0] sm:$0xff] %vm781_vm1, %v2895_v11  ;;  %3268 = vrot.lane.b32.xlu1 %v12733_v59, %s11077_s20 }
 0x452   : > { %3266 = vrot.lane.b32.xlu0 %v12727_v57, %s11077_s20 }
 0x453   : > { %v2901_v34 = vpop.permute.xlu1 %2900 }
 0x454   : > { %v2899_v28 = vpop.permute.xlu0 %2898  ;;  %2971 = vst.msk [vmem:[#allocation3 + $0xc8] sm:$0xff] %vm781_vm1, %v2901_v34 }
 0x455   : > { %2970 = vst.msk [vmem:[#allocation3 + $0xc0] sm:$0xff] %vm781_vm1, %v2899_v28  ;;  %3272 = vrot.lane.b32.xlu1 %v12749_v1, %s11077_s20 }
 0x456   : > { %3270 = vrot.lane.b32.xlu0 %v12743_v61, %s11077_s20 }
 0x457   : > { %v2905_v26 = vpop.permute.xlu1 %2904 }
 0x458   : > { %v2903_v63 = vpop.permute.xlu0 %2902  ;;  %2973 = vst.msk [vmem:[#allocation3 + $0xd8] sm:$0xff] %vm781_vm1, %v2905_v26  ;;  %v13083_v26 = vld [vmem:[#allocation2 + $0x2ce] sm:$0xff] }
 0x459   : > { %2972 = vst.msk [vmem:[#allocation3 + $0xd0] sm:$0xff] %vm781_vm1, %v2903_v63  ;;  %3276 = vrot.lane.b32.xlu1 %v12765_v5, %s11077_s20 }
 0x45a   : > { %3274 = vrot.lane.b32.xlu0 %v12759_v3, %s11077_s20 }
 0x45b   : > { %v2909_v47 = vpop.permute.xlu1 %2908 }
 0x45c   : > { %v2907_v53 = vpop.permute.xlu0 %2906  ;;  %2975 = vst.msk [vmem:[#allocation3 + $0xe8] sm:$0xff] %vm781_vm1, %v2909_v47  ;;  %v13085_v47 = vld [vmem:[#allocation2 + $0x2c6] sm:$0xff] }
 0x45d   : > { %2974 = vst.msk [vmem:[#allocation3 + $0xe0] sm:$0xff] %vm781_vm1, %v2907_v53  ;;  %3280 = vrot.lane.b32.xlu1 %v12781_v9, %s11077_s20 }
 0x45e   : > { %3278 = vrot.lane.b32.xlu0 %v12775_v7, %s11077_s20 }
 0x45f   : > { %v2913_v56 = vpop.permute.xlu1 %2912 }
 0x460   : > { %v2911_v11 = vpop.permute.xlu0 %2910  ;;  %2977 = vst.msk [vmem:[#allocation3 + $0xf8] sm:$0xff] %vm781_vm1, %v2913_v56  ;;  %v13093_v56 = vld [vmem:[#allocation2 + $0x2ee] sm:$0xff] }
 0x461   : > { %2976 = vst.msk [vmem:[#allocation3 + $0xf0] sm:$0xff] %vm781_vm1, %v2911_v11  ;;  %3284 = vrot.lane.b32.xlu1 %v12797_v16, %s11077_s20 }
 0x462   : > { %3282 = vrot.lane.b32.xlu0 %v12791_v12, %s11077_s20 }
 0x463   : > { %v3045_v34 = vpop.permute.xlu1 %3044 }
 0x464   : > { %v3043_v28 = vpop.permute.xlu0 %3042  ;;  %3139 = vst.msk [vmem:[#allocation3 + $0x8] sm:$0xff] %vm974_vm2, %v3045_v34  ;;  %v13095_v34 = vld [vmem:[#allocation2 + $0x2e6] sm:$0xff] }
 0x465   : > { %3138 = vst.msk [vmem:[#allocation3] sm:$0xff] %vm974_vm2, %v3043_v28  ;;  %3288 = vrot.lane.b32.xlu1 %v12813_v41, %s11077_s20 }
 0x466   : > { %3286 = vrot.lane.b32.xlu0 %v12807_v20, %s11077_s20 }
 0x467   : > { %v3049_v63 = vpop.permute.xlu1 %3048 }
 0x468   : > { %v3047_v53 = vpop.permute.xlu0 %3046  ;;  %3141 = vst.msk [vmem:[#allocation3 + $0x18] sm:$0xff] %vm974_vm2, %v3049_v63 }
 0x469   : > { %3140 = vst.msk [vmem:[#allocation3 + $0x10] sm:$0xff] %vm974_vm2, %v3047_v53  ;;  %3292 = vrot.lane.b32.xlu1 %v13083_v26, %s11077_s20 }
 0x46a   : > { %3290 = vrot.lane.b32.xlu0 %v13085_v47, %s11077_s20 }
 0x46b   : > { %v3053_v11 = vpop.permute.xlu1 %3052 }
 0x46c   : > { %v3051_v28 = vpop.permute.xlu0 %3050  ;;  %3143 = vst.msk [vmem:[#allocation3 + $0x28] sm:$0xff] %vm974_vm2, %v3053_v11 }
 0x46d   : > { %3142 = vst.msk [vmem:[#allocation3 + $0x20] sm:$0xff] %vm974_vm2, %v3051_v28  ;;  %3296 = vrot.lane.b32.xlu1 %v13093_v56, %s11077_s20 }
 0x46e   : > { %3294 = vrot.lane.b32.xlu0 %v13095_v34, %s11077_s20 }
 0x46f   : > { %v3057_v63 = vpop.permute.xlu1 %3056 }
 0x470   : > { %v3055_v53 = vpop.permute.xlu0 %3054  ;;  %3145 = vst.msk [vmem:[#allocation3 + $0x38] sm:$0xff] %vm974_vm2, %v3057_v63 }
 0x471   : > { %3144 = vst.msk [vmem:[#allocation3 + $0x30] sm:$0xff] %vm974_vm2, %v3055_v53  ;;  %3428 = vrot.lane.b32.xlu1 %v12645_v18, %s11078_s21 }
 0x472   : > { %3426 = vrot.lane.b32.xlu0 %v12649_v22, %s11078_s21 }
 0x473   : > { %v3061_v11 = vpop.permute.xlu1 %3060 }
 0x474   : > { %v3059_v28 = vpop.permute.xlu0 %3058  ;;  %3147 = vst.msk [vmem:[#allocation3 + $0x48] sm:$0xff] %vm974_vm2, %v3061_v11 }
 0x475   : > { %3146 = vst.msk [vmem:[#allocation3 + $0x40] sm:$0xff] %vm974_vm2, %v3059_v28  ;;  %3432 = vrot.lane.b32.xlu1 %v12661_v23, %s11078_s21  ;;  %v13189_v28 = vld [vmem:[#allocation2 + $0x2c8] sm:$0xff] }
 0x476   : > { %3430 = vrot.lane.b32.xlu0 %v12665_v48, %s11078_s21 }
 0x477   : > { %v3065_v63 = vpop.permute.xlu1 %3064 }
 0x478   : > { %v3063_v53 = vpop.permute.xlu0 %3062  ;;  %3149 = vst.msk [vmem:[#allocation3 + $0x58] sm:$0xff] %vm974_vm2, %v3065_v63  ;;  %v13199_v63 = vld [vmem:[#allocation2 + $0x2e8] sm:$0xff] }
 0x479   : > { %3148 = vst.msk [vmem:[#allocation3 + $0x50] sm:$0xff] %vm974_vm2, %v3063_v53  ;;  %3436 = vrot.lane.b32.xlu1 %v12677_v25, %s11078_s21 }
 0x47a   : > { %3434 = vrot.lane.b32.xlu0 %v12681_v36, %s11078_s21 }
 0x47b   : > { %v3069_v18 = vpop.permute.xlu1 %3068 }
 0x47c   : > { %v3067_v22 = vpop.permute.xlu0 %3066  ;;  %3151 = vst.msk [vmem:[#allocation3 + $0x68] sm:$0xff] %vm974_vm2, %v3069_v18 }
 0x47d   : > { %3150 = vst.msk [vmem:[#allocation3 + $0x60] sm:$0xff] %vm974_vm2, %v3067_v22  ;;  %3440 = vrot.lane.b32.xlu1 %v12693_v37, %s11078_s21 }
 0x47e   : > { %3438 = vrot.lane.b32.xlu0 %v12697_v45, %s11078_s21 }
 0x47f   : > { %v3073_v23 = vpop.permute.xlu1 %3072 }
 0x480   : > { %v3071_v48 = vpop.permute.xlu0 %3070  ;;  %3153 = vst.msk [vmem:[#allocation3 + $0x78] sm:$0xff] %vm974_vm2, %v3073_v23  ;;  %v16328_v23 = vld [vmem:[#allocation12_spill] sm:$0xff] }
 0x481   : > { %3152 = vst.msk [vmem:[#allocation3 + $0x70] sm:$0xff] %vm974_vm2, %v3071_v48  ;;  %3444 = vrot.lane.b32.xlu1 %v12709_v38, %s11078_s21 }
 0x482   : > { %3442 = vrot.lane.b32.xlu0 %v12713_v40, %s11078_s21 }
 0x483   : > { %v3077_v25 = vpop.permute.xlu1 %3076 }
 0x484   : > { %v3075_v36 = vpop.permute.xlu0 %3074  ;;  %3155 = vst.msk [vmem:[#allocation3 + $0x88] sm:$0xff] %vm974_vm2, %v3077_v25 }
 0x485   : > { %3154 = vst.msk [vmem:[#allocation3 + $0x80] sm:$0xff] %vm974_vm2, %v3075_v36  ;;  %3448 = vrot.lane.b32.xlu1 %v12725_v52, %s11078_s21  ;;  %v16329_v36 = vld [vmem:[#allocation13_spill] sm:$0xff] }
 0x486   : > { %3446 = vrot.lane.b32.xlu0 %v12729_v55, %s11078_s21 }
 0x487   : > { %v3081_v37 = vpop.permute.xlu1 %3080 }
 0x488   : > { %v3079_v45 = vpop.permute.xlu0 %3078  ;;  %3157 = vst.msk [vmem:[#allocation3 + $0x98] sm:$0xff] %vm974_vm2, %v3081_v37  ;;  %v16330_v37 = vld [vmem:[#allocation14_spill] sm:$0xff] }
 0x489   : > { %3156 = vst.msk [vmem:[#allocation3 + $0x90] sm:$0xff] %vm974_vm2, %v3079_v45  ;;  %3452 = vrot.lane.b32.xlu1 %v12741_v58, %s11078_s21 }
 0x48a   : > { %3450 = vrot.lane.b32.xlu0 %v12745_v60, %s11078_s21 }
 0x48b   : > { %v3085_v38 = vpop.permute.xlu1 %3084 }
 0x48c   : > { %v3083_v40 = vpop.permute.xlu0 %3082  ;;  %3159 = vst.msk [vmem:[#allocation3 + $0xa8] sm:$0xff] %vm974_vm2, %v3085_v38 }
 0x48d   : > { %3158 = vst.msk [vmem:[#allocation3 + $0xa0] sm:$0xff] %vm974_vm2, %v3083_v40  ;;  %3456 = vrot.lane.b32.xlu1 %v12757_v62, %s11078_s21  ;;  %v16332_v40 = vld [vmem:[#allocation16_spill] sm:$0xff] }
 0x48e   : > { %3454 = vrot.lane.b32.xlu0 %v12761_v2, %s11078_s21 }
 0x48f   : > { %v3089_v52 = vpop.permute.xlu1 %3088 }
 0x490   : > { %v3087_v55 = vpop.permute.xlu0 %3086  ;;  %3161 = vst.msk [vmem:[#allocation3 + $0xb8] sm:$0xff] %vm974_vm2, %v3089_v52 }
 0x491   : > { %3160 = vst.msk [vmem:[#allocation3 + $0xb0] sm:$0xff] %vm974_vm2, %v3087_v55  ;;  %3460 = vrot.lane.b32.xlu1 %v12773_v4, %s11078_s21 }
 0x492   : > { %3458 = vrot.lane.b32.xlu0 %v12777_v6, %s11078_s21 }
 0x493   : > { %v3093_v58 = vpop.permute.xlu1 %3092 }
 0x494   : > { %v3091_v60 = vpop.permute.xlu0 %3090  ;;  %3163 = vst.msk [vmem:[#allocation3 + $0xc8] sm:$0xff] %vm974_vm2, %v3093_v58  ;;  %v16333_v58 = vld [vmem:[#allocation17_spill] sm:$0xff] }
 0x495   : > { %3162 = vst.msk [vmem:[#allocation3 + $0xc0] sm:$0xff] %vm974_vm2, %v3091_v60  ;;  %3464 = vrot.lane.b32.xlu1 %v12789_v8, %s11078_s21  ;;  %v16334_v60 = vld [vmem:[#allocation18_spill] sm:$0xff] }
 0x496   : > { %3462 = vrot.lane.b32.xlu0 %v12793_v10, %s11078_s21 }
 0x497   : > { %v3097_v62 = vpop.permute.xlu1 %3096 }
 0x498   : > { %v3095_v2 = vpop.permute.xlu0 %3094  ;;  %3165 = vst.msk [vmem:[#allocation3 + $0xd8] sm:$0xff] %vm974_vm2, %v3097_v62 }
 0x499   : > { %3164 = vst.msk [vmem:[#allocation3 + $0xd0] sm:$0xff] %vm974_vm2, %v3095_v2  ;;  %3468 = vrot.lane.b32.xlu1 %v12805_v13, %s11078_s21 }
 0x49a   : > { %3466 = vrot.lane.b32.xlu0 %v12809_v17, %s11078_s21 }
 0x49b   : > { %v3101_v4 = vpop.permute.xlu1 %3100 }
 0x49c   : > { %v3099_v6 = vpop.permute.xlu0 %3098  ;;  %3167 = vst.msk [vmem:[#allocation3 + $0xe8] sm:$0xff] %vm974_vm2, %v3101_v4  ;;  %v16335_v4 = vld [vmem:[#allocation19_spill] sm:$0xff] }
 0x49d   : > { %3166 = vst.msk [vmem:[#allocation3 + $0xe0] sm:$0xff] %vm974_vm2, %v3099_v6  ;;  %3472 = vrot.lane.b32.xlu1 %v12821_v24, %s11078_s21  ;;  %v16327_v24 = vld [vmem:[#allocation11_spill] sm:$0xff]  ;;  %v16336_v6 = vld [vmem:[#allocation20_spill] sm:$0xff] }
 0x49e   : > { %3470 = vrot.lane.b32.xlu0 %v12823_v42, %s11078_s21  ;;  %v13187_v42 = vld [vmem:[#allocation2 + $0x2d0] sm:$0xff] }
 0x49f   : > { %v3105_v8 = vpop.permute.xlu1 %3104 }
 0x4a0   : > { %v3103_v10 = vpop.permute.xlu0 %3102  ;;  %3169 = vst.msk [vmem:[#allocation3 + $0xf8] sm:$0xff] %vm974_vm2, %v3105_v8 }
 0x4a1   : > { %3168 = vst.msk [vmem:[#allocation3 + $0xf0] sm:$0xff] %vm974_vm2, %v3103_v10  ;;  %3476 = vrot.lane.b32.xlu1 %v12831_v43, %s11078_s21 }
 0x4a2   : > { %3474 = vrot.lane.b32.xlu0 %v12833_v44, %s11078_s21  ;;  %v13197_v44 = vld [vmem:[#allocation2 + $0x2f0] sm:$0xff] }
 0x4a3   : > { %v3237_v13 = vpop.permute.xlu1 %3236 }
 0x4a4   : > { %v3235_v17 = vpop.permute.xlu0 %3234  ;;  %3331 = vst.msk [vmem:[#allocation3 + $0x8] sm:$0xff] %vm1167_vm3, %v3237_v13  ;;  %v16337_v13 = vld [vmem:[#allocation21_spill] sm:$0xff] }
 0x4a5   : > { %3330 = vst.msk [vmem:[#allocation3] sm:$0xff] %vm1167_vm3, %v3235_v17  ;;  %3480 = vrot.lane.b32.xlu1 %v12841_v50, %s11078_s21  ;;  %v16338_v17 = vld [vmem:[#allocation22_spill] sm:$0xff] }
 0x4a6   : > { %3478 = vrot.lane.b32.xlu0 %v16327_v24, %s11078_s21 }
 0x4a7   : > { %v3241_v11 = vpop.permute.xlu1 %3240 }
 0x4a8   : > { %v3239_v43 = vpop.permute.xlu0 %3238  ;;  %3333 = vst.msk [vmem:[#allocation3 + $0x18] sm:$0xff] %vm1167_vm3, %v3241_v11 }
 0x4a9   : > { %3332 = vst.msk [vmem:[#allocation3 + $0x10] sm:$0xff] %vm1167_vm3, %v3239_v43  ;;  %3484 = vrot.lane.b32.xlu1 %v13187_v42, %s11078_s21  ;;  %v16339_v43 = vld [vmem:[#allocation23_spill] sm:$0xff] }
 0x4aa   : > { %3482 = vrot.lane.b32.xlu0 %v13189_v28, %s11078_s21 }
 0x4ab   : > { %v3245_v50 = vpop.permute.xlu1 %3244 }
 0x4ac   : > { %v3243_v53 = vpop.permute.xlu0 %3242  ;;  %3335 = vst.msk [vmem:[#allocation3 + $0x28] sm:$0xff] %vm1167_vm3, %v3245_v50  ;;  %v16340_v50 = vld [vmem:[#allocation24_spill] sm:$0xff] }
 0x4ad   : > { %3334 = vst.msk [vmem:[#allocation3 + $0x20] sm:$0xff] %vm1167_vm3, %v3243_v53  ;;  %3488 = vrot.lane.b32.xlu1 %v13197_v44, %s11078_s21 }
 0x4ae   : > { %3486 = vrot.lane.b32.xlu0 %v13199_v63, %s11078_s21 }
 0x4af   : > { %v3249_v18 = vpop.permute.xlu1 %3248 }
 0x4b0   : > { %v3247_v22 = vpop.permute.xlu0 %3246  ;;  %3337 = vst.msk [vmem:[#allocation3 + $0x38] sm:$0xff] %vm1167_vm3, %v3249_v18 }
 0x4b1   : > { %3336 = vst.msk [vmem:[#allocation3 + $0x30] sm:$0xff] %vm1167_vm3, %v3247_v22  ;;  %3620 = vrot.lane.b32.xlu1 %v12859_v14, %s11079_s22  ;;  %v16331_v14 = vld [vmem:[#allocation15_spill] sm:$0xff]  ;;  %v16341_v22 = vld [vmem:[#allocation25_spill] sm:$0xff] }
 0x4b2   : > { %3618 = vrot.lane.b32.xlu0 %v16328_v23, %s11079_s22  ;;  %v16342_v23 = vld [vmem:[#allocation26_spill] sm:$0xff] }
 0x4b3   : > { %v3253_v48 = vpop.permute.xlu1 %3252 }
 0x4b4   : > { %v3251_v25 = vpop.permute.xlu0 %3250  ;;  %3339 = vst.msk [vmem:[#allocation3 + $0x48] sm:$0xff] %vm1167_vm3, %v3253_v48 }
 0x4b5   : > { %3338 = vst.msk [vmem:[#allocation3 + $0x40] sm:$0xff] %vm1167_vm3, %v3251_v25  ;;  %3624 = vrot.lane.b32.xlu1 %v16329_v36, %s11079_s22  ;;  %v16343_v36 = vld [vmem:[#allocation27_spill] sm:$0xff] }
 0x4b6   : > { %3622 = vrot.lane.b32.xlu0 %v16330_v37, %s11079_s22  ;;  %v16344_v37 = vld [vmem:[#allocation28_spill] sm:$0xff] }
 0x4b7   : > { %v3257_v45 = vpop.permute.xlu1 %3256 }
 0x4b8   : > { %v3255_v38 = vpop.permute.xlu0 %3254  ;;  %3341 = vst.msk [vmem:[#allocation3 + $0x58] sm:$0xff] %vm1167_vm3, %v3257_v45 }
 0x4b9   : > { %3340 = vst.msk [vmem:[#allocation3 + $0x50] sm:$0xff] %vm1167_vm3, %v3255_v38  ;;  %3628 = vrot.lane.b32.xlu1 %v16331_v14, %s11079_s22  ;;  %v16345_v14 = vld [vmem:[#allocation29_spill] sm:$0xff] }
 0x4ba   : > { %3626 = vrot.lane.b32.xlu0 %v16332_v40, %s11079_s22  ;;  %v16346_v40 = vld [vmem:[#allocation30_spill] sm:$0xff] }
 0x4bb   : > { %v3261_v52 = vpop.permute.xlu1 %3260 }
 0x4bc   : > { %v3259_v55 = vpop.permute.xlu0 %3258  ;;  %3343 = vst.msk [vmem:[#allocation3 + $0x68] sm:$0xff] %vm1167_vm3, %v3261_v52 }
 0x4bd   : > { %3342 = vst.msk [vmem:[#allocation3 + $0x60] sm:$0xff] %vm1167_vm3, %v3259_v55  ;;  %3632 = vrot.lane.b32.xlu1 %v16333_v58, %s11079_s22  ;;  %v16347_v58 = vld [vmem:[#allocation31_spill] sm:$0xff] }
 0x4be   : > { %3630 = vrot.lane.b32.xlu0 %v16334_v60, %s11079_s22  ;;  %v16348_v60 = vld [vmem:[#allocation32_spill] sm:$0xff] }
 0x4bf   : > { %v3265_v62 = vpop.permute.xlu1 %3264 }
 0x4c0   : > { %v3263_v2 = vpop.permute.xlu0 %3262  ;;  %3345 = vst.msk [vmem:[#allocation3 + $0x78] sm:$0xff] %vm1167_vm3, %v3265_v62 }
 0x4c1   : > { %3344 = vst.msk [vmem:[#allocation3 + $0x70] sm:$0xff] %vm1167_vm3, %v3263_v2  ;;  %3636 = vrot.lane.b32.xlu1 %v16335_v4, %s11079_s22  ;;  %v16349_v4 = vld [vmem:[#allocation33_spill] sm:$0xff] }
 0x4c2   : > { %3634 = vrot.lane.b32.xlu0 %v16336_v6, %s11079_s22  ;;  %v16350_v6 = vld [vmem:[#allocation34_spill] sm:$0xff] }
 0x4c3   : > { %v3269_v8 = vpop.permute.xlu1 %3268 }
 0x4c4   : > { %v3267_v10 = vpop.permute.xlu0 %3266  ;;  %3347 = vst.msk [vmem:[#allocation3 + $0x88] sm:$0xff] %vm1167_vm3, %v3269_v8 }
 0x4c5   : > { %3346 = vst.msk [vmem:[#allocation3 + $0x80] sm:$0xff] %vm1167_vm3, %v3267_v10  ;;  %3640 = vrot.lane.b32.xlu1 %v16337_v13, %s11079_s22 }
 0x4c6   : > { %3638 = vrot.lane.b32.xlu0 %v16338_v17, %s11079_s22 }
 0x4c7   : > { %v3273_v24 = vpop.permute.xlu1 %3272 }
 0x4c8   : > { %v3271_v11 = vpop.permute.xlu0 %3270  ;;  %3349 = vst.msk [vmem:[#allocation3 + $0x98] sm:$0xff] %vm1167_vm3, %v3273_v24  ;;  %v13291_v24 = vld [vmem:[#allocation2 + $0x2d2] sm:$0xff] }
 0x4c9   : > { %3348 = vst.msk [vmem:[#allocation3 + $0x90] sm:$0xff] %vm1167_vm3, %v3271_v11  ;;  %3644 = vrot.lane.b32.xlu1 %v16339_v43, %s11079_s22  ;;  %v13293_v43 = vld [vmem:[#allocation2 + $0x2ca] sm:$0xff] }
 0x4ca   : > { %3642 = vrot.lane.b32.xlu0 %v16340_v50, %s11079_s22 }
 0x4cb   : > { %v3277_v53 = vpop.permute.xlu1 %3276 }
 0x4cc   : > { %v3275_v18 = vpop.permute.xlu0 %3274  ;;  %3351 = vst.msk [vmem:[#allocation3 + $0xa8] sm:$0xff] %vm1167_vm3, %v3277_v53 }
 0x4cd   : > { %3350 = vst.msk [vmem:[#allocation3 + $0xa0] sm:$0xff] %vm1167_vm3, %v3275_v18  ;;  %3648 = vrot.lane.b32.xlu1 %v16341_v22, %s11079_s22 }
 0x4ce   : > { %3646 = vrot.lane.b32.xlu0 %v16342_v23, %s11079_s22 }
 0x4cf   : > { %v3281_v48 = vpop.permute.xlu1 %3280 }
 0x4d0   : > { %v3279_v25 = vpop.permute.xlu0 %3278  ;;  %3353 = vst.msk [vmem:[#allocation3 + $0xb8] sm:$0xff] %vm1167_vm3, %v3281_v48 }
 0x4d1   : > { %3352 = vst.msk [vmem:[#allocation3 + $0xb0] sm:$0xff] %vm1167_vm3, %v3279_v25  ;;  %3652 = vrot.lane.b32.xlu1 %v16343_v36, %s11079_s22  ;;  %v3775_v36 = vld [vmem:[#allocation2 + $0x306] sm:$0xff] }
 0x4d2   : > { %3650 = vrot.lane.b32.xlu0 %v16344_v37, %s11079_s22 }
 0x4d3   : > { %v3285_v45 = vpop.permute.xlu1 %3284 }
 0x4d4   : > { %v3283_v38 = vpop.permute.xlu0 %3282  ;;  %3355 = vst.msk [vmem:[#allocation3 + $0xc8] sm:$0xff] %vm1167_vm3, %v3285_v45  ;;  %v3777_v45 = vld [vmem:[#allocation2 + $0x326] sm:$0xff] }
 0x4d5   : > { %3354 = vst.msk [vmem:[#allocation3 + $0xc0] sm:$0xff] %vm1167_vm3, %v3283_v38  ;;  %3656 = vrot.lane.b32.xlu1 %v16345_v14, %s11079_s22  ;;  %v3939_v14 = vld [vmem:[#allocation2 + $0x148] sm:$0xff] }
 0x4d6   : > { %3654 = vrot.lane.b32.xlu0 %v16346_v40, %s11079_s22 }
 0x4d7   : > { %v3289_v52 = vpop.permute.xlu1 %3288 }
 0x4d8   : > { %v3287_v55 = vpop.permute.xlu0 %3286  ;;  %3357 = vst.msk [vmem:[#allocation3 + $0xd8] sm:$0xff] %vm1167_vm3, %v3289_v52  ;;  %v3942_v52 = vld [vmem:[#allocation2 + $0x170] sm:$0xff] }
 0x4d9   : > { %3356 = vst.msk [vmem:[#allocation3 + $0xd0] sm:$0xff] %vm1167_vm3, %v3287_v55  ;;  %3660 = vrot.lane.b32.xlu1 %v16347_v58, %s11079_s22  ;;  %v3941_v58 = vld [vmem:[#allocation2 + $0x168] sm:$0xff] }
 0x4da   : > { %3658 = vrot.lane.b32.xlu0 %v16348_v60, %s11079_s22 }
 0x4db   : > { %v3293_v62 = vpop.permute.xlu1 %3292 }
 0x4dc   : > { %v3291_v2 = vpop.permute.xlu0 %3290  ;;  %3359 = vst.msk [vmem:[#allocation3 + $0xe8] sm:$0xff] %vm1167_vm3, %v3293_v62  ;;  %v3944_v62 = vld [vmem:[#allocation2 + $0x190] sm:$0xff] }
 0x4dd   : > { %3358 = vst.msk [vmem:[#allocation3 + $0xe0] sm:$0xff] %vm1167_vm3, %v3291_v2  ;;  %3664 = vrot.lane.b32.xlu1 %v16349_v4, %s11079_s22  ;;  %v13411_v4 = vld [vmem:[#allocation2 + $0x188] sm:$0xff] }
 0x4de   : > { %3662 = vrot.lane.b32.xlu0 %v16350_v6, %s11079_s22 }
 0x4df   : > { %v3297_v8 = vpop.permute.xlu1 %3296 }
 0x4e0   : > { %v3295_v10 = vpop.permute.xlu0 %3294  ;;  %3361 = vst.msk [vmem:[#allocation3 + $0xf8] sm:$0xff] %vm1167_vm3, %v3297_v8  ;;  %v3946_v8 = vld [vmem:[#allocation2 + $0x1b0] sm:$0xff] }
 0x4e1   : > { %3360 = vst.msk [vmem:[#allocation3 + $0xf0] sm:$0xff] %vm1167_vm3, %v3295_v10  ;;  %3668 = vrot.lane.b32.xlu1 %v12979_v0, %s11079_s22 }
 0x4e2   : > { %3666 = vrot.lane.b32.xlu0 %v12981_v27, %s11079_s22  ;;  %v13301_v27 = vld [vmem:[#allocation2 + $0x2f2] sm:$0xff] }
 0x4e3   : > { %v3429_v13 = vpop.permute.xlu1 %3428 }
 0x4e4   : > { %v3427_v17 = vpop.permute.xlu0 %3426  ;;  %3523 = vst.msk [vmem:[#allocation3 + $0x8] sm:$0xff] %vm1360_vm4, %v3429_v13  ;;  %v3945_v13 = vld [vmem:[#allocation2 + $0x1a8] sm:$0xff] }
 0x4e5   : > { %3522 = vst.msk [vmem:[#allocation3] sm:$0xff] %vm1360_vm4, %v3427_v17  ;;  %3672 = vrot.lane.b32.xlu1 %v12989_v21, %s11079_s22 }
 0x4e6   : > { %3670 = vrot.lane.b32.xlu0 %v12991_v29, %s11079_s22  ;;  %v13303_v29 = vld [vmem:[#allocation2 + $0x2ea] sm:$0xff] }
 0x4e7   : > { %v3433_v11 = vpop.permute.xlu1 %3432 }
 0x4e8   : > { %v3431_v0 = vpop.permute.xlu0 %3430  ;;  %3525 = vst.msk [vmem:[#allocation3 + $0x18] sm:$0xff] %vm1360_vm4, %v3433_v11  ;;  %v3948_v11 = vld [vmem:[#allocation2 + $0x1d0] sm:$0xff] }
 0x4e9   : > { %3524 = vst.msk [vmem:[#allocation3 + $0x10] sm:$0xff] %vm1360_vm4, %v3431_v0  ;;  %3676 = vrot.lane.b32.xlu1 %v13291_v24, %s11079_s22 }
 0x4ea   : > { %3674 = vrot.lane.b32.xlu0 %v13293_v43, %s11079_s22 }
 0x4eb   : > { %v3437_v21 = vpop.permute.xlu1 %3436 }
 0x4ec   : > { %v3435_v50 = vpop.permute.xlu0 %3434  ;;  %3527 = vst.msk [vmem:[#allocation3 + $0x28] sm:$0xff] %vm1360_vm4, %v3437_v21  ;;  %v3947_v21 = vld [vmem:[#allocation2 + $0x1c8] sm:$0xff] }
 0x4ed   : > { %3526 = vst.msk [vmem:[#allocation3 + $0x20] sm:$0xff] %vm1360_vm4, %v3435_v50  ;;  %3680 = vrot.lane.b32.xlu1 %v13301_v27, %s11079_s22 }
 0x4ee   : > { %3678 = vrot.lane.b32.xlu0 %v13303_v29, %s11079_s22 }
 0x4ef   : > { %v3441_v53 = vpop.permute.xlu1 %3440 }
 0x4f0   : > { %v3439_v18 = vpop.permute.xlu0 %3438  ;;  %3529 = vst.msk [vmem:[#allocation3 + $0x38] sm:$0xff] %vm1360_vm4, %v3441_v53  ;;  %v3950_v53 = vld [vmem:[#allocation2 + $0x1f0] sm:$0xff] }
 0x4f1   : > { %3528 = vst.msk [vmem:[#allocation3 + $0x30] sm:$0xff] %vm1360_vm4, %v3439_v18  ;;  %3813 = vrot.lane.b32.xlu1 %v12639_v15, %s11080_s23 }
 0x4f2   : > { %3811 = vrot.lane.b32.xlu0 %v12635_v31, %s11080_s23 }
 0x4f3   : > { %v3445_v22 = vpop.permute.xlu1 %3444 }
 0x4f4   : > { %v3443_v23 = vpop.permute.xlu0 %3442  ;;  %3531 = vst.msk [vmem:[#allocation3 + $0x48] sm:$0xff] %vm1360_vm4, %v3445_v22  ;;  %v3949_v22 = vld [vmem:[#allocation2 + $0x1e8] sm:$0xff] }
 0x4f5   : > { %3530 = vst.msk [vmem:[#allocation3 + $0x40] sm:$0xff] %vm1360_vm4, %v3443_v23  ;;  %3817 = vrot.lane.b32.xlu1 %v12653_v35, %s11080_s23 }
 0x4f6   : > { %3815 = vrot.lane.b32.xlu0 %v12647_v19, %s11080_s23 }
 0x4f7   : > { %v3449_v48 = vpop.permute.xlu1 %3448 }
 0x4f8   : > { %v3447_v25 = vpop.permute.xlu0 %3446  ;;  %3533 = vst.msk [vmem:[#allocation3 + $0x58] sm:$0xff] %vm1360_vm4, %v3449_v48  ;;  %v3952_v48 = vld [vmem:[#allocation2 + $0x210] sm:$0xff] }
 0x4f9   : > { %3532 = vst.msk [vmem:[#allocation3 + $0x50] sm:$0xff] %vm1360_vm4, %v3447_v25  ;;  %3821 = vrot.lane.b32.xlu1 %v12669_v33, %s11080_s23 }
 0x4fa   : > { %3819 = vrot.lane.b32.xlu0 %v12663_v49, %s11080_s23 }
 0x4fb   : > { %v3453_v31 = vpop.permute.xlu1 %3452 }
 0x4fc   : > { %v3451_v15 = vpop.permute.xlu0 %3450  ;;  %3535 = vst.msk [vmem:[#allocation3 + $0x68] sm:$0xff] %vm1360_vm4, %v3453_v31  ;;  %v3951_v31 = vld [vmem:[#allocation2 + $0x208] sm:$0xff] }
 0x4fd   : > { %3534 = vst.msk [vmem:[#allocation3 + $0x60] sm:$0xff] %vm1360_vm4, %v3451_v15  ;;  %3825 = vrot.lane.b32.xlu1 %v12685_v30, %s11080_s23 }
 0x4fe   : > { %3823 = vrot.lane.b32.xlu0 %v12679_v46, %s11080_s23 }
 0x4ff   : > { %v3457_v19 = vpop.permute.xlu1 %3456 }
 0x500   : > { %v3455_v35 = vpop.permute.xlu0 %3454  ;;  %3537 = vst.msk [vmem:[#allocation3 + $0x78] sm:$0xff] %vm1360_vm4, %v3457_v19  ;;  %v3954_v19 = vld [vmem:[#allocation2 + $0x230] sm:$0xff] }
 0x501   : > { %3536 = vst.msk [vmem:[#allocation3 + $0x70] sm:$0xff] %vm1360_vm4, %v3455_v35  ;;  %3829 = vrot.lane.b32.xlu1 %v12701_v39, %s11080_s23 }
 0x502   : > { %3827 = vrot.lane.b32.xlu0 %v12695_v32, %s11080_s23 }
 0x503   : > { %v3461_v49 = vpop.permute.xlu1 %3460 }
 0x504   : > { %v3459_v33 = vpop.permute.xlu0 %3458  ;;  %3539 = vst.msk [vmem:[#allocation3 + $0x88] sm:$0xff] %vm1360_vm4, %v3461_v49  ;;  %v3953_v49 = vld [vmem:[#allocation2 + $0x228] sm:$0xff] }
 0x505   : > { %3538 = vst.msk [vmem:[#allocation3 + $0x80] sm:$0xff] %vm1360_vm4, %v3459_v33  ;;  %3833 = vrot.lane.b32.xlu1 %v12717_v54, %s11080_s23 }
 0x506   : > { %3831 = vrot.lane.b32.xlu0 %v12711_v51, %s11080_s23 }
 0x507   : > { %v3465_v46 = vpop.permute.xlu1 %3464 }
 0x508   : > { %v3463_v30 = vpop.permute.xlu0 %3462  ;;  %3541 = vst.msk [vmem:[#allocation3 + $0x98] sm:$0xff] %vm1360_vm4, %v3465_v46  ;;  %v10214_v46 = vld [vmem:[%s16177_s1 + $0x28] sm:$0xff] }
 0x509   : > { %3540 = vst.msk [vmem:[#allocation3 + $0x90] sm:$0xff] %vm1360_vm4, %v3463_v30  ;;  %3837 = vrot.lane.b32.xlu1 %v12733_v59, %s11080_s23  ;;  %v10215_v30 = vld [vmem:[%s16177_s1 + $0x30] sm:$0xff] }
 0x50a   : > { %3835 = vrot.lane.b32.xlu0 %v12727_v57, %s11080_s23 }
 0x50b   : > { %v3469_v32 = vpop.permute.xlu1 %3468 }
 0x50c   : > { %v3467_v39 = vpop.permute.xlu0 %3466  ;;  %3543 = vst.msk [vmem:[#allocation3 + $0xa8] sm:$0xff] %vm1360_vm4, %v3469_v32  ;;  %v3956_v32 = vld [vmem:[#allocation2 + $0x250] sm:$0xff] }
 0x50d   : > { %3542 = vst.msk [vmem:[#allocation3 + $0xa0] sm:$0xff] %vm1360_vm4, %v3467_v39  ;;  %3841 = vrot.lane.b32.xlu1 %v12749_v1, %s11080_s23  ;;  %v10872_v39 = vpack.c.bf16 %v10215_v30, %v10214_v46  ;;  %v4144_v46 = vld [vmem:[#allocation2 + $0x212] sm:$0xff] }
 0x50e   : > { %3839 = vrot.lane.b32.xlu0 %v12743_v61, %s11080_s23 }
 0x50f   : > { %v3473_v51 = vpop.permute.xlu1 %3472  ;;  %10873 = vmatprep.subr.bf16.mxu1 %v10872_v39 }
 0x510   : > { %v3471_v54 = vpop.permute.xlu0 %3470  ;;  %3545 = vst.msk [vmem:[#allocation3 + $0xb8] sm:$0xff] %vm1360_vm4, %v3473_v51  ;;  %10875 = vmatpush3.bf16.msra.mxu1 %v10872_v39 }
 0x511   : > { %3544 = vst.msk [vmem:[#allocation3 + $0xb0] sm:$0xff] %vm1360_vm4, %v3471_v54  ;;  %3845 = vrot.lane.b32.xlu1 %v12765_v5, %s11080_s23  ;;  %v3955_v54 = vld [vmem:[#allocation2 + $0x248] sm:$0xff] }
 0x512   : > { %3843 = vrot.lane.b32.xlu0 %v12759_v3, %s11080_s23 }
 0x513   : > { %v3477_v57 = vpop.permute.xlu1 %3476 }
 0x514   : > { %v3475_v59 = vpop.permute.xlu0 %3474  ;;  %3547 = vst.msk [vmem:[#allocation3 + $0xc8] sm:$0xff] %vm1360_vm4, %v3477_v57 }
 0x515   : > { %3546 = vst.msk [vmem:[#allocation3 + $0xc0] sm:$0xff] %vm1360_vm4, %v3475_v59  ;;  %3849 = vrot.lane.b32.xlu1 %v12781_v9, %s11080_s23  ;;  %v3958_v59 = vld [vmem:[#allocation2 + $0x270] sm:$0xff] }
 0x516   : > { %3847 = vrot.lane.b32.xlu0 %v12775_v7, %s11080_s23 }
 0x517   : > { %v3481_v61 = vpop.permute.xlu1 %3480 }
 0x518   : > { %v3479_v1 = vpop.permute.xlu0 %3478  ;;  %3549 = vst.msk [vmem:[#allocation3 + $0xd8] sm:$0xff] %vm1360_vm4, %v3481_v61 }
 0x519   : > { %3548 = vst.msk [vmem:[#allocation3 + $0xd0] sm:$0xff] %vm1360_vm4, %v3479_v1  ;;  %3853 = vrot.lane.b32.xlu1 %v12797_v16, %s11080_s23  ;;  %v3957_v1 = vld [vmem:[#allocation2 + $0x268] sm:$0xff] }
 0x51a   : > { %3851 = vrot.lane.b32.xlu0 %v12791_v12, %s11080_s23 }
 0x51b   : > { %v3485_v3 = vpop.permute.xlu1 %3484 }
 0x51c   : > { %v3483_v5 = vpop.permute.xlu0 %3482  ;;  %3551 = vst.msk [vmem:[#allocation3 + $0xe8] sm:$0xff] %vm1360_vm4, %v3485_v3 }
 0x51d   : > { %3550 = vst.msk [vmem:[#allocation3 + $0xe0] sm:$0xff] %vm1360_vm4, %v3483_v5  ;;  %3857 = vrot.lane.b32.xlu1 %v12813_v41, %s11080_s23  ;;  %v10216_v5 = vld [vmem:[%s16177_s1 + $0x38] sm:$0xff] }
 0x51e   : > { %3855 = vrot.lane.b32.xlu0 %v12807_v20, %s11080_s23  ;;  %v3776_v20 = vld [vmem:[#allocation2 + $0x30e] sm:$0xff] }
 0x51f   : > { %v3489_v7 = vpop.permute.xlu1 %3488 }
 0x520   : > { %v3487_v9 = vpop.permute.xlu0 %3486  ;;  %3553 = vst.msk [vmem:[#allocation3 + $0xf8] sm:$0xff] %vm1360_vm4, %v3489_v7  ;;  %v10217_v7 = vld [vmem:[%s16177_s1 + $0x40] sm:$0xff] }
 0x521   : > { %3552 = vst.msk [vmem:[#allocation3 + $0xf0] sm:$0xff] %vm1360_vm4, %v3487_v9  ;;  %3861 = vrot.lane.b32.xlu1 %v13083_v26, %s11080_s23  ;;  %v3778_v26 = vld [vmem:[#allocation2 + $0x32e] sm:$0xff] }
 0x522   : > { %3859 = vrot.lane.b32.xlu0 %v13085_v47, %s11080_s23  ;;  %v3960_v9 = vld [vmem:[#allocation2 + $0x290] sm:$0xff] }
 0x523   : > { %v3621_v12 = vpop.permute.xlu1 %3620 }
 0x524   : > { %v3619_v16 = vpop.permute.xlu0 %3618  ;;  %3715 = vst.msk [vmem:[#allocation3 + $0x8] sm:$0xff] %vm1553_vm5, %v3621_v12  ;;  %v10876_v12 = vpack.c.bf16 %v10217_v7, %v10216_v5  ;;  %v4150_v7 = vld [vmem:[#allocation2 + $0x272] sm:$0xff] }
 0x525   : > { %3714 = vst.msk [vmem:[#allocation3] sm:$0xff] %vm1553_vm5, %v3619_v16  ;;  %3865 = vrot.lane.b32.xlu1 %v13093_v56, %s11080_s23  ;;  %v3940_v56 = vld [vmem:[#allocation2 + $0x150] sm:$0xff] }
 0x526   : > { %3863 = vrot.lane.b32.xlu0 %v13095_v34, %s11080_s23  ;;  %10877 = vmatprep.subr.bf16.mxu1 %v10876_v12 }
 0x527   : > { %v3625_v41 = vpop.permute.xlu1 %3624  ;;  %10879 = vmatpush3.bf16.msra.mxu1 %v10876_v12  ;;  %v4149_v12 = vld [vmem:[#allocation2 + $0x26a] sm:$0xff] }
 0x528   : > { %v3623_v37 = vpop.permute.xlu0 %3622  ;;  %3717 = vst.msk [vmem:[#allocation3 + $0x18] sm:$0xff] %vm1553_vm5, %v3625_v41 }
 0x529   : > { %3716 = vst.msk [vmem:[#allocation3 + $0x10] sm:$0xff] %vm1553_vm5, %v3623_v37  ;;  %3869 = vrot.lane.b32.xlu1 %v3776_v20, %s11080_s23  ;;  %v3959_v20 = vld [vmem:[#allocation2 + $0x288] sm:$0xff] }
 0x52a   : > { %3867 = vrot.lane.b32.xlu0 %v3775_v36, %s11080_s23  ;;  %v3962_v36 = vld [vmem:[#allocation2 + $0x2b0] sm:$0xff] }
 0x52b   : > { %v3629_v47 = vpop.permute.xlu1 %3628 }
 0x52c   : > { %v3627_v38 = vpop.permute.xlu0 %3626  ;;  %3719 = vst.msk [vmem:[#allocation3 + $0x28] sm:$0xff] %vm1553_vm5, %v3629_v47 }
 0x52d   : > { %3718 = vst.msk [vmem:[#allocation3 + $0x20] sm:$0xff] %vm1553_vm5, %v3627_v38  ;;  %3873 = vrot.lane.b32.xlu1 %v3778_v26, %s11080_s23  ;;  %v3961_v26 = vld [vmem:[#allocation2 + $0x2a8] sm:$0xff] }
 0x52e   : > { %3871 = vrot.lane.b32.xlu0 %v3777_v45, %s11080_s23 }
 0x52f   : > { %v3633_v34 = vpop.permute.xlu1 %3632 }
 0x530   : > { %v3631_v40 = vpop.permute.xlu0 %3630  ;;  %3721 = vst.msk [vmem:[#allocation3 + $0x38] sm:$0xff] %vm1553_vm5, %v3633_v34 }
 0x531   : > { %3720 = vst.msk [vmem:[#allocation3 + $0x30] sm:$0xff] %vm1553_vm5, %v3631_v40  ;;  %4005 = vrot.lane.b32.xlu1 %v3940_v56, %s11081_s29  ;;  %v10218_v56 = vld [vmem:[%s16177_s1 + $0x48] sm:$0xf] }
 0x532   : > { %4003 = vrot.lane.b32.xlu0 %v3939_v14, %s11081_s29  ;;  %10628 = vmatprep.subr.msk.mxu1 %vm2300_vm7, %v10218_v56 }
 0x533   : > { %v3637_v55 = vpop.permute.xlu1 %3636  ;;  %10629 = vmatpush3.msk.msra.mxu1 %vm2300_vm7, %v10218_v56 }
 0x534   : > { %v3635_v60 = vpop.permute.xlu0 %3634  ;;  %3723 = vst.msk [vmem:[#allocation3 + $0x48] sm:$0xff] %vm1553_vm5, %v3637_v55  ;;  %v3970_v55 = vld [vmem:[#allocation2 + $0x330] sm:$0xff] }
 0x535   : > { %3722 = vst.msk [vmem:[#allocation3 + $0x40] sm:$0xff] %vm1553_vm5, %v3635_v60  ;;  %4009 = vrot.lane.b32.xlu1 %v3942_v52, %s11081_s29  ;;  %v3967_v52 = vld [vmem:[#allocation2 + $0x308] sm:$0xff] }
 0x536   : > { %4007 = vrot.lane.b32.xlu0 %v3941_v58, %s11081_s29  ;;  %v3969_v60 = vld [vmem:[#allocation2 + $0x328] sm:$0xff] }
 0x537   : > { %v3641_v2 = vpop.permute.xlu1 %3640 }
 0x538   : > { %v3639_v6 = vpop.permute.xlu0 %3638  ;;  %3725 = vst.msk [vmem:[#allocation3 + $0x58] sm:$0xff] %vm1553_vm5, %v3641_v2  ;;  %v4131_v2 = vld [vmem:[#allocation2 + $0x14a] sm:$0xff] }
 0x539   : > { %3724 = vst.msk [vmem:[#allocation3 + $0x50] sm:$0xff] %vm1553_vm5, %v3639_v6  ;;  %4013 = vrot.lane.b32.xlu1 %v3944_v62, %s11081_s29 }
 0x53a   : > { %4011 = vrot.lane.b32.xlu0 %v13411_v4, %s11081_s29 }
 0x53b   : > { %v3645_v10 = vpop.permute.xlu1 %3644 }
 0x53c   : > { %v3643_v17 = vpop.permute.xlu0 %3642  ;;  %3727 = vst.msk [vmem:[#allocation3 + $0x68] sm:$0xff] %vm1553_vm5, %v3645_v10 }
 0x53d   : > { %3726 = vst.msk [vmem:[#allocation3 + $0x60] sm:$0xff] %vm1553_vm5, %v3643_v17  ;;  %4017 = vrot.lane.b32.xlu1 %v3946_v8, %s11081_s29  ;;  %v4134_v8 = vld [vmem:[#allocation2 + $0x172] sm:$0xff] }
 0x53e   : > { %4015 = vrot.lane.b32.xlu0 %v3945_v13, %s11081_s29  ;;  %v4133_v13 = vld [vmem:[#allocation2 + $0x16a] sm:$0xff] }
 0x53f   : > { %v3649_v0 = vpop.permute.xlu1 %3648 }
 0x540   : > { %v3647_v50 = vpop.permute.xlu0 %3646  ;;  %3729 = vst.msk [vmem:[#allocation3 + $0x78] sm:$0xff] %vm1553_vm5, %v3649_v0 }
 0x541   : > { %3728 = vst.msk [vmem:[#allocation3 + $0x70] sm:$0xff] %vm1553_vm5, %v3647_v50  ;;  %4021 = vrot.lane.b32.xlu1 %v3948_v11, %s11081_s29  ;;  %v4136_v11 = vld [vmem:[#allocation2 + $0x192] sm:$0xff] }
 0x542   : > { %4019 = vrot.lane.b32.xlu0 %v3947_v21, %s11081_s29  ;;  %v4135_v21 = vld [vmem:[#allocation2 + $0x18a] sm:$0xff] }
 0x543   : > { %v3653_v18 = vpop.permute.xlu1 %3652 }
 0x544   : > { %v3651_v23 = vpop.permute.xlu0 %3650  ;;  %3731 = vst.msk [vmem:[#allocation3 + $0x88] sm:$0xff] %vm1553_vm5, %v3653_v18 }
 0x545   : > { %3730 = vst.msk [vmem:[#allocation3 + $0x80] sm:$0xff] %vm1553_vm5, %v3651_v23  ;;  %4025 = vrot.lane.b32.xlu1 %v3950_v53, %s11081_s29  ;;  %v4138_v53 = vld [vmem:[#allocation2 + $0x1b2] sm:$0xff] }
 0x546   : > { %4023 = vrot.lane.b32.xlu0 %v3949_v22, %s11081_s29  ;;  %v4137_v22 = vld [vmem:[#allocation2 + $0x1aa] sm:$0xff] }
 0x547   : > { %v3657_v25 = vpop.permute.xlu1 %3656 }
 0x548   : > { %v3655_v15 = vpop.permute.xlu0 %3654  ;;  %3733 = vst.msk [vmem:[#allocation3 + $0x98] sm:$0xff] %vm1553_vm5, %v3657_v25 }
 0x549   : > { %3732 = vst.msk [vmem:[#allocation3 + $0x90] sm:$0xff] %vm1553_vm5, %v3655_v15  ;;  %4029 = vrot.lane.b32.xlu1 %v3952_v48, %s11081_s29  ;;  %v4140_v48 = vld [vmem:[#allocation2 + $0x1d2] sm:$0xff] }
 0x54a   : > { %4027 = vrot.lane.b32.xlu0 %v3951_v31, %s11081_s29  ;;  %v4139_v31 = vld [vmem:[#allocation2 + $0x1ca] sm:$0xff] }
 0x54b   : > { %v3661_v35 = vpop.permute.xlu1 %3660 }
 0x54c   : > { %v3659_v33 = vpop.permute.xlu0 %3658  ;;  %3735 = vst.msk [vmem:[#allocation3 + $0xa8] sm:$0xff] %vm1553_vm5, %v3661_v35 }
 0x54d   : > { %3734 = vst.msk [vmem:[#allocation3 + $0xa0] sm:$0xff] %vm1553_vm5, %v3659_v33  ;;  %4033 = vrot.lane.b32.xlu1 %v3954_v19, %s11081_s29  ;;  %v4142_v19 = vld [vmem:[#allocation2 + $0x1f2] sm:$0xff] }
 0x54e   : > { %4031 = vrot.lane.b32.xlu0 %v3953_v49, %s11081_s29  ;;  %v4141_v49 = vld [vmem:[#allocation2 + $0x1ea] sm:$0xff] }
 0x54f   : > { %v3665_v51 = vpop.permute.xlu1 %3664 }
 0x550   : > { %v3663_v57 = vpop.permute.xlu0 %3662  ;;  %3737 = vst.msk [vmem:[#allocation3 + $0xb8] sm:$0xff] %vm1553_vm5, %v3665_v51  ;;  %v4146_v51 = vld [vmem:[#allocation2 + $0x232] sm:$0xff] }
 0x551   : > { %3736 = vst.msk [vmem:[#allocation3 + $0xb0] sm:$0xff] %vm1553_vm5, %v3663_v57  ;;  %4037 = vrot.lane.b32.xlu1 %v3956_v32, %s11081_s29  ;;  %v4143_v32 = vld [vmem:[#allocation2 + $0x20a] sm:$0xff] }
 0x552   : > { %4035 = vrot.lane.b32.xlu0 %v3955_v54, %s11081_s29  ;;  %v4145_v57 = vld [vmem:[#allocation2 + $0x22a] sm:$0xff] }
 0x553   : > { %v3669_v61 = vpop.permute.xlu1 %3668 }
 0x554   : > { %v3667_v3 = vpop.permute.xlu0 %3666  ;;  %3739 = vst.msk [vmem:[#allocation3 + $0xc8] sm:$0xff] %vm1553_vm5, %v3669_v61  ;;  %v4148_v61 = vld [vmem:[#allocation2 + $0x252] sm:$0xff] }
 0x555   : > { %3738 = vst.msk [vmem:[#allocation3 + $0xc0] sm:$0xff] %vm1553_vm5, %v3667_v3  ;;  %4041 = vrot.lane.b32.xlu1 %v3958_v59, %s11081_s29  ;;  %v4147_v3 = vld [vmem:[#allocation2 + $0x24a] sm:$0xff] }
 0x556   : > { %4039 = vrot.lane.b32.xlu0 %v3957_v1, %s11081_s29 }
 0x557   : > { %v3673_v16 = vpop.permute.xlu1 %3672 }
 0x558   : > { %v3671_v41 = vpop.permute.xlu0 %3670  ;;  %3741 = vst.msk [vmem:[#allocation3 + $0xd8] sm:$0xff] %vm1553_vm5, %v3673_v16 }
 0x559   : > { %3740 = vst.msk [vmem:[#allocation3 + $0xd0] sm:$0xff] %vm1553_vm5, %v3671_v41  ;;  %4045 = vrot.lane.b32.xlu1 %v3960_v9, %s11081_s29 }
 0x55a   : > { %4043 = vrot.lane.b32.xlu0 %v3959_v20, %s11081_s29  ;;  %v4152_v20 = vld [vmem:[#allocation2 + $0x292] sm:$0xff] }
 0x55b   : > { %v3677_v37 = vpop.permute.xlu1 %3676 }
 0x55c   : > { %v3675_v47 = vpop.permute.xlu0 %3674  ;;  %3743 = vst.msk [vmem:[#allocation3 + $0xe8] sm:$0xff] %vm1553_vm5, %v3677_v37 }
 0x55d   : > { %3742 = vst.msk [vmem:[#allocation3 + $0xe0] sm:$0xff] %vm1553_vm5, %v3675_v47  ;;  %4049 = vrot.lane.b32.xlu1 %v3962_v36, %s11081_s29  ;;  %v4151_v36 = vld [vmem:[#allocation2 + $0x28a] sm:$0xff] }
 0x55e   : > { %4047 = vrot.lane.b32.xlu0 %v3961_v26, %s11081_s29  ;;  %v4154_v26 = vld [vmem:[#allocation2 + $0x2b2] sm:$0xff] }
 0x55f   : > { %v3681_v45 = vpop.permute.xlu1 %3680 }
 0x560   : > { %v3679_v38 = vpop.permute.xlu0 %3678  ;;  %3745 = vst.msk [vmem:[#allocation3 + $0xf8] sm:$0xff] %vm1553_vm5, %v3681_v45  ;;  %v4153_v45 = vld [vmem:[#allocation2 + $0x2aa] sm:$0xff] }
 0x561   : > { %3744 = vst.msk [vmem:[#allocation3 + $0xf0] sm:$0xff] %vm1553_vm5, %v3679_v38  ;;  %4053 = vrot.lane.b32.xlu1 %v13187_v42, %s11081_s29  ;;  %v3968_v42 = vld [vmem:[#allocation2 + $0x310] sm:$0xff] }
 0x562   : > { %4051 = vrot.lane.b32.xlu0 %v13189_v28, %s11081_s29 }
 0x563   : > { %v3814_v34 = vpop.permute.xlu1 %3813 }
 0x564   : > { %v3812_v14 = vpop.permute.xlu0 %3811  ;;  %3908 = vst.msk [vmem:[#allocation3 + $0x8] sm:$0xff] %vm1747_vm6, %v3814_v34 }
 0x565   : > { %3907 = vst.msk [vmem:[#allocation3] sm:$0xff] %vm1747_vm6, %v3812_v14  ;;  %4057 = vrot.lane.b32.xlu1 %v13197_v44, %s11081_s29  ;;  %v4132_v44 = vld [vmem:[#allocation2 + $0x152] sm:$0xff] }
 0x566   : > { %4055 = vrot.lane.b32.xlu0 %v13199_v63, %s11081_s29 }
 0x567   : > { %v3818_v40 = vpop.permute.xlu1 %3817 }
 0x568   : > { %v3816_v28 = vpop.permute.xlu0 %3815  ;;  %3910 = vst.msk [vmem:[#allocation3 + $0x18] sm:$0xff] %vm1747_vm6, %v3818_v40  ;;  %v4160_v40 = vld [vmem:[#allocation2 + $0x312] sm:$0xff] }
 0x569   : > { %3909 = vst.msk [vmem:[#allocation3 + $0x10] sm:$0xff] %vm1747_vm6, %v3816_v28  ;;  %4061 = vrot.lane.b32.xlu1 %v3968_v42, %s11081_s29  ;;  %v4159_v28 = vld [vmem:[#allocation2 + $0x30a] sm:$0xff] }
 0x56a   : > { %4059 = vrot.lane.b32.xlu0 %v3967_v52, %s11081_s29 }
 0x56b   : > { %v3822_v58 = vpop.permute.xlu1 %3821 }
 0x56c   : > { %v3820_v62 = vpop.permute.xlu0 %3819  ;;  %3912 = vst.msk [vmem:[#allocation3 + $0x28] sm:$0xff] %vm1747_vm6, %v3822_v58  ;;  %v4161_v58 = vld [vmem:[#allocation2 + $0x32a] sm:$0xff] }
 0x56d   : > { %3911 = vst.msk [vmem:[#allocation3 + $0x20] sm:$0xff] %vm1747_vm6, %v3820_v62  ;;  %4065 = vrot.lane.b32.xlu1 %v3970_v55, %s11081_s29 }
 0x56e   : > { %4063 = vrot.lane.b32.xlu0 %v3969_v60, %s11081_s29 }
 0x56f   : > { %v3826_v63 = vpop.permute.xlu1 %3825 }
 0x570   : > { %v3824_v6 = vpop.permute.xlu0 %3823  ;;  %3914 = vst.msk [vmem:[#allocation3 + $0x38] sm:$0xff] %vm1747_vm6, %v3826_v63 }
 0x571   : > { %3913 = vst.msk [vmem:[#allocation3 + $0x30] sm:$0xff] %vm1747_vm6, %v3824_v6  ;;  %4197 = vrot.lane.b32.xlu1 %v4132_v44, %s11082_s15 }
 0x572   : > { %4195 = vrot.lane.b32.xlu0 %v4131_v2, %s11082_s15 }
 0x573   : > { %v3830_v10 = vpop.permute.xlu1 %3829 }
 0x574   : > { %v3828_v17 = vpop.permute.xlu0 %3827  ;;  %3916 = vst.msk [vmem:[#allocation3 + $0x48] sm:$0xff] %vm1747_vm6, %v3830_v10 }
 0x575   : > { %3915 = vst.msk [vmem:[#allocation3 + $0x40] sm:$0xff] %vm1747_vm6, %v3828_v17  ;;  %4201 = vrot.lane.b32.xlu1 %v4134_v8, %s11082_s15 }
 0x576   : > { %4199 = vrot.lane.b32.xlu0 %v4133_v13, %s11082_s15 }
 0x577   : > { %v3834_v0 = vpop.permute.xlu1 %3833 }
 0x578   : > { %v3832_v50 = vpop.permute.xlu0 %3831  ;;  %3918 = vst.msk [vmem:[#allocation3 + $0x58] sm:$0xff] %vm1747_vm6, %v3834_v0 }
 0x579   : > { %3917 = vst.msk [vmem:[#allocation3 + $0x50] sm:$0xff] %vm1747_vm6, %v3832_v50  ;;  %4205 = vrot.lane.b32.xlu1 %v4136_v11, %s11082_s15 }
 0x57a   : > { %4203 = vrot.lane.b32.xlu0 %v4135_v21, %s11082_s15 }
 0x57b   : > { %v3838_v18 = vpop.permute.xlu1 %3837 }
 0x57c   : > { %v3836_v23 = vpop.permute.xlu0 %3835  ;;  %3920 = vst.msk [vmem:[#allocation3 + $0x68] sm:$0xff] %vm1747_vm6, %v3838_v18 }
 0x57d   : > { %3919 = vst.msk [vmem:[#allocation3 + $0x60] sm:$0xff] %vm1747_vm6, %v3836_v23  ;;  %4209 = vrot.lane.b32.xlu1 %v4138_v53, %s11082_s15 }
 0x57e   : > { %4207 = vrot.lane.b32.xlu0 %v4137_v22, %s11082_s15 }
 0x57f   : > { %v3842_v25 = vpop.permute.xlu1 %3841 }
 0x580   : > { %v3840_v15 = vpop.permute.xlu0 %3839  ;;  %3922 = vst.msk [vmem:[#allocation3 + $0x78] sm:$0xff] %vm1747_vm6, %v3842_v25 }
 0x581   : > { %3921 = vst.msk [vmem:[#allocation3 + $0x70] sm:$0xff] %vm1747_vm6, %v3840_v15  ;;  %4213 = vrot.lane.b32.xlu1 %v4140_v48, %s11082_s15 }
 0x582   : > { %4211 = vrot.lane.b32.xlu0 %v4139_v31, %s11082_s15 }
 0x583   : > { %v3846_v35 = vpop.permute.xlu1 %3845 }
 0x584   : > { %v3844_v33 = vpop.permute.xlu0 %3843  ;;  %3924 = vst.msk [vmem:[#allocation3 + $0x88] sm:$0xff] %vm1747_vm6, %v3846_v35 }
 0x585   : > { %3923 = vst.msk [vmem:[#allocation3 + $0x80] sm:$0xff] %vm1747_vm6, %v3844_v33  ;;  %4217 = vrot.lane.b32.xlu1 %v4142_v19, %s11082_s15 }
 0x586   : > { %4215 = vrot.lane.b32.xlu0 %v4141_v49, %s11082_s15 }
 0x587   : > { %v3850_v30 = vpop.permute.xlu1 %3849 }
 0x588   : > { %v3848_v39 = vpop.permute.xlu0 %3847  ;;  %3926 = vst.msk [vmem:[#allocation3 + $0x98] sm:$0xff] %vm1747_vm6, %v3850_v30 }
 0x589   : > { %3925 = vst.msk [vmem:[#allocation3 + $0x90] sm:$0xff] %vm1747_vm6, %v3848_v39  ;;  %4221 = vrot.lane.b32.xlu1 %v4144_v46, %s11082_s15 }
 0x58a   : > { %4219 = vrot.lane.b32.xlu0 %v4143_v32, %s11082_s15 }
 0x58b   : > { %v3854_v54 = vpop.permute.xlu1 %3853 }
 0x58c   : > { %v3852_v59 = vpop.permute.xlu0 %3851  ;;  %3928 = vst.msk [vmem:[#allocation3 + $0xa8] sm:$0xff] %vm1747_vm6, %v3854_v54 }
 0x58d   : > { %3927 = vst.msk [vmem:[#allocation3 + $0xa0] sm:$0xff] %vm1747_vm6, %v3852_v59  ;;  %4225 = vrot.lane.b32.xlu1 %v4146_v51, %s11082_s15 }
 0x58e   : > { %4223 = vrot.lane.b32.xlu0 %v4145_v57, %s11082_s15 }
 0x58f   : > { %v3858_v1 = vpop.permute.xlu1 %3857 }
 0x590   : > { %v3856_v5 = vpop.permute.xlu0 %3855  ;;  %3930 = vst.msk [vmem:[#allocation3 + $0xb8] sm:$0xff] %vm1747_vm6, %v3858_v1 }
 0x591   : > { %3929 = vst.msk [vmem:[#allocation3 + $0xb0] sm:$0xff] %vm1747_vm6, %v3856_v5  ;;  %4229 = vrot.lane.b32.xlu1 %v4148_v61, %s11082_s15 }
 0x592   : > { %4227 = vrot.lane.b32.xlu0 %v4147_v3, %s11082_s15 }
 0x593   : > { %v3862_v9 = vpop.permute.xlu1 %3861 }
 0x594   : > { %v3860_v16 = vpop.permute.xlu0 %3859  ;;  %3932 = vst.msk [vmem:[#allocation3 + $0xc8] sm:$0xff] %vm1747_vm6, %v3862_v9 }
 0x595   : > { %3931 = vst.msk [vmem:[#allocation3 + $0xc0] sm:$0xff] %vm1747_vm6, %v3860_v16  ;;  %4233 = vrot.lane.b32.xlu1 %v4150_v7, %s11082_s15  ;;  %v13601_v16 = vld [vmem:[#allocation2 + $0x8c] sm:$0xff] }
 0x596   : > { %4231 = vrot.lane.b32.xlu0 %v4149_v12, %s11082_s15 }
 0x597   : > { %v3866_v41 = vpop.permute.xlu1 %3865 }
 0x598   : > { %v3864_v37 = vpop.permute.xlu0 %3863  ;;  %3934 = vst.msk [vmem:[#allocation3 + $0xd8] sm:$0xff] %vm1747_vm6, %v3866_v41 }
 0x599   : > { %3933 = vst.msk [vmem:[#allocation3 + $0xd0] sm:$0xff] %vm1747_vm6, %v3864_v37  ;;  %4237 = vrot.lane.b32.xlu1 %v4152_v20, %s11082_s15  ;;  %v13605_v20 = vld [vmem:[#allocation2 + $0xac] sm:$0xff] }
 0x59a   : > { %4235 = vrot.lane.b32.xlu0 %v4151_v36, %s11082_s15  ;;  %v13609_v37 = vld [vmem:[#allocation2 + $0xcc] sm:$0xff] }
 0x59b   : > { %v3870_v47 = vpop.permute.xlu1 %3869 }
 0x59c   : > { %v3868_v38 = vpop.permute.xlu0 %3867  ;;  %3936 = vst.msk [vmem:[#allocation3 + $0xe8] sm:$0xff] %vm1747_vm6, %v3870_v47 }
 0x59d   : > { %3935 = vst.msk [vmem:[#allocation3 + $0xe0] sm:$0xff] %vm1747_vm6, %v3868_v38  ;;  %4241 = vrot.lane.b32.xlu1 %v4154_v26, %s11082_s15 }
 0x59e   : > { %4239 = vrot.lane.b32.xlu0 %v4153_v45, %s11082_s15  ;;  %v13617_v45 = vld [vmem:[#allocation2 + $0x104] sm:$0xff] }
 0x59f   : > { %v3874_v56 = vpop.permute.xlu1 %3873 }
 0x5a0   : > { %v3872_v34 = vpop.permute.xlu0 %3871  ;;  %3938 = vst.msk [vmem:[#allocation3 + $0xf8] sm:$0xff] %vm1747_vm6, %v3874_v56 }
 0x5a1   : > { %3937 = vst.msk [vmem:[#allocation3 + $0xf0] sm:$0xff] %vm1747_vm6, %v3872_v34  ;;  %4245 = vrot.lane.b32.xlu1 %v13291_v24, %s11082_s15  ;;  %v4162_v24 = vld [vmem:[#allocation2 + $0x332] sm:$0xff] }
 0x5a2   : > { %4243 = vrot.lane.b32.xlu0 %v13293_v43, %s11082_s15 }
 0x5a3   : > { %v4006_v14 = vpop.permute.xlu1 %4005 }
 0x5a4   : > { %v4004_v42 = vpop.permute.xlu0 %4003  ;;  %4100 = vst.msk [vmem:[#allocation3 + $0x8] sm:$0xff] %vm1940_vm8, %v4006_v14  ;;  %v13624_v14 = vld [vmem:[#allocation2 + $0x10c] sm:$0xff] }
 0x5a5   : > { %4099 = vst.msk [vmem:[#allocation3] sm:$0xff] %vm1940_vm8, %v4004_v42  ;;  %4249 = vrot.lane.b32.xlu1 %v13301_v27, %s11082_s15 }
 0x5a6   : > { %4247 = vrot.lane.b32.xlu0 %v13303_v29, %s11082_s15 }
 0x5a7   : > { %v4010_v52 = vpop.permute.xlu1 %4009 }
 0x5a8   : > { %v4008_v55 = vpop.permute.xlu0 %4007  ;;  %4102 = vst.msk [vmem:[#allocation3 + $0x18] sm:$0xff] %vm1940_vm8, %v4010_v52 }
 0x5a9   : > { %4101 = vst.msk [vmem:[#allocation3 + $0x10] sm:$0xff] %vm1940_vm8, %v4008_v55  ;;  %4253 = vrot.lane.b32.xlu1 %v4160_v40, %s11082_s15 }
 0x5aa   : > { %4251 = vrot.lane.b32.xlu0 %v4159_v28, %s11082_s15 }
 0x5ab   : > { %v4014_v43 = vpop.permute.xlu1 %4013 }
 0x5ac   : > { %v4012_v60 = vpop.permute.xlu0 %4011  ;;  %4104 = vst.msk [vmem:[#allocation3 + $0x28] sm:$0xff] %vm1940_vm8, %v4014_v43 }
 0x5ad   : > { %4103 = vst.msk [vmem:[#allocation3 + $0x20] sm:$0xff] %vm1940_vm8, %v4012_v60  ;;  %4257 = vrot.lane.b32.xlu1 %v4162_v24, %s11082_s15 }
 0x5ae   : > { %4255 = vrot.lane.b32.xlu0 %v4161_v58, %s11082_s15 }
 0x5af   : > { %v4018_v27 = vpop.permute.xlu1 %4017 }
 0x5b0   : > { %v4016_v29 = vpop.permute.xlu0 %4015  ;;  %4106 = vst.msk [vmem:[#allocation3 + $0x38] sm:$0xff] %vm1940_vm8, %v4018_v27 }
 0x5b1   : > { %4105 = vst.msk [vmem:[#allocation3 + $0x30] sm:$0xff] %vm1940_vm8, %v4016_v29 }
 0x5b3   : > { %v4022_v62 = vpop.permute.xlu1 %4021 }
 0x5b4   : > { %v4020_v44 = vpop.permute.xlu0 %4019  ;;  %4108 = vst.msk [vmem:[#allocation3 + $0x48] sm:$0xff] %vm1940_vm8, %v4022_v62 }
 0x5b5   : > { %4107 = vst.msk [vmem:[#allocation3 + $0x40] sm:$0xff] %vm1940_vm8, %v4020_v44 }
 0x5b7   : > { %v4026_v63 = vpop.permute.xlu1 %4025 }
 0x5b8   : > { %v4024_v2 = vpop.permute.xlu0 %4023  ;;  %4110 = vst.msk [vmem:[#allocation3 + $0x58] sm:$0xff] %vm1940_vm8, %v4026_v63 }
 0x5b9   : > { %4109 = vst.msk [vmem:[#allocation3 + $0x50] sm:$0xff] %vm1940_vm8, %v4024_v2 }
 0x5bb   : > { %v4030_v6 = vpop.permute.xlu1 %4029 }
 0x5bc   : > { %v4028_v8 = vpop.permute.xlu0 %4027  ;;  %4112 = vst.msk [vmem:[#allocation3 + $0x68] sm:$0xff] %vm1940_vm8, %v4030_v6 }
 0x5bd   : > { %4111 = vst.msk [vmem:[#allocation3 + $0x60] sm:$0xff] %vm1940_vm8, %v4028_v8 }
 0x5bf   : > { %v4034_v10 = vpop.permute.xlu1 %4033 }
 0x5c0   : > { %v4032_v13 = vpop.permute.xlu0 %4031  ;;  %4114 = vst.msk [vmem:[#allocation3 + $0x78] sm:$0xff] %vm1940_vm8, %v4034_v10 }
 0x5c1   : > { %4113 = vst.msk [vmem:[#allocation3 + $0x70] sm:$0xff] %vm1940_vm8, %v4032_v13 }
 0x5c3   : > { %v4038_v17 = vpop.permute.xlu1 %4037 }
 0x5c4   : > { %v4036_v11 = vpop.permute.xlu0 %4035  ;;  %4116 = vst.msk [vmem:[#allocation3 + $0x88] sm:$0xff] %vm1940_vm8, %v4038_v17 }
 0x5c5   : > { %4115 = vst.msk [vmem:[#allocation3 + $0x80] sm:$0xff] %vm1940_vm8, %v4036_v11 }
 0x5c7   : > { %v4042_v0 = vpop.permute.xlu1 %4041 }
 0x5c8   : > { %v4040_v21 = vpop.permute.xlu0 %4039  ;;  %4118 = vst.msk [vmem:[#allocation3 + $0x98] sm:$0xff] %vm1940_vm8, %v4042_v0 }
 0x5c9   : > { %4117 = vst.msk [vmem:[#allocation3 + $0x90] sm:$0xff] %vm1940_vm8, %v4040_v21 }
 0x5cb   : > { %v4046_v50 = vpop.permute.xlu1 %4045 }
 0x5cc   : > { %v4044_v53 = vpop.permute.xlu0 %4043  ;;  %4120 = vst.msk [vmem:[#allocation3 + $0xa8] sm:$0xff] %vm1940_vm8, %v4046_v50 }
 0x5cd   : > { %4119 = vst.msk [vmem:[#allocation3 + $0xa0] sm:$0xff] %vm1940_vm8, %v4044_v53  ;;  %v13649_v53 = vld [vmem:[#allocation2 + $0xec] sm:$0xff] }
 0x5cf   : > { %v4050_v18 = vpop.permute.xlu1 %4049 }
 0x5d0   : > { %v4048_v22 = vpop.permute.xlu0 %4047  ;;  %4122 = vst.msk [vmem:[#allocation3 + $0xb8] sm:$0xff] %vm1940_vm8, %v4050_v18 }
 0x5d1   : > { %4121 = vst.msk [vmem:[#allocation3 + $0xb0] sm:$0xff] %vm1940_vm8, %v4048_v22 }
 0x5d3   : > { %v4054_v23 = vpop.permute.xlu1 %4053 }
 0x5d4   : > { %v4052_v48 = vpop.permute.xlu0 %4051  ;;  %4124 = vst.msk [vmem:[#allocation3 + $0xc8] sm:$0xff] %vm1940_vm8, %v4054_v23 }
 0x5d5   : > { %4123 = vst.msk [vmem:[#allocation3 + $0xc0] sm:$0xff] %vm1940_vm8, %v4052_v48 }
 0x5d7   : > { %v4058_v25 = vpop.permute.xlu1 %4057 }
 0x5d8   : > { %v4056_v31 = vpop.permute.xlu0 %4055  ;;  %4126 = vst.msk [vmem:[#allocation3 + $0xd8] sm:$0xff] %vm1940_vm8, %v4058_v25 }
 0x5d9   : > { %4125 = vst.msk [vmem:[#allocation3 + $0xd0] sm:$0xff] %vm1940_vm8, %v4056_v31 }
 0x5db   : > { %v4062_v15 = vpop.permute.xlu1 %4061 }
 0x5dc   : > { %v4060_v19 = vpop.permute.xlu0 %4059  ;;  %4128 = vst.msk [vmem:[#allocation3 + $0xe8] sm:$0xff] %vm1940_vm8, %v4062_v15 }
 0x5dd   : > { %4127 = vst.msk [vmem:[#allocation3 + $0xe0] sm:$0xff] %vm1940_vm8, %v4060_v19 }
 0x5df   : > { %v4066_v35 = vpop.permute.xlu1 %4065 }
 0x5e0   : > { %v4064_v49 = vpop.permute.xlu0 %4063  ;;  %4130 = vst.msk [vmem:[#allocation3 + $0xf8] sm:$0xff] %vm1940_vm8, %v4066_v35 }
 0x5e1   : > { %4129 = vst.msk [vmem:[#allocation3 + $0xf0] sm:$0xff] %vm1940_vm8, %v4064_v49 }
 0x5e3   : > { %v4198_v33 = vpop.permute.xlu1 %4197 }
 0x5e4   : > { %v4196_v46 = vpop.permute.xlu0 %4195  ;;  %4292 = vst.msk [vmem:[#allocation3 + $0x8] sm:$0xff] %vm2133_vm9, %v4198_v33 }
 0x5e5   : > { %4291 = vst.msk [vmem:[#allocation3] sm:$0xff] %vm2133_vm9, %v4196_v46 }
 0x5e7   : > { %v4202_v30 = vpop.permute.xlu1 %4201 }
 0x5e8   : > { %v4200_v32 = vpop.permute.xlu0 %4199  ;;  %4294 = vst.msk [vmem:[#allocation3 + $0x18] sm:$0xff] %vm2133_vm9, %v4202_v30 }
 0x5e9   : > { %4293 = vst.msk [vmem:[#allocation3 + $0x10] sm:$0xff] %vm2133_vm9, %v4200_v32 }
 0x5eb   : > { %v4206_v39 = vpop.permute.xlu1 %4205  ;;  %v4324_v51 = vld [vmem:[#allocation3 + $0x8] sm:$0xff] }
 0x5ec   : > { %v4204_v54 = vpop.permute.xlu0 %4203  ;;  %4296 = vst.msk [vmem:[#allocation3 + $0x28] sm:$0xff] %vm2133_vm9, %v4206_v39  ;;  %v4323_v57 = vld [vmem:[#allocation3] sm:$0xff] }
 0x5ed   : > { %4295 = vst.msk [vmem:[#allocation3 + $0x20] sm:$0xff] %vm2133_vm9, %v4204_v54  ;;  %10630 = vmatprep.mubr.msk.f32.mxu1 %vm2203_vm10, %v4323_v57 }
 0x5ee   : > { %10631 = vmatmul.mubr.msk.f32.vlgmr.msra.gmra.mrb[16].mxu1 %vm2203_vm10, %v4324_v51  ;;  %4911 = vst.msk [vmem:[#allocation3 + $0x8] sm:$0xff] %vm298_vm0, %v13601_v16 }
 0x5ef   : > { %v4210_v59 = vpop.permute.xlu1 %4209  ;;  %v4326_v61 = vld [vmem:[#allocation3 + $0x18] sm:$0xff] }
 0x5f0   : > { %v4208_v1 = vpop.permute.xlu0 %4207  ;;  %4298 = vst.msk [vmem:[#allocation3 + $0x38] sm:$0xff] %vm2133_vm9, %v4210_v59  ;;  %v4325_v3 = vld [vmem:[#allocation3 + $0x10] sm:$0xff] }
 0x5f1   : > { %4297 = vst.msk [vmem:[#allocation3 + $0x30] sm:$0xff] %vm2133_vm9, %v4208_v1  ;;  %10633 = vmatprep.mubr.msk.f32.mxu1 %vm2203_vm10, %v4325_v3 }
 0x5f2   : > { %10634 = vmatmul.mubr.msk.f32.gmra.mrb[18].mxu1 %vm2203_vm10, %v4326_v61  ;;  %4913 = vst.msk [vmem:[#allocation3 + $0x18] sm:$0xff] %vm298_vm0, %v13605_v20 }
 0x5f3   : > { %v4328_v5 = vld [vmem:[#allocation3 + $0x28] sm:$0xff]  ;;  %v4214_v41 = vpop.permute.xlu1 %4213 }
 0x5f4   : > { %v4327_v7 = vld [vmem:[#allocation3 + $0x20] sm:$0xff]  ;;  %v4212_v36 = vpop.permute.xlu0 %4211  ;;  %4300 = vst.msk [vmem:[#allocation3 + $0x48] sm:$0xff] %vm2133_vm9, %v4214_v41 }
 0x5f5   : > { %10636 = vmatprep.mubr.msk.f32.mxu1 %vm2203_vm10, %v4327_v7  ;;  %4299 = vst.msk [vmem:[#allocation3 + $0x40] sm:$0xff] %vm2133_vm9, %v4212_v36 }
 0x5f6   : > { %10637 = vmatmul.mubr.msk.f32.gmra.mrb[20].mxu1 %vm2203_vm10, %v4328_v5  ;;  %4915 = vst.msk [vmem:[#allocation3 + $0x28] sm:$0xff] %vm298_vm0, %v13609_v37 }
 0x5f7   : > { %v4330_v9 = vld [vmem:[#allocation3 + $0x38] sm:$0xff]  ;;  %v4218_v26 = vpop.permute.xlu1 %4217 }
 0x5f8   : > { %v4329_v12 = vld [vmem:[#allocation3 + $0x30] sm:$0xff]  ;;  %v4216_v47 = vpop.permute.xlu0 %4215  ;;  %4302 = vst.msk [vmem:[#allocation3 + $0x58] sm:$0xff] %vm2133_vm9, %v4218_v26 }
 0x5f9   : > { %10639 = vmatprep.mubr.msk.f32.mxu1 %vm2203_vm10, %v4329_v12  ;;  %4301 = vst.msk [vmem:[#allocation3 + $0x50] sm:$0xff] %vm2133_vm9, %v4216_v47 }
 0x5fa   : > { %10640 = vmatmul.mubr.msk.f32.gmra.mrb[22].mxu1 %vm2203_vm10, %v4330_v9  ;;  %4917 = vst.msk [vmem:[#allocation3 + $0x38] sm:$0xff] %vm298_vm0, %v13649_v53  ;;  %v4878_v9 = vld [vmem:[#allocation2 + $0x84] sm:$0xff] }
 0x5fb   : > { %v4222_v38 = vpop.permute.xlu1 %4221  ;;  %v4332_v42 = vld [vmem:[#allocation3 + $0x48] sm:$0xff]  ;;  %4910 = vst.msk [vmem:[#allocation3] sm:$0xff] %vm298_vm0, %v4878_v9  ;;  %v13828_v9 = vld [vmem:[#allocation2 + $0x1d0] sm:$0xff] }
 0x5fc   : > { %v4220_v56 = vpop.permute.xlu0 %4219  ;;  %v4331_v34 = vld [vmem:[#allocation3 + $0x40] sm:$0xff]  ;;  %4304 = vst.msk [vmem:[#allocation3 + $0x68] sm:$0xff] %vm2133_vm9, %v4222_v38 }
 0x5fd   : > { %4303 = vst.msk [vmem:[#allocation3 + $0x60] sm:$0xff] %vm2133_vm9, %v4220_v56  ;;  %10642 = vmatprep.mubr.msk.f32.mxu1 %vm2203_vm10, %v4331_v34 }
 0x5fe   : > { %4918 = vst.msk [vmem:[#allocation3 + $0x40] sm:$0xff] %vm298_vm0, %v13617_v45  ;;  %10643 = vmatmul.mubr.msk.f32.gmra.mrb[24].mxu1 %vm2203_vm10, %v4332_v42  ;;  %4919 = vst.msk [vmem:[#allocation3 + $0x48] sm:$0xff] %vm298_vm0, %v13624_v14 }
 0x5ff   : > { %v4226_v40 = vpop.permute.xlu1 %4225  ;;  %v4334_v55 = vld [vmem:[#allocation3 + $0x58] sm:$0xff] }
 0x600   : > { %v4224_v52 = vpop.permute.xlu0 %4223  ;;  %v4333_v28 = vld [vmem:[#allocation3 + $0x50] sm:$0xff]  ;;  %4306 = vst.msk [vmem:[#allocation3 + $0x78] sm:$0xff] %vm2133_vm9, %v4226_v40 }
 0x601   : > { %4305 = vst.msk [vmem:[#allocation3 + $0x70] sm:$0xff] %vm2133_vm9, %v4224_v52  ;;  %10645 = vmatprep.mubr.msk.f32.mxu1 %vm2203_vm10, %v4333_v28  ;;  %v4943_v40 = vld [vmem:[#allocation2 + $0x90] sm:$0xff]  ;;  %v4880_v52 = vld [vmem:[#allocation2 + $0xa4] sm:$0xff] }
 0x602   : > { %10646 = vmatmul.mubr.msk.f32.gmra.mrb[26].mxu1 %vm2203_vm10, %v4334_v55  ;;  %v4942_v28 = vld [vmem:[#allocation2 + $0x88] sm:$0xff]  ;;  %4912 = vst.msk [vmem:[#allocation3 + $0x10] sm:$0xff] %vm298_vm0, %v4880_v52  ;;  %v5135_v55 = vld [vmem:[#allocation2 + $0x94] sm:$0xff] }
 0x603   : > { %v4230_v24 = vpop.permute.xlu1 %4229  ;;  %v4336_v60 = vld [vmem:[#allocation3 + $0x68] sm:$0xff]  ;;  %v13860_v52 = vld [vmem:[#allocation2 + $0x174] sm:$0xff] }
 0x604   : > { %v4228_v43 = vpop.permute.xlu0 %4227  ;;  %v4335_v58 = vld [vmem:[#allocation3 + $0x60] sm:$0xff]  ;;  %4308 = vst.msk [vmem:[#allocation3 + $0x88] sm:$0xff] %vm2133_vm9, %v4230_v24  ;;  %v4944_v24 = vld [vmem:[#allocation2 + $0xa8] sm:$0xff] }
 0x605   : > { %4307 = vst.msk [vmem:[#allocation3 + $0x80] sm:$0xff] %vm2133_vm9, %v4228_v43  ;;  %10648 = vmatprep.mubr.msk.f32.mxu1 %vm2203_vm10, %v4335_v58  ;;  %v13692_v43 = vld [vmem:[#allocation2 + $0x108] sm:$0xff]  ;;  %v13697_v58 = vld [vmem:[#allocation2 + $0x110] sm:$0xff] }
 0x606   : > { %10649 = vmatmul.mubr.msk.f32.gmra.mrb[28].mxu1 %vm2203_vm10, %v4336_v60  ;;  %v13708_v60 = vld [vmem:[#allocation2 + $0x114] sm:$0xff] }
 0x607   : > { %v4234_v27 = vpop.permute.xlu1 %4233  ;;  %v4338_v44 = vld [vmem:[#allocation3 + $0x78] sm:$0xff] }
 0x608   : > { %v4232_v29 = vpop.permute.xlu0 %4231  ;;  %v4337_v62 = vld [vmem:[#allocation3 + $0x70] sm:$0xff]  ;;  %4310 = vst.msk [vmem:[#allocation3 + $0x98] sm:$0xff] %vm2133_vm9, %v4234_v27  ;;  %v5328_v27 = vld [vmem:[#allocation2 + $0x124] sm:$0xff] }
 0x609   : > { %4309 = vst.msk [vmem:[#allocation3 + $0x90] sm:$0xff] %vm2133_vm9, %v4232_v29  ;;  %10651 = vmatprep.mubr.msk.f32.mxu1 %vm2203_vm10, %v4337_v62  ;;  %v5137_v29 = vld [vmem:[#allocation2 + $0xb4] sm:$0xff]  ;;  %v13716_v62 = vld [vmem:[#allocation2 + $0x18c] sm:$0xff] }
 0x60a   : > { %10652 = vmatmul.mubr.msk.f32.gmra.mrb[30].mxu1 %vm2203_vm10, %v4338_v44  ;;  %v10252_v44 = vld [vmem:[%s16177_s1 + $0x50] sm:$0xff] }
 0x60b   : > { %v4238_v63 = vpop.permute.xlu1 %4237  ;;  %v4340_v8 = vld [vmem:[#allocation3 + $0x88] sm:$0xff] }
 0x60c   : > { %v4236_v2 = vpop.permute.xlu0 %4235  ;;  %v4339_v6 = vld [vmem:[#allocation3 + $0x80] sm:$0xff]  ;;  %4312 = vst.msk [vmem:[#allocation3 + $0xa8] sm:$0xff] %vm2133_vm9, %v4238_v63  ;;  %v10253_v63 = vld [vmem:[%s16177_s1 + $0x58] sm:$0xff] }
 0x60d   : > { %4311 = vst.msk [vmem:[#allocation3 + $0xa0] sm:$0xff] %vm2133_vm9, %v4236_v2  ;;  %10654 = vmatprep.mubr.msk.f32.mxu1 %vm2203_vm10, %v4339_v6  ;;  %v10880_v2 = vpack.c.bf16 %v10253_v63, %v10252_v44  ;;  %v13729_v6 = vld [vmem:[#allocation2 + $0x128] sm:$0xff] }
 0x60e   : > { %10655 = vmatmul.mubr.msk.f32.gmra.mrb[32].mxu1 %vm2203_vm10, %v4340_v8  ;;  %v13731_v8 = vld [vmem:[#allocation2 + $0x12c] sm:$0xff] }
 0x60f   : > { %v4242_v10 = vpop.permute.xlu1 %4241  ;;  %v4342_v11 = vld [vmem:[#allocation3 + $0x98] sm:$0xff]  ;;  %10881 = vmatprep.subr.bf16.mxu0 %v10880_v2 }
 0x610   : > { %v4240_v13 = vpop.permute.xlu0 %4239  ;;  %v4341_v17 = vld [vmem:[#allocation3 + $0x90] sm:$0xff]  ;;  %4314 = vst.msk [vmem:[#allocation3 + $0xb8] sm:$0xff] %vm2133_vm9, %v4242_v10  ;;  %10883 = vmatpush3.bf16.msra.mxu0 %v10880_v2  ;;  %v10254_v10 = vld [vmem:[%s16177_s1 + $0x60] sm:$0xff] }
 0x611   : > { %4313 = vst.msk [vmem:[#allocation3 + $0xb0] sm:$0xff] %vm2133_vm9, %v4240_v13  ;;  %10657 = vmatprep.mubr.msk.f32.mxu1 %vm2203_vm10, %v4341_v17  ;;  %v10255_v13 = vld [vmem:[%s16177_s1 + $0x68] sm:$0xff]  ;;  %v10973_v17 = vld [vmem:[#allocation2 + $0x190] sm:$0xff] }
 0x612   : > { %10658 = vmatmul.mubr.msk.f32.gmra.mrb[34].mxu1 %vm2203_vm10, %v4342_v11  ;;  %v13746_v11 = vld [vmem:[#allocation2 + $0x130] sm:$0xff] }
 0x613   : > { %v4246_v0 = vpop.permute.xlu1 %4245  ;;  %v4344_v18 = vld [vmem:[#allocation3 + $0xa8] sm:$0xff] }
 0x614   : > { %v4244_v21 = vpop.permute.xlu0 %4243  ;;  %v4343_v50 = vld [vmem:[#allocation3 + $0xa0] sm:$0xff]  ;;  %4316 = vst.msk [vmem:[#allocation3 + $0xc8] sm:$0xff] %vm2133_vm9, %v4246_v0  ;;  %v10256_v0 = vld [vmem:[%s16177_s1 + $0x70] sm:$0xf] }
 0x615   : > { %4315 = vst.msk [vmem:[#allocation3 + $0xc0] sm:$0xff] %vm2133_vm9, %v4244_v21  ;;  %10660 = vmatprep.mubr.msk.f32.mxu1 %vm2203_vm10, %v4343_v50  ;;  %v4946_v21 = vld [vmem:[#allocation2 + $0xc8] sm:$0xff]  ;;  %v13756_v50 = vld [vmem:[#allocation2 + $0x194] sm:$0xff] }
 0x616   : > { %10661 = vmatmul.mubr.msk.f32.gmra.mrb[36].mxu1 %vm2203_vm10, %v4344_v18  ;;  %v4947_v18 = vld [vmem:[#allocation2 + $0xd0] sm:$0xff] }
 0x617   : > { %v4250_v22 = vpop.permute.xlu1 %4249  ;;  %v4346_v25 = vld [vmem:[#allocation3 + $0xb8] sm:$0xff] }
 0x618   : > { %v4248_v23 = vpop.permute.xlu0 %4247  ;;  %v4345_v48 = vld [vmem:[#allocation3 + $0xb0] sm:$0xff]  ;;  %4318 = vst.msk [vmem:[#allocation3 + $0xd8] sm:$0xff] %vm2133_vm9, %v4250_v22  ;;  %v13765_v22 = vld [vmem:[#allocation2 + $0x1a4] sm:$0xff] }
 0x619   : > { %4317 = vst.msk [vmem:[#allocation3 + $0xd0] sm:$0xff] %vm2133_vm9, %v4248_v23  ;;  %10663 = vmatprep.mubr.msk.f32.mxu1 %vm2203_vm10, %v4345_v48  ;;  %v13767_v23 = vld [vmem:[#allocation2 + $0x134] sm:$0xff]  ;;  %v5330_v48 = vld [vmem:[#allocation2 + $0x144] sm:$0xff] }
 0x61a   : > { %10664 = vmatmul.mubr.msk.f32.gmra.mrb[38].mxu1 %vm2203_vm10, %v4346_v25  ;;  %v5139_v25 = vld [vmem:[#allocation2 + $0xd4] sm:$0xff] }
 0x61b   : > { %v4254_v31 = vpop.permute.xlu1 %4253  ;;  %v4348_v35 = vld [vmem:[#allocation3 + $0xc8] sm:$0xff] }
 0x61c   : > { %v4252_v15 = vpop.permute.xlu0 %4251  ;;  %v4347_v19 = vld [vmem:[#allocation3 + $0xc0] sm:$0xff]  ;;  %4320 = vst.msk [vmem:[#allocation3 + $0xe8] sm:$0xff] %vm2133_vm9, %v4254_v31  ;;  %v13775_v31 = vld [vmem:[#allocation2 + $0x1ac] sm:$0xff] }
 0x61d   : > { %4319 = vst.msk [vmem:[#allocation3 + $0xe0] sm:$0xff] %vm2133_vm9, %v4252_v15  ;;  %10666 = vmatprep.mubr.msk.f32.mxu1 %vm2203_vm10, %v4347_v19  ;;  %v10974_v15 = vld [vmem:[#allocation2 + $0x1a8] sm:$0xff] }
 0x61e   : > { %10667 = vmatmul.mubr.msk.f32.gmra.mrb[40].mxu1 %vm2203_vm10, %v4348_v35  ;;  %v13781_v19 = vld [vmem:[#allocation2 + $0x14c] sm:$0xff] }
 0x61f   : > { %v4258_v49 = vpop.permute.xlu1 %4257  ;;  %v4350_v30 = vld [vmem:[#allocation3 + $0xd8] sm:$0xff]  ;;  %v10975_v35 = vld [vmem:[#allocation2 + $0x148] sm:$0xff] }
 0x620   : > { %v4256_v33 = vpop.permute.xlu0 %4255  ;;  %v4349_v46 = vld [vmem:[#allocation3 + $0xd0] sm:$0xff]  ;;  %4322 = vst.msk [vmem:[#allocation3 + $0xf8] sm:$0xff] %vm2133_vm9, %v4258_v49 }
 0x621   : > { %4321 = vst.msk [vmem:[#allocation3 + $0xf0] sm:$0xff] %vm2133_vm9, %v4256_v33  ;;  %10669 = vmatprep.mubr.msk.f32.mxu1 %vm2203_vm10, %v4349_v46  ;;  %v10976_v49 = vld [vmem:[#allocation2 + $0x1b0] sm:$0xff]  ;;  %v4948_v33 = vld [vmem:[#allocation2 + $0xe8] sm:$0xff] }
 0x622   : > { %10670 = vmatmul.mubr.msk.f32.gmra.mrb[42].mxu1 %vm2203_vm10, %v4350_v30  ;;  %v10977_v46 = vld [vmem:[#allocation2 + $0x150] sm:$0xff] }
 0x623   : > { %v4352_v39 = vld [vmem:[#allocation3 + $0xe8] sm:$0xff]  ;;  %v13791_v30 = vld [vmem:[#allocation2 + $0x1b4] sm:$0xff] }
 0x624   : > { %v4351_v32 = vld [vmem:[#allocation3 + $0xe0] sm:$0xff] }
 0x625   : > { %10672 = vmatprep.mubr.msk.f32.mxu1 %vm2203_vm10, %v4351_v32  ;;  %v4949_v32 = vld [vmem:[#allocation2 + $0xf0] sm:$0xff] }
 0x626   : > { %10673 = vmatmul.mubr.msk.f32.gmra.mrb[44].mxu1 %vm2203_vm10, %v4352_v39  ;;  %v13800_v39 = vld [vmem:[#allocation2 + $0x1c4] sm:$0xff] }
 0x627   : > { %v4354_v54 = vld [vmem:[#allocation3 + $0xf8] sm:$0xff] }
 0x628   : > { %v4353_v51 = vld [vmem:[#allocation3 + $0xf0] sm:$0xff] }
 0x629   : > { %10675 = vmatprep.mubr.msk.f32.mxu1 %vm2203_vm10, %v4353_v51  ;;  %v13802_v51 = vld [vmem:[#allocation2 + $0x154] sm:$0xff] }
 0x62a   : > { %10676 = vmatmul.mubr.msk.f32.gmra.mrb[46].mxu1 %vm2203_vm10, %v4354_v54  ;;  %v5332_v54 = vld [vmem:[#allocation2 + $0x164] sm:$0xff] }
 0x6c1   : > { %v10632_v57 = vpop.f32.mrb[16].mxu1 }
 0x6c2   : > { %v4686_v59 = vmax.f32 %v10632_v57, 0.0  ;;  %v4526_v61 = vpop.f32.mrb[17].mxu1  ;;  %v5141_v57 = vld [vmem:[#allocation2 + $0xf4] sm:$0xff] }
 0x6c3   : > { %v4685_v1 = vmax.f32 %v4526_v61, 0.0  ;;  %v13818_v61 = vld [vmem:[#allocation2 + $0x168] sm:$0xff] }
 0x6c4   : > { %4751 = vrot.lane.b32.xlu1 %v4686_v59, %s11076_s19  ;;  %v13810_v59 = vld [vmem:[#allocation2 + $0x1c8] sm:$0xff] }
 0x6c5   : > { %4749 = vrot.lane.b32.xlu0 %v4685_v1, %s11076_s19  ;;  %v10635_v3 = vpop.f32.mrb[18].mxu1 }
 0x6c6   : > { %v4688_v5 = vmax.f32 %v10635_v3, 0.0  ;;  %v4536_v7 = vpop.f32.mrb[19].mxu1  ;;  %v13820_v3 = vld [vmem:[#allocation2 + $0x16c] sm:$0xff] }
 0x6c7   : > { %v4687_v12 = vmax.f32 %v4536_v7, 0.0 }
 0x6c8   : > { %4755 = vrot.lane.b32.xlu1 %v4688_v5, %s11076_s19 }
 0x6c9   : > { %4753 = vrot.lane.b32.xlu0 %v4687_v12, %s11076_s19  ;;  %v10638_v41 = vpop.f32.mrb[20].mxu1 }
 0x6ca   : > { %v4690_v36 = vmax.f32 %v10638_v41, 0.0  ;;  %v4546_v26 = vpop.f32.mrb[21].mxu1  ;;  %v13836_v41 = vld [vmem:[#allocation2 + $0x170] sm:$0xff] }
 0x6cb   : > { %v4689_v47 = vmax.f32 %v4546_v26, 0.0 }
 0x6cc   : > { %4759 = vrot.lane.b32.xlu1 %v4690_v36, %s11076_s19 }
 0x6cd   : > { %4757 = vrot.lane.b32.xlu0 %v4689_v47, %s11076_s19  ;;  %v10641_v38 = vpop.f32.mrb[22].mxu1  ;;  %v13844_v47 = vld [vmem:[#allocation2 + $0x1d4] sm:$0xff] }
 0x6ce   : > { %v4692_v56 = vmax.f32 %v10641_v38, 0.0  ;;  %v4556_v34 = vpop.f32.mrb[23].mxu1 }
 0x6cf   : > { %v4691_v42 = vmax.f32 %v4556_v34, 0.0 }
 0x6d0   : > { %4763 = vrot.lane.b32.xlu1 %v4692_v56, %s11076_s19 }
 0x6d1   : > { %4761 = vrot.lane.b32.xlu0 %v4691_v42, %s11076_s19  ;;  %v13852_v42 = vld [vmem:[#allocation2 + $0x8] sm:$0xff] }
 0x6d4   : > { %5008 = vrot.lane.b32.xlu1 %v4943_v40, %s11075_s18 }
 0x6d5   : > { %5006 = vrot.lane.b32.xlu0 %v4942_v28, %s11075_s18 }
 0x6d8   : > { %5200 = vrot.lane.b32.xlu1 %v5135_v55, %s11076_s19 }
 0x6d9   : > { %5198 = vrot.lane.b32.xlu0 %v13601_v16, %s11076_s19  ;;  %v4945_v16 = vld [vmem:[#allocation2 + $0xb0] sm:$0xff] }
 0x6dc   : > { %5392 = vrot.lane.b32.xlu1 %v13624_v14, %s11077_s20 }
 0x6dd   : > { %5390 = vrot.lane.b32.xlu0 %v13617_v45, %s11077_s20  ;;  %v13706_v45 = vld [vmem:[#allocation2 + $0x184] sm:$0xff] }
 0x6e0   : > { %5010 = vrot.lane.b32.xlu1 %v4944_v24, %s11075_s18  ;;  %v7098_v24 = vld [vmem:[#allocation2 + $0x10] sm:$0xff] }
 0x6e1   : > { %5582 = vrot.lane.b32.xlu0 %v13692_v43, %s11078_s21 }
 0x6e4   : > { %5774 = vrot.lane.b32.xlu1 %v13624_v14, %s11079_s22 }
 0x6e5   : > { %5584 = vrot.lane.b32.xlu0 %v13697_v58, %s11078_s21 }
 0x6e8   : > { %5202 = vrot.lane.b32.xlu1 %v13605_v20, %s11076_s19  ;;  %v4882_v20 = vld [vmem:[#allocation2 + $0xc4] sm:$0xff] }
 0x6e9   : > { %5012 = vrot.lane.b32.xlu0 %v4945_v16, %s11075_s18  ;;  %4914 = vst.msk [vmem:[#allocation3 + $0x20] sm:$0xff] %vm298_vm0, %v4882_v20 }
 0x6ec   : > { %5967 = vrot.lane.b32.xlu1 %v13706_v45, %s11080_s23 }
 0x6ed   : > { %5776 = vrot.lane.b32.xlu0 %v13708_v60, %s11079_s22 }
 0x6f0   : > { %5394 = vrot.lane.b32.xlu1 %v5328_v27, %s11077_s20  ;;  %v13868_v27 = vld [vmem:[#allocation2 + $0x1e4] sm:$0xff] }
 0x6f1   : > { %5204 = vrot.lane.b32.xlu0 %v5137_v29, %s11076_s19 }
 0x6f4   : > { %6159 = vrot.lane.b32.xlu1 %v13411_v4, %s11081_s29  ;;  %v10884_v4 = vpack.c.bf16 %v10255_v13, %v10254_v10  ;;  %v7290_v10 = vld [vmem:[#allocation2 + $0x18] sm:$0xff] }
 0x6f5   : > { %5969 = vrot.lane.b32.xlu0 %v13716_v62, %s11080_s23 }
 0x6f6   : > { %10885 = vmatprep.subr.bf16.mxu0 %v10884_v4 }
 0x6f7   : > { %10887 = vmatpush3.bf16.msra.mxu0 %v10884_v4  ;;  %v13888_v4 = vld [vmem:[#allocation2 + $0x1e8] sm:$0xff] }
 0x6f8   : > { %5586 = vrot.lane.b32.xlu1 %v13729_v6, %s11078_s21  ;;  %10686 = vmatprep.subr.msk.mxu0 %vm2300_vm7, %v10256_v0 }
 0x6f9   : > { %5396 = vrot.lane.b32.xlu0 %v13731_v8, %s11077_s20 }
 0x6fb   : > { %10687 = vmatpush3.msk.msra.mxu0 %vm2300_vm7, %v10256_v0 }
 0x6fc   : > { %6351 = vrot.lane.b32.xlu1 %v13716_v62, %s11082_s15 }
 0x6fd   : > { %6161 = vrot.lane.b32.xlu0 %v10973_v17, %s11081_s29  ;;  %v4888_v17 = vld [vmem:[#allocation2 + $0x124] sm:$0xff] }
 0x6fe   : > { %4920 = vst.msk [vmem:[#allocation3 + $0x50] sm:$0xff] %vm298_vm0, %v4888_v17  ;;  %v5911_v17 = vld [vmem:[#allocation2 + $0x204] sm:$0xff] }
 0x700   : > { %5588 = vrot.lane.b32.xlu1 %v13746_v11, %s11078_s21 }
 0x701   : > { %5014 = vrot.lane.b32.xlu0 %v4946_v21, %s11075_s18  ;;  %v7481_v21 = vld [vmem:[#allocation2 + $0x100] sm:$0xff] }
 0x704   : > { %6353 = vrot.lane.b32.xlu1 %v13756_v50, %s11082_s15 }
 0x705   : > { %5778 = vrot.lane.b32.xlu0 %v13731_v8, %s11079_s22 }
 0x708   : > { %5206 = vrot.lane.b32.xlu1 %v13609_v37, %s11076_s19  ;;  %v4884_v37 = vld [vmem:[#allocation2 + $0xe4] sm:$0xff] }
 0x709   : > { %5016 = vrot.lane.b32.xlu0 %v4947_v18, %s11075_s18  ;;  %4916 = vst.msk [vmem:[#allocation3 + $0x30] sm:$0xff] %vm298_vm0, %v4884_v37  ;;  %v6102_v18 = vld [vmem:[#allocation2 + $0x1f0] sm:$0xff] }
 0x70c   : > { %5971 = vrot.lane.b32.xlu1 %v13765_v22, %s11080_s23 }
 0x70d   : > { %5780 = vrot.lane.b32.xlu0 %v13767_v23, %s11079_s22 }
 0x710   : > { %5398 = vrot.lane.b32.xlu1 %v5330_v48, %s11077_s20 }
 0x711   : > { %5208 = vrot.lane.b32.xlu0 %v5139_v25, %s11076_s19  ;;  %v5526_v25 = vld [vmem:[#allocation2 + $0x188] sm:$0xff] }
 0x714   : > { %6163 = vrot.lane.b32.xlu1 %v10974_v15, %s11081_s29  ;;  %v13902_v15 = vpop.f32.mrb[24].mxu1 }
 0x715   : > { %5973 = vrot.lane.b32.xlu0 %v13775_v31, %s11080_s23 }
 0x718   : > { %5590 = vrot.lane.b32.xlu1 %v10975_v35, %s11078_s21  ;;  %v13906_v35 = vpop.f32.mrb[25].mxu1 }
 0x719   : > { %5400 = vrot.lane.b32.xlu0 %v13781_v19, %s11077_s20 }
 0x71c   : > { %6355 = vrot.lane.b32.xlu1 %v13775_v31, %s11082_s15 }
 0x71d   : > { %6165 = vrot.lane.b32.xlu0 %v10976_v49, %s11081_s29 }
 0x720   : > { %5592 = vrot.lane.b32.xlu1 %v10977_v46, %s11078_s21  ;;  %v13910_v46 = vpop.f32.mrb[26].mxu1 }
 0x721   : > { %5018 = vrot.lane.b32.xlu0 %v4948_v33, %s11075_s18 }
 0x724   : > { %6357 = vrot.lane.b32.xlu1 %v13791_v30, %s11082_s15 }
 0x725   : > { %5782 = vrot.lane.b32.xlu0 %v13781_v19, %s11079_s22 }
 0x728   : > { %5210 = vrot.lane.b32.xlu1 %v13649_v53, %s11076_s19  ;;  %v13812_v53 = vld [vmem:[#allocation2 + $0x1cc] sm:$0xff] }
 0x729   : > { %5020 = vrot.lane.b32.xlu0 %v4949_v32, %s11075_s18  ;;  %v13915_v32 = vpop.f32.mrb[27].mxu1 }
 0x72c   : > { %5975 = vrot.lane.b32.xlu1 %v13800_v39, %s11080_s23 }
 0x72d   : > { %5784 = vrot.lane.b32.xlu0 %v13802_v51, %s11079_s22 }
 0x730   : > { %5402 = vrot.lane.b32.xlu1 %v5332_v54, %s11077_s20 }
 0x731   : > { %5212 = vrot.lane.b32.xlu0 %v5141_v57, %s11076_s19 }
 0x734   : > { %6167 = vrot.lane.b32.xlu1 %v13810_v59, %s11081_s29 }
 0x735   : > { %5977 = vrot.lane.b32.xlu0 %v13812_v53, %s11080_s23 }
 0x736   : > { %v4752_v1 = vpop.permute.xlu1 %4751 }
 0x737   : > { %4846 = vst.msk [vmem:[#allocation4 + $0x8] sm:$0xff] %vm974_vm2, %v4752_v1  ;;  %v4750_v5 = vpop.permute.xlu0 %4749  ;;  %v13920_v1 = vpop.f32.mrb[28].mxu1 }
 0x738   : > { %4845 = vst.msk [vmem:[#allocation4] sm:$0xff] %vm974_vm2, %v4750_v5  ;;  %5594 = vrot.lane.b32.xlu1 %v13818_v61, %s11078_s21  ;;  %v13925_v5 = vpop.f32.mrb[29].mxu1 }
 0x739   : > { %5404 = vrot.lane.b32.xlu0 %v13820_v3, %s11077_s20 }
 0x73a   : > { %v4756_v7 = vpop.permute.xlu1 %4755 }
 0x73b   : > { %4848 = vst.msk [vmem:[#allocation4 + $0x18] sm:$0xff] %vm974_vm2, %v4756_v7  ;;  %v4754_v12 = vpop.permute.xlu0 %4753 }
 0x73c   : > { %4847 = vst.msk [vmem:[#allocation4 + $0x10] sm:$0xff] %vm974_vm2, %v4754_v12  ;;  %6359 = vrot.lane.b32.xlu1 %v13812_v53, %s11082_s15  ;;  %v5527_v12 = vld [vmem:[#allocation2 + $0x190] sm:$0xff] }
 0x73d   : > { %6169 = vrot.lane.b32.xlu0 %v13828_v9, %s11081_s29 }
 0x73e   : > { %v4760_v36 = vpop.permute.xlu1 %4759 }
 0x73f   : > { %4850 = vst.msk [vmem:[#allocation4 + $0x28] sm:$0xff] %vm974_vm2, %v4760_v36  ;;  %v4758_v26 = vpop.permute.xlu0 %4757  ;;  %v4889_v36 = vld [vmem:[#allocation2 + $0x12c] sm:$0xff] }
 0x740   : > { %4849 = vst.msk [vmem:[#allocation4 + $0x20] sm:$0xff] %vm974_vm2, %v4758_v26  ;;  %5596 = vrot.lane.b32.xlu1 %v13836_v41, %s11078_s21 }
 0x741   : > { %5022 = vrot.lane.b32.xlu0 %v13692_v43, %s11075_s18  ;;  %4921 = vst.msk [vmem:[#allocation3 + $0x58] sm:$0xff] %vm298_vm0, %v4889_v36 }
 0x742   : > { %v4764_v38 = vpop.permute.xlu1 %4763 }
 0x743   : > { %4852 = vst.msk [vmem:[#allocation4 + $0x38] sm:$0xff] %vm974_vm2, %v4764_v38  ;;  %v4762_v56 = vpop.permute.xlu0 %4761  ;;  %v13930_v38 = vpop.f32.mrb[30].mxu1 }
 0x744   : > { %4851 = vst.msk [vmem:[#allocation4 + $0x30] sm:$0xff] %vm974_vm2, %v4762_v56  ;;  %6361 = vrot.lane.b32.xlu1 %v13844_v47, %s11082_s15  ;;  %v13936_v56 = vpop.f32.mrb[31].mxu1 }
 0x745   : > { %5786 = vrot.lane.b32.xlu0 %v13820_v3, %s11079_s22 }
 0x746   : > { %v5009_v34 = vpop.permute.xlu1 %5008 }
 0x747   : > { %5103 = vst.msk [vmem:[#allocation3 + $0x8] sm:$0xff] %vm781_vm1, %v5009_v34  ;;  %v5007_v40 = vpop.permute.xlu0 %5006 }
 0x748   : > { %5102 = vst.msk [vmem:[#allocation3] sm:$0xff] %vm781_vm1, %v5007_v40  ;;  %5024 = vrot.lane.b32.xlu1 %v13697_v58, %s11075_s18  ;;  %v6294_v40 = vld [vmem:[#allocation2 + $0x1f4] sm:$0xff] }
 0x749   : > { %7161 = vrot.lane.b32.xlu0 %v13852_v42, %s11075_s18 }
 0x74a   : > { %v5201_v28 = vpop.permute.xlu1 %5200 }
 0x74b   : > { %5295 = vst.msk [vmem:[#allocation3 + $0x8] sm:$0xff] %vm974_vm2, %v5201_v28  ;;  %v5199_v55 = vpop.permute.xlu0 %5198 }
 0x74c   : > { %5294 = vst.msk [vmem:[#allocation3] sm:$0xff] %vm974_vm2, %v5199_v55  ;;  %5788 = vrot.lane.b32.xlu1 %v13860_v52, %s11079_s22  ;;  %v13942_v55 = vpop.f32.mrb[32].mxu1 }
 0x74d   : > { %5214 = vrot.lane.b32.xlu0 %v13624_v14, %s11076_s19  ;;  %v13880_v14 = vld [vmem:[#allocation2 + $0x1ec] sm:$0xff] }
 0x74e   : > { %v5393_v16 = vpop.permute.xlu1 %5392 }
 0x74f   : > { %5487 = vst.msk [vmem:[#allocation3 + $0x8] sm:$0xff] %vm1167_vm3, %v5393_v16  ;;  %v5391_v29 = vpop.permute.xlu0 %5390 }
 0x750   : > { %5486 = vst.msk [vmem:[#allocation3] sm:$0xff] %vm1167_vm3, %v5391_v29  ;;  %7163 = vrot.lane.b32.xlu1 %v7098_v24, %s11075_s18 }
 0x751   : > { %5979 = vrot.lane.b32.xlu0 %v13868_v27, %s11080_s23 }
 0x752   : > { %v5011_v20 = vpop.permute.xlu1 %5010 }
 0x753   : > { %5104 = vst.msk [vmem:[#allocation3 + $0x10] sm:$0xff] %vm781_vm1, %v5011_v20  ;;  %v5583_v44 = vpop.permute.xlu0 %5582 }
 0x754   : > { %5678 = vst.msk [vmem:[#allocation3] sm:$0xff] %vm1360_vm4, %v5583_v44  ;;  %5216 = vrot.lane.b32.xlu1 %v13708_v60, %s11076_s19 }
 0x755   : > { %7353 = vrot.lane.b32.xlu0 %v7098_v24, %s11076_s19  ;;  %v7033_v24 = vld [vmem:[#allocation2] sm:$0xff] }
 0x756   : > { %v5775_v63 = vpop.permute.xlu1 %5774 }
 0x757   : > { %5870 = vst.msk [vmem:[#allocation3] sm:$0xff] %vm1553_vm5, %v5775_v63  ;;  %v5585_v2 = vpop.permute.xlu0 %5584 }
 0x758   : > { %5679 = vst.msk [vmem:[#allocation3 + $0x8] sm:$0xff] %vm1360_vm4, %v5585_v2  ;;  %5981 = vrot.lane.b32.xlu1 %v13880_v14, %s11080_s23 }
 0x759   : > { %5406 = vrot.lane.b32.xlu0 %v13706_v45, %s11077_s20 }
 0x75a   : > { %v5203_v13 = vpop.permute.xlu1 %5202 }
 0x75b   : > { %5296 = vst.msk [vmem:[#allocation3 + $0x10] sm:$0xff] %vm974_vm2, %v5203_v13  ;;  %v5013_v60 = vpop.permute.xlu0 %5012 }
 0x75c   : > { %5105 = vst.msk [vmem:[#allocation3 + $0x18] sm:$0xff] %vm781_vm1, %v5013_v60  ;;  %7355 = vrot.lane.b32.xlu1 %v7290_v10, %s11076_s19 }
 0x75d   : > { %6171 = vrot.lane.b32.xlu0 %v13888_v4, %s11081_s29 }
 0x75e   : > { %v5968_v0 = vpop.permute.xlu1 %5967 }
 0x75f   : > { %6063 = vst.msk [vmem:[#allocation3] sm:$0xff] %vm1747_vm6, %v5968_v0  ;;  %v5777_v45 = vpop.permute.xlu0 %5776 }
 0x760   : > { %5871 = vst.msk [vmem:[#allocation3 + $0x8] sm:$0xff] %vm1553_vm5, %v5777_v45  ;;  %5408 = vrot.lane.b32.xlu1 %v13716_v62, %s11077_s20 }
 0x761   : > { %7545 = vrot.lane.b32.xlu0 %v7481_v21, %s11077_s20 }
 0x762   : > { %v5395_v48 = vpop.permute.xlu1 %5394 }
 0x763   : > { %5488 = vst.msk [vmem:[#allocation3 + $0x10] sm:$0xff] %vm1167_vm3, %v5395_v48  ;;  %v5205_v37 = vpop.permute.xlu0 %5204 }
 0x764   : > { %5297 = vst.msk [vmem:[#allocation3 + $0x18] sm:$0xff] %vm974_vm2, %v5205_v37  ;;  %6173 = vrot.lane.b32.xlu1 %v6102_v18, %s11081_s29  ;;  %v7291_v18 = vld [vmem:[#allocation2 + $0x30] sm:$0xff] }
 0x765   : > { %5598 = vrot.lane.b32.xlu0 %v5526_v25, %s11078_s21 }
 0x766   : > { %v6160_v49 = vpop.permute.xlu1 %6159 }
 0x767   : > { %6255 = vst.msk [vmem:[#allocation3] sm:$0xff] %vm1940_vm8, %v6160_v49  ;;  %v5970_v33 = vpop.permute.xlu0 %5969  ;;  %v8058_v49 = vld [vmem:[#allocation2 + $0x200] sm:$0xff] }
 0x768   : > { %6064 = vst.msk [vmem:[#allocation3 + $0x8] sm:$0xff] %vm1747_vm6, %v5970_v33  ;;  %7547 = vrot.lane.b32.xlu1 %v13692_v43, %s11077_s20 }
 0x769   : > { %6363 = vrot.lane.b32.xlu0 %v13880_v14, %s11082_s15 }
 0x76a   : > { %v5587_v54 = vpop.permute.xlu1 %5586 }
 0x76b   : > { %5680 = vst.msk [vmem:[#allocation3 + $0x10] sm:$0xff] %vm1360_vm4, %v5587_v54  ;;  %v5397_v57 = vpop.permute.xlu0 %5396  ;;  %v7866_v54 = vld [vmem:[#allocation2 + $0x118] sm:$0xff] }
 0x76c   : > { %5489 = vst.msk [vmem:[#allocation3 + $0x18] sm:$0xff] %vm1167_vm3, %v5397_v57  ;;  %5026 = vrot.lane.b32.xlu1 %v13729_v6, %s11075_s18 }
 0x76d   : > { %7737 = vrot.lane.b32.xlu0 %v13692_v43, %s11078_s21  ;;  %v13939_v43 = vld [vmem:[#allocation2 + $0x28] sm:$0xff] }
 0x76e   : > { %v6352_v7 = vpop.permute.xlu1 %6351 }
 0x76f   : > { %6447 = vst.msk [vmem:[#allocation3] sm:$0xff] %vm2133_vm9, %v6352_v7  ;;  %v6162_v26 = vpop.permute.xlu0 %6161 }
 0x770   : > { %6256 = vst.msk [vmem:[#allocation3 + $0x8] sm:$0xff] %vm1940_vm8, %v6162_v26  ;;  %5790 = vrot.lane.b32.xlu1 %v13716_v62, %s11079_s22  ;;  %v13947_v62 = vpop.f32.mrb[33].mxu1 }
 0x771   : > { %5600 = vrot.lane.b32.xlu0 %v5527_v12, %s11078_s21  ;;  %v13953_v44 = vpop.f32.mrb[34].mxu1 }
 0x772   : > { %v5589_v34 = vpop.permute.xlu1 %5588  ;;  %v13958_v63 = vpop.f32.mrb[35].mxu1 }
 0x773   : > { %5681 = vst.msk [vmem:[#allocation3 + $0x18] sm:$0xff] %vm1360_vm4, %v5589_v34  ;;  %v5015_v28 = vpop.permute.xlu0 %5014  ;;  %v13963_v13 = vpop.f32.mrb[36].mxu1 }
 0x774   : > { %5106 = vst.msk [vmem:[#allocation3 + $0x20] sm:$0xff] %vm781_vm1, %v5015_v28  ;;  %7165 = vrot.lane.b32.xlu1 %v13939_v43, %s11075_s18  ;;  %v13968_v60 = vpop.f32.mrb[37].mxu1 }
 0x775   : > { %6365 = vrot.lane.b32.xlu0 %v6294_v40, %s11082_s15  ;;  %v13976_v45 = vpop.f32.mrb[38].mxu1  ;;  %v6103_v40 = vld [vmem:[#allocation2 + $0x208] sm:$0xff] }
 0x776   : > { %v6354_v16 = vpop.permute.xlu1 %6353  ;;  %v6479_v29 = vld [vmem:[#allocation3] sm:$0xff] }
 0x777   : > { %6448 = vst.msk [vmem:[#allocation3 + $0x8] sm:$0xff] %vm2133_vm9, %v6354_v16  ;;  %v5779_v20 = vpop.permute.xlu0 %5778  ;;  %10688 = vmatprep.mubr.msk.f32.mxu0 %vm2203_vm10, %v6479_v29 }
 0x778   : > { %7065 = vst.msk [vmem:[#allocation3] sm:$0xff] %vm298_vm0, %v7033_v24  ;;  %7929 = vrot.lane.b32.xlu1 %v13697_v58, %s11079_s22  ;;  %v5912_v24 = vld [vmem:[#allocation2 + $0x20c] sm:$0xff] }
 0x779   : > { %5872 = vst.msk [vmem:[#allocation3 + $0x10] sm:$0xff] %vm1553_vm5, %v5779_v20  ;;  %7739 = vrot.lane.b32.xlu0 %v13697_v58, %s11078_s21 }
 0x77a   : > { %v5207_v2 = vpop.permute.xlu1 %5206 }
 0x77b   : > { %5298 = vst.msk [vmem:[#allocation3 + $0x20] sm:$0xff] %vm974_vm2, %v5207_v2  ;;  %v5017_v10 = vpop.permute.xlu0 %5016 }
 0x77c   : > { %5107 = vst.msk [vmem:[#allocation3 + $0x28] sm:$0xff] %vm781_vm1, %v5017_v10  ;;  %5218 = vrot.lane.b32.xlu1 %v13731_v8, %s11076_s19  ;;  %v13980_v8 = vpop.f32.mrb[39].mxu1  ;;  %v7292_v10 = vld [vmem:[#allocation2 + $0x38] sm:$0xff] }
 0x77d   : > { %5028 = vrot.lane.b32.xlu0 %v13746_v11, %s11075_s18  ;;  %16351 = vst [vmem:[#allocation35_spill] sm:$0xff] %v13980_v8  ;;  %v13985_v37 = vpop.f32.mrb[40].mxu1 }
 0x77e   : > { %v5972_v0 = vpop.permute.xlu1 %5971  ;;  %v6480_v21 = vld [vmem:[#allocation3 + $0x8] sm:$0xff]  ;;  %16352 = vst [vmem:[#allocation36_spill] sm:$0xff] %v13985_v37 }
 0x77f   : > { %6065 = vst.msk [vmem:[#allocation3 + $0x10] sm:$0xff] %vm1747_vm6, %v5972_v0  ;;  %v5781_v58 = vpop.permute.xlu0 %5780  ;;  %10689 = vmatmul.mubr.msk.f32.vlgmr.msra.gmra.mrb[16].mxu0 %vm2203_vm10, %v6480_v21 }
 0x780   : > { %7066 = vst.msk [vmem:[#allocation3 + $0x8] sm:$0xff] %vm298_vm0, %v13852_v42  ;;  %5983 = vrot.lane.b32.xlu1 %v5911_v17, %s11080_s23  ;;  %v13989_v42 = vpop.f32.mrb[41].mxu1  ;;  %v7035_v17 = vld [vmem:[#allocation2 + $0x20] sm:$0xff] }
 0x781   : > { %5873 = vst.msk [vmem:[#allocation3 + $0x18] sm:$0xff] %vm1553_vm5, %v5781_v58  ;;  %5792 = vrot.lane.b32.xlu0 %v13756_v50, %s11079_s22  ;;  %16353 = vst [vmem:[#allocation37_spill] sm:$0xff] %v13989_v42  ;;  %v13993_v57 = vpop.f32.mrb[42].mxu1 }
 0x782   : > { %v5399_v48 = vpop.permute.xlu1 %5398  ;;  %16354 = vst [vmem:[#allocation38_spill] sm:$0xff] %v13993_v57  ;;  %v13997_v7 = vpop.f32.mrb[43].mxu1 }
 0x783   : > { %5490 = vst.msk [vmem:[#allocation3 + $0x20] sm:$0xff] %vm1167_vm3, %v5399_v48  ;;  %v5209_v25 = vpop.permute.xlu0 %5208  ;;  %16355 = vst [vmem:[#allocation39_spill] sm:$0xff] %v13997_v7  ;;  %v14001_v26 = vpop.f32.mrb[44].mxu1  ;;  %v7878_v7 = vld [vmem:[#allocation2 + $0x1d8] sm:$0xff] }
 0x784   : > { %5299 = vst.msk [vmem:[#allocation3 + $0x28] sm:$0xff] %vm974_vm2, %v5209_v25  ;;  %7357 = vrot.lane.b32.xlu1 %v7291_v18, %s11076_s19  ;;  %16356 = vst [vmem:[#allocation40_spill] sm:$0xff] %v14001_v26  ;;  %v14006_v34 = vpop.f32.mrb[45].mxu1 }
 0x785   : > { %7167 = vrot.lane.b32.xlu0 %v7291_v18, %s11075_s18  ;;  %16357 = vst [vmem:[#allocation11_spill] sm:$0xff] %v14006_v34  ;;  %v14011_v29 = vpop.f32.mrb[46].mxu1  ;;  %v5528_v18 = vld [vmem:[#allocation2 + $0x1a8] sm:$0xff] }
 0x786   : > { %v6164_v33 = vpop.permute.xlu1 %6163  ;;  %16358 = vst [vmem:[#allocation12_spill] sm:$0xff] %v14011_v29  ;;  %v14015_v20 = vpop.f32.mrb[47].mxu1  ;;  %v7876_v29 = vld [vmem:[#allocation2 + $0x1b8] sm:$0xff] }
 0x787   : > { %6257 = vst.msk [vmem:[#allocation3 + $0x10] sm:$0xff] %vm1940_vm8, %v6164_v33  ;;  %v5974_v50 = vpop.permute.xlu0 %5973  ;;  %16359 = vst [vmem:[#allocation13_spill] sm:$0xff] %v14015_v20 }
 0x788   : > { %6066 = vst.msk [vmem:[#allocation3 + $0x18] sm:$0xff] %vm1747_vm6, %v5974_v50  ;;  %8122 = vrot.lane.b32.xlu1 %v8058_v49, %s11080_s23  ;;  %v4890_v50 = vld [vmem:[#allocation2 + $0x144] sm:$0xff] }
 0x789   : > { %7931 = vrot.lane.b32.xlu0 %v7866_v54, %s11079_s22  ;;  %v6104_v54 = vld [vmem:[#allocation2 + $0x210] sm:$0xff]  ;;  %4922 = vst.msk [vmem:[#allocation3 + $0x60] sm:$0xff] %vm298_vm0, %v4890_v50 }
 0x78a   : > { %v5591_v12 = vpop.permute.xlu1 %5590 }
 0x78b   : > { %5682 = vst.msk [vmem:[#allocation3 + $0x20] sm:$0xff] %vm1360_vm4, %v5591_v12  ;;  %v5401_v36 = vpop.permute.xlu0 %5400 }
 0x78c   : > { %5491 = vst.msk [vmem:[#allocation3 + $0x28] sm:$0xff] %vm1167_vm3, %v5401_v36  ;;  %5410 = vrot.lane.b32.xlu1 %v13765_v22, %s11077_s20  ;;  %v7483_v22 = vld [vmem:[#allocation2 + $0x120] sm:$0xff] }
 0x78d   : > { %5220 = vrot.lane.b32.xlu0 %v13767_v23, %s11076_s19 }
 0x78e   : > { %v6356_v28 = vpop.permute.xlu1 %6355 }
 0x78f   : > { %6449 = vst.msk [vmem:[#allocation3 + $0x10] sm:$0xff] %vm2133_vm9, %v6356_v28  ;;  %v6166_v16 = vpop.permute.xlu0 %6165 }
 0x790   : > { %6258 = vst.msk [vmem:[#allocation3 + $0x18] sm:$0xff] %vm1940_vm8, %v6166_v16  ;;  %6175 = vrot.lane.b32.xlu1 %v6103_v40, %s11081_s29  ;;  %v10291_v16 = vld [vmem:[%s16177_s1 + $0x80] sm:$0xff] }
 0x791   : > { %5985 = vrot.lane.b32.xlu0 %v5912_v24, %s11080_s23 }
 0x792   : > { %v5593_v2 = vpop.permute.xlu1 %5592 }
 0x793   : > { %5683 = vst.msk [vmem:[#allocation3 + $0x28] sm:$0xff] %vm1360_vm4, %v5593_v2  ;;  %v5019_v23 = vpop.permute.xlu0 %5018 }
 0x794   : > { %5108 = vst.msk [vmem:[#allocation3 + $0x30] sm:$0xff] %vm781_vm1, %v5019_v23  ;;  %7549 = vrot.lane.b32.xlu1 %v7483_v22, %s11077_s20 }
 0x795   : > { %7359 = vrot.lane.b32.xlu0 %v7292_v10, %s11076_s19  ;;  %v14057_v10 = vld [vmem:[#allocation2 + $0x148] sm:$0xff] }
 0x796   : > { %v6358_v0 = vpop.permute.xlu1 %6357  ;;  %v6481_v21 = vld [vmem:[#allocation3 + $0x10] sm:$0xff] }
 0x797   : > { %6450 = vst.msk [vmem:[#allocation3 + $0x18] sm:$0xff] %vm2133_vm9, %v6358_v0  ;;  %v5783_v58 = vpop.permute.xlu0 %5782  ;;  %10691 = vmatprep.mubr.msk.f32.mxu0 %vm2203_vm10, %v6481_v21  ;;  %v10293_v0 = vld [vmem:[%s16177_s1 + $0x90] sm:$0xff] }
 0x798   : > { %7067 = vst.msk [vmem:[#allocation3 + $0x10] sm:$0xff] %vm298_vm0, %v7035_v17  ;;  %8314 = vrot.lane.b32.xlu1 %v6103_v40, %s11081_s29  ;;  %v10292_v17 = vld [vmem:[%s16177_s1 + $0x88] sm:$0xff] }
 0x799   : > { %5874 = vst.msk [vmem:[#allocation3 + $0x20] sm:$0xff] %vm1553_vm5, %v5783_v58  ;;  %8124 = vrot.lane.b32.xlu0 %v6103_v40, %s11080_s23  ;;  %v10892_v21 = vpack.c.bf16 %v10293_v0, %v10292_v17  ;;  %v6296_v58 = vld [vmem:[#allocation2 + $0x214] sm:$0xff] }
 0x79a   : > { %v5211_v48 = vpop.permute.xlu1 %5210 }
 0x79b   : > { %5300 = vst.msk [vmem:[#allocation3 + $0x30] sm:$0xff] %vm974_vm2, %v5211_v48  ;;  %v5021_v25 = vpop.permute.xlu0 %5020  ;;  %v4891_v48 = vld [vmem:[#allocation2 + $0x14c] sm:$0xff] }
 0x79c   : > { %5109 = vst.msk [vmem:[#allocation3 + $0x38] sm:$0xff] %vm781_vm1, %v5021_v25  ;;  %5602 = vrot.lane.b32.xlu1 %v5528_v18, %s11078_s21 }
 0x79d   : > { %5412 = vrot.lane.b32.xlu0 %v13775_v31, %s11077_s20  ;;  %4923 = vst.msk [vmem:[#allocation3 + $0x68] sm:$0xff] %vm298_vm0, %v4891_v48 }
 0x79e   : > { %v5976_v49 = vpop.permute.xlu1 %5975  ;;  %v6482_v33 = vld [vmem:[#allocation3 + $0x18] sm:$0xff] }
 0x79f   : > { %6067 = vst.msk [vmem:[#allocation3 + $0x20] sm:$0xff] %vm1747_vm6, %v5976_v49  ;;  %v5785_v12 = vpop.permute.xlu0 %5784  ;;  %10692 = vmatmul.mubr.msk.f32.gmra.mrb[18].mxu0 %vm2203_vm10, %v6482_v33  ;;  %v10294_v49 = vld [vmem:[%s16177_s1 + $0x98] sm:$0xf] }
 0x7a0   : > { %7068 = vst.msk [vmem:[#allocation3 + $0x18] sm:$0xff] %vm298_vm0, %v13939_v43  ;;  %6367 = vrot.lane.b32.xlu1 %v5912_v24, %s11082_s15  ;;  %v10290_v24 = vld [vmem:[%s16177_s1 + $0x78] sm:$0xff] }
 0x7a1   : > { %5875 = vst.msk [vmem:[#allocation3 + $0x28] sm:$0xff] %vm1553_vm5, %v5785_v12  ;;  %6177 = vrot.lane.b32.xlu0 %v6104_v54, %s11081_s29  ;;  %v10888_v22 = vpack.c.bf16 %v10291_v16, %v10290_v24  ;;  %v7037_v12 = vld [vmem:[#allocation2 + $0x40] sm:$0xff]  ;;  %v14093_v24 = vld [vmem:[#allocation2 + $0x150] sm:$0xff] }
 0x7a2   : > { %v5403_v36 = vpop.permute.xlu1 %5402 }
 0x7a3   : > { %5492 = vst.msk [vmem:[#allocation3 + $0x30] sm:$0xff] %vm1167_vm3, %v5403_v36  ;;  %v5213_v40 = vpop.permute.xlu0 %5212  ;;  %10889 = vmatprep.subr.bf16.mxu1 %v10888_v22 }
 0x7a4   : > { %5301 = vst.msk [vmem:[#allocation3 + $0x38] sm:$0xff] %vm974_vm2, %v5213_v40  ;;  %7741 = vrot.lane.b32.xlu1 %v13729_v6, %s11078_s21  ;;  %10891 = vmatpush3.bf16.msra.mxu1 %v10888_v22  ;;  %v14096_v22 = vld [vmem:[#allocation2 + $0x18c] sm:$0xff] }
 0x7a5   : > { %7551 = vrot.lane.b32.xlu0 %v13729_v6, %s11077_s20  ;;  %v5529_v6 = vld [vmem:[#allocation2 + $0x1b0] sm:$0xff]  ;;  %10893 = vmatprep.subr.bf16.mxu1 %v10892_v21  ;;  %4927 = vst.msk [vmem:[#allocation3 + $0x88] sm:$0xff] %vm298_vm0, %v14096_v22 }
 0x7a6   : > { %v6168_v43 = vpop.permute.xlu1 %6167 }
 0x7a7   : > { %6259 = vst.msk [vmem:[#allocation3 + $0x20] sm:$0xff] %vm1940_vm8, %v6168_v43  ;;  %v5978_v28 = vpop.permute.xlu0 %5977 }
 0x7a8   : > { %6068 = vst.msk [vmem:[#allocation3 + $0x28] sm:$0xff] %vm1747_vm6, %v5978_v28  ;;  %8506 = vrot.lane.b32.xlu1 %v6104_v54, %s11082_s15  ;;  %10895 = vmatpush3.bf16.msra.mxu1 %v10892_v21  ;;  %v8060_v21 = vld [vmem:[#allocation2 + $0x220] sm:$0xff] }
 0x7a9   : > { %8316 = vrot.lane.b32.xlu0 %v6104_v54, %s11081_s29  ;;  %v7101_v54 = vld [vmem:[#allocation2 + $0x48] sm:$0xff]  ;;  %10744 = vmatprep.subr.msk.mxu1 %vm2300_vm7, %v10294_v49 }
 0x7aa   : > { %v5595_v2 = vpop.permute.xlu1 %5594 }
 0x7ab   : > { %5684 = vst.msk [vmem:[#allocation3 + $0x30] sm:$0xff] %vm1360_vm4, %v5595_v2  ;;  %v5405_v23 = vpop.permute.xlu0 %5404 }
 0x7ac   : > { %5493 = vst.msk [vmem:[#allocation3 + $0x38] sm:$0xff] %vm1167_vm3, %v5405_v23  ;;  %5604 = vrot.lane.b32.xlu1 %v5529_v6, %s11078_s21  ;;  %10745 = vmatpush3.msk.msra.mxu1 %vm2300_vm7, %v10294_v49  ;;  %v6105_v49 = vld [vmem:[#allocation2 + $0x228] sm:$0xff] }
 0x7ad   : > { %5030 = vrot.lane.b32.xlu0 %v14057_v10, %s11075_s18 }
 0x7ae   : > { %v6360_v18 = vpop.permute.xlu1 %6359 }
 0x7af   : > { %6451 = vst.msk [vmem:[#allocation3 + $0x20] sm:$0xff] %vm2133_vm9, %v6360_v18  ;;  %v6170_v25 = vpop.permute.xlu0 %6169  ;;  %v7868_v18 = vld [vmem:[#allocation2 + $0x138] sm:$0xff] }
 0x7b0   : > { %6260 = vst.msk [vmem:[#allocation3 + $0x28] sm:$0xff] %vm1940_vm8, %v6170_v25  ;;  %6369 = vrot.lane.b32.xlu1 %v6296_v58, %s11082_s15 }
 0x7b1   : > { %5794 = vrot.lane.b32.xlu0 %v13775_v31, %s11079_s22  ;;  %v8443_v31 = vld [vmem:[#allocation2 + $0x218] sm:$0xff] }
 0x7b2   : > { %v5597_v33 = vpop.permute.xlu1 %5596 }
 0x7b3   : > { %5685 = vst.msk [vmem:[#allocation3 + $0x38] sm:$0xff] %vm1360_vm4, %v5597_v33  ;;  %v5023_v50 = vpop.permute.xlu0 %5022 }
 0x7b4   : > { %5110 = vst.msk [vmem:[#allocation3 + $0x40] sm:$0xff] %vm781_vm1, %v5023_v50  ;;  %7743 = vrot.lane.b32.xlu1 %v13746_v11, %s11078_s21 }
 0x7b5   : > { %7169 = vrot.lane.b32.xlu0 %v7101_v54, %s11075_s18 }
 0x7b6   : > { %v6362_v36 = vpop.permute.xlu1 %6361  ;;  %v6483_v40 = vld [vmem:[#allocation3 + $0x20] sm:$0xff] }
 0x7b7   : > { %6452 = vst.msk [vmem:[#allocation3 + $0x28] sm:$0xff] %vm2133_vm9, %v6362_v36  ;;  %v5787_v43 = vpop.permute.xlu0 %5786  ;;  %10694 = vmatprep.mubr.msk.f32.mxu0 %vm2203_vm10, %v6483_v40  ;;  %v7294_v36 = vld [vmem:[#allocation2 + $0x58] sm:$0xff] }
 0x7b8   : > { %7069 = vst.msk [vmem:[#allocation3 + $0x20] sm:$0xff] %vm298_vm0, %v7037_v12  ;;  %8508 = vrot.lane.b32.xlu1 %v8443_v31, %s11082_s15  ;;  %v7485_v12 = vld [vmem:[#allocation2 + $0x140] sm:$0xff] }
 0x7b9   : > { %5876 = vst.msk [vmem:[#allocation3 + $0x30] sm:$0xff] %vm1553_vm5, %v5787_v43  ;;  %7933 = vrot.lane.b32.xlu0 %v13746_v11, %s11079_s22  ;;  %v5913_v11 = vld [vmem:[#allocation2 + $0x224] sm:$0xff] }
 0x7ba   : > { %v5025_v28 = vpop.permute.xlu1 %5024 }
 0x7bb   : > { %5111 = vst.msk [vmem:[#allocation3 + $0x48] sm:$0xff] %vm781_vm1, %v5025_v28  ;;  %v7162_v16 = vpop.permute.xlu0 %7161 }
 0x7bc   : > { %7257 = vst.msk [vmem:[#allocation3] sm:$0xff] %vm781_vm1, %v7162_v16  ;;  %5222 = vrot.lane.b32.xlu1 %v13781_v19, %s11076_s19  ;;  %v7293_v19 = vld [vmem:[#allocation2 + $0x50] sm:$0xff] }
 0x7bd   : > { %5032 = vrot.lane.b32.xlu0 %v14093_v24, %s11075_s18 }
 0x7be   : > { %v5789_v6 = vpop.permute.xlu1 %5788  ;;  %v6484_v2 = vld [vmem:[#allocation3 + $0x28] sm:$0xff] }
 0x7bf   : > { %5877 = vst.msk [vmem:[#allocation3 + $0x38] sm:$0xff] %vm1553_vm5, %v5789_v6  ;;  %v5215_v23 = vpop.permute.xlu0 %5214  ;;  %10695 = vmatmul.mubr.msk.f32.gmra.mrb[20].mxu0 %vm2203_vm10, %v6484_v2  ;;  %v4892_v6 = vld [vmem:[#allocation2 + $0x164] sm:$0xff] }
 0x7c0   : > { %7070 = vst.msk [vmem:[#allocation3 + $0x28] sm:$0xff] %vm298_vm0, %v7101_v54  ;;  %5987 = vrot.lane.b32.xlu1 %v5913_v11, %s11080_s23  ;;  %v5914_v54 = vld [vmem:[#allocation2 + $0x22c] sm:$0xff]  ;;  %4924 = vst.msk [vmem:[#allocation3 + $0x70] sm:$0xff] %vm298_vm0, %v4892_v6 }
 0x7c1   : > { %5302 = vst.msk [vmem:[#allocation3 + $0x40] sm:$0xff] %vm974_vm2, %v5215_v23  ;;  %5796 = vrot.lane.b32.xlu0 %v13791_v30, %s11079_s22  ;;  %v6106_v11 = vld [vmem:[#allocation2 + $0x230] sm:$0xff] }
 0x7c2   : > { %v7164_v17 = vpop.permute.xlu1 %7163 }
 0x7c3   : > { %7258 = vst.msk [vmem:[#allocation3 + $0x8] sm:$0xff] %vm781_vm1, %v7164_v17  ;;  %v5980_v0 = vpop.permute.xlu0 %5979 }
 0x7c4   : > { %6069 = vst.msk [vmem:[#allocation3 + $0x30] sm:$0xff] %vm1747_vm6, %v5980_v0  ;;  %7361 = vrot.lane.b32.xlu1 %v7293_v19, %s11076_s19  ;;  %v7039_v0 = vld [vmem:[#allocation2 + $0x60] sm:$0xff] }
 0x7c5   : > { %7171 = vrot.lane.b32.xlu0 %v7293_v19, %s11075_s18 }
 0x7c6   : > { %v5217_v58 = vpop.permute.xlu1 %5216 }
 0x7c7   : > { %5303 = vst.msk [vmem:[#allocation3 + $0x48] sm:$0xff] %vm974_vm2, %v5217_v58  ;;  %v7354_v48 = vpop.permute.xlu0 %7353 }
 0x7c8   : > { %7449 = vst.msk [vmem:[#allocation3] sm:$0xff] %vm974_vm2, %v7354_v48  ;;  %8126 = vrot.lane.b32.xlu1 %v8060_v21, %s11080_s23 }
 0x7c9   : > { %7935 = vrot.lane.b32.xlu0 %v7868_v18, %s11079_s22 }
 0x7ca   : > { %v5982_v30 = vpop.permute.xlu1 %5981 }
 0x7cb   : > { %6070 = vst.msk [vmem:[#allocation3 + $0x38] sm:$0xff] %vm1747_vm6, %v5982_v30  ;;  %v5407_v25 = vpop.permute.xlu0 %5406  ;;  %v4893_v30 = vld [vmem:[#allocation2 + $0x16c] sm:$0xff] }
 0x7cc   : > { %5494 = vst.msk [vmem:[#allocation3 + $0x40] sm:$0xff] %vm1167_vm3, %v5407_v25  ;;  %5414 = vrot.lane.b32.xlu1 %v13800_v39, %s11077_s20 }
 0x7cd   : > { %5224 = vrot.lane.b32.xlu0 %v13802_v51, %s11076_s19  ;;  %4925 = vst.msk [vmem:[#allocation3 + $0x78] sm:$0xff] %vm298_vm0, %v4893_v30 }
 0x7ce   : > { %v7356_v33 = vpop.permute.xlu1 %7355 }
 0x7cf   : > { %7450 = vst.msk [vmem:[#allocation3 + $0x8] sm:$0xff] %vm974_vm2, %v7356_v33  ;;  %v6172_v50 = vpop.permute.xlu0 %6171  ;;  %v7103_v33 = vld [vmem:[#allocation2 + $0x68] sm:$0xff] }
 0x7d0   : > { %6261 = vst.msk [vmem:[#allocation3 + $0x30] sm:$0xff] %vm1940_vm8, %v6172_v50  ;;  %6179 = vrot.lane.b32.xlu1 %v6105_v49, %s11081_s29 }
 0x7d1   : > { %5989 = vrot.lane.b32.xlu0 %v5914_v54, %s11080_s23 }
 0x7d2   : > { %v5409_v31 = vpop.permute.xlu1 %5408 }
 0x7d3   : > { %5495 = vst.msk [vmem:[#allocation3 + $0x48] sm:$0xff] %vm1167_vm3, %v5409_v31  ;;  %v7546_v39 = vpop.permute.xlu0 %7545 }
 0x7d4   : > { %7641 = vst.msk [vmem:[#allocation3] sm:$0xff] %vm1167_vm3, %v7546_v39  ;;  %7553 = vrot.lane.b32.xlu1 %v7485_v12, %s11077_s20  ;;  %v14195_v39 = vld [vmem:[#allocation2 + $0x244] sm:$0xff] }
 0x7d5   : > { %7363 = vrot.lane.b32.xlu0 %v7294_v36, %s11076_s19  ;;  %v14186_v36 = vld [vmem:[#allocation2 + $0x1ac] sm:$0xff] }
 0x7d6   : > { %v6174_v51 = vpop.permute.xlu1 %6173  ;;  %4929 = vst.msk [vmem:[#allocation3 + $0x98] sm:$0xff] %vm298_vm0, %v14186_v36 }
 0x7d7   : > { %6262 = vst.msk [vmem:[#allocation3 + $0x38] sm:$0xff] %vm1940_vm8, %v6174_v51  ;;  %v5599_v40 = vpop.permute.xlu0 %5598 }
 0x7d8   : > { %5686 = vst.msk [vmem:[#allocation3 + $0x40] sm:$0xff] %vm1360_vm4, %v5599_v40  ;;  %8318 = vrot.lane.b32.xlu1 %v6105_v49, %s11081_s29 }
 0x7d9   : > { %8128 = vrot.lane.b32.xlu0 %v6105_v49, %s11080_s23 }
 0x7da   : > { %v7548_v43 = vpop.permute.xlu1 %7547 }
 0x7db   : > { %7642 = vst.msk [vmem:[#allocation3 + $0x8] sm:$0xff] %vm1167_vm3, %v7548_v43  ;;  %v6364_v28 = vpop.permute.xlu0 %6363 }
 0x7dc   : > { %6453 = vst.msk [vmem:[#allocation3 + $0x30] sm:$0xff] %vm2133_vm9, %v6364_v28  ;;  %5606 = vrot.lane.b32.xlu1 %v13810_v59, %s11078_s21 }
 0x7dd   : > { %5416 = vrot.lane.b32.xlu0 %v13812_v53, %s11077_s20 }
 0x7de   : > { %v5027_v16 = vpop.permute.xlu1 %5026 }
 0x7df   : > { %5112 = vst.msk [vmem:[#allocation3 + $0x50] sm:$0xff] %vm781_vm1, %v5027_v16  ;;  %v7738_v2 = vpop.permute.xlu0 %7737  ;;  %v7870_v16 = vld [vmem:[#allocation2 + $0x158] sm:$0xff] }
 0x7e0   : > { %7833 = vst.msk [vmem:[#allocation3] sm:$0xff] %vm1360_vm4, %v7738_v2  ;;  %6371 = vrot.lane.b32.xlu1 %v5914_v54, %s11082_s15  ;;  %v8445_v54 = vld [vmem:[#allocation2 + $0x238] sm:$0xff]  ;;  %v14217_v2 = vld [vmem:[#allocation2 + $0x248] sm:$0xff] }
 0x7e1   : > { %6181 = vrot.lane.b32.xlu0 %v6106_v11, %s11081_s29 }
 0x7e2   : > { %v5791_v23 = vpop.permute.xlu1 %5790 }
 0x7e3   : > { %5878 = vst.msk [vmem:[#allocation3 + $0x40] sm:$0xff] %vm1553_vm5, %v5791_v23  ;;  %v5601_v59 = vpop.permute.xlu0 %5600  ;;  %v6485_v19 = vld [vmem:[#allocation3 + $0x30] sm:$0xff] }
 0x7e4   : > { %5687 = vst.msk [vmem:[#allocation3 + $0x48] sm:$0xff] %vm1360_vm4, %v5601_v59  ;;  %7745 = vrot.lane.b32.xlu1 %v14057_v10, %s11078_s21  ;;  %10697 = vmatprep.mubr.msk.f32.mxu0 %vm2203_vm10, %v6485_v19  ;;  %v14219_v59 = vld [vmem:[#allocation2 + $0x24c] sm:$0xff] }
 0x7e5   : > { %7555 = vrot.lane.b32.xlu0 %v14057_v10, %s11077_s20  ;;  %7071 = vst.msk [vmem:[#allocation3 + $0x30] sm:$0xff] %vm298_vm0, %v7039_v0  ;;  %v6298_v10 = vld [vmem:[#allocation2 + $0x234] sm:$0xff] }
 0x7e6   : > { %v7166_v17 = vpop.permute.xlu1 %7165  ;;  %v7296_v0 = vld [vmem:[#allocation2 + $0x78] sm:$0xff] }
 0x7e7   : > { %7259 = vst.msk [vmem:[#allocation3 + $0x10] sm:$0xff] %vm781_vm1, %v7166_v17  ;;  %v6366_v21 = vpop.permute.xlu0 %6365 }
 0x7e8   : > { %6454 = vst.msk [vmem:[#allocation3 + $0x38] sm:$0xff] %vm2133_vm9, %v6366_v21  ;;  %8510 = vrot.lane.b32.xlu1 %v6106_v11, %s11082_s15 }
 0x7e9   : > { %8320 = vrot.lane.b32.xlu0 %v6106_v11, %s11081_s29 }
 0x7ea   : > { %v7930_v58 = vpop.permute.xlu1 %7929 }
 0x7eb   : > { %8025 = vst.msk [vmem:[#allocation3] sm:$0xff] %vm1553_vm5, %v7930_v58  ;;  %v7740_v18 = vpop.permute.xlu0 %7739 }
 0x7ec   : > { %7834 = vst.msk [vmem:[#allocation3 + $0x8] sm:$0xff] %vm1360_vm4, %v7740_v18  ;;  %5608 = vrot.lane.b32.xlu1 %v13828_v9, %s11078_s21 }
 0x7ed   : > { %5034 = vrot.lane.b32.xlu0 %v13818_v61, %s11075_s18 }
 0x7ee   : > { %v5219_v48 = vpop.permute.xlu1 %5218 }
 0x7ef   : > { %5304 = vst.msk [vmem:[#allocation3 + $0x50] sm:$0xff] %vm974_vm2, %v5219_v48  ;;  %v5029_v25 = vpop.permute.xlu0 %5028  ;;  %v6486_v49 = vld [vmem:[#allocation3 + $0x38] sm:$0xff] }
 0x7f0   : > { %5113 = vst.msk [vmem:[#allocation3 + $0x58] sm:$0xff] %vm781_vm1, %v5029_v25  ;;  %6373 = vrot.lane.b32.xlu1 %v6298_v10, %s11082_s15  ;;  %10698 = vmatmul.mubr.msk.f32.gmra.mrb[22].mxu0 %vm2203_vm10, %v6486_v49  ;;  %v14244_v25 = vld [vmem:[#allocation2 + $0x250] sm:$0xff]  ;;  %v4894_v49 = vld [vmem:[#allocation2 + $0x184] sm:$0xff] }
 0x7f1   : > { %7072 = vst.msk [vmem:[#allocation3 + $0x38] sm:$0xff] %vm298_vm0, %v7103_v33  ;;  %5798 = vrot.lane.b32.xlu0 %v13812_v53, %s11079_s22  ;;  %4926 = vst.msk [vmem:[#allocation3 + $0x80] sm:$0xff] %vm298_vm0, %v4894_v49 }
 0x7f2   : > { %v5984_v61 = vpop.permute.xlu1 %5983 }
 0x7f3   : > { %6071 = vst.msk [vmem:[#allocation3 + $0x40] sm:$0xff] %vm1747_vm6, %v5984_v61  ;;  %v5793_v9 = vpop.permute.xlu0 %5792 }
 0x7f4   : > { %5879 = vst.msk [vmem:[#allocation3 + $0x48] sm:$0xff] %vm1553_vm5, %v5793_v9  ;;  %7747 = vrot.lane.b32.xlu1 %v14093_v24, %s11078_s21 }
 0x7f5   : > { %7173 = vrot.lane.b32.xlu0 %v7103_v33, %s11075_s18 }
 0x7f6   : > { %v7358_v50 = vpop.permute.xlu1 %7357 }
 0x7f7   : > { %7451 = vst.msk [vmem:[#allocation3 + $0x10] sm:$0xff] %vm974_vm2, %v7358_v50  ;;  %v7168_v12 = vpop.permute.xlu0 %7167  ;;  %v7041_v50 = vld [vmem:[#allocation2 + $0x80] sm:$0xff] }
 0x7f8   : > { %7260 = vst.msk [vmem:[#allocation3 + $0x18] sm:$0xff] %vm781_vm1, %v7168_v12  ;;  %8512 = vrot.lane.b32.xlu1 %v8445_v54, %s11082_s15 }
 0x7f9   : > { %7937 = vrot.lane.b32.xlu0 %v14093_v24, %s11079_s22 }
 0x7fa   : > { %v8123_v53 = vpop.permute.xlu1 %8122 }
 0x7fb   : > { %8218 = vst.msk [vmem:[#allocation3] sm:$0xff] %vm1747_vm6, %v8123_v53  ;;  %v7932_v31 = vpop.permute.xlu0 %7931  ;;  %v14265_v53 = vld [vmem:[#allocation2 + $0x1f0] sm:$0xff] }
 0x7fc   : > { %8026 = vst.msk [vmem:[#allocation3 + $0x8] sm:$0xff] %vm1553_vm5, %v7932_v31  ;;  %5226 = vrot.lane.b32.xlu1 %v13820_v3, %s11076_s19  ;;  %v7295_v3 = vld [vmem:[#allocation2 + $0x70] sm:$0xff] }
 0x7fd   : > { %5036 = vrot.lane.b32.xlu0 %v13836_v41, %s11075_s18  ;;  %v8062_v41 = vld [vmem:[#allocation2 + $0x240] sm:$0xff] }
 0x7fe   : > { %v5411_v24 = vpop.permute.xlu1 %5410 }
 0x7ff   : > { %5496 = vst.msk [vmem:[#allocation3 + $0x50] sm:$0xff] %vm1167_vm3, %v5411_v24  ;;  %v5221_v51 = vpop.permute.xlu0 %5220 }
 0x800   : > { %5305 = vst.msk [vmem:[#allocation3 + $0x58] sm:$0xff] %vm974_vm2, %v5221_v51  ;;  %5991 = vrot.lane.b32.xlu1 %v14195_v39, %s11080_s23  ;;  %v14267_v51 = vld [vmem:[#allocation2 + $0x188] sm:$0xff] }
 0x801   : > { %5800 = vrot.lane.b32.xlu0 %v13844_v47, %s11079_s22 }
 0x802   : > { %v6176_v40 = vpop.permute.xlu1 %6175 }
 0x803   : > { %6263 = vst.msk [vmem:[#allocation3 + $0x40] sm:$0xff] %vm1940_vm8, %v6176_v40  ;;  %v5986_v43 = vpop.permute.xlu0 %5985 }
 0x804   : > { %6072 = vst.msk [vmem:[#allocation3 + $0x48] sm:$0xff] %vm1747_vm6, %v5986_v43  ;;  %7365 = vrot.lane.b32.xlu1 %v7295_v3, %s11076_s19  ;;  %v14277_v43 = vld [vmem:[#allocation2 + $0x254] sm:$0xff] }
 0x805   : > { %7175 = vrot.lane.b32.xlu0 %v7295_v3, %s11075_s18  ;;  %v7105_v3 = vld [vmem:[#allocation2 + $0x88] sm:$0xff] }
 0x806   : > { %v7550_v28 = vpop.permute.xlu1 %7549 }
 0x807   : > { %7643 = vst.msk [vmem:[#allocation3 + $0x10] sm:$0xff] %vm1167_vm3, %v7550_v28  ;;  %v7360_v11 = vpop.permute.xlu0 %7359  ;;  %v14279_v28 = vld [vmem:[#allocation2 + $0x1ec] sm:$0xff] }
 0x808   : > { %7452 = vst.msk [vmem:[#allocation3 + $0x18] sm:$0xff] %vm974_vm2, %v7360_v11  ;;  %8130 = vrot.lane.b32.xlu1 %v8062_v41, %s11080_s23  ;;  %v7680_v11 = vld [vmem:[#allocation2 + $0x170] sm:$0xff] }
 0x809   : > { %7939 = vrot.lane.b32.xlu0 %v7870_v16, %s11079_s22 }
 0x80a   : > { %v8315_v47 = vpop.permute.xlu1 %8314 }
 0x80b   : > { %8410 = vst.msk [vmem:[#allocation3] sm:$0xff] %vm1940_vm8, %v8315_v47  ;;  %v8125_v6 = vpop.permute.xlu0 %8124 }
 0x80c   : > { %8219 = vst.msk [vmem:[#allocation3 + $0x8] sm:$0xff] %vm1747_vm6, %v8125_v6  ;;  %5418 = vrot.lane.b32.xlu1 %v13868_v27, %s11077_s20  ;;  %v7487_v27 = vld [vmem:[#allocation2 + $0x160] sm:$0xff] }
 0x80d   : > { %5228 = vrot.lane.b32.xlu0 %v13860_v52, %s11076_s19 }
 0x80e   : > { %v5603_v23 = vpop.permute.xlu1 %5602 }
 0x80f   : > { %5688 = vst.msk [vmem:[#allocation3 + $0x50] sm:$0xff] %vm1360_vm4, %v5603_v23  ;;  %v5413_v19 = vpop.permute.xlu0 %5412 }
 0x810   : > { %5497 = vst.msk [vmem:[#allocation3 + $0x58] sm:$0xff] %vm1167_vm3, %v5413_v19  ;;  %6183 = vrot.lane.b32.xlu1 %v14217_v2, %s11081_s29  ;;  %v8447_v19 = vld [vmem:[#allocation2 + $0x258] sm:$0xff] }
 0x811   : > { %5993 = vrot.lane.b32.xlu0 %v14219_v59, %s11080_s23 }
 0x812   : > { %v6368_v17 = vpop.permute.xlu1 %6367 }
 0x813   : > { %6455 = vst.msk [vmem:[#allocation3 + $0x40] sm:$0xff] %vm2133_vm9, %v6368_v17  ;;  %v6178_v52 = vpop.permute.xlu0 %6177 }
 0x814   : > { %6264 = vst.msk [vmem:[#allocation3 + $0x48] sm:$0xff] %vm1940_vm8, %v6178_v52  ;;  %7557 = vrot.lane.b32.xlu1 %v7487_v27, %s11077_s20  ;;  %v14296_v52 = vld [vmem:[#allocation2 + $0x190] sm:$0xff] }
 0x815   : > { %7367 = vrot.lane.b32.xlu0 %v7296_v0, %s11076_s19 }
 0x816   : > { %v7742_v21 = vpop.permute.xlu1 %7741 }
 0x817   : > { %7835 = vst.msk [vmem:[#allocation3 + $0x10] sm:$0xff] %vm1360_vm4, %v7742_v21  ;;  %v7552_v58 = vpop.permute.xlu0 %7551 }
 0x818   : > { %7644 = vst.msk [vmem:[#allocation3 + $0x18] sm:$0xff] %vm1167_vm3, %v7552_v58  ;;  %8322 = vrot.lane.b32.xlu1 %v14217_v2, %s11081_s29  ;;  %v14299_v58 = vld [vmem:[#allocation2 + $0x1cc] sm:$0xff] }
 0x819   : > { %8132 = vrot.lane.b32.xlu0 %v14217_v2, %s11080_s23  ;;  %4931 = vst.msk [vmem:[#allocation3 + $0xa8] sm:$0xff] %vm298_vm0, %v14299_v58 }
 0x81a   : > { %v8507_v18 = vpop.permute.xlu1 %8506  ;;  %v6487_v10 = vld [vmem:[#allocation3 + $0x40] sm:$0xff] }
 0x81b   : > { %8602 = vst.msk [vmem:[#allocation3] sm:$0xff] %vm2133_vm9, %v8507_v18  ;;  %v8317_v48 = vpop.permute.xlu0 %8316  ;;  %10700 = vmatprep.mubr.msk.f32.mxu0 %vm2203_vm10, %v6487_v10  ;;  %v14308_v18 = vld [vmem:[#allocation2 + $0x264] sm:$0xff] }
 0x81c   : > { %8411 = vst.msk [vmem:[#allocation3 + $0x8] sm:$0xff] %vm1940_vm8, %v8317_v48  ;;  %5610 = vrot.lane.b32.xlu1 %v13888_v4, %s11078_s21  ;;  %v7679_v4 = vld [vmem:[#allocation2 + $0x168] sm:$0xff]  ;;  %v14310_v48 = vld [vmem:[#allocation2 + $0x1f4] sm:$0xff] }
 0x81d   : > { %5420 = vrot.lane.b32.xlu0 %v13880_v14, %s11077_s20  ;;  %7073 = vst.msk [vmem:[#allocation3 + $0x40] sm:$0xff] %vm298_vm0, %v7041_v50 }
 0x81e   : > { %v5605_v30 = vpop.permute.xlu1 %5604 }
 0x81f   : > { %5689 = vst.msk [vmem:[#allocation3 + $0x58] sm:$0xff] %vm1360_vm4, %v5605_v30  ;;  %v5031_v33 = vpop.permute.xlu0 %5030 }
 0x820   : > { %5114 = vst.msk [vmem:[#allocation3 + $0x60] sm:$0xff] %vm781_vm1, %v5031_v33  ;;  %6375 = vrot.lane.b32.xlu1 %v14219_v59, %s11082_s15 }
 0x821   : > { %6185 = vrot.lane.b32.xlu0 %v14244_v25, %s11081_s29 }
 0x822   : > { %v6370_v61 = vpop.permute.xlu1 %6369  ;;  %v8634_v14 = vld [vmem:[#allocation3] sm:$0xff] }
 0x823   : > { %6456 = vst.msk [vmem:[#allocation3 + $0x48] sm:$0xff] %vm2133_vm9, %v6370_v61  ;;  %v5795_v9 = vpop.permute.xlu0 %5794  ;;  %10746 = vmatprep.mubr.msk.f32.mxu1 %vm2203_vm10, %v8634_v14  ;;  %v7872_v14 = vld [vmem:[#allocation2 + $0x178] sm:$0xff] }
 0x824   : > { %5880 = vst.msk [vmem:[#allocation3 + $0x50] sm:$0xff] %vm1553_vm5, %v5795_v9  ;;  %7749 = vrot.lane.b32.xlu1 %v7679_v4, %s11078_s21 }
 0x825   : > { %7559 = vrot.lane.b32.xlu0 %v7679_v4, %s11077_s20  ;;  %v8064_v4 = vld [vmem:[#allocation2 + $0x260] sm:$0xff] }
 0x826   : > { %v7744_v54 = vpop.permute.xlu1 %7743 }
 0x827   : > { %7836 = vst.msk [vmem:[#allocation3 + $0x18] sm:$0xff] %vm1360_vm4, %v7744_v54  ;;  %v7170_v12 = vpop.permute.xlu0 %7169  ;;  %v5342_v54 = vld [vmem:[#allocation2 + $0x204] sm:$0xff] }
 0x828   : > { %7261 = vst.msk [vmem:[#allocation3 + $0x20] sm:$0xff] %vm781_vm1, %v7170_v12  ;;  %8514 = vrot.lane.b32.xlu1 %v14244_v25, %s11082_s15  ;;  %v5151_v12 = vld [vmem:[#allocation2 + $0x194] sm:$0xff] }
 0x829   : > { %8324 = vrot.lane.b32.xlu0 %v14244_v25, %s11081_s29 }
 0x82a   : > { %v8509_v31 = vpop.permute.xlu1 %8508  ;;  %v6488_v24 = vld [vmem:[#allocation3 + $0x48] sm:$0xff] }
 0x82b   : > { %8603 = vst.msk [vmem:[#allocation3 + $0x8] sm:$0xff] %vm2133_vm9, %v8509_v31  ;;  %v7934_v40 = vpop.permute.xlu0 %7933  ;;  %10701 = vmatmul.mubr.msk.f32.gmra.mrb[24].mxu0 %vm2203_vm10, %v6488_v24  ;;  %v14330_v24 = vld [vmem:[#allocation2 + $0x268] sm:$0xff] }
 0x82c   : > { %7074 = vst.msk [vmem:[#allocation3 + $0x48] sm:$0xff] %vm298_vm0, %v7105_v3  ;;  %5612 = vrot.lane.b32.xlu1 %v14265_v53, %s11078_s21 }
 0x82d   : > { %8027 = vst.msk [vmem:[#allocation3 + $0x10] sm:$0xff] %vm1553_vm5, %v7934_v40  ;;  %5038 = vrot.lane.b32.xlu0 %v14267_v51, %s11075_s18  ;;  %v14332_v40 = vld [vmem:[#allocation2 + $0x26c] sm:$0xff] }
 0x82e   : > { %v5223_v41 = vpop.permute.xlu1 %5222 }
 0x82f   : > { %5306 = vst.msk [vmem:[#allocation3 + $0x60] sm:$0xff] %vm974_vm2, %v5223_v41  ;;  %v5033_v16 = vpop.permute.xlu0 %5032 }
 0x830   : > { %5115 = vst.msk [vmem:[#allocation3 + $0x68] sm:$0xff] %vm781_vm1, %v5033_v16  ;;  %6377 = vrot.lane.b32.xlu1 %v14277_v43, %s11082_s15  ;;  %v7489_v16 = vld [vmem:[#allocation2 + $0x180] sm:$0xff] }
 0x831   : > { %5802 = vrot.lane.b32.xlu0 %v14279_v28, %s11079_s22 }
 0x832   : > { %v5988_v47 = vpop.permute.xlu1 %5987  ;;  %v8635_v6 = vld [vmem:[#allocation3 + $0x8] sm:$0xff] }
 0x833   : > { %6073 = vst.msk [vmem:[#allocation3 + $0x50] sm:$0xff] %vm1747_vm6, %v5988_v47  ;;  %v5797_v23 = vpop.permute.xlu0 %5796  ;;  %10747 = vmatmul.mubr.msk.f32.vlgmr.msra.gmra.mrb[48].mxu1 %vm2203_vm10, %v8635_v6  ;;  %v7298_v6 = vld [vmem:[#allocation2 + $0x98] sm:$0xff] }
 0x834   : > { %5881 = vst.msk [vmem:[#allocation3 + $0x58] sm:$0xff] %vm1553_vm5, %v5797_v23  ;;  %7751 = vrot.lane.b32.xlu1 %v7680_v11, %s11078_s21 }
 0x835   : > { %7177 = vrot.lane.b32.xlu0 %v7105_v3, %s11075_s18 }
 0x836   : > { %v7362_v27 = vpop.permute.xlu1 %7361 }
 0x837   : > { %7453 = vst.msk [vmem:[#allocation3 + $0x20] sm:$0xff] %vm974_vm2, %v7362_v27  ;;  %v7172_v17 = vpop.permute.xlu0 %7171 }
 0x838   : > { %7262 = vst.msk [vmem:[#allocation3 + $0x28] sm:$0xff] %vm781_vm1, %v7172_v17  ;;  %8516 = vrot.lane.b32.xlu1 %v8447_v19, %s11082_s15 }
 0x839   : > { %7941 = vrot.lane.b32.xlu0 %v7680_v11, %s11079_s22 }
 0x83a   : > { %v8127_v0 = vpop.permute.xlu1 %8126 }
 0x83b   : > { %8220 = vst.msk [vmem:[#allocation3 + $0x10] sm:$0xff] %vm1747_vm6, %v8127_v0  ;;  %v7936_v21 = vpop.permute.xlu0 %7935  ;;  %v14354_v0 = vld [vmem:[#allocation2 + $0x208] sm:$0xff] }
 0x83c   : > { %8028 = vst.msk [vmem:[#allocation3 + $0x18] sm:$0xff] %vm1553_vm5, %v7936_v21  ;;  %5230 = vrot.lane.b32.xlu1 %v14096_v22, %s11076_s19  ;;  %v7297_v22 = vld [vmem:[#allocation2 + $0x90] sm:$0xff] }
 0x83d   : > { %5040 = vrot.lane.b32.xlu0 %v14296_v52, %s11075_s18 }
 0x83e   : > { %v5415_v10 = vpop.permute.xlu1 %5414 }
 0x83f   : > { %5498 = vst.msk [vmem:[#allocation3 + $0x60] sm:$0xff] %vm1167_vm3, %v5415_v10  ;;  %v5225_v30 = vpop.permute.xlu0 %5224  ;;  %v5343_v10 = vld [vmem:[#allocation2 + $0x20c] sm:$0xff] }
 0x840   : > { %5307 = vst.msk [vmem:[#allocation3 + $0x68] sm:$0xff] %vm974_vm2, %v5225_v30  ;;  %5995 = vrot.lane.b32.xlu1 %v14308_v18, %s11080_s23 }
 0x841   : > { %5804 = vrot.lane.b32.xlu0 %v14310_v48, %s11079_s22 }
 0x842   : > { %v6180_v49 = vpop.permute.xlu1 %6179 }
 0x843   : > { %6265 = vst.msk [vmem:[#allocation3 + $0x50] sm:$0xff] %vm1940_vm8, %v6180_v49  ;;  %v5990_v33 = vpop.permute.xlu0 %5989 }
 0x844   : > { %6074 = vst.msk [vmem:[#allocation3 + $0x58] sm:$0xff] %vm1747_vm6, %v5990_v33  ;;  %7369 = vrot.lane.b32.xlu1 %v7297_v22, %s11076_s19  ;;  %v14362_v33 = vld [vmem:[#allocation2 + $0x270] sm:$0xff] }
 0x845   : > { %7179 = vrot.lane.b32.xlu0 %v7297_v22, %s11075_s18 }
 0x846   : > { %v7554_v61 = vpop.permute.xlu1 %7553 }
 0x847   : > { %7645 = vst.msk [vmem:[#allocation3 + $0x20] sm:$0xff] %vm1167_vm3, %v7554_v61  ;;  %v7364_v9 = vpop.permute.xlu0 %7363 }
 0x848   : > { %7454 = vst.msk [vmem:[#allocation3 + $0x28] sm:$0xff] %vm974_vm2, %v7364_v9  ;;  %8134 = vrot.lane.b32.xlu1 %v8064_v4, %s11080_s23  ;;  %v4896_v4 = vld [vmem:[#allocation2 + $0x1a4] sm:$0xff] }
 0x849   : > { %7943 = vrot.lane.b32.xlu0 %v7872_v14, %s11079_s22  ;;  %4928 = vst.msk [vmem:[#allocation3 + $0x90] sm:$0xff] %vm298_vm0, %v4896_v4 }
 0x84a   : > { %v8319_v50 = vpop.permute.xlu1 %8318 }
 0x84b   : > { %8412 = vst.msk [vmem:[#allocation3 + $0x10] sm:$0xff] %vm1940_vm8, %v8319_v50  ;;  %v8129_v31 = vpop.permute.xlu0 %8128 }
 0x84c   : > { %8221 = vst.msk [vmem:[#allocation3 + $0x18] sm:$0xff] %vm1747_vm6, %v8129_v31  ;;  %5422 = vrot.lane.b32.xlu1 %v5342_v54, %s11077_s20 }
 0x84d   : > { %5232 = vrot.lane.b32.xlu0 %v5151_v12, %s11076_s19  ;;  %v7043_v12 = vld [vmem:[#allocation2 + $0xa0] sm:$0xff] }
 0x84e   : > { %v5607_v3 = vpop.permute.xlu1 %5606 }
 0x84f   : > { %5690 = vst.msk [vmem:[#allocation3 + $0x60] sm:$0xff] %vm1360_vm4, %v5607_v3  ;;  %v5417_v41 = vpop.permute.xlu0 %5416  ;;  %v14385_v3 = vld [vmem:[#allocation2 + $0x210] sm:$0xff] }
 0x850   : > { %5499 = vst.msk [vmem:[#allocation3 + $0x68] sm:$0xff] %vm1167_vm3, %v5417_v41  ;;  %6187 = vrot.lane.b32.xlu1 %v14330_v24, %s11081_s29 }
 0x851   : > { %5997 = vrot.lane.b32.xlu0 %v14332_v40, %s11080_s23 }
 0x852   : > { %v6372_v11 = vpop.permute.xlu1 %6371  ;;  %v14340_v47 = vpop.f32.mrb[16].mxu0 }
 0x853   : > { %6457 = vst.msk [vmem:[#allocation3 + $0x50] sm:$0xff] %vm2133_vm9, %v6372_v11  ;;  %v6182_v23 = vpop.permute.xlu0 %6181  ;;  %v14343_v19 = vpop.f32.mrb[17].mxu0  ;;  %v7107_v11 = vld [vmem:[#allocation2 + $0xa8] sm:$0xff] }
 0x854   : > { %6266 = vst.msk [vmem:[#allocation3 + $0x58] sm:$0xff] %vm1940_vm8, %v6182_v23  ;;  %7561 = vrot.lane.b32.xlu1 %v7489_v16, %s11077_s20  ;;  %v14397_v23 = vld [vmem:[#allocation2 + $0x274] sm:$0xff] }
 0x855   : > { %7371 = vrot.lane.b32.xlu0 %v7298_v6, %s11076_s19 }
 0x856   : > { %v7746_v27 = vpop.permute.xlu1 %7745 }
 0x857   : > { %7837 = vst.msk [vmem:[#allocation3 + $0x20] sm:$0xff] %vm1360_vm4, %v7746_v27  ;;  %v7556_v17 = vpop.permute.xlu0 %7555 }
 0x858   : > { %7646 = vst.msk [vmem:[#allocation3 + $0x28] sm:$0xff] %vm1167_vm3, %v7556_v17  ;;  %8326 = vrot.lane.b32.xlu1 %v14330_v24, %s11081_s29 }
 0x859   : > { %8136 = vrot.lane.b32.xlu0 %v14330_v24, %s11080_s23 }
 0x85a   : > { %v8511_v21 = vpop.permute.xlu1 %8510  ;;  %v6489_v30 = vld [vmem:[#allocation3 + $0x50] sm:$0xff] }
 0x85b   : > { %8604 = vst.msk [vmem:[#allocation3 + $0x10] sm:$0xff] %vm2133_vm9, %v8511_v21  ;;  %v8321_v22 = vpop.permute.xlu0 %8320  ;;  %10703 = vmatprep.mubr.msk.f32.mxu0 %vm2203_vm10, %v6489_v30 }
 0x85c   : > { %8413 = vst.msk [vmem:[#allocation3 + $0x18] sm:$0xff] %vm1940_vm8, %v8321_v22  ;;  %5614 = vrot.lane.b32.xlu1 %v14354_v0, %s11078_s21 }
 0x85d   : > { %5424 = vrot.lane.b32.xlu0 %v5343_v10, %s11077_s20  ;;  %7075 = vst.msk [vmem:[#allocation3 + $0x50] sm:$0xff] %vm298_vm0, %v7043_v12  ;;  %v14427_v12 = vld [vmem:[#allocation2 + $0x284] sm:$0xff] }
 0x85e   : > { %v5609_v49 = vpop.permute.xlu1 %5608 }
 0x85f   : > { %5691 = vst.msk [vmem:[#allocation3 + $0x68] sm:$0xff] %vm1360_vm4, %v5609_v49  ;;  %v5035_v61 = vpop.permute.xlu0 %5034 }
 0x860   : > { %5116 = vst.msk [vmem:[#allocation3 + $0x70] sm:$0xff] %vm781_vm1, %v5035_v61  ;;  %6379 = vrot.lane.b32.xlu1 %v14332_v40, %s11082_s15  ;;  %v8449_v61 = vld [vmem:[#allocation2 + $0x278] sm:$0xff] }
 0x861   : > { %6189 = vrot.lane.b32.xlu0 %v14362_v33, %s11081_s29 }
 0x862   : > { %v6374_v14 = vpop.permute.xlu1 %6373  ;;  %v8636_v9 = vld [vmem:[#allocation3 + $0x10] sm:$0xff] }
 0x863   : > { %6458 = vst.msk [vmem:[#allocation3 + $0x58] sm:$0xff] %vm2133_vm9, %v6374_v14  ;;  %v5799_v54 = vpop.permute.xlu0 %5798  ;;  %10749 = vmatprep.mubr.msk.f32.mxu1 %vm2203_vm10, %v8636_v9 }
 0x864   : > { %5882 = vst.msk [vmem:[#allocation3 + $0x60] sm:$0xff] %vm1553_vm5, %v5799_v54  ;;  %7753 = vrot.lane.b32.xlu1 %v14267_v51, %s11078_s21  ;;  %v14419_v54 = vld [vmem:[#allocation2 + $0x1b0] sm:$0xff] }
 0x865   : > { %7563 = vrot.lane.b32.xlu0 %v14267_v51, %s11077_s20  ;;  %v14387_v51 = vld [vmem:[#allocation2 + $0x1a8] sm:$0xff] }
 0x866   : > { %v7748_v50 = vpop.permute.xlu1 %7747 }
 0x867   : > { %7838 = vst.msk [vmem:[#allocation3 + $0x28] sm:$0xff] %vm1360_vm4, %v7748_v50  ;;  %v7174_v31 = vpop.permute.xlu0 %7173 }
 0x868   : > { %7263 = vst.msk [vmem:[#allocation3 + $0x30] sm:$0xff] %vm781_vm1, %v7174_v31  ;;  %8518 = vrot.lane.b32.xlu1 %v14362_v33, %s11082_s15 }
 0x869   : > { %8328 = vrot.lane.b32.xlu0 %v14362_v33, %s11081_s29 }
 0x86a   : > { %v8513_v41 = vpop.permute.xlu1 %8512  ;;  %v6490_v16 = vld [vmem:[#allocation3 + $0x58] sm:$0xff] }
 0x86b   : > { %8605 = vst.msk [vmem:[#allocation3 + $0x18] sm:$0xff] %vm2133_vm9, %v8513_v41  ;;  %v7938_v6 = vpop.permute.xlu0 %7937  ;;  %10704 = vmatmul.mubr.msk.f32.gmra.mrb[26].mxu0 %vm2203_vm10, %v6490_v16  ;;  %v14429_v41 = vld [vmem:[#allocation2 + $0x214] sm:$0xff] }
 0x86c   : > { %7076 = vst.msk [vmem:[#allocation3 + $0x58] sm:$0xff] %vm298_vm0, %v7107_v11  ;;  %5616 = vrot.lane.b32.xlu1 %v14385_v3, %s11078_s21 }
 0x86d   : > { %8029 = vst.msk [vmem:[#allocation3 + $0x20] sm:$0xff] %vm1553_vm5, %v7938_v6  ;;  %5042 = vrot.lane.b32.xlu0 %v14387_v51, %s11075_s18  ;;  %v8066_v6 = vld [vmem:[#allocation2 + $0x280] sm:$0xff] }
 0x86e   : > { %v5227_v27 = vpop.permute.xlu1 %5226 }
 0x86f   : > { %5308 = vst.msk [vmem:[#allocation3 + $0x70] sm:$0xff] %vm974_vm2, %v5227_v27  ;;  %v5037_v17 = vpop.permute.xlu0 %5036 }
 0x870   : > { %5117 = vst.msk [vmem:[#allocation3 + $0x78] sm:$0xff] %vm781_vm1, %v5037_v17  ;;  %6381 = vrot.lane.b32.xlu1 %v14397_v23, %s11082_s15  ;;  %v7874_v17 = vld [vmem:[#allocation2 + $0x198] sm:$0xff] }
 0x871   : > { %5806 = vrot.lane.b32.xlu0 %v5343_v10, %s11079_s22 }
 0x872   : > { %v5992_v21 = vpop.permute.xlu1 %5991  ;;  %v14404_v30 = vpop.f32.mrb[18].mxu0  ;;  %v8637_v22 = vld [vmem:[#allocation3 + $0x18] sm:$0xff] }
 0x873   : > { %6075 = vst.msk [vmem:[#allocation3 + $0x60] sm:$0xff] %vm1747_vm6, %v5992_v21  ;;  %v5801_v49 = vpop.permute.xlu0 %5800  ;;  %v14407_v4 = vpop.f32.mrb[19].mxu0  ;;  %10750 = vmatmul.mubr.msk.f32.gmra.mrb[50].mxu1 %vm2203_vm10, %v8637_v22  ;;  %v5344_v22 = vld [vmem:[#allocation2 + $0x224] sm:$0xff] }
 0x874   : > { %5883 = vst.msk [vmem:[#allocation3 + $0x68] sm:$0xff] %vm1553_vm5, %v5801_v49  ;;  %7755 = vrot.lane.b32.xlu1 %v14296_v52, %s11078_s21 }
 0x875   : > { %7181 = vrot.lane.b32.xlu0 %v7107_v11, %s11075_s18 }
 0x876   : > { %v7366_v10 = vpop.permute.xlu1 %7365 }
 0x877   : > { %7455 = vst.msk [vmem:[#allocation3 + $0x30] sm:$0xff] %vm974_vm2, %v7366_v10  ;;  %v7176_v14 = vpop.permute.xlu0 %7175 }
 0x878   : > { %7264 = vst.msk [vmem:[#allocation3 + $0x38] sm:$0xff] %vm781_vm1, %v7176_v14  ;;  %8520 = vrot.lane.b32.xlu1 %v8449_v61, %s11082_s15  ;;  %v5153_v61 = vld [vmem:[#allocation2 + $0x1b4] sm:$0xff]  ;;  %v14449_v14 = vld [vmem:[#allocation2 + $0x288] sm:$0xff] }
 0x879   : > { %7945 = vrot.lane.b32.xlu0 %v14296_v52, %s11079_s22 }
 0x87a   : > { %v8131_v9 = vpop.permute.xlu1 %8130 }
 0x87b   : > { %8222 = vst.msk [vmem:[#allocation3 + $0x20] sm:$0xff] %vm1747_vm6, %v8131_v9  ;;  %v7940_v50 = vpop.permute.xlu0 %7939 }
 0x87c   : > { %8030 = vst.msk [vmem:[#allocation3 + $0x28] sm:$0xff] %vm1553_vm5, %v7940_v50  ;;  %5234 = vrot.lane.b32.xlu1 %v14186_v36, %s11076_s19  ;;  %v7299_v36 = vld [vmem:[#allocation2 + $0xb0] sm:$0xff] }
 0x87d   : > { %5044 = vrot.lane.b32.xlu0 %v14419_v54, %s11075_s18  ;;  %v14451_v50 = vld [vmem:[#allocation2 + $0x28c] sm:$0xff] }
 0x87e   : > { %v5419_v31 = vpop.permute.xlu1 %5418 }
 0x87f   : > { %5500 = vst.msk [vmem:[#allocation3 + $0x70] sm:$0xff] %vm1167_vm3, %v5419_v31  ;;  %v5229_v52 = vpop.permute.xlu0 %5228 }
 0x880   : > { %5309 = vst.msk [vmem:[#allocation3 + $0x78] sm:$0xff] %vm974_vm2, %v5229_v52  ;;  %5999 = vrot.lane.b32.xlu1 %v14427_v12, %s11080_s23  ;;  %v7491_v52 = vld [vmem:[#allocation2 + $0x1a0] sm:$0xff] }
 0x881   : > { %5808 = vrot.lane.b32.xlu0 %v14429_v41, %s11079_s22 }
 0x882   : > { %v6184_v16 = vpop.permute.xlu1 %6183 }
 0x883   : > { %6267 = vst.msk [vmem:[#allocation3 + $0x60] sm:$0xff] %vm1940_vm8, %v6184_v16  ;;  %v5994_v11 = vpop.permute.xlu0 %5993 }
 0x884   : > { %6076 = vst.msk [vmem:[#allocation3 + $0x68] sm:$0xff] %vm1747_vm6, %v5994_v11  ;;  %7373 = vrot.lane.b32.xlu1 %v7299_v36, %s11076_s19  ;;  %v7300_v11 = vld [vmem:[#allocation2 + $0xb8] sm:$0xff] }
 0x885   : > { %7183 = vrot.lane.b32.xlu0 %v7299_v36, %s11075_s18 }
 0x886   : > { %v7558_v27 = vpop.permute.xlu1 %7557 }
 0x887   : > { %7647 = vst.msk [vmem:[#allocation3 + $0x30] sm:$0xff] %vm1167_vm3, %v7558_v27  ;;  %v7368_v21 = vpop.permute.xlu0 %7367 }
 0x888   : > { %7456 = vst.msk [vmem:[#allocation3 + $0x38] sm:$0xff] %vm974_vm2, %v7368_v21  ;;  %8138 = vrot.lane.b32.xlu1 %v8066_v6, %s11080_s23 }
 0x889   : > { %7947 = vrot.lane.b32.xlu0 %v7874_v17, %s11079_s22 }
 0x88a   : > { %v8323_v49 = vpop.permute.xlu1 %8322 }
 0x88b   : > { %8414 = vst.msk [vmem:[#allocation3 + $0x20] sm:$0xff] %vm1940_vm8, %v8323_v49  ;;  %v8133_v10 = vpop.permute.xlu0 %8132 }
 0x88c   : > { %8223 = vst.msk [vmem:[#allocation3 + $0x28] sm:$0xff] %vm1747_vm6, %v8133_v10  ;;  %5426 = vrot.lane.b32.xlu1 %v5344_v22, %s11077_s20  ;;  %v14473_v22 = vld [vmem:[#allocation2 + $0x228] sm:$0xff] }
 0x88d   : > { %5236 = vrot.lane.b32.xlu0 %v5153_v61, %s11076_s19  ;;  %v5345_v61 = vld [vmem:[#allocation2 + $0x22c] sm:$0xff] }
 0x88e   : > { %v5611_v9 = vpop.permute.xlu1 %5610 }
 0x88f   : > { %5692 = vst.msk [vmem:[#allocation3 + $0x70] sm:$0xff] %vm1360_vm4, %v5611_v9  ;;  %v5421_v31 = vpop.permute.xlu0 %5420 }
 0x890   : > { %5501 = vst.msk [vmem:[#allocation3 + $0x78] sm:$0xff] %vm1167_vm3, %v5421_v31  ;;  %6191 = vrot.lane.b32.xlu1 %v14449_v14, %s11081_s29 }
 0x891   : > { %6001 = vrot.lane.b32.xlu0 %v14451_v50, %s11080_s23 }
 0x892   : > { %v6376_v36 = vpop.permute.xlu1 %6375  ;;  %v14459_v16 = vpop.f32.mrb[20].mxu0 }
 0x893   : > { %6459 = vst.msk [vmem:[#allocation3 + $0x60] sm:$0xff] %vm2133_vm9, %v6376_v36  ;;  %v6186_v6 = vpop.permute.xlu0 %6185  ;;  %v14462_v27 = vpop.f32.mrb[21].mxu0  ;;  %v4898_v36 = vld [vmem:[#allocation2 + $0x1c4] sm:$0xff] }
 0x894   : > { %6268 = vst.msk [vmem:[#allocation3 + $0x68] sm:$0xff] %vm1940_vm8, %v6186_v6  ;;  %7565 = vrot.lane.b32.xlu1 %v7491_v52, %s11077_s20  ;;  %v14481_v52 = vld [vmem:[#allocation2 + $0x290] sm:$0xff] }
 0x895   : > { %7375 = vrot.lane.b32.xlu0 %v7300_v11, %s11076_s19  ;;  %4930 = vst.msk [vmem:[#allocation3 + $0xa0] sm:$0xff] %vm298_vm0, %v4898_v36 }
 0x896   : > { %v7750_v17 = vpop.permute.xlu1 %7749 }
 0x897   : > { %7839 = vst.msk [vmem:[#allocation3 + $0x30] sm:$0xff] %vm1360_vm4, %v7750_v17  ;;  %v7560_v21 = vpop.permute.xlu0 %7559 }
 0x898   : > { %7648 = vst.msk [vmem:[#allocation3 + $0x38] sm:$0xff] %vm1167_vm3, %v7560_v21  ;;  %8330 = vrot.lane.b32.xlu1 %v14449_v14, %s11081_s29 }
 0x899   : > { %8140 = vrot.lane.b32.xlu0 %v14449_v14, %s11080_s23 }
 0x89a   : > { %v8515_v49 = vpop.permute.xlu1 %8514  ;;  %v6491_v10 = vld [vmem:[#allocation3 + $0x60] sm:$0xff] }
 0x89b   : > { %8606 = vst.msk [vmem:[#allocation3 + $0x20] sm:$0xff] %vm2133_vm9, %v8515_v49  ;;  %v8325_v9 = vpop.permute.xlu0 %8324  ;;  %10706 = vmatprep.mubr.msk.f32.mxu0 %vm2203_vm10, %v6491_v10  ;;  %v7045_v10 = vld [vmem:[#allocation2 + $0xc0] sm:$0xff] }
 0x89c   : > { %8415 = vst.msk [vmem:[#allocation3 + $0x28] sm:$0xff] %vm1940_vm8, %v8325_v9  ;;  %5618 = vrot.lane.b32.xlu1 %v14473_v22, %s11078_s21 }
 0x89d   : > { %5428 = vrot.lane.b32.xlu0 %v5345_v61, %s11077_s20  ;;  %7077 = vst.msk [vmem:[#allocation3 + $0x60] sm:$0xff] %vm298_vm0, %v7045_v10 }
 0x89e   : > { %v5613_v31 = vpop.permute.xlu1 %5612 }
 0x89f   : > { %5693 = vst.msk [vmem:[#allocation3 + $0x78] sm:$0xff] %vm1360_vm4, %v5613_v31  ;;  %v5039_v11 = vpop.permute.xlu0 %5038  ;;  %v14504_v31 = vld [vmem:[#allocation2 + $0x230] sm:$0xff] }
 0x8a0   : > { %5118 = vst.msk [vmem:[#allocation3 + $0x80] sm:$0xff] %vm781_vm1, %v5039_v11  ;;  %6383 = vrot.lane.b32.xlu1 %v14451_v50, %s11082_s15 }
 0x8a1   : > { %6193 = vrot.lane.b32.xlu0 %v14481_v52, %s11081_s29 }
 0x8a2   : > { %v6378_v6 = vpop.permute.xlu1 %6377  ;;  %v8638_v17 = vld [vmem:[#allocation3 + $0x20] sm:$0xff] }
 0x8a3   : > { %6460 = vst.msk [vmem:[#allocation3 + $0x68] sm:$0xff] %vm2133_vm9, %v6378_v6  ;;  %v5803_v21 = vpop.permute.xlu0 %5802  ;;  %10752 = vmatprep.mubr.msk.f32.mxu1 %vm2203_vm10, %v8638_v17  ;;  %v7109_v6 = vld [vmem:[#allocation2 + $0xc8] sm:$0xff] }
 0x8a4   : > { %5884 = vst.msk [vmem:[#allocation3 + $0x70] sm:$0xff] %vm1553_vm5, %v5803_v21  ;;  %7757 = vrot.lane.b32.xlu1 %v14387_v51, %s11078_s21  ;;  %v14516_v21 = vld [vmem:[#allocation2 + $0x294] sm:$0xff] }
 0x8a5   : > { %7567 = vrot.lane.b32.xlu0 %v14387_v51, %s11077_s20  ;;  %v14506_v51 = vld [vmem:[#allocation2 + $0x1c8] sm:$0xff] }
 0x8a6   : > { %v7752_v49 = vpop.permute.xlu1 %7751 }
 0x8a7   : > { %7840 = vst.msk [vmem:[#allocation3 + $0x38] sm:$0xff] %vm1360_vm4, %v7752_v49  ;;  %v7178_v9 = vpop.permute.xlu0 %7177 }
 0x8a8   : > { %7265 = vst.msk [vmem:[#allocation3 + $0x40] sm:$0xff] %vm781_vm1, %v7178_v9  ;;  %8522 = vrot.lane.b32.xlu1 %v14481_v52, %s11082_s15 }
 0x8a9   : > { %8332 = vrot.lane.b32.xlu0 %v14481_v52, %s11081_s29 }
 0x8aa   : > { %v8517_v36 = vpop.permute.xlu1 %8516  ;;  %v6492_v11 = vld [vmem:[#allocation3 + $0x68] sm:$0xff] }
 0x8ab   : > { %8607 = vst.msk [vmem:[#allocation3 + $0x28] sm:$0xff] %vm2133_vm9, %v8517_v36  ;;  %v7942_v17 = vpop.permute.xlu0 %7941  ;;  %10707 = vmatmul.mubr.msk.f32.gmra.mrb[28].mxu0 %vm2203_vm10, %v6492_v11 }
 0x8ac   : > { %7078 = vst.msk [vmem:[#allocation3 + $0x68] sm:$0xff] %vm298_vm0, %v7109_v6  ;;  %5620 = vrot.lane.b32.xlu1 %v14504_v31, %s11078_s21 }
 0x8ad   : > { %8031 = vst.msk [vmem:[#allocation3 + $0x30] sm:$0xff] %vm1553_vm5, %v7942_v17  ;;  %5046 = vrot.lane.b32.xlu0 %v14506_v51, %s11075_s18  ;;  %v8451_v17 = vld [vmem:[#allocation2 + $0x298] sm:$0xff] }
 0x8ae   : > { %v5231_v49 = vpop.permute.xlu1 %5230 }
 0x8af   : > { %5310 = vst.msk [vmem:[#allocation3 + $0x80] sm:$0xff] %vm974_vm2, %v5231_v49  ;;  %v5041_v10 = vpop.permute.xlu0 %5040 }
 0x8b0   : > { %5119 = vst.msk [vmem:[#allocation3 + $0x88] sm:$0xff] %vm781_vm1, %v5041_v10  ;;  %6385 = vrot.lane.b32.xlu1 %v14516_v21, %s11082_s15 }
 0x8b1   : > { %5810 = vrot.lane.b32.xlu0 %v5345_v61, %s11079_s22 }
 0x8b2   : > { %v5996_v9 = vpop.permute.xlu1 %5995  ;;  %v8639_v36 = vld [vmem:[#allocation3 + $0x28] sm:$0xff] }
 0x8b3   : > { %6077 = vst.msk [vmem:[#allocation3 + $0x70] sm:$0xff] %vm1747_vm6, %v5996_v9  ;;  %v5805_v11 = vpop.permute.xlu0 %5804  ;;  %10753 = vmatmul.mubr.msk.f32.gmra.mrb[52].mxu1 %vm2203_vm10, %v8639_v36  ;;  %v14534_v9 = vld [vmem:[#allocation2 + $0x1d0] sm:$0xff] }
 0x8b4   : > { %5885 = vst.msk [vmem:[#allocation3 + $0x78] sm:$0xff] %vm1553_vm5, %v5805_v11  ;;  %7759 = vrot.lane.b32.xlu1 %v14419_v54, %s11078_s21  ;;  %v14537_v11 = vld [vmem:[#allocation2 + $0x20c] sm:$0xff] }
 0x8b5   : > { %7185 = vrot.lane.b32.xlu0 %v7109_v6, %s11075_s18  ;;  %4935 = vst.msk [vmem:[#allocation3 + $0xc8] sm:$0xff] %vm298_vm0, %v14537_v11 }
 0x8b6   : > { %v7370_v49 = vpop.permute.xlu1 %7369 }
 0x8b7   : > { %7457 = vst.msk [vmem:[#allocation3 + $0x40] sm:$0xff] %vm974_vm2, %v7370_v49  ;;  %v7180_v10 = vpop.permute.xlu0 %7179 }
 0x8b8   : > { %7266 = vst.msk [vmem:[#allocation3 + $0x48] sm:$0xff] %vm781_vm1, %v7180_v10  ;;  %8524 = vrot.lane.b32.xlu1 %v8451_v17, %s11082_s15  ;;  %v14548_v17 = vld [vmem:[#allocation2 + $0x234] sm:$0xff] }
 0x8b9   : > { %7949 = vrot.lane.b32.xlu0 %v14419_v54, %s11079_s22  ;;  %v14546_v54 = vld [vmem:[#allocation2 + $0x2a4] sm:$0xff] }
 0x8ba   : > { %v8135_v61 = vpop.permute.xlu1 %8134 }
 0x8bb   : > { %8224 = vst.msk [vmem:[#allocation3 + $0x30] sm:$0xff] %vm1747_vm6, %v8135_v61  ;;  %v7944_v36 = vpop.permute.xlu0 %7943 }
 0x8bc   : > { %8032 = vst.msk [vmem:[#allocation3 + $0x38] sm:$0xff] %vm1553_vm5, %v7944_v36  ;;  %5238 = vrot.lane.b32.xlu1 %v14299_v58, %s11076_s19  ;;  %v7301_v58 = vld [vmem:[#allocation2 + $0xd0] sm:$0xff] }
 0x8bd   : > { %5048 = vrot.lane.b32.xlu0 %v14534_v9, %s11075_s18 }
 0x8be   : > { %v5423_v6 = vpop.permute.xlu1 %5422 }
 0x8bf   : > { %5502 = vst.msk [vmem:[#allocation3 + $0x80] sm:$0xff] %vm1167_vm3, %v5423_v6  ;;  %v5233_v49 = vpop.permute.xlu0 %5232 }
 0x8c0   : > { %5311 = vst.msk [vmem:[#allocation3 + $0x88] sm:$0xff] %vm974_vm2, %v5233_v49  ;;  %6003 = vrot.lane.b32.xlu1 %v14546_v54, %s11080_s23  ;;  %v8068_v49 = vld [vmem:[#allocation2 + $0x2a0] sm:$0xff] }
 0x8c1   : > { %5812 = vrot.lane.b32.xlu0 %v14548_v17, %s11079_s22 }
 0x8c2   : > { %v6188_v10 = vpop.permute.xlu1 %6187 }
 0x8c3   : > { %6269 = vst.msk [vmem:[#allocation3 + $0x70] sm:$0xff] %vm1940_vm8, %v6188_v10  ;;  %v14557_v61 = vpop.f32.mrb[22].mxu0  ;;  %v5998_v36 = vpop.permute.xlu0 %5997 }
 0x8c4   : > { %6078 = vst.msk [vmem:[#allocation3 + $0x78] sm:$0xff] %vm1747_vm6, %v5998_v36  ;;  %7377 = vrot.lane.b32.xlu1 %v7301_v58, %s11076_s19  ;;  %v14561_v6 = vpop.f32.mrb[23].mxu0  ;;  %v5155_v36 = vld [vmem:[#allocation2 + $0x1d4] sm:$0xff] }
 0x8c5   : > { %7187 = vrot.lane.b32.xlu0 %v7301_v58, %s11075_s18 }
 0x8c6   : > { %v7562_v20 = vpop.permute.xlu1 %7561 }
 0x8c7   : > { %7649 = vst.msk [vmem:[#allocation3 + $0x40] sm:$0xff] %vm1167_vm3, %v7562_v20  ;;  %v7372_v34 = vpop.permute.xlu0 %7371  ;;  %v14573_v20 = vld [vmem:[#allocation2 + $0x2a8] sm:$0xff] }
 0x8c8   : > { %7458 = vst.msk [vmem:[#allocation3 + $0x48] sm:$0xff] %vm974_vm2, %v7372_v34  ;;  %8142 = vrot.lane.b32.xlu1 %v8068_v49, %s11080_s23  ;;  %v14575_v34 = vld [vmem:[#allocation2 + $0x2ac] sm:$0xff]  ;;  %v7302_v49 = vld [vmem:[#allocation2 + $0xd8] sm:$0xff] }
 0x8c9   : > { %7951 = vrot.lane.b32.xlu0 %v7876_v29, %s11079_s22 }
 0x8ca   : > { %v8327_v10 = vpop.permute.xlu1 %8326 }
 0x8cb   : > { %8416 = vst.msk [vmem:[#allocation3 + $0x30] sm:$0xff] %vm1940_vm8, %v8327_v10  ;;  %v8137_v26 = vpop.permute.xlu0 %8136 }
 0x8cc   : > { %8225 = vst.msk [vmem:[#allocation3 + $0x38] sm:$0xff] %vm1747_vm6, %v8137_v26  ;;  %5430 = vrot.lane.b32.xlu1 %v14195_v39, %s11077_s20  ;;  %v7493_v26 = vld [vmem:[#allocation2 + $0x1c0] sm:$0xff] }
 0x8cd   : > { %5240 = vrot.lane.b32.xlu0 %v5155_v36, %s11076_s19 }
 0x8ce   : > { %v5615_v58 = vpop.permute.xlu1 %5614 }
 0x8cf   : > { %5694 = vst.msk [vmem:[#allocation3 + $0x80] sm:$0xff] %vm1360_vm4, %v5615_v58  ;;  %v5425_v29 = vpop.permute.xlu0 %5424 }
 0x8d0   : > { %5503 = vst.msk [vmem:[#allocation3 + $0x88] sm:$0xff] %vm1167_vm3, %v5425_v29  ;;  %6195 = vrot.lane.b32.xlu1 %v14573_v20, %s11081_s29 }
 0x8d1   : > { %6005 = vrot.lane.b32.xlu0 %v14575_v34, %s11080_s23 }
 0x8d2   : > { %v6380_v39 = vpop.permute.xlu1 %6379 }
 0x8d3   : > { %6461 = vst.msk [vmem:[#allocation3 + $0x70] sm:$0xff] %vm2133_vm9, %v6380_v39  ;;  %v6190_v10 = vpop.permute.xlu0 %6189 }
 0x8d4   : > { %6270 = vst.msk [vmem:[#allocation3 + $0x78] sm:$0xff] %vm1940_vm8, %v6190_v10  ;;  %7569 = vrot.lane.b32.xlu1 %v7493_v26, %s11077_s20 }
 0x8d5   : > { %7379 = vrot.lane.b32.xlu0 %v7302_v49, %s11076_s19  ;;  %v14600_v49 = vld [vmem:[#allocation2 + $0x2b0] sm:$0xff] }
 0x8d6   : > { %v7754_v36 = vpop.permute.xlu1 %7753 }
 0x8d7   : > { %7841 = vst.msk [vmem:[#allocation3 + $0x40] sm:$0xff] %vm1360_vm4, %v7754_v36  ;;  %v7564_v58 = vpop.permute.xlu0 %7563  ;;  %v4900_v36 = vld [vmem:[#allocation2 + $0x1e4] sm:$0xff] }
 0x8d8   : > { %7650 = vst.msk [vmem:[#allocation3 + $0x48] sm:$0xff] %vm1167_vm3, %v7564_v58  ;;  %8334 = vrot.lane.b32.xlu1 %v14573_v20, %s11081_s29 }
 0x8d9   : > { %8144 = vrot.lane.b32.xlu0 %v14573_v20, %s11080_s23  ;;  %4932 = vst.msk [vmem:[#allocation3 + $0xb0] sm:$0xff] %vm298_vm0, %v4900_v36 }
 0x8da   : > { %v8519_v29 = vpop.permute.xlu1 %8518  ;;  %v6493_v39 = vld [vmem:[#allocation3 + $0x70] sm:$0xff] }
 0x8db   : > { %8608 = vst.msk [vmem:[#allocation3 + $0x30] sm:$0xff] %vm2133_vm9, %v8519_v29  ;;  %v8329_v10 = vpop.permute.xlu0 %8328  ;;  %10709 = vmatprep.mubr.msk.f32.mxu0 %vm2203_vm10, %v6493_v39 }
 0x8dc   : > { %8417 = vst.msk [vmem:[#allocation3 + $0x38] sm:$0xff] %vm1940_vm8, %v8329_v10  ;;  %5622 = vrot.lane.b32.xlu1 %v14217_v2, %s11078_s21  ;;  %v7047_v10 = vld [vmem:[#allocation2 + $0xe0] sm:$0xff] }
 0x8dd   : > { %5432 = vrot.lane.b32.xlu0 %v14219_v59, %s11077_s20  ;;  %7079 = vst.msk [vmem:[#allocation3 + $0x70] sm:$0xff] %vm298_vm0, %v7047_v10  ;;  %v14635_v10 = vld [vmem:[#allocation2 + $0x24c] sm:$0xff] }
 0x8de   : > { %v5617_v26 = vpop.permute.xlu1 %5616 }
 0x8df   : > { %5695 = vst.msk [vmem:[#allocation3 + $0x88] sm:$0xff] %vm1360_vm4, %v5617_v26  ;;  %v5043_v58 = vpop.permute.xlu0 %5042 }
 0x8e0   : > { %5120 = vst.msk [vmem:[#allocation3 + $0x90] sm:$0xff] %vm781_vm1, %v5043_v58  ;;  %6387 = vrot.lane.b32.xlu1 %v14575_v34, %s11082_s15 }
 0x8e1   : > { %6197 = vrot.lane.b32.xlu0 %v14600_v49, %s11081_s29 }
 0x8e2   : > { %v6382_v2 = vpop.permute.xlu1 %6381  ;;  %v8640_v29 = vld [vmem:[#allocation3 + $0x30] sm:$0xff] }
 0x8e3   : > { %6462 = vst.msk [vmem:[#allocation3 + $0x78] sm:$0xff] %vm2133_vm9, %v6382_v2  ;;  %v5807_v59 = vpop.permute.xlu0 %5806  ;;  %10755 = vmatprep.mubr.msk.f32.mxu1 %vm2203_vm10, %v8640_v29  ;;  %v14623_v2 = vld [vmem:[#allocation2 + $0x1e8] sm:$0xff] }
 0x8e4   : > { %5886 = vst.msk [vmem:[#allocation3 + $0x80] sm:$0xff] %vm1553_vm5, %v5807_v59  ;;  %7761 = vrot.lane.b32.xlu1 %v14506_v51, %s11078_s21  ;;  %v14633_v59 = vld [vmem:[#allocation2 + $0x2b4] sm:$0xff] }
 0x8e5   : > { %7571 = vrot.lane.b32.xlu0 %v14506_v51, %s11077_s20  ;;  %v7111_v51 = vld [vmem:[#allocation2 + $0xe8] sm:$0xff] }
 0x8e6   : > { %v7756_v39 = vpop.permute.xlu1 %7755 }
 0x8e7   : > { %7842 = vst.msk [vmem:[#allocation3 + $0x48] sm:$0xff] %vm1360_vm4, %v7756_v39  ;;  %v7182_v26 = vpop.permute.xlu0 %7181 }
 0x8e8   : > { %7267 = vst.msk [vmem:[#allocation3 + $0x50] sm:$0xff] %vm781_vm1, %v7182_v26  ;;  %8526 = vrot.lane.b32.xlu1 %v14600_v49, %s11082_s15  ;;  %v4901_v26 = vld [vmem:[#allocation2 + $0x1ec] sm:$0xff] }
 0x8e9   : > { %8336 = vrot.lane.b32.xlu0 %v14600_v49, %s11081_s29  ;;  %4933 = vst.msk [vmem:[#allocation3 + $0xb8] sm:$0xff] %vm298_vm0, %v4901_v26 }
 0x8ea   : > { %v8521_v36 = vpop.permute.xlu1 %8520  ;;  %v6494_v58 = vld [vmem:[#allocation3 + $0x78] sm:$0xff] }
 0x8eb   : > { %8609 = vst.msk [vmem:[#allocation3 + $0x38] sm:$0xff] %vm2133_vm9, %v8521_v36  ;;  %v7946_v29 = vpop.permute.xlu0 %7945  ;;  %10710 = vmatmul.mubr.msk.f32.gmra.mrb[30].mxu0 %vm2203_vm10, %v6494_v58 }
 0x8ec   : > { %7080 = vst.msk [vmem:[#allocation3 + $0x78] sm:$0xff] %vm298_vm0, %v7111_v51  ;;  %5624 = vrot.lane.b32.xlu1 %v14244_v25, %s11078_s21 }
 0x8ed   : > { %8033 = vst.msk [vmem:[#allocation3 + $0x40] sm:$0xff] %vm1553_vm5, %v7946_v29  ;;  %5050 = vrot.lane.b32.xlu0 %v14623_v2, %s11075_s18 }
 0x8ee   : > { %v5235_v39 = vpop.permute.xlu1 %5234 }
 0x8ef   : > { %5312 = vst.msk [vmem:[#allocation3 + $0x90] sm:$0xff] %vm974_vm2, %v5235_v39  ;;  %v5045_v36 = vpop.permute.xlu0 %5044  ;;  %v8453_v39 = vld [vmem:[#allocation2 + $0x2b8] sm:$0xff] }
 0x8f0   : > { %5121 = vst.msk [vmem:[#allocation3 + $0x98] sm:$0xff] %vm781_vm1, %v5045_v36  ;;  %6389 = vrot.lane.b32.xlu1 %v14633_v59, %s11082_s15 }
 0x8f1   : > { %5814 = vrot.lane.b32.xlu0 %v14635_v10, %s11079_s22 }
 0x8f2   : > { %v6000_v25 = vpop.permute.xlu1 %5999  ;;  %v8641_v58 = vld [vmem:[#allocation3 + $0x38] sm:$0xff] }
 0x8f3   : > { %6079 = vst.msk [vmem:[#allocation3 + $0x80] sm:$0xff] %vm1747_vm6, %v6000_v25  ;;  %v5809_v29 = vpop.permute.xlu0 %5808  ;;  %10756 = vmatmul.mubr.msk.f32.gmra.mrb[54].mxu1 %vm2203_vm10, %v8641_v58 }
 0x8f4   : > { %5887 = vst.msk [vmem:[#allocation3 + $0x88] sm:$0xff] %vm1553_vm5, %v5809_v29  ;;  %7763 = vrot.lane.b32.xlu1 %v14534_v9, %s11078_s21  ;;  %v14656_v29 = vld [vmem:[#allocation2 + $0x22c] sm:$0xff] }
 0x8f5   : > { %7189 = vrot.lane.b32.xlu0 %v7111_v51, %s11075_s18  ;;  %4937 = vst.msk [vmem:[#allocation3 + $0xd8] sm:$0xff] %vm298_vm0, %v14656_v29  ;;  %v14665_v51 = vld [vmem:[#allocation2 + $0x2c4] sm:$0xff] }
 0x8f6   : > { %v7374_v26 = vpop.permute.xlu1 %7373 }
 0x8f7   : > { %7459 = vst.msk [vmem:[#allocation3 + $0x50] sm:$0xff] %vm974_vm2, %v7374_v26  ;;  %v7184_v36 = vpop.permute.xlu0 %7183 }
 0x8f8   : > { %7268 = vst.msk [vmem:[#allocation3 + $0x58] sm:$0xff] %vm781_vm1, %v7184_v36  ;;  %8528 = vrot.lane.b32.xlu1 %v8453_v39, %s11082_s15 }
 0x8f9   : > { %7953 = vrot.lane.b32.xlu0 %v14534_v9, %s11079_s22 }
 0x8fa   : > { %v8139_v25 = vpop.permute.xlu1 %8138 }
 0x8fb   : > { %8226 = vst.msk [vmem:[#allocation3 + $0x40] sm:$0xff] %vm1747_vm6, %v8139_v25  ;;  %v7948_v58 = vpop.permute.xlu0 %7947 }
 0x8fc   : > { %8034 = vst.msk [vmem:[#allocation3 + $0x48] sm:$0xff] %vm1553_vm5, %v7948_v58  ;;  %5242 = vrot.lane.b32.xlu1 %v14279_v28, %s11076_s19  ;;  %v7303_v28 = vld [vmem:[#allocation2 + $0xf0] sm:$0xff]  ;;  %v8070_v58 = vld [vmem:[#allocation2 + $0x2c0] sm:$0xff] }
 0x8fd   : > { %5052 = vrot.lane.b32.xlu0 %v14265_v53, %s11075_s18 }
 0x8fe   : > { %v5427_v9 = vpop.permute.xlu1 %5426  ;;  %v14667_v39 = vpop.f32.mrb[24].mxu0 }
 0x8ff   : > { %5504 = vst.msk [vmem:[#allocation3 + $0x90] sm:$0xff] %vm1167_vm3, %v5427_v9  ;;  %v5237_v26 = vpop.permute.xlu0 %5236  ;;  %v14670_v36 = vpop.f32.mrb[25].mxu0 }
 0x900   : > { %5313 = vst.msk [vmem:[#allocation3 + $0x98] sm:$0xff] %vm974_vm2, %v5237_v26  ;;  %6007 = vrot.lane.b32.xlu1 %v14665_v51, %s11080_s23 }
 0x901   : > { %5816 = vrot.lane.b32.xlu0 %v14277_v43, %s11079_s22 }
 0x902   : > { %v6192_v53 = vpop.permute.xlu1 %6191 }
 0x903   : > { %6271 = vst.msk [vmem:[#allocation3 + $0x80] sm:$0xff] %vm1940_vm8, %v6192_v53  ;;  %v6002_v25 = vpop.permute.xlu0 %6001 }
 0x904   : > { %6080 = vst.msk [vmem:[#allocation3 + $0x88] sm:$0xff] %vm1747_vm6, %v6002_v25  ;;  %7381 = vrot.lane.b32.xlu1 %v7303_v28, %s11076_s19  ;;  %v14695_v25 = vld [vmem:[#allocation2 + $0x2c8] sm:$0xff] }
 0x905   : > { %7191 = vrot.lane.b32.xlu0 %v7303_v28, %s11075_s18 }
 0x906   : > { %v7566_v9 = vpop.permute.xlu1 %7565  ;;  %v14681_v26 = vpop.f32.mrb[48].mxu1 }
 0x907   : > { %7651 = vst.msk [vmem:[#allocation3 + $0x50] sm:$0xff] %vm1167_vm3, %v7566_v9  ;;  %v7376_v57 = vpop.permute.xlu0 %7375  ;;  %v14684_v43 = vpop.f32.mrb[49].mxu1 }
 0x908   : > { %7460 = vst.msk [vmem:[#allocation3 + $0x58] sm:$0xff] %vm974_vm2, %v7376_v57  ;;  %8146 = vrot.lane.b32.xlu1 %v8070_v58, %s11080_s23  ;;  %v14697_v57 = vld [vmem:[#allocation2 + $0x2cc] sm:$0xff] }
 0x909   : > { %7955 = vrot.lane.b32.xlu0 %v7878_v7, %s11079_s22 }
 0x90a   : > { %v8331_v53 = vpop.permute.xlu1 %8330 }
 0x90b   : > { %8418 = vst.msk [vmem:[#allocation3 + $0x40] sm:$0xff] %vm1940_vm8, %v8331_v53  ;;  %v8141_v28 = vpop.permute.xlu0 %8140  ;;  %v7304_v53 = vld [vmem:[#allocation2 + $0xf8] sm:$0xff] }
 0x90c   : > { %8227 = vst.msk [vmem:[#allocation3 + $0x48] sm:$0xff] %vm1747_vm6, %v8141_v28  ;;  %5434 = vrot.lane.b32.xlu1 %v14308_v18, %s11077_s20  ;;  %v7495_v18 = vld [vmem:[#allocation2 + $0x1e0] sm:$0xff] }
 0x90d   : > { %5244 = vrot.lane.b32.xlu0 %v14310_v48, %s11076_s19 }
 0x90e   : > { %v5619_v9 = vpop.permute.xlu1 %5618 }
 0x90f   : > { %5696 = vst.msk [vmem:[#allocation3 + $0x90] sm:$0xff] %vm1360_vm4, %v5619_v9  ;;  %v5429_v7 = vpop.permute.xlu0 %5428 }
 0x910   : > { %5505 = vst.msk [vmem:[#allocation3 + $0x98] sm:$0xff] %vm1167_vm3, %v5429_v7  ;;  %6199 = vrot.lane.b32.xlu1 %v14695_v25, %s11081_s29 }
 0x911   : > { %6009 = vrot.lane.b32.xlu0 %v14697_v57, %s11080_s23 }
 0x912   : > { %v6384_v58 = vpop.permute.xlu1 %6383 }
 0x913   : > { %6463 = vst.msk [vmem:[#allocation3 + $0x80] sm:$0xff] %vm2133_vm9, %v6384_v58  ;;  %v6194_v48 = vpop.permute.xlu0 %6193 }
 0x914   : > { %6272 = vst.msk [vmem:[#allocation3 + $0x88] sm:$0xff] %vm1940_vm8, %v6194_v48  ;;  %7573 = vrot.lane.b32.xlu1 %v7495_v18, %s11077_s20 }
 0x915   : > { %7383 = vrot.lane.b32.xlu0 %v7304_v53, %s11076_s19  ;;  %v14722_v53 = vld [vmem:[#allocation2 + $0x2d0] sm:$0xff] }
 0x916   : > { %v7758_v28 = vpop.permute.xlu1 %7757 }
 0x917   : > { %7843 = vst.msk [vmem:[#allocation3 + $0x50] sm:$0xff] %vm1360_vm4, %v7758_v28  ;;  %v7568_v9 = vpop.permute.xlu0 %7567  ;;  %v4902_v28 = vld [vmem:[#allocation2 + $0x204] sm:$0xff] }
 0x918   : > { %7652 = vst.msk [vmem:[#allocation3 + $0x58] sm:$0xff] %vm1167_vm3, %v7568_v9  ;;  %8338 = vrot.lane.b32.xlu1 %v14695_v25, %s11081_s29 }
 0x919   : > { %8148 = vrot.lane.b32.xlu0 %v14695_v25, %s11080_s23  ;;  %4934 = vst.msk [vmem:[#allocation3 + $0xc0] sm:$0xff] %vm298_vm0, %v4902_v28 }
 0x91a   : > { %v8523_v7 = vpop.permute.xlu1 %8522  ;;  %v6495_v58 = vld [vmem:[#allocation3 + $0x80] sm:$0xff] }
 0x91b   : > { %8610 = vst.msk [vmem:[#allocation3 + $0x40] sm:$0xff] %vm2133_vm9, %v8523_v7  ;;  %v8333_v48 = vpop.permute.xlu0 %8332  ;;  %10712 = vmatprep.mubr.msk.f32.mxu0 %vm2203_vm10, %v6495_v58 }
 0x91c   : > { %8419 = vst.msk [vmem:[#allocation3 + $0x48] sm:$0xff] %vm1940_vm8, %v8333_v48  ;;  %5626 = vrot.lane.b32.xlu1 %v14330_v24, %s11078_s21  ;;  %v7049_v48 = vld [vmem:[#allocation2 + $0x100] sm:$0xff] }
 0x91d   : > { %5436 = vrot.lane.b32.xlu0 %v14332_v40, %s11077_s20  ;;  %7081 = vst.msk [vmem:[#allocation3 + $0x80] sm:$0xff] %vm298_vm0, %v7049_v48 }
 0x91e   : > { %v5621_v18 = vpop.permute.xlu1 %5620 }
 0x91f   : > { %5697 = vst.msk [vmem:[#allocation3 + $0x98] sm:$0xff] %vm1360_vm4, %v5621_v18  ;;  %v5047_v9 = vpop.permute.xlu0 %5046 }
 0x920   : > { %5122 = vst.msk [vmem:[#allocation3 + $0xa0] sm:$0xff] %vm781_vm1, %v5047_v9  ;;  %6391 = vrot.lane.b32.xlu1 %v14697_v57, %s11082_s15 }
 0x921   : > { %6201 = vrot.lane.b32.xlu0 %v14722_v53, %s11081_s29 }
 0x922   : > { %v6386_v24 = vpop.permute.xlu1 %6385  ;;  %v8642_v7 = vld [vmem:[#allocation3 + $0x40] sm:$0xff] }
 0x923   : > { %6464 = vst.msk [vmem:[#allocation3 + $0x88] sm:$0xff] %vm2133_vm9, %v6386_v24  ;;  %v5811_v40 = vpop.permute.xlu0 %5810  ;;  %10758 = vmatprep.mubr.msk.f32.mxu1 %vm2203_vm10, %v8642_v7  ;;  %v7113_v24 = vld [vmem:[#allocation2 + $0x108] sm:$0xff]  ;;  %v14753_v7 = vld [vmem:[#allocation2 + $0x2d4] sm:$0xff] }
 0x924   : > { %5888 = vst.msk [vmem:[#allocation3 + $0x90] sm:$0xff] %vm1553_vm5, %v5811_v40  ;;  %7765 = vrot.lane.b32.xlu1 %v14623_v2, %s11078_s21 }
 0x925   : > { %7575 = vrot.lane.b32.xlu0 %v14623_v2, %s11077_s20 }
 0x926   : > { %v7760_v58 = vpop.permute.xlu1 %7759 }
 0x927   : > { %7844 = vst.msk [vmem:[#allocation3 + $0x58] sm:$0xff] %vm1360_vm4, %v7760_v58  ;;  %v7186_v18 = vpop.permute.xlu0 %7185  ;;  %v14755_v58 = vld [vmem:[#allocation2 + $0x26c] sm:$0xff] }
 0x928   : > { %7269 = vst.msk [vmem:[#allocation3 + $0x60] sm:$0xff] %vm781_vm1, %v7186_v18  ;;  %8530 = vrot.lane.b32.xlu1 %v14722_v53, %s11082_s15 }
 0x929   : > { %8340 = vrot.lane.b32.xlu0 %v14722_v53, %s11081_s29 }
 0x92a   : > { %v8525_v28 = vpop.permute.xlu1 %8524  ;;  %v6496_v9 = vld [vmem:[#allocation3 + $0x88] sm:$0xff] }
 0x92b   : > { %8611 = vst.msk [vmem:[#allocation3 + $0x48] sm:$0xff] %vm2133_vm9, %v8525_v28  ;;  %v7950_v2 = vpop.permute.xlu0 %7949  ;;  %10713 = vmatmul.mubr.msk.f32.gmra.mrb[32].mxu0 %vm2203_vm10, %v6496_v9  ;;  %v8455_v9 = vld [vmem:[#allocation2 + $0x2d8] sm:$0xff] }
 0x92c   : > { %7082 = vst.msk [vmem:[#allocation3 + $0x88] sm:$0xff] %vm298_vm0, %v7113_v24  ;;  %5628 = vrot.lane.b32.xlu1 %v14362_v33, %s11078_s21  ;;  %v7688_v33 = vld [vmem:[#allocation2 + $0x1f0] sm:$0xff] }
 0x92d   : > { %8035 = vst.msk [vmem:[#allocation3 + $0x50] sm:$0xff] %vm1553_vm5, %v7950_v2  ;;  %5054 = vrot.lane.b32.xlu0 %v14354_v0, %s11075_s18 }
 0x92e   : > { %v5239_v40 = vpop.permute.xlu1 %5238 }
 0x92f   : > { %5314 = vst.msk [vmem:[#allocation3 + $0xa0] sm:$0xff] %vm974_vm2, %v5239_v40  ;;  %v5049_v48 = vpop.permute.xlu0 %5048 }
 0x930   : > { %5123 = vst.msk [vmem:[#allocation3 + $0xa8] sm:$0xff] %vm781_vm1, %v5049_v48  ;;  %6393 = vrot.lane.b32.xlu1 %v14753_v7, %s11082_s15 }
 0x931   : > { %5818 = vrot.lane.b32.xlu0 %v14755_v58, %s11079_s22 }
 0x932   : > { %v6004_v18 = vpop.permute.xlu1 %6003  ;;  %v8643_v28 = vld [vmem:[#allocation3 + $0x48] sm:$0xff] }
 0x933   : > { %6081 = vst.msk [vmem:[#allocation3 + $0x90] sm:$0xff] %vm1747_vm6, %v6004_v18  ;;  %v5813_v0 = vpop.permute.xlu0 %5812  ;;  %10759 = vmatmul.mubr.msk.f32.gmra.mrb[56].mxu1 %vm2203_vm10, %v8643_v28 }
 0x934   : > { %5889 = vst.msk [vmem:[#allocation3 + $0x98] sm:$0xff] %vm1553_vm5, %v5813_v0  ;;  %7767 = vrot.lane.b32.xlu1 %v7688_v33, %s11078_s21 }
 0x935   : > { %7193 = vrot.lane.b32.xlu0 %v7113_v24, %s11075_s18  ;;  %v14778_v24 = vld [vmem:[#allocation2 + $0x2e4] sm:$0xff] }
 0x936   : > { %v7378_v2 = vpop.permute.xlu1 %7377 }
 0x937   : > { %7461 = vst.msk [vmem:[#allocation3 + $0x60] sm:$0xff] %vm974_vm2, %v7378_v2  ;;  %v7188_v40 = vpop.permute.xlu0 %7187 }
 0x938   : > { %7270 = vst.msk [vmem:[#allocation3 + $0x68] sm:$0xff] %vm781_vm1, %v7188_v40  ;;  %8532 = vrot.lane.b32.xlu1 %v8455_v9, %s11082_s15  ;;  %v8072_v40 = vld [vmem:[#allocation2 + $0x2e0] sm:$0xff] }
 0x939   : > { %7957 = vrot.lane.b32.xlu0 %v7688_v33, %s11079_s22 }
 0x93a   : > { %v8143_v48 = vpop.permute.xlu1 %8142 }
 0x93b   : > { %8228 = vst.msk [vmem:[#allocation3 + $0x50] sm:$0xff] %vm1747_vm6, %v8143_v48  ;;  %v7952_v18 = vpop.permute.xlu0 %7951 }
 0x93c   : > { %8036 = vst.msk [vmem:[#allocation3 + $0x58] sm:$0xff] %vm1553_vm5, %v7952_v18  ;;  %5246 = vrot.lane.b32.xlu1 %v14537_v11, %s11076_s19  ;;  %v7305_v11 = vld [vmem:[#allocation2 + $0x110] sm:$0xff] }
 0x93d   : > { %5056 = vrot.lane.b32.xlu0 %v14385_v3, %s11075_s18 }
 0x93e   : > { %v5431_v28 = vpop.permute.xlu1 %5430  ;;  %v14780_v0 = vpop.f32.mrb[26].mxu0 }
 0x93f   : > { %5506 = vst.msk [vmem:[#allocation3 + $0xa0] sm:$0xff] %vm1167_vm3, %v5431_v28  ;;  %v5241_v33 = vpop.permute.xlu0 %5240  ;;  %v14783_v9 = vpop.f32.mrb[27].mxu0  ;;  %v7880_v28 = vld [vmem:[#allocation2 + $0x1f8] sm:$0xff] }
 0x940   : > { %5315 = vst.msk [vmem:[#allocation3 + $0xa8] sm:$0xff] %vm974_vm2, %v5241_v33  ;;  %6011 = vrot.lane.b32.xlu1 %v14778_v24, %s11080_s23 }
 0x941   : > { %5820 = vrot.lane.b32.xlu0 %v14397_v23, %s11079_s22 }
 0x942   : > { %v6196_v3 = vpop.permute.xlu1 %6195 }
 0x943   : > { %6273 = vst.msk [vmem:[#allocation3 + $0x90] sm:$0xff] %vm1940_vm8, %v6196_v3  ;;  %v6006_v2 = vpop.permute.xlu0 %6005 }
 0x944   : > { %6082 = vst.msk [vmem:[#allocation3 + $0x98] sm:$0xff] %vm1747_vm6, %v6006_v2  ;;  %7385 = vrot.lane.b32.xlu1 %v7305_v11, %s11076_s19  ;;  %v14808_v2 = vld [vmem:[#allocation2 + $0x2e8] sm:$0xff] }
 0x945   : > { %7195 = vrot.lane.b32.xlu0 %v7305_v11, %s11075_s18 }
 0x946   : > { %v7570_v48 = vpop.permute.xlu1 %7569  ;;  %v14794_v18 = vpop.f32.mrb[50].mxu1 }
 0x947   : > { %7653 = vst.msk [vmem:[#allocation3 + $0x60] sm:$0xff] %vm1167_vm3, %v7570_v48  ;;  %v7380_v33 = vpop.permute.xlu0 %7379  ;;  %v14797_v23 = vpop.f32.mrb[51].mxu1 }
 0x948   : > { %7462 = vst.msk [vmem:[#allocation3 + $0x68] sm:$0xff] %vm974_vm2, %v7380_v33  ;;  %8150 = vrot.lane.b32.xlu1 %v8072_v40, %s11080_s23  ;;  %v14810_v33 = vld [vmem:[#allocation2 + $0x2ec] sm:$0xff] }
 0x949   : > { %7959 = vrot.lane.b32.xlu0 %v7880_v28, %s11079_s22 }
 0x94a   : > { %v8335_v3 = vpop.permute.xlu1 %8334 }
 0x94b   : > { %8420 = vst.msk [vmem:[#allocation3 + $0x50] sm:$0xff] %vm1940_vm8, %v8335_v3  ;;  %v8145_v11 = vpop.permute.xlu0 %8144  ;;  %v7306_v3 = vld [vmem:[#allocation2 + $0x118] sm:$0xff] }
 0x94c   : > { %8229 = vst.msk [vmem:[#allocation3 + $0x58] sm:$0xff] %vm1747_vm6, %v8145_v11  ;;  %5438 = vrot.lane.b32.xlu1 %v14427_v12, %s11077_s20  ;;  %v7497_v12 = vld [vmem:[#allocation2 + $0x200] sm:$0xff] }
 0x94d   : > { %5248 = vrot.lane.b32.xlu0 %v14429_v41, %s11076_s19 }
 0x94e   : > { %v5623_v48 = vpop.permute.xlu1 %5622 }
 0x94f   : > { %5698 = vst.msk [vmem:[#allocation3 + $0xa0] sm:$0xff] %vm1360_vm4, %v5623_v48  ;;  %v5433_v40 = vpop.permute.xlu0 %5432 }
 0x950   : > { %5507 = vst.msk [vmem:[#allocation3 + $0xa8] sm:$0xff] %vm1167_vm3, %v5433_v40  ;;  %6203 = vrot.lane.b32.xlu1 %v14808_v2, %s11081_s29 }
 0x951   : > { %6013 = vrot.lane.b32.xlu0 %v14810_v33, %s11080_s23 }
 0x952   : > { %v6388_v28 = vpop.permute.xlu1 %6387 }
 0x953   : > { %6465 = vst.msk [vmem:[#allocation3 + $0x90] sm:$0xff] %vm2133_vm9, %v6388_v28  ;;  %v6198_v41 = vpop.permute.xlu0 %6197 }
 0x954   : > { %6274 = vst.msk [vmem:[#allocation3 + $0x98] sm:$0xff] %vm1940_vm8, %v6198_v41  ;;  %7577 = vrot.lane.b32.xlu1 %v7497_v12, %s11077_s20 }
 0x955   : > { %7387 = vrot.lane.b32.xlu0 %v7306_v3, %s11076_s19  ;;  %v14835_v3 = vld [vmem:[#allocation2 + $0x2f0] sm:$0xff] }
 0x956   : > { %v7762_v11 = vpop.permute.xlu1 %7761 }
 0x957   : > { %7845 = vst.msk [vmem:[#allocation3 + $0x60] sm:$0xff] %vm1360_vm4, %v7762_v11  ;;  %v7572_v48 = vpop.permute.xlu0 %7571  ;;  %v4904_v11 = vld [vmem:[#allocation2 + $0x224] sm:$0xff] }
 0x958   : > { %7654 = vst.msk [vmem:[#allocation3 + $0x68] sm:$0xff] %vm1167_vm3, %v7572_v48  ;;  %8342 = vrot.lane.b32.xlu1 %v14808_v2, %s11081_s29 }
 0x959   : > { %8152 = vrot.lane.b32.xlu0 %v14808_v2, %s11080_s23  ;;  %4936 = vst.msk [vmem:[#allocation3 + $0xd0] sm:$0xff] %vm298_vm0, %v4904_v11 }
 0x95a   : > { %v8527_v40 = vpop.permute.xlu1 %8526  ;;  %v6497_v28 = vld [vmem:[#allocation3 + $0x90] sm:$0xff] }
 0x95b   : > { %8612 = vst.msk [vmem:[#allocation3 + $0x50] sm:$0xff] %vm2133_vm9, %v8527_v40  ;;  %v8337_v41 = vpop.permute.xlu0 %8336  ;;  %10715 = vmatprep.mubr.msk.f32.mxu0 %vm2203_vm10, %v6497_v28 }
 0x95c   : > { %8421 = vst.msk [vmem:[#allocation3 + $0x58] sm:$0xff] %vm1940_vm8, %v8337_v41  ;;  %5630 = vrot.lane.b32.xlu1 %v14449_v14, %s11078_s21  ;;  %v7689_v14 = vld [vmem:[#allocation2 + $0x208] sm:$0xff] }
 0x95d   : > { %5440 = vrot.lane.b32.xlu0 %v14451_v50, %s11077_s20 }
 0x95e   : > { %v5625_v12 = vpop.permute.xlu1 %5624 }
 0x95f   : > { %5699 = vst.msk [vmem:[#allocation3 + $0xa8] sm:$0xff] %vm1360_vm4, %v5625_v12  ;;  %v5051_v48 = vpop.permute.xlu0 %5050  ;;  %v7051_v12 = vld [vmem:[#allocation2 + $0x120] sm:$0xff] }
 0x960   : > { %5124 = vst.msk [vmem:[#allocation3 + $0xb0] sm:$0xff] %vm781_vm1, %v5051_v48  ;;  %6395 = vrot.lane.b32.xlu1 %v14810_v33, %s11082_s15 }
 0x961   : > { %6205 = vrot.lane.b32.xlu0 %v14835_v3, %s11081_s29  ;;  %7083 = vst.msk [vmem:[#allocation3 + $0x90] sm:$0xff] %vm298_vm0, %v7051_v12  ;;  %v5734_v12 = vld [vmem:[#allocation2 + $0x28c] sm:$0xff] }
 0x962   : > { %v6390_v40 = vpop.permute.xlu1 %6389  ;;  %v8644_v50 = vld [vmem:[#allocation3 + $0x50] sm:$0xff] }
 0x963   : > { %6466 = vst.msk [vmem:[#allocation3 + $0x98] sm:$0xff] %vm2133_vm9, %v6390_v40  ;;  %v5815_v28 = vpop.permute.xlu0 %5814  ;;  %10761 = vmatprep.mubr.msk.f32.mxu1 %vm2203_vm10, %v8644_v50  ;;  %v7115_v50 = vld [vmem:[#allocation2 + $0x128] sm:$0xff] }
 0x964   : > { %5890 = vst.msk [vmem:[#allocation3 + $0xa0] sm:$0xff] %vm1553_vm5, %v5815_v28  ;;  %7769 = vrot.lane.b32.xlu1 %v7689_v14, %s11078_s21  ;;  %v14864_v28 = vld [vmem:[#allocation2 + $0x2f4] sm:$0xff] }
 0x965   : > { %7579 = vrot.lane.b32.xlu0 %v7689_v14, %s11077_s20 }
 0x966   : > { %v7764_v41 = vpop.permute.xlu1 %7763 }
 0x967   : > { %7846 = vst.msk [vmem:[#allocation3 + $0x68] sm:$0xff] %vm1360_vm4, %v7764_v41  ;;  %v7190_v11 = vpop.permute.xlu0 %7189 }
 0x968   : > { %7271 = vst.msk [vmem:[#allocation3 + $0x70] sm:$0xff] %vm781_vm1, %v7190_v11  ;;  %8534 = vrot.lane.b32.xlu1 %v14835_v3, %s11082_s15 }
 0x969   : > { %8344 = vrot.lane.b32.xlu0 %v14835_v3, %s11081_s29 }
 0x96a   : > { %v8529_v48 = vpop.permute.xlu1 %8528  ;;  %v6498_v40 = vld [vmem:[#allocation3 + $0x98] sm:$0xff] }
 0x96b   : > { %8613 = vst.msk [vmem:[#allocation3 + $0x58] sm:$0xff] %vm2133_vm9, %v8529_v48  ;;  %v7954_v14 = vpop.permute.xlu0 %7953  ;;  %10716 = vmatmul.mubr.msk.f32.gmra.mrb[34].mxu0 %vm2203_vm10, %v6498_v40  ;;  %v7690_v48 = vld [vmem:[#allocation2 + $0x210] sm:$0xff] }
 0x96c   : > { %7084 = vst.msk [vmem:[#allocation3 + $0x98] sm:$0xff] %vm298_vm0, %v7115_v50  ;;  %5632 = vrot.lane.b32.xlu1 %v14481_v52, %s11078_s21 }
 0x96d   : > { %8037 = vst.msk [vmem:[#allocation3 + $0x60] sm:$0xff] %vm1553_vm5, %v7954_v14  ;;  %5058 = vrot.lane.b32.xlu0 %v14473_v22, %s11075_s18  ;;  %v8457_v14 = vld [vmem:[#allocation2 + $0x2f8] sm:$0xff] }
 0x96e   : > { %v5243_v41 = vpop.permute.xlu1 %5242 }
 0x96f   : > { %5316 = vst.msk [vmem:[#allocation3 + $0xb0] sm:$0xff] %vm974_vm2, %v5243_v41  ;;  %v5053_v11 = vpop.permute.xlu0 %5052 }
 0x970   : > { %5125 = vst.msk [vmem:[#allocation3 + $0xb8] sm:$0xff] %vm781_vm1, %v5053_v11  ;;  %6397 = vrot.lane.b32.xlu1 %v14864_v28, %s11082_s15 }
 0x971   : > { %5822 = vrot.lane.b32.xlu0 %v5734_v12, %s11079_s22 }
 0x972   : > { %v6008_v40 = vpop.permute.xlu1 %6007  ;;  %v8645_v52 = vld [vmem:[#allocation3 + $0x58] sm:$0xff] }
 0x973   : > { %6083 = vst.msk [vmem:[#allocation3 + $0xa0] sm:$0xff] %vm1747_vm6, %v6008_v40  ;;  %v5817_v22 = vpop.permute.xlu0 %5816  ;;  %10762 = vmatmul.mubr.msk.f32.gmra.mrb[58].mxu1 %vm2203_vm10, %v8645_v52 }
 0x974   : > { %5891 = vst.msk [vmem:[#allocation3 + $0xa8] sm:$0xff] %vm1553_vm5, %v5817_v22  ;;  %7771 = vrot.lane.b32.xlu1 %v7690_v48, %s11078_s21 }
 0x975   : > { %7197 = vrot.lane.b32.xlu0 %v7115_v50, %s11075_s18  ;;  %v5927_v50 = vld [vmem:[#allocation2 + $0x304] sm:$0xff] }
 0x976   : > { %v7382_v41 = vpop.permute.xlu1 %7381 }
 0x977   : > { %7463 = vst.msk [vmem:[#allocation3 + $0x70] sm:$0xff] %vm974_vm2, %v7382_v41  ;;  %v7192_v11 = vpop.permute.xlu0 %7191 }
 0x978   : > { %7272 = vst.msk [vmem:[#allocation3 + $0x78] sm:$0xff] %vm781_vm1, %v7192_v11  ;;  %8536 = vrot.lane.b32.xlu1 %v8457_v14, %s11082_s15  ;;  %v8074_v11 = vld [vmem:[#allocation2 + $0x300] sm:$0xff] }
 0x979   : > { %7961 = vrot.lane.b32.xlu0 %v7690_v48, %s11079_s22 }
 0x97a   : > { %v8147_v12 = vpop.permute.xlu1 %8146 }
 0x97b   : > { %8230 = vst.msk [vmem:[#allocation3 + $0x60] sm:$0xff] %vm1747_vm6, %v8147_v12  ;;  %v7956_v40 = vpop.permute.xlu0 %7955 }
 0x97c   : > { %8038 = vst.msk [vmem:[#allocation3 + $0x68] sm:$0xff] %vm1553_vm5, %v7956_v40  ;;  %5250 = vrot.lane.b32.xlu1 %v14656_v29, %s11076_s19  ;;  %v7307_v29 = vld [vmem:[#allocation2 + $0x130] sm:$0xff] }
 0x97d   : > { %5060 = vrot.lane.b32.xlu0 %v14504_v31, %s11075_s18 }
 0x97e   : > { %v5435_v52 = vpop.permute.xlu1 %5434  ;;  %v14886_v22 = vpop.f32.mrb[28].mxu0 }
 0x97f   : > { %5508 = vst.msk [vmem:[#allocation3 + $0xb0] sm:$0xff] %vm1167_vm3, %v5435_v52  ;;  %v5245_v14 = vpop.permute.xlu0 %5244  ;;  %v14889_v48 = vpop.f32.mrb[29].mxu0  ;;  %v7882_v52 = vld [vmem:[#allocation2 + $0x218] sm:$0xff] }
 0x980   : > { %5317 = vst.msk [vmem:[#allocation3 + $0xb8] sm:$0xff] %vm974_vm2, %v5245_v14  ;;  %6015 = vrot.lane.b32.xlu1 %v5927_v50, %s11080_s23 }
 0x981   : > { %5824 = vrot.lane.b32.xlu0 %v14516_v21, %s11079_s22 }
 0x982   : > { %v6200_v41 = vpop.permute.xlu1 %6199 }
 0x983   : > { %6275 = vst.msk [vmem:[#allocation3 + $0xa0] sm:$0xff] %vm1940_vm8, %v6200_v41  ;;  %v6010_v31 = vpop.permute.xlu0 %6009  ;;  %v6119_v41 = vld [vmem:[#allocation2 + $0x308] sm:$0xff] }
 0x984   : > { %6084 = vst.msk [vmem:[#allocation3 + $0xa8] sm:$0xff] %vm1747_vm6, %v6010_v31  ;;  %7389 = vrot.lane.b32.xlu1 %v7307_v29, %s11076_s19 }
 0x985   : > { %7199 = vrot.lane.b32.xlu0 %v7307_v29, %s11075_s18 }
 0x986   : > { %v7574_v12 = vpop.permute.xlu1 %7573  ;;  %v14899_v40 = vpop.f32.mrb[52].mxu1 }
 0x987   : > { %7655 = vst.msk [vmem:[#allocation3 + $0x70] sm:$0xff] %vm1167_vm3, %v7574_v12  ;;  %v7384_v50 = vpop.permute.xlu0 %7383  ;;  %v14902_v21 = vpop.f32.mrb[53].mxu1  ;;  %v5928_v12 = vld [vmem:[#allocation2 + $0x30c] sm:$0xff] }
 0x988   : > { %7464 = vst.msk [vmem:[#allocation3 + $0x78] sm:$0xff] %vm974_vm2, %v7384_v50  ;;  %8154 = vrot.lane.b32.xlu1 %v8074_v11, %s11080_s23 }
 0x989   : > { %7963 = vrot.lane.b32.xlu0 %v7882_v52, %s11079_s22  ;;  %v7499_v52 = vld [vmem:[#allocation2 + $0x220] sm:$0xff] }
 0x98a   : > { %v8339_v14 = vpop.permute.xlu1 %8338 }
 0x98b   : > { %8422 = vst.msk [vmem:[#allocation3 + $0x60] sm:$0xff] %vm1940_vm8, %v8339_v14  ;;  %v8149_v29 = vpop.permute.xlu0 %8148  ;;  %v7308_v14 = vld [vmem:[#allocation2 + $0x138] sm:$0xff] }
 0x98c   : > { %8231 = vst.msk [vmem:[#allocation3 + $0x68] sm:$0xff] %vm1747_vm6, %v8149_v29  ;;  %5442 = vrot.lane.b32.xlu1 %v14546_v54, %s11077_s20 }
 0x98d   : > { %5252 = vrot.lane.b32.xlu0 %v14548_v17, %s11076_s19 }
 0x98e   : > { %v5627_v31 = vpop.permute.xlu1 %5626 }
 0x98f   : > { %5700 = vst.msk [vmem:[#allocation3 + $0xb0] sm:$0xff] %vm1360_vm4, %v5627_v31  ;;  %v5437_v11 = vpop.permute.xlu0 %5436 }
 0x990   : > { %5509 = vst.msk [vmem:[#allocation3 + $0xb8] sm:$0xff] %vm1167_vm3, %v5437_v11  ;;  %6207 = vrot.lane.b32.xlu1 %v6119_v41, %s11081_s29 }
 0x991   : > { %6017 = vrot.lane.b32.xlu0 %v5928_v12, %s11080_s23 }
 0x992   : > { %v6392_v50 = vpop.permute.xlu1 %6391 }
 0x993   : > { %6467 = vst.msk [vmem:[#allocation3 + $0xa0] sm:$0xff] %vm2133_vm9, %v6392_v50  ;;  %v6202_v54 = vpop.permute.xlu0 %6201 }
 0x994   : > { %6276 = vst.msk [vmem:[#allocation3 + $0xa8] sm:$0xff] %vm1940_vm8, %v6202_v54  ;;  %7581 = vrot.lane.b32.xlu1 %v7499_v52, %s11077_s20  ;;  %v4906_v54 = vld [vmem:[#allocation2 + $0x244] sm:$0xff] }
 0x995   : > { %7391 = vrot.lane.b32.xlu0 %v7308_v14, %s11076_s19  ;;  %v6120_v14 = vld [vmem:[#allocation2 + $0x310] sm:$0xff]  ;;  %4938 = vst.msk [vmem:[#allocation3 + $0xe0] sm:$0xff] %vm298_vm0, %v4906_v54  ;;  %v14947_v54 = vld [vmem:[#allocation2 + $0x248] sm:$0xff] }
 0x996   : > { %v7766_v17 = vpop.permute.xlu1 %7765 }
 0x997   : > { %7847 = vst.msk [vmem:[#allocation3 + $0x70] sm:$0xff] %vm1360_vm4, %v7766_v17  ;;  %v7576_v29 = vpop.permute.xlu0 %7575  ;;  %v7691_v17 = vld [vmem:[#allocation2 + $0x228] sm:$0xff] }
 0x998   : > { %7656 = vst.msk [vmem:[#allocation3 + $0x78] sm:$0xff] %vm1167_vm3, %v7576_v29  ;;  %8346 = vrot.lane.b32.xlu1 %v6119_v41, %s11081_s29 }
 0x999   : > { %8156 = vrot.lane.b32.xlu0 %v6119_v41, %s11080_s23 }
 0x99a   : > { %v8531_v31 = vpop.permute.xlu1 %8530  ;;  %v6499_v11 = vld [vmem:[#allocation3 + $0xa0] sm:$0xff] }
 0x99b   : > { %8614 = vst.msk [vmem:[#allocation3 + $0x60] sm:$0xff] %vm2133_vm9, %v8531_v31  ;;  %v8341_v50 = vpop.permute.xlu0 %8340  ;;  %10718 = vmatprep.mubr.msk.f32.mxu0 %vm2203_vm10, %v6499_v11  ;;  %v7053_v11 = vld [vmem:[#allocation2 + $0x140] sm:$0xff] }
 0x99c   : > { %8423 = vst.msk [vmem:[#allocation3 + $0x68] sm:$0xff] %vm1940_vm8, %v8341_v50  ;;  %5634 = vrot.lane.b32.xlu1 %v14573_v20, %s11078_s21 }
 0x99d   : > { %5444 = vrot.lane.b32.xlu0 %v14575_v34, %s11077_s20  ;;  %7085 = vst.msk [vmem:[#allocation3 + $0xa0] sm:$0xff] %vm298_vm0, %v7053_v11  ;;  %v7692_v11 = vld [vmem:[#allocation2 + $0x230] sm:$0xff] }
 0x99e   : > { %v5629_v52 = vpop.permute.xlu1 %5628 }
 0x99f   : > { %5701 = vst.msk [vmem:[#allocation3 + $0xb8] sm:$0xff] %vm1360_vm4, %v5629_v52  ;;  %v5055_v41 = vpop.permute.xlu0 %5054 }
 0x9a0   : > { %5126 = vst.msk [vmem:[#allocation3 + $0xc0] sm:$0xff] %vm781_vm1, %v5055_v41  ;;  %6399 = vrot.lane.b32.xlu1 %v5928_v12, %s11082_s15  ;;  %v7117_v41 = vld [vmem:[#allocation2 + $0x148] sm:$0xff] }
 0x9a1   : > { %6209 = vrot.lane.b32.xlu0 %v6120_v14, %s11081_s29 }
 0x9a2   : > { %v6394_v29 = vpop.permute.xlu1 %6393  ;;  %v8646_v20 = vld [vmem:[#allocation3 + $0x60] sm:$0xff] }
 0x9a3   : > { %6468 = vst.msk [vmem:[#allocation3 + $0xa8] sm:$0xff] %vm2133_vm9, %v6394_v29  ;;  %v5819_v34 = vpop.permute.xlu0 %5818  ;;  %10764 = vmatprep.mubr.msk.f32.mxu1 %vm2203_vm10, %v8646_v20  ;;  %v5736_v20 = vld [vmem:[#allocation2 + $0x2ac] sm:$0xff] }
 0x9a4   : > { %5892 = vst.msk [vmem:[#allocation3 + $0xb0] sm:$0xff] %vm1553_vm5, %v5819_v34  ;;  %7773 = vrot.lane.b32.xlu1 %v7691_v17, %s11078_s21  ;;  %v4907_v34 = vld [vmem:[#allocation2 + $0x24c] sm:$0xff] }
 0x9a5   : > { %7583 = vrot.lane.b32.xlu0 %v7691_v17, %s11077_s20  ;;  %4939 = vst.msk [vmem:[#allocation3 + $0xe8] sm:$0xff] %vm298_vm0, %v4907_v34 }
 0x9a6   : > { %v7768_v31 = vpop.permute.xlu1 %7767 }
 0x9a7   : > { %7848 = vst.msk [vmem:[#allocation3 + $0x78] sm:$0xff] %vm1360_vm4, %v7768_v31  ;;  %v7194_v12 = vpop.permute.xlu0 %7193 }
 0x9a8   : > { %7273 = vst.msk [vmem:[#allocation3 + $0x80] sm:$0xff] %vm781_vm1, %v7194_v12  ;;  %8538 = vrot.lane.b32.xlu1 %v6120_v14, %s11082_s15 }
 0x9a9   : > { %8348 = vrot.lane.b32.xlu0 %v6120_v14, %s11081_s29  ;;  %v6312_v14 = vld [vmem:[#allocation2 + $0x314] sm:$0xff] }
 0x9aa   : > { %v8533_v50 = vpop.permute.xlu1 %8532  ;;  %v6500_v52 = vld [vmem:[#allocation3 + $0xa8] sm:$0xff] }
 0x9ab   : > { %8615 = vst.msk [vmem:[#allocation3 + $0x68] sm:$0xff] %vm2133_vm9, %v8533_v50  ;;  %v7958_v17 = vpop.permute.xlu0 %7957  ;;  %10719 = vmatmul.mubr.msk.f32.gmra.mrb[36].mxu0 %vm2203_vm10, %v6500_v52  ;;  %v8459_v52 = vld [vmem:[#allocation2 + $0x318] sm:$0xff] }
 0x9ac   : > { %7086 = vst.msk [vmem:[#allocation3 + $0xa8] sm:$0xff] %vm298_vm0, %v7117_v41  ;;  %5636 = vrot.lane.b32.xlu1 %v14600_v49, %s11078_s21 }
 0x9ad   : > { %8039 = vst.msk [vmem:[#allocation3 + $0x70] sm:$0xff] %vm1553_vm5, %v7958_v17  ;;  %5062 = vrot.lane.b32.xlu0 %v14947_v54, %s11075_s18 }
 0x9ae   : > { %v5247_v29 = vpop.permute.xlu1 %5246 }
 0x9af   : > { %5318 = vst.msk [vmem:[#allocation3 + $0xc0] sm:$0xff] %vm974_vm2, %v5247_v29  ;;  %v5057_v31 = vpop.permute.xlu0 %5056 }
 0x9b0   : > { %5127 = vst.msk [vmem:[#allocation3 + $0xc8] sm:$0xff] %vm781_vm1, %v5057_v31  ;;  %6401 = vrot.lane.b32.xlu1 %v6312_v14, %s11082_s15 }
 0x9b1   : > { %5826 = vrot.lane.b32.xlu0 %v5736_v20, %s11079_s22  ;;  %v14971_v20 = vld [vmem:[#allocation2 + $0x250] sm:$0xff] }
 0x9b2   : > { %v6012_v49 = vpop.permute.xlu1 %6011  ;;  %v8647_v12 = vld [vmem:[#allocation3 + $0x68] sm:$0xff] }
 0x9b3   : > { %6085 = vst.msk [vmem:[#allocation3 + $0xb0] sm:$0xff] %vm1747_vm6, %v6012_v49  ;;  %v5821_v50 = vpop.permute.xlu0 %5820  ;;  %10765 = vmatmul.mubr.msk.f32.gmra.mrb[60].mxu1 %vm2203_vm10, %v8647_v12 }
 0x9b4   : > { %5893 = vst.msk [vmem:[#allocation3 + $0xb8] sm:$0xff] %vm1553_vm5, %v5821_v50  ;;  %7775 = vrot.lane.b32.xlu1 %v7692_v11, %s11078_s21 }
 0x9b5   : > { %7201 = vrot.lane.b32.xlu0 %v7117_v41, %s11075_s18  ;;  %v5929_v41 = vld [vmem:[#allocation2 + $0x324] sm:$0xff] }
 0x9b6   : > { %v7386_v17 = vpop.permute.xlu1 %7385 }
 0x9b7   : > { %7465 = vst.msk [vmem:[#allocation3 + $0x80] sm:$0xff] %vm974_vm2, %v7386_v17  ;;  %v7196_v14 = vpop.permute.xlu0 %7195  ;;  %v8076_v17 = vld [vmem:[#allocation2 + $0x320] sm:$0xff] }
 0x9b8   : > { %7274 = vst.msk [vmem:[#allocation3 + $0x88] sm:$0xff] %vm781_vm1, %v7196_v14  ;;  %8540 = vrot.lane.b32.xlu1 %v8459_v52, %s11082_s15 }
 0x9b9   : > { %7965 = vrot.lane.b32.xlu0 %v7692_v11, %s11079_s22 }
 0x9ba   : > { %v8151_v29 = vpop.permute.xlu1 %8150 }
 0x9bb   : > { %8232 = vst.msk [vmem:[#allocation3 + $0x70] sm:$0xff] %vm1747_vm6, %v8151_v29  ;;  %v7960_v34 = vpop.permute.xlu0 %7959 }
 0x9bc   : > { %8040 = vst.msk [vmem:[#allocation3 + $0x78] sm:$0xff] %vm1553_vm5, %v7960_v34  ;;  %5254 = vrot.lane.b32.xlu1 %v14635_v10, %s11076_s19  ;;  %v7309_v10 = vld [vmem:[#allocation2 + $0x150] sm:$0xff]  ;;  %v7884_v34 = vld [vmem:[#allocation2 + $0x238] sm:$0xff] }
 0x9bd   : > { %5064 = vrot.lane.b32.xlu0 %v14971_v20, %s11075_s18 }
 0x9be   : > { %v5439_v31 = vpop.permute.xlu1 %5438  ;;  %v14979_v49 = vpop.f32.mrb[30].mxu0 }
 0x9bf   : > { %5510 = vst.msk [vmem:[#allocation3 + $0xc0] sm:$0xff] %vm1167_vm3, %v5439_v31  ;;  %v5249_v11 = vpop.permute.xlu0 %5248  ;;  %v14982_v12 = vpop.f32.mrb[31].mxu0 }
 0x9c0   : > { %5319 = vst.msk [vmem:[#allocation3 + $0xc8] sm:$0xff] %vm974_vm2, %v5249_v11  ;;  %6019 = vrot.lane.b32.xlu1 %v5929_v41, %s11080_s23  ;;  %v5163_v11 = vld [vmem:[#allocation2 + $0x254] sm:$0xff] }
 0x9c1   : > { %5828 = vrot.lane.b32.xlu0 %v14633_v59, %s11079_s22 }
 0x9c2   : > { %v6204_v50 = vpop.permute.xlu1 %6203 }
 0x9c3   : > { %6277 = vst.msk [vmem:[#allocation3 + $0xb0] sm:$0xff] %vm1940_vm8, %v6204_v50  ;;  %v6014_v52 = vpop.permute.xlu0 %6013  ;;  %v6121_v50 = vld [vmem:[#allocation2 + $0x328] sm:$0xff] }
 0x9c4   : > { %6086 = vst.msk [vmem:[#allocation3 + $0xb8] sm:$0xff] %vm1747_vm6, %v6014_v52  ;;  %7393 = vrot.lane.b32.xlu1 %v7309_v10, %s11076_s19 }
 0x9c5   : > { %7203 = vrot.lane.b32.xlu0 %v7309_v10, %s11075_s18 }
 0x9c6   : > { %v7578_v14 = vpop.permute.xlu1 %7577  ;;  %v14992_v29 = vpop.f32.mrb[54].mxu1 }
 0x9c7   : > { %7657 = vst.msk [vmem:[#allocation3 + $0x80] sm:$0xff] %vm1167_vm3, %v7578_v14  ;;  %v7388_v41 = vpop.permute.xlu0 %7387  ;;  %v14995_v59 = vpop.f32.mrb[55].mxu1  ;;  %v5930_v14 = vld [vmem:[#allocation2 + $0x32c] sm:$0xff] }
 0x9c8   : > { %7466 = vst.msk [vmem:[#allocation3 + $0x88] sm:$0xff] %vm974_vm2, %v7388_v41  ;;  %8158 = vrot.lane.b32.xlu1 %v8076_v17, %s11080_s23 }
 0x9c9   : > { %7967 = vrot.lane.b32.xlu0 %v7884_v34, %s11079_s22  ;;  %v7501_v34 = vld [vmem:[#allocation2 + $0x240] sm:$0xff] }
 0x9ca   : > { %v8343_v31 = vpop.permute.xlu1 %8342 }
 0x9cb   : > { %8424 = vst.msk [vmem:[#allocation3 + $0x70] sm:$0xff] %vm1940_vm8, %v8343_v31  ;;  %v8153_v10 = vpop.permute.xlu0 %8152  ;;  %v7310_v31 = vld [vmem:[#allocation2 + $0x158] sm:$0xff] }
 0x9cc   : > { %8233 = vst.msk [vmem:[#allocation3 + $0x78] sm:$0xff] %vm1747_vm6, %v8153_v10  ;;  %5446 = vrot.lane.b32.xlu1 %v14665_v51, %s11077_s20 }
 0x9cd   : > { %5256 = vrot.lane.b32.xlu0 %v5163_v11, %s11076_s19 }
 0x9ce   : > { %v5631_v52 = vpop.permute.xlu1 %5630 }
 0x9cf   : > { %5702 = vst.msk [vmem:[#allocation3 + $0xc0] sm:$0xff] %vm1360_vm4, %v5631_v52  ;;  %v5441_v17 = vpop.permute.xlu0 %5440 }
 0x9d0   : > { %5511 = vst.msk [vmem:[#allocation3 + $0xc8] sm:$0xff] %vm1167_vm3, %v5441_v17  ;;  %6211 = vrot.lane.b32.xlu1 %v6121_v50, %s11081_s29 }
 0x9d1   : > { %6021 = vrot.lane.b32.xlu0 %v5930_v14, %s11080_s23 }
 0x9d2   : > { %v6396_v41 = vpop.permute.xlu1 %6395 }
 0x9d3   : > { %6469 = vst.msk [vmem:[#allocation3 + $0xb0] sm:$0xff] %vm2133_vm9, %v6396_v41  ;;  %v6206_v51 = vpop.permute.xlu0 %6205 }
 0x9d4   : > { %6278 = vst.msk [vmem:[#allocation3 + $0xb8] sm:$0xff] %vm1940_vm8, %v6206_v51  ;;  %7585 = vrot.lane.b32.xlu1 %v7501_v34, %s11077_s20  ;;  %v4908_v51 = vld [vmem:[#allocation2 + $0x264] sm:$0xff] }
 0x9d5   : > { %7395 = vrot.lane.b32.xlu0 %v7310_v31, %s11076_s19  ;;  %v6122_v31 = vld [vmem:[#allocation2 + $0x330] sm:$0xff]  ;;  %4940 = vst.msk [vmem:[#allocation3 + $0xf0] sm:$0xff] %vm298_vm0, %v4908_v51  ;;  %v7119_v51 = vld [vmem:[#allocation2 + $0x168] sm:$0xff] }
 0x9d6   : > { %v7770_v11 = vpop.permute.xlu1 %7769 }
 0x9d7   : > { %7849 = vst.msk [vmem:[#allocation3 + $0x80] sm:$0xff] %vm1360_vm4, %v7770_v11  ;;  %v7580_v10 = vpop.permute.xlu0 %7579 }
 0x9d8   : > { %7658 = vst.msk [vmem:[#allocation3 + $0x88] sm:$0xff] %vm1167_vm3, %v7580_v10  ;;  %8350 = vrot.lane.b32.xlu1 %v6121_v50, %s11081_s29 }
 0x9d9   : > { %8160 = vrot.lane.b32.xlu0 %v6121_v50, %s11080_s23 }
 0x9da   : > { %v8535_v52 = vpop.permute.xlu1 %8534  ;;  %v6501_v17 = vld [vmem:[#allocation3 + $0xb0] sm:$0xff] }
 0x9db   : > { %8616 = vst.msk [vmem:[#allocation3 + $0x70] sm:$0xff] %vm2133_vm9, %v8535_v52  ;;  %v8345_v41 = vpop.permute.xlu0 %8344  ;;  %10721 = vmatprep.mubr.msk.f32.mxu0 %vm2203_vm10, %v6501_v17  ;;  %v7055_v52 = vld [vmem:[#allocation2 + $0x160] sm:$0xff] }
 0x9dc   : > { %8425 = vst.msk [vmem:[#allocation3 + $0x78] sm:$0xff] %vm1940_vm8, %v8345_v41  ;;  %5638 = vrot.lane.b32.xlu1 %v14695_v25, %s11078_s21 }
 0x9dd   : > { %5448 = vrot.lane.b32.xlu0 %v14697_v57, %s11077_s20  ;;  %7087 = vst.msk [vmem:[#allocation3 + $0xb0] sm:$0xff] %vm298_vm0, %v7055_v52 }
 0x9de   : > { %v5633_v34 = vpop.permute.xlu1 %5632 }
 0x9df   : > { %5703 = vst.msk [vmem:[#allocation3 + $0xc8] sm:$0xff] %vm1360_vm4, %v5633_v34  ;;  %v5059_v50 = vpop.permute.xlu0 %5058  ;;  %v15041_v34 = vld [vmem:[#allocation2 + $0x268] sm:$0xff] }
 0x9e0   : > { %5128 = vst.msk [vmem:[#allocation3 + $0xd0] sm:$0xff] %vm781_vm1, %v5059_v50  ;;  %6403 = vrot.lane.b32.xlu1 %v5930_v14, %s11082_s15 }
 0x9e1   : > { %6213 = vrot.lane.b32.xlu0 %v6122_v31, %s11081_s29 }
 0x9e2   : > { %v6398_v11 = vpop.permute.xlu1 %6397  ;;  %v8648_v10 = vld [vmem:[#allocation3 + $0x70] sm:$0xff] }
 0x9e3   : > { %6470 = vst.msk [vmem:[#allocation3 + $0xb8] sm:$0xff] %vm2133_vm9, %v6398_v11  ;;  %v5823_v25 = vpop.permute.xlu0 %5822  ;;  %10767 = vmatprep.mubr.msk.f32.mxu1 %vm2203_vm10, %v8648_v10  ;;  %v5738_v11 = vld [vmem:[#allocation2 + $0x2cc] sm:$0xff] }
 0x9e4   : > { %5894 = vst.msk [vmem:[#allocation3 + $0xc0] sm:$0xff] %vm1553_vm5, %v5823_v25  ;;  %7777 = vrot.lane.b32.xlu1 %v14947_v54, %s11078_s21  ;;  %v4909_v10 = vld [vmem:[#allocation2 + $0x26c] sm:$0xff] }
 0x9e5   : > { %7587 = vrot.lane.b32.xlu0 %v14947_v54, %s11077_s20  ;;  %4941 = vst.msk [vmem:[#allocation3 + $0xf8] sm:$0xff] %vm298_vm0, %v4909_v10 }
 0x9e6   : > { %v7772_v57 = vpop.permute.xlu1 %7771 }
 0x9e7   : > { %7850 = vst.msk [vmem:[#allocation3 + $0x88] sm:$0xff] %vm1360_vm4, %v7772_v57  ;;  %v7198_v14 = vpop.permute.xlu0 %7197 }
 0x9e8   : > { %7275 = vst.msk [vmem:[#allocation3 + $0x90] sm:$0xff] %vm781_vm1, %v7198_v14  ;;  %8542 = vrot.lane.b32.xlu1 %v6122_v31, %s11082_s15  ;;  %v8461_v14 = vld [vmem:[#allocation2 + $0x338] sm:$0xff] }
 0x9e9   : > { %8352 = vrot.lane.b32.xlu0 %v6122_v31, %s11081_s29  ;;  %v6314_v31 = vld [vmem:[#allocation2 + $0x334] sm:$0xff] }
 0x9ea   : > { %v8537_v17 = vpop.permute.xlu1 %8536  ;;  %v6502_v41 = vld [vmem:[#allocation3 + $0xb8] sm:$0xff] }
 0x9eb   : > { %8617 = vst.msk [vmem:[#allocation3 + $0x78] sm:$0xff] %vm2133_vm9, %v8537_v17  ;;  %v7962_v54 = vpop.permute.xlu0 %7961  ;;  %10722 = vmatmul.mubr.msk.f32.gmra.mrb[38].mxu0 %vm2203_vm10, %v6502_v41 }
 0x9ec   : > { %7088 = vst.msk [vmem:[#allocation3 + $0xb8] sm:$0xff] %vm298_vm0, %v7119_v51  ;;  %5640 = vrot.lane.b32.xlu1 %v14722_v53, %s11078_s21 }
 0x9ed   : > { %8041 = vst.msk [vmem:[#allocation3 + $0x80] sm:$0xff] %vm1553_vm5, %v7962_v54  ;;  %5066 = vrot.lane.b32.xlu0 %v15041_v34, %s11075_s18 }
 0x9ee   : > { %v5251_v50 = vpop.permute.xlu1 %5250 }
 0x9ef   : > { %5320 = vst.msk [vmem:[#allocation3 + $0xd0] sm:$0xff] %vm974_vm2, %v5251_v50  ;;  %v5061_v25 = vpop.permute.xlu0 %5060 }
 0x9f0   : > { %5129 = vst.msk [vmem:[#allocation3 + $0xd8] sm:$0xff] %vm781_vm1, %v5061_v25  ;;  %6405 = vrot.lane.b32.xlu1 %v6314_v31, %s11082_s15  ;;  %v15067_v31 = vld [vmem:[#allocation2 + $0x270] sm:$0xff] }
 0x9f1   : > { %5830 = vrot.lane.b32.xlu0 %v5738_v11, %s11079_s22 }
 0x9f2   : > { %v6016_v57 = vpop.permute.xlu1 %6015  ;;  %v8649_v53 = vld [vmem:[#allocation3 + $0x78] sm:$0xff] }
 0x9f3   : > { %6087 = vst.msk [vmem:[#allocation3 + $0xc0] sm:$0xff] %vm1747_vm6, %v6016_v57  ;;  %v5825_v52 = vpop.permute.xlu0 %5824  ;;  %10768 = vmatmul.mubr.msk.f32.gmra.mrb[62].mxu1 %vm2203_vm10, %v8649_v53 }
 0x9f4   : > { %5895 = vst.msk [vmem:[#allocation3 + $0xc8] sm:$0xff] %vm1553_vm5, %v5825_v52  ;;  %7779 = vrot.lane.b32.xlu1 %v14971_v20, %s11078_s21  ;;  %v8078_v52 = vld [vmem:[#allocation2 + $0x340] sm:$0xff] }
 0x9f5   : > { %7205 = vrot.lane.b32.xlu0 %v7119_v51, %s11075_s18  ;;  %v5931_v51 = vld [vmem:[#allocation2 + $0x344] sm:$0xff] }
 0x9f6   : > { %v7390_v17 = vpop.permute.xlu1 %7389 }
 0x9f7   : > { %7467 = vst.msk [vmem:[#allocation3 + $0x90] sm:$0xff] %vm974_vm2, %v7390_v17  ;;  %v7200_v41 = vpop.permute.xlu0 %7199 }
 0x9f8   : > { %7276 = vst.msk [vmem:[#allocation3 + $0x98] sm:$0xff] %vm781_vm1, %v7200_v41  ;;  %8544 = vrot.lane.b32.xlu1 %v8461_v14, %s11082_s15  ;;  %v7886_v41 = vld [vmem:[#allocation2 + $0x258] sm:$0xff] }
 0x9f9   : > { %7969 = vrot.lane.b32.xlu0 %v14971_v20, %s11079_s22 }
 0x9fa   : > { %v8155_v54 = vpop.permute.xlu1 %8154 }
 0x9fb   : > { %8234 = vst.msk [vmem:[#allocation3 + $0x80] sm:$0xff] %vm1747_vm6, %v8155_v54  ;;  %v7964_v50 = vpop.permute.xlu0 %7963 }
 0x9fc   : > { %8042 = vst.msk [vmem:[#allocation3 + $0x88] sm:$0xff] %vm1553_vm5, %v7964_v50  ;;  %5258 = vrot.lane.b32.xlu1 %v14755_v58, %s11076_s19  ;;  %v7311_v58 = vld [vmem:[#allocation2 + $0x170] sm:$0xff] }
 0x9fd   : > { %5068 = vrot.lane.b32.xlu0 %v15067_v31, %s11075_s18 }
 0x9fe   : > { %v5443_v11 = vpop.permute.xlu1 %5442  ;;  %v15075_v10 = vpop.f32.mrb[32].mxu0 }
 0x9ff   : > { %5512 = vst.msk [vmem:[#allocation3 + $0xd0] sm:$0xff] %vm1167_vm3, %v5443_v11  ;;  %v5253_v20 = vpop.permute.xlu0 %5252  ;;  %v15078_v25 = vpop.f32.mrb[33].mxu0 }
 0xa00   : > { %5321 = vst.msk [vmem:[#allocation3 + $0xd8] sm:$0xff] %vm974_vm2, %v5253_v20  ;;  %6023 = vrot.lane.b32.xlu1 %v5931_v51, %s11080_s23  ;;  %v5165_v51 = vld [vmem:[#allocation2 + $0x274] sm:$0xff]  ;;  %v6123_v20 = vld [vmem:[#allocation2 + $0x348] sm:$0xff] }
 0xa01   : > { %5832 = vrot.lane.b32.xlu0 %v14753_v7, %s11079_s22 }
 0xa02   : > { %v6208_v57 = vpop.permute.xlu1 %6207 }
 0xa03   : > { %6279 = vst.msk [vmem:[#allocation3 + $0xc0] sm:$0xff] %vm1940_vm8, %v6208_v57  ;;  %v6018_v53 = vpop.permute.xlu0 %6017  ;;  %v5932_v57 = vld [vmem:[#allocation2 + $0x34c] sm:$0xff] }
 0xa04   : > { %6088 = vst.msk [vmem:[#allocation3 + $0xc8] sm:$0xff] %vm1747_vm6, %v6018_v53  ;;  %7397 = vrot.lane.b32.xlu1 %v7311_v58, %s11076_s19 }
 0xa05   : > { %7207 = vrot.lane.b32.xlu0 %v7311_v58, %s11075_s18 }
 0xa06   : > { %v7582_v14 = vpop.permute.xlu1 %7581  ;;  %v15088_v17 = vpop.f32.mrb[56].mxu1 }
 0xa07   : > { %7659 = vst.msk [vmem:[#allocation3 + $0x90] sm:$0xff] %vm1167_vm3, %v7582_v14  ;;  %v7392_v54 = vpop.permute.xlu0 %7391  ;;  %v15091_v7 = vpop.f32.mrb[57].mxu1 }
 0xa08   : > { %7468 = vst.msk [vmem:[#allocation3 + $0x98] sm:$0xff] %vm974_vm2, %v7392_v54  ;;  %8162 = vrot.lane.b32.xlu1 %v8078_v52, %s11080_s23  ;;  %v7503_v52 = vld [vmem:[#allocation2 + $0x260] sm:$0xff] }
 0xa09   : > { %7971 = vrot.lane.b32.xlu0 %v7886_v41, %s11079_s22  ;;  %v7312_v41 = vld [vmem:[#allocation2 + $0x178] sm:$0xff] }
 0xa0a   : > { %v8347_v50 = vpop.permute.xlu1 %8346 }
 0xa0b   : > { %8426 = vst.msk [vmem:[#allocation3 + $0x80] sm:$0xff] %vm1940_vm8, %v8347_v50  ;;  %v8157_v11 = vpop.permute.xlu0 %8156 }
 0xa0c   : > { %8235 = vst.msk [vmem:[#allocation3 + $0x88] sm:$0xff] %vm1747_vm6, %v8157_v11  ;;  %5450 = vrot.lane.b32.xlu1 %v14778_v24, %s11077_s20 }
 0xa0d   : > { %5260 = vrot.lane.b32.xlu0 %v5165_v51, %s11076_s19 }
 0xa0e   : > { %v5635_v58 = vpop.permute.xlu1 %5634 }
 0xa0f   : > { %5704 = vst.msk [vmem:[#allocation3 + $0xd0] sm:$0xff] %vm1360_vm4, %v5635_v58  ;;  %v5445_v53 = vpop.permute.xlu0 %5444 }
 0xa10   : > { %5513 = vst.msk [vmem:[#allocation3 + $0xd8] sm:$0xff] %vm1167_vm3, %v5445_v53  ;;  %6215 = vrot.lane.b32.xlu1 %v6123_v20, %s11081_s29 }
 0xa11   : > { %6025 = vrot.lane.b32.xlu0 %v5932_v57, %s11080_s23 }
 0xa12   : > { %v6400_v14 = vpop.permute.xlu1 %6399 }
 0xa13   : > { %6471 = vst.msk [vmem:[#allocation3 + $0xc0] sm:$0xff] %vm2133_vm9, %v6400_v14  ;;  %v6210_v24 = vpop.permute.xlu0 %6209  ;;  %v7057_v14 = vld [vmem:[#allocation2 + $0x180] sm:$0xff] }
 0xa14   : > { %6280 = vst.msk [vmem:[#allocation3 + $0xc8] sm:$0xff] %vm1940_vm8, %v6210_v24  ;;  %7589 = vrot.lane.b32.xlu1 %v7503_v52, %s11077_s20  ;;  %v6124_v52 = vld [vmem:[#allocation2 + $0x350] sm:$0xff] }
 0xa15   : > { %7399 = vrot.lane.b32.xlu0 %v7312_v41, %s11076_s19 }
 0xa16   : > { %v7774_v54 = vpop.permute.xlu1 %7773 }
 0xa17   : > { %7851 = vst.msk [vmem:[#allocation3 + $0x90] sm:$0xff] %vm1360_vm4, %v7774_v54  ;;  %v7584_v50 = vpop.permute.xlu0 %7583  ;;  %v5740_v54 = vld [vmem:[#allocation2 + $0x2ec] sm:$0xff] }
 0xa18   : > { %7660 = vst.msk [vmem:[#allocation3 + $0x98] sm:$0xff] %vm1167_vm3, %v7584_v50  ;;  %8354 = vrot.lane.b32.xlu1 %v6123_v20, %s11081_s29 }
 0xa19   : > { %8164 = vrot.lane.b32.xlu0 %v6123_v20, %s11080_s23 }
 0xa1a   : > { %v8539_v51 = vpop.permute.xlu1 %8538  ;;  %v6503_v11 = vld [vmem:[#allocation3 + $0xc0] sm:$0xff] }
 0xa1b   : > { %8618 = vst.msk [vmem:[#allocation3 + $0x80] sm:$0xff] %vm2133_vm9, %v8539_v51  ;;  %v8349_v58 = vpop.permute.xlu0 %8348  ;;  %10724 = vmatprep.mubr.msk.f32.mxu0 %vm2203_vm10, %v6503_v11  ;;  %v7121_v11 = vld [vmem:[#allocation2 + $0x188] sm:$0xff] }
 0xa1c   : > { %8427 = vst.msk [vmem:[#allocation3 + $0x88] sm:$0xff] %vm1940_vm8, %v8349_v58  ;;  %5642 = vrot.lane.b32.xlu1 %v14808_v2, %s11078_s21 }
 0xa1d   : > { %5452 = vrot.lane.b32.xlu0 %v14810_v33, %s11077_s20  ;;  %7089 = vst.msk [vmem:[#allocation3 + $0xc0] sm:$0xff] %vm298_vm0, %v7057_v14 }
 0xa1e   : > { %v5637_v53 = vpop.permute.xlu1 %5636 }
 0xa1f   : > { %5705 = vst.msk [vmem:[#allocation3 + $0xd8] sm:$0xff] %vm1360_vm4, %v5637_v53  ;;  %v5063_v20 = vpop.permute.xlu0 %5062  ;;  %v6316_v53 = vld [vmem:[#allocation2 + $0x354] sm:$0xff] }
 0xa20   : > { %5130 = vst.msk [vmem:[#allocation3 + $0xe0] sm:$0xff] %vm781_vm1, %v5063_v20  ;;  %6407 = vrot.lane.b32.xlu1 %v5932_v57, %s11082_s15 }
 0xa21   : > { %6217 = vrot.lane.b32.xlu0 %v6124_v52, %s11081_s29 }
 0xa22   : > { %v6402_v41 = vpop.permute.xlu1 %6401  ;;  %v8650_v24 = vld [vmem:[#allocation3 + $0x80] sm:$0xff] }
 0xa23   : > { %6472 = vst.msk [vmem:[#allocation3 + $0xc8] sm:$0xff] %vm2133_vm9, %v6402_v41  ;;  %v5827_v2 = vpop.permute.xlu0 %5826  ;;  %10770 = vmatprep.mubr.msk.f32.mxu1 %vm2203_vm10, %v8650_v24  ;;  %v8463_v24 = vld [vmem:[#allocation2 + $0x358] sm:$0xff] }
 0xa24   : > { %5896 = vst.msk [vmem:[#allocation3 + $0xd0] sm:$0xff] %vm1553_vm5, %v5827_v2  ;;  %7781 = vrot.lane.b32.xlu1 %v15041_v34, %s11078_s21 }
 0xa25   : > { %7591 = vrot.lane.b32.xlu0 %v15041_v34, %s11077_s20 }
 0xa26   : > { %v7776_v33 = vpop.permute.xlu1 %7775 }
 0xa27   : > { %7852 = vst.msk [vmem:[#allocation3 + $0x98] sm:$0xff] %vm1360_vm4, %v7776_v33  ;;  %v7202_v57 = vpop.permute.xlu0 %7201  ;;  %v7122_v33 = vld [vmem:[#allocation2 + $0x190] sm:$0xff] }
 0xa28   : > { %7277 = vst.msk [vmem:[#allocation3 + $0xa0] sm:$0xff] %vm781_vm1, %v7202_v57  ;;  %8546 = vrot.lane.b32.xlu1 %v6124_v52, %s11082_s15 }
 0xa29   : > { %8356 = vrot.lane.b32.xlu0 %v6124_v52, %s11081_s29 }
 0xa2a   : > { %v8541_v50 = vpop.permute.xlu1 %8540  ;;  %v6504_v51 = vld [vmem:[#allocation3 + $0xc8] sm:$0xff] }
 0xa2b   : > { %8619 = vst.msk [vmem:[#allocation3 + $0x88] sm:$0xff] %vm2133_vm9, %v8541_v50  ;;  %v7966_v58 = vpop.permute.xlu0 %7965  ;;  %10725 = vmatmul.mubr.msk.f32.gmra.mrb[40].mxu0 %vm2203_vm10, %v6504_v51 }
 0xa2c   : > { %7090 = vst.msk [vmem:[#allocation3 + $0xc8] sm:$0xff] %vm298_vm0, %v7121_v11  ;;  %5834 = vrot.lane.b32.xlu1 %v5740_v54, %s11079_s22  ;;  %v5933_v54 = vld [vmem:[#allocation2 + $0x364] sm:$0xff] }
 0xa2d   : > { %8043 = vst.msk [vmem:[#allocation3 + $0x90] sm:$0xff] %vm1553_vm5, %v7966_v58  ;;  %5644 = vrot.lane.b32.xlu0 %v14835_v3, %s11078_s21 }
 0xa2e   : > { %v5255_v34 = vpop.permute.xlu1 %5254 }
 0xa2f   : > { %5322 = vst.msk [vmem:[#allocation3 + $0xe0] sm:$0xff] %vm974_vm2, %v5255_v34  ;;  %v5065_v52 = vpop.permute.xlu0 %5064  ;;  %v5934_v34 = vld [vmem:[#allocation2 + $0x36c] sm:$0xff] }
 0xa30   : > { %5131 = vst.msk [vmem:[#allocation3 + $0xe8] sm:$0xff] %vm781_vm1, %v5065_v52  ;;  %7209 = vrot.lane.b32.xlu1 %v7121_v11, %s11075_s18  ;;  %v8080_v52 = vld [vmem:[#allocation2 + $0x360] sm:$0xff] }
 0xa31   : > { %6409 = vrot.lane.b32.xlu0 %v6316_v53, %s11082_s15 }
 0xa32   : > { %v6020_v20 = vpop.permute.xlu1 %6019  ;;  %v8651_v14 = vld [vmem:[#allocation3 + $0x88] sm:$0xff] }
 0xa33   : > { %6089 = vst.msk [vmem:[#allocation3 + $0xd0] sm:$0xff] %vm1747_vm6, %v6020_v20  ;;  %v5829_v41 = vpop.permute.xlu0 %5828  ;;  %10771 = vmatmul.mubr.msk.f32.gmra.mrb[64].mxu1 %vm2203_vm10, %v8651_v14  ;;  %v7314_v14 = vld [vmem:[#allocation2 + $0x198] sm:$0xff] }
 0xa34   : > { %5897 = vst.msk [vmem:[#allocation3 + $0xd8] sm:$0xff] %vm1553_vm5, %v5829_v41  ;;  %7973 = vrot.lane.b32.xlu1 %v15067_v31, %s11079_s22 }
 0xa35   : > { %7783 = vrot.lane.b32.xlu0 %v15067_v31, %s11078_s21  ;;  %v7888_v31 = vld [vmem:[#allocation2 + $0x278] sm:$0xff] }
 0xa36   : > { %v7394_v3 = vpop.permute.xlu1 %7393 }
 0xa37   : > { %7469 = vst.msk [vmem:[#allocation3 + $0xa0] sm:$0xff] %vm974_vm2, %v7394_v3  ;;  %v7204_v2 = vpop.permute.xlu0 %7203 }
 0xa38   : > { %7278 = vst.msk [vmem:[#allocation3 + $0xa8] sm:$0xff] %vm781_vm1, %v7204_v2  ;;  %5836 = vrot.lane.b32.xlu1 %v14864_v28, %s11079_s22 }
 0xa39   : > { %8548 = vrot.lane.b32.xlu0 %v8463_v24, %s11082_s15  ;;  %v6125_v24 = vld [vmem:[#allocation2 + $0x368] sm:$0xff] }
 0xa3a   : > { %v8159_v57 = vpop.permute.xlu1 %8158 }
 0xa3b   : > { %8236 = vst.msk [vmem:[#allocation3 + $0x90] sm:$0xff] %vm1747_vm6, %v8159_v57  ;;  %v7968_v50 = vpop.permute.xlu0 %7967 }
 0xa3c   : > { %8044 = vst.msk [vmem:[#allocation3 + $0x98] sm:$0xff] %vm1553_vm5, %v7968_v50  ;;  %7211 = vrot.lane.b32.xlu1 %v7122_v33, %s11075_s18 }
 0xa3d   : > { %6027 = vrot.lane.b32.xlu0 %v5933_v54, %s11080_s23  ;;  %v7505_v54 = vld [vmem:[#allocation2 + $0x280] sm:$0xff] }
 0xa3e   : > { %v5447_v51 = vpop.permute.xlu1 %5446  ;;  %v15163_v11 = vpop.f32.mrb[34].mxu0 }
 0xa3f   : > { %5514 = vst.msk [vmem:[#allocation3 + $0xe0] sm:$0xff] %vm1167_vm3, %v5447_v51  ;;  %v5257_v28 = vpop.permute.xlu0 %5256  ;;  %v15166_v58 = vpop.f32.mrb[35].mxu0 }
 0xa40   : > { %5323 = vst.msk [vmem:[#allocation3 + $0xe8] sm:$0xff] %vm974_vm2, %v5257_v28  ;;  %7975 = vrot.lane.b32.xlu1 %v7888_v31, %s11079_s22  ;;  %v6126_v31 = vld [vmem:[#allocation2 + $0x370] sm:$0xff] }
 0xa41   : > { %7401 = vrot.lane.b32.xlu0 %v7122_v33, %s11076_s19 }
 0xa42   : > { %v6212_v53 = vpop.permute.xlu1 %6211 }
 0xa43   : > { %6281 = vst.msk [vmem:[#allocation3 + $0xd0] sm:$0xff] %vm1940_vm8, %v6212_v53  ;;  %v6022_v20 = vpop.permute.xlu0 %6021  ;;  %v7506_v53 = vld [vmem:[#allocation2 + $0x288] sm:$0xff] }
 0xa44   : > { %6090 = vst.msk [vmem:[#allocation3 + $0xd8] sm:$0xff] %vm1747_vm6, %v6022_v20  ;;  %6029 = vrot.lane.b32.xlu1 %v5934_v34, %s11080_s23 }
 0xa45   : > { %8166 = vrot.lane.b32.xlu0 %v8080_v52, %s11080_s23 }
 0xa46   : > { %v7586_v41 = vpop.permute.xlu1 %7585  ;;  %v15175_v3 = vpop.f32.mrb[58].mxu1 }
 0xa47   : > { %7661 = vst.msk [vmem:[#allocation3 + $0xa0] sm:$0xff] %vm1167_vm3, %v7586_v41  ;;  %v7396_v2 = vpop.permute.xlu0 %7395  ;;  %v15178_v33 = vpop.f32.mrb[59].mxu1 }
 0xa48   : > { %7470 = vst.msk [vmem:[#allocation3 + $0xa8] sm:$0xff] %vm974_vm2, %v7396_v2  ;;  %7403 = vrot.lane.b32.xlu1 %v7314_v14, %s11076_s19  ;;  %v6318_v2 = vld [vmem:[#allocation2 + $0x374] sm:$0xff] }
 0xa49   : > { %6219 = vrot.lane.b32.xlu0 %v6125_v24, %s11081_s29 }
 0xa4a   : > { %v8351_v57 = vpop.permute.xlu1 %8350 }
 0xa4b   : > { %8428 = vst.msk [vmem:[#allocation3 + $0x90] sm:$0xff] %vm1940_vm8, %v8351_v57  ;;  %v8161_v50 = vpop.permute.xlu0 %8160 }
 0xa4c   : > { %8237 = vst.msk [vmem:[#allocation3 + $0x98] sm:$0xff] %vm1747_vm6, %v8161_v50  ;;  %8168 = vrot.lane.b32.xlu1 %v6125_v24, %s11080_s23 }
 0xa4d   : > { %7593 = vrot.lane.b32.xlu0 %v7505_v54, %s11077_s20 }
 0xa4e   : > { %v5639_v51 = vpop.permute.xlu1 %5638 }
 0xa4f   : > { %5706 = vst.msk [vmem:[#allocation3 + $0xe0] sm:$0xff] %vm1360_vm4, %v5639_v51  ;;  %v5449_v28 = vpop.permute.xlu0 %5448 }
 0xa50   : > { %5515 = vst.msk [vmem:[#allocation3 + $0xe8] sm:$0xff] %vm1167_vm3, %v5449_v28  ;;  %6221 = vrot.lane.b32.xlu1 %v6126_v31, %s11081_s29  ;;  %v7123_v28 = vld [vmem:[#allocation2 + $0x1a8] sm:$0xff] }
 0xa51   : > { %8358 = vrot.lane.b32.xlu0 %v6125_v24, %s11081_s29  ;;  %v7059_v24 = vld [vmem:[#allocation2 + $0x1a0] sm:$0xff] }
 0xa52   : > { %v6404_v52 = vpop.permute.xlu1 %6403 }
 0xa53   : > { %6473 = vst.msk [vmem:[#allocation3 + $0xd0] sm:$0xff] %vm2133_vm9, %v6404_v52  ;;  %v6214_v20 = vpop.permute.xlu0 %6213  ;;  %v8465_v52 = vld [vmem:[#allocation2 + $0x378] sm:$0xff] }
 0xa54   : > { %6282 = vst.msk [vmem:[#allocation3 + $0xd8] sm:$0xff] %vm1940_vm8, %v6214_v20  ;;  %7595 = vrot.lane.b32.xlu1 %v7506_v53, %s11077_s20 }
 0xa55   : > { %6411 = vrot.lane.b32.xlu0 %v5934_v34, %s11082_s15  ;;  %v7698_v34 = vld [vmem:[#allocation2 + $0x290] sm:$0xff] }
 0xa56   : > { %v7778_v14 = vpop.permute.xlu1 %7777 }
 0xa57   : > { %7853 = vst.msk [vmem:[#allocation3 + $0xa0] sm:$0xff] %vm1360_vm4, %v7778_v14  ;;  %v7588_v41 = vpop.permute.xlu0 %7587 }
 0xa58   : > { %7662 = vst.msk [vmem:[#allocation3 + $0xa8] sm:$0xff] %vm1167_vm3, %v7588_v41  ;;  %8360 = vrot.lane.b32.xlu1 %v6126_v31, %s11081_s29 }
 0xa59   : > { %7785 = vrot.lane.b32.xlu0 %v7506_v53, %s11078_s21 }
 0xa5a   : > { %v8543_v57 = vpop.permute.xlu1 %8542  ;;  %v6505_v54 = vld [vmem:[#allocation3 + $0xd0] sm:$0xff] }
 0xa5b   : > { %8620 = vst.msk [vmem:[#allocation3 + $0x90] sm:$0xff] %vm2133_vm9, %v8543_v57  ;;  %v8353_v50 = vpop.permute.xlu0 %8352  ;;  %10727 = vmatprep.mubr.msk.f32.mxu0 %vm2203_vm10, %v6505_v54  ;;  %v8082_v57 = vld [vmem:[#allocation2 + $0x380] sm:$0xff] }
 0xa5c   : > { %7091 = vst.msk [vmem:[#allocation3 + $0xd0] sm:$0xff] %vm298_vm0, %v7059_v24  ;;  %6413 = vrot.lane.b32.xlu1 %v6318_v2, %s11082_s15 }
 0xa5d   : > { %8429 = vst.msk [vmem:[#allocation3 + $0x98] sm:$0xff] %vm1940_vm8, %v8353_v50  ;;  %8550 = vrot.lane.b32.xlu0 %v6126_v31, %s11082_s15  ;;  %v7315_v31 = vld [vmem:[#allocation2 + $0x1b0] sm:$0xff] }
 0xa5e   : > { %v5641_v51 = vpop.permute.xlu1 %5640 }
 0xa5f   : > { %5707 = vst.msk [vmem:[#allocation3 + $0xe8] sm:$0xff] %vm1360_vm4, %v5641_v51  ;;  %v5067_v53 = vpop.permute.xlu0 %5066  ;;  %v7890_v51 = vld [vmem:[#allocation2 + $0x298] sm:$0xff] }
 0xa60   : > { %5132 = vst.msk [vmem:[#allocation3 + $0xf0] sm:$0xff] %vm781_vm1, %v5067_v53  ;;  %7787 = vrot.lane.b32.xlu1 %v7698_v34, %s11078_s21 }
 0xa61   : > { %7213 = vrot.lane.b32.xlu0 %v7123_v28, %s11075_s18 }
 0xa62   : > { %v6406_v20 = vpop.permute.xlu1 %6405  ;;  %v8652_v14 = vld [vmem:[#allocation3 + $0x90] sm:$0xff] }
 0xa63   : > { %6474 = vst.msk [vmem:[#allocation3 + $0xd8] sm:$0xff] %vm2133_vm9, %v6406_v20  ;;  %v5831_v41 = vpop.permute.xlu0 %5830  ;;  %10773 = vmatprep.mubr.msk.f32.mxu1 %vm2203_vm10, %v8652_v14  ;;  %v7316_v20 = vld [vmem:[#allocation2 + $0x1b8] sm:$0xff] }
 0xa64   : > { %5898 = vst.msk [vmem:[#allocation3 + $0xe0] sm:$0xff] %vm1553_vm5, %v5831_v41  ;;  %8552 = vrot.lane.b32.xlu1 %v8465_v52, %s11082_s15  ;;  %v8274_v41 = vld [vmem:[#allocation2 + $0x388] sm:$0xff] }
 0xa65   : > { %7977 = vrot.lane.b32.xlu0 %v7698_v34, %s11079_s22  ;;  %v7507_v34 = vld [vmem:[#allocation2 + $0x2a0] sm:$0xff] }
 0xa66   : > { %v7780_v24 = vpop.permute.xlu1 %7779 }
 0xa67   : > { %7854 = vst.msk [vmem:[#allocation3 + $0xa8] sm:$0xff] %vm1360_vm4, %v7780_v24  ;;  %v7206_v2 = vpop.permute.xlu0 %7205 }
 0xa68   : > { %7279 = vst.msk [vmem:[#allocation3 + $0xb0] sm:$0xff] %vm781_vm1, %v7206_v2  ;;  %7405 = vrot.lane.b32.xlu1 %v7315_v31, %s11076_s19  ;;  %v7699_v2 = vld [vmem:[#allocation2 + $0x2a8] sm:$0xff] }
 0xa69   : > { %7215 = vrot.lane.b32.xlu0 %v7315_v31, %s11075_s18 }
 0xa6a   : > { %v8545_v54 = vpop.permute.xlu1 %8544  ;;  %v6506_v50 = vld [vmem:[#allocation3 + $0xd8] sm:$0xff] }
 0xa6b   : > { %8621 = vst.msk [vmem:[#allocation3 + $0x98] sm:$0xff] %vm2133_vm9, %v8545_v54  ;;  %v7970_v53 = vpop.permute.xlu0 %7969  ;;  %10728 = vmatmul.mubr.msk.f32.gmra.mrb[42].mxu0 %vm2203_vm10, %v6506_v50  ;;  %v8466_v50 = vld [vmem:[#allocation2 + $0x390] sm:$0xff] }
 0xa6c   : > { %7092 = vst.msk [vmem:[#allocation3 + $0xd8] sm:$0xff] %vm298_vm0, %v7123_v28  ;;  %8170 = vrot.lane.b32.xlu1 %v8082_v57, %s11080_s23 }
 0xa6d   : > { %8045 = vst.msk [vmem:[#allocation3 + $0xa0] sm:$0xff] %vm1553_vm5, %v7970_v53  ;;  %7979 = vrot.lane.b32.xlu0 %v7890_v51, %s11079_s22 }
 0xa6e   : > { %v5259_v52 = vpop.permute.xlu1 %5258 }
 0xa6f   : > { %5324 = vst.msk [vmem:[#allocation3 + $0xf0] sm:$0xff] %vm974_vm2, %v5259_v52  ;;  %v5069_v14 = vpop.permute.xlu0 %5068 }
 0xa70   : > { %5133 = vst.msk [vmem:[#allocation3 + $0xf8] sm:$0xff] %vm781_vm1, %v5069_v14  ;;  %7597 = vrot.lane.b32.xlu1 %v7507_v34, %s11077_s20  ;;  %v7700_v34 = vld [vmem:[#allocation2 + $0x2b0] sm:$0xff]  ;;  %v15243_v14 = vld [vmem:[#allocation2 + $0x1c8] sm:$0xff] }
 0xa71   : > { %7407 = vrot.lane.b32.xlu0 %v7316_v20, %s11076_s19 }
 0xa72   : > { %v6024_v28 = vpop.permute.xlu1 %6023  ;;  %v8653_v31 = vld [vmem:[#allocation3 + $0x98] sm:$0xff] }
 0xa73   : > { %6091 = vst.msk [vmem:[#allocation3 + $0xe0] sm:$0xff] %vm1747_vm6, %v6024_v28  ;;  %10774 = vmatmul.mubr.msk.f32.gmra.mrb[66].mxu1 %vm2203_vm10, %v8653_v31  ;;  %v5833_v24 = vpop.permute.xlu0 %5832  ;;  %v8467_v31 = vld [vmem:[#allocation2 + $0x398] sm:$0xff] }
 0xa74   : > { %5899 = vst.msk [vmem:[#allocation3 + $0xe8] sm:$0xff] %vm1553_vm5, %v5833_v24  ;;  %8362 = vrot.lane.b32.xlu1 %v8274_v41, %s11081_s29 }
 0xa75   : > { %8172 = vrot.lane.b32.xlu0 %v8274_v41, %s11080_s23 }
 0xa76   : > { %v7398_v57 = vpop.permute.xlu1 %7397 }
 0xa77   : > { %7471 = vst.msk [vmem:[#allocation3 + $0xb0] sm:$0xff] %vm974_vm2, %v7398_v57  ;;  %v7208_v54 = vpop.permute.xlu0 %7207  ;;  %v7317_v57 = vld [vmem:[#allocation2 + $0x1d0] sm:$0xff] }
 0xa78   : > { %7280 = vst.msk [vmem:[#allocation3 + $0xb8] sm:$0xff] %vm781_vm1, %v7208_v54  ;;  %7789 = vrot.lane.b32.xlu1 %v7699_v2, %s11078_s21 }
 0xa79   : > { %7599 = vrot.lane.b32.xlu0 %v7699_v2, %s11077_s20 }
 0xa7a   : > { %v8163_v51 = vpop.permute.xlu1 %8162 }
 0xa7b   : > { %8238 = vst.msk [vmem:[#allocation3 + $0xa0] sm:$0xff] %vm1747_vm6, %v8163_v51  ;;  %v7972_v53 = vpop.permute.xlu0 %7971 }
 0xa7c   : > { %8046 = vst.msk [vmem:[#allocation3 + $0xa8] sm:$0xff] %vm1553_vm5, %v7972_v53  ;;  %8554 = vrot.lane.b32.xlu1 %v8466_v50, %s11082_s15 }
 0xa7d   : > { %8364 = vrot.lane.b32.xlu0 %v8466_v50, %s11081_s29 }
 0xa7e   : > { %v5451_v52 = vpop.permute.xlu1 %5450  ;;  %v15241_v20 = vpop.f32.mrb[36].mxu0 }
 0xa7f   : > { %5516 = vst.msk [vmem:[#allocation3 + $0xf0] sm:$0xff] %vm1167_vm3, %v5451_v52  ;;  %v5261_v41 = vpop.permute.xlu0 %5260  ;;  %v15246_v28 = vpop.f32.mrb[37].mxu0  ;;  %v8084_v52 = vld [vmem:[#allocation2 + $0x3a0] sm:$0xff] }
 0xa80   : > { %5325 = vst.msk [vmem:[#allocation3 + $0xf8] sm:$0xff] %vm974_vm2, %v5261_v41  ;;  %7791 = vrot.lane.b32.xlu1 %v7700_v34, %s11078_s21 }
 0xa81   : > { %7217 = vrot.lane.b32.xlu0 %v15243_v14, %s11075_s18 }
 0xa82   : > { %v6216_v24 = vpop.permute.xlu1 %6215 }
 0xa83   : > { %6283 = vst.msk [vmem:[#allocation3 + $0xe0] sm:$0xff] %vm1940_vm8, %v6216_v24  ;;  %v6026_v2 = vpop.permute.xlu0 %6025  ;;  %v7509_v24 = vld [vmem:[#allocation2 + $0x2c0] sm:$0xff] }
 0xa84   : > { %6092 = vst.msk [vmem:[#allocation3 + $0xe8] sm:$0xff] %vm1747_vm6, %v6026_v2  ;;  %8556 = vrot.lane.b32.xlu1 %v8467_v31, %s11082_s15  ;;  %v7892_v31 = vld [vmem:[#allocation2 + $0x2b8] sm:$0xff] }
 0xa85   : > { %7981 = vrot.lane.b32.xlu0 %v7700_v34, %s11079_s22 }
 0xa86   : > { %v7590_v54 = vpop.permute.xlu1 %7589  ;;  %v15256_v50 = vpop.f32.mrb[60].mxu1 }
 0xa87   : > { %7663 = vst.msk [vmem:[#allocation3 + $0xb0] sm:$0xff] %vm1167_vm3, %v7590_v54  ;;  %v7400_v51 = vpop.permute.xlu0 %7399  ;;  %v15259_v53 = vpop.f32.mrb[61].mxu1  ;;  %v7318_v54 = vld [vmem:[#allocation2 + $0x1d8] sm:$0xff] }
 0xa88   : > { %7472 = vst.msk [vmem:[#allocation3 + $0xb8] sm:$0xff] %vm974_vm2, %v7400_v51  ;;  %7409 = vrot.lane.b32.xlu1 %v7317_v57, %s11076_s19 }
 0xa89   : > { %7219 = vrot.lane.b32.xlu0 %v7317_v57, %s11075_s18  ;;  %v8276_v57 = vld [vmem:[#allocation2 + $0x3a8] sm:$0xff] }
 0xa8a   : > { %v8355_v41 = vpop.permute.xlu1 %8354 }
 0xa8b   : > { %8430 = vst.msk [vmem:[#allocation3 + $0xa0] sm:$0xff] %vm1940_vm8, %v8355_v41  ;;  %v8165_v34 = vpop.permute.xlu0 %8164 }
 0xa8c   : > { %8239 = vst.msk [vmem:[#allocation3 + $0xa8] sm:$0xff] %vm1747_vm6, %v8165_v34  ;;  %8174 = vrot.lane.b32.xlu1 %v8084_v52, %s11080_s23  ;;  %v7701_v52 = vld [vmem:[#allocation2 + $0x2c8] sm:$0xff] }
 0xa8d   : > { %7983 = vrot.lane.b32.xlu0 %v7892_v31, %s11079_s22 }
 0xa8e   : > { %v5643_v2 = vpop.permute.xlu1 %5642 }
 0xa8f   : > { %5708 = vst.msk [vmem:[#allocation3 + $0xf0] sm:$0xff] %vm1360_vm4, %v5643_v2  ;;  %v5453_v51 = vpop.permute.xlu0 %5452 }
 0xa90   : > { %5517 = vst.msk [vmem:[#allocation3 + $0xf8] sm:$0xff] %vm1167_vm3, %v5453_v51  ;;  %7601 = vrot.lane.b32.xlu1 %v7509_v24, %s11077_s20  ;;  %v7061_v24 = vld [vmem:[#allocation2 + $0x1c0] sm:$0xff] }
 0xa91   : > { %7411 = vrot.lane.b32.xlu0 %v7318_v54, %s11076_s19  ;;  %v8468_v54 = vld [vmem:[#allocation2 + $0x3b0] sm:$0xff] }
 0xa92   : > { %v6408_v41 = vpop.permute.xlu1 %6407 }
 0xa93   : > { %6475 = vst.msk [vmem:[#allocation3 + $0xe0] sm:$0xff] %vm2133_vm9, %v6408_v41  ;;  %v6218_v34 = vpop.permute.xlu0 %6217 }
 0xa94   : > { %6284 = vst.msk [vmem:[#allocation3 + $0xe8] sm:$0xff] %vm1940_vm8, %v6218_v34  ;;  %8366 = vrot.lane.b32.xlu1 %v8276_v57, %s11081_s29 }
 0xa95   : > { %8176 = vrot.lane.b32.xlu0 %v8276_v57, %s11080_s23  ;;  %v7702_v57 = vld [vmem:[#allocation2 + $0x2d0] sm:$0xff] }
 0xa96   : > { %v7782_v31 = vpop.permute.xlu1 %7781 }
 0xa97   : > { %7855 = vst.msk [vmem:[#allocation3 + $0xb0] sm:$0xff] %vm1360_vm4, %v7782_v31  ;;  %v7592_v2 = vpop.permute.xlu0 %7591 }
 0xa98   : > { %7664 = vst.msk [vmem:[#allocation3 + $0xb8] sm:$0xff] %vm1167_vm3, %v7592_v2  ;;  %7793 = vrot.lane.b32.xlu1 %v7701_v52, %s11078_s21  ;;  %v15286_v2 = vld [vmem:[#allocation2 + $0x1e8] sm:$0xff] }
 0xa99   : > { %7603 = vrot.lane.b32.xlu0 %v7701_v52, %s11077_s20 }
 0xa9a   : > { %v8547_v51 = vpop.permute.xlu1 %8546  ;;  %v6507_v41 = vld [vmem:[#allocation3 + $0xe0] sm:$0xff] }
 0xa9b   : > { %8622 = vst.msk [vmem:[#allocation3 + $0xa0] sm:$0xff] %vm2133_vm9, %v8547_v51  ;;  %v8357_v34 = vpop.permute.xlu0 %8356  ;;  %10730 = vmatprep.mubr.msk.f32.mxu0 %vm2203_vm10, %v6507_v41 }
 0xa9c   : > { %7093 = vst.msk [vmem:[#allocation3 + $0xe0] sm:$0xff] %vm298_vm0, %v7061_v24  ;;  %8558 = vrot.lane.b32.xlu1 %v8468_v54, %s11082_s15  ;;  %v8469_v24 = vld [vmem:[#allocation2 + $0x3b8] sm:$0xff] }
 0xa9d   : > { %8431 = vst.msk [vmem:[#allocation3 + $0xa8] sm:$0xff] %vm1940_vm8, %v8357_v34  ;;  %8368 = vrot.lane.b32.xlu0 %v8468_v54, %s11081_s29  ;;  %v7319_v34 = vld [vmem:[#allocation2 + $0x1f0] sm:$0xff] }
 0xa9e   : > { %v5835_v31 = vpop.permute.xlu1 %5834 }
 0xa9f   : > { %5900 = vst.msk [vmem:[#allocation3 + $0xf0] sm:$0xff] %vm1553_vm5, %v5835_v31  ;;  %v5645_v52 = vpop.permute.xlu0 %5644 }
 0xaa0   : > { %5709 = vst.msk [vmem:[#allocation3 + $0xf8] sm:$0xff] %vm1360_vm4, %v5645_v52  ;;  %7795 = vrot.lane.b32.xlu1 %v7702_v57, %s11078_s21 }
 0xaa1   : > { %7221 = vrot.lane.b32.xlu0 %v15286_v2, %s11075_s18 }
 0xaa2   : > { %v7210_v51 = vpop.permute.xlu1 %7209  ;;  %v8654_v41 = vld [vmem:[#allocation3 + $0xa0] sm:$0xff] }
 0xaa3   : > { %7281 = vst.msk [vmem:[#allocation3 + $0xc0] sm:$0xff] %vm781_vm1, %v7210_v51  ;;  %v6410_v54 = vpop.permute.xlu0 %6409  ;;  %10776 = vmatprep.mubr.msk.f32.mxu1 %vm2203_vm10, %v8654_v41  ;;  %v8086_v51 = vld [vmem:[#allocation2 + $0x3c0] sm:$0xff]  ;;  %v7894_v41 = vld [vmem:[#allocation2 + $0x2d8] sm:$0xff] }
 0xaa4   : > { %6476 = vst.msk [vmem:[#allocation3 + $0xe8] sm:$0xff] %vm2133_vm9, %v6410_v54  ;;  %8560 = vrot.lane.b32.xlu1 %v8469_v24, %s11082_s15 }
 0xaa5   : > { %7985 = vrot.lane.b32.xlu0 %v7702_v57, %s11079_s22  ;;  %v7511_v57 = vld [vmem:[#allocation2 + $0x2e0] sm:$0xff] }
 0xaa6   : > { %v7974_v31 = vpop.permute.xlu1 %7973 }
 0xaa7   : > { %8047 = vst.msk [vmem:[#allocation3 + $0xb0] sm:$0xff] %vm1553_vm5, %v7974_v31  ;;  %v7784_v52 = vpop.permute.xlu0 %7783  ;;  %v7320_v31 = vld [vmem:[#allocation2 + $0x1f8] sm:$0xff] }
 0xaa8   : > { %7856 = vst.msk [vmem:[#allocation3 + $0xb8] sm:$0xff] %vm1360_vm4, %v7784_v52  ;;  %7413 = vrot.lane.b32.xlu1 %v7319_v34, %s11076_s19 }
 0xaa9   : > { %7223 = vrot.lane.b32.xlu0 %v7319_v34, %s11075_s18 }
 0xaaa   : > { %v5837_v42 = vpop.permute.xlu1 %5836 }
 0xaab   : > { %5901 = vst.msk [vmem:[#allocation3 + $0xf8] sm:$0xff] %vm1553_vm5, %v5837_v42  ;;  %v8549_v54 = vpop.permute.xlu0 %8548  ;;  %v6508_v24 = vld [vmem:[#allocation3 + $0xe8] sm:$0xff] }
 0xaac   : > { %8623 = vst.msk [vmem:[#allocation3 + $0xa8] sm:$0xff] %vm2133_vm9, %v8549_v54  ;;  %8178 = vrot.lane.b32.xlu1 %v8086_v51, %s11080_s23  ;;  %10731 = vmatmul.mubr.msk.f32.gmra.mrb[44].mxu0 %vm2203_vm10, %v6508_v24  ;;  %v8278_v42 = vld [vmem:[#allocation2 + $0x3c8] sm:$0xff] }
 0xaad   : > { %7094 = vst.msk [vmem:[#allocation3 + $0xe8] sm:$0xff] %vm298_vm0, %v15243_v14  ;;  %7987 = vrot.lane.b32.xlu0 %v7894_v41, %s11079_s22  ;;  %v7703_v41 = vld [vmem:[#allocation2 + $0x2e8] sm:$0xff] }
 0xaae   : > { %v7212_v34 = vpop.permute.xlu1 %7211 }
 0xaaf   : > { %7282 = vst.msk [vmem:[#allocation3 + $0xc8] sm:$0xff] %vm781_vm1, %v7212_v34  ;;  %v6028_v52 = vpop.permute.xlu0 %6027  ;;  %v8470_v34 = vld [vmem:[#allocation2 + $0x3d0] sm:$0xff] }
 0xab0   : > { %6093 = vst.msk [vmem:[#allocation3 + $0xf0] sm:$0xff] %vm1747_vm6, %v6028_v52  ;;  %7605 = vrot.lane.b32.xlu1 %v7511_v57, %s11077_s20 }
 0xab1   : > { %7415 = vrot.lane.b32.xlu0 %v7320_v31, %s11076_s19 }
 0xab2   : > { %v7976_v51 = vpop.permute.xlu1 %7975 }
 0xab3   : > { %8048 = vst.msk [vmem:[#allocation3 + $0xb8] sm:$0xff] %vm1553_vm5, %v7976_v51  ;;  %v7402_v54 = vpop.permute.xlu0 %7401  ;;  %v8655_v14 = vld [vmem:[#allocation3 + $0xa8] sm:$0xff] }
 0xab4   : > { %7473 = vst.msk [vmem:[#allocation3 + $0xc0] sm:$0xff] %vm974_vm2, %v7402_v54  ;;  %8370 = vrot.lane.b32.xlu1 %v8278_v42, %s11081_s29  ;;  %10777 = vmatmul.mubr.msk.f32.gmra.mrb[68].mxu1 %vm2203_vm10, %v8655_v14 }
 0xab5   : > { %8180 = vrot.lane.b32.xlu0 %v8278_v42, %s11080_s23  ;;  %v7895_v42 = vld [vmem:[#allocation2 + $0x2f0] sm:$0xff] }
 0xab6   : > { %v6030_v24 = vpop.permute.xlu1 %6029 }
 0xab7   : > { %6094 = vst.msk [vmem:[#allocation3 + $0xf8] sm:$0xff] %vm1747_vm6, %v6030_v24  ;;  %v8167_v57 = vpop.permute.xlu0 %8166 }
 0xab8   : > { %8240 = vst.msk [vmem:[#allocation3 + $0xb0] sm:$0xff] %vm1747_vm6, %v8167_v57  ;;  %7797 = vrot.lane.b32.xlu1 %v7703_v41, %s11078_s21 }
 0xab9   : > { %7607 = vrot.lane.b32.xlu0 %v7703_v41, %s11077_s20  ;;  %v7896_v41 = vld [vmem:[#allocation2 + $0x2f8] sm:$0xff] }
 0xaba   : > { %v7404_v31 = vpop.permute.xlu1 %7403 }
 0xabb   : > { %7474 = vst.msk [vmem:[#allocation3 + $0xc8] sm:$0xff] %vm974_vm2, %v7404_v31  ;;  %v6220_v52 = vpop.permute.xlu0 %6219  ;;  %v8471_v31 = vld [vmem:[#allocation2 + $0x3d8] sm:$0xff] }
 0xabc   : > { %6285 = vst.msk [vmem:[#allocation3 + $0xf0] sm:$0xff] %vm1940_vm8, %v6220_v52  ;;  %8562 = vrot.lane.b32.xlu1 %v8470_v34, %s11082_s15  ;;  %v8089_v52 = vld [vmem:[#allocation2 + $0x3e8] sm:$0xff] }
 0xabd   : > { %8372 = vrot.lane.b32.xlu0 %v8470_v34, %s11081_s29 }
 0xabe   : > { %v8169_v51 = vpop.permute.xlu1 %8168  ;;  %v15326_v54 = vpop.f32.mrb[38].mxu0 }
 0xabf   : > { %16360 = vst [vmem:[#allocation14_spill] sm:$0xff] %v15326_v54  ;;  %8241 = vst.msk [vmem:[#allocation3 + $0xb8] sm:$0xff] %vm1747_vm6, %v8169_v51  ;;  %v7594_v14 = vpop.permute.xlu0 %7593  ;;  %v15329_v24 = vpop.f32.mrb[39].mxu0 }
 0xac0   : > { %16361 = vst [vmem:[#allocation15_spill] sm:$0xff] %v15329_v24  ;;  %7665 = vst.msk [vmem:[#allocation3 + $0xc0] sm:$0xff] %vm1167_vm3, %v7594_v14  ;;  %7989 = vrot.lane.b32.xlu1 %v7895_v42, %s11079_s22  ;;  %v8088_v14 = vld [vmem:[#allocation2 + $0x3e0] sm:$0xff] }
 0xac1   : > { %7799 = vrot.lane.b32.xlu0 %v7895_v42, %s11078_s21 }
 0xac2   : > { %v6222_v57 = vpop.permute.xlu1 %6221 }
 0xac3   : > { %6286 = vst.msk [vmem:[#allocation3 + $0xf8] sm:$0xff] %vm1940_vm8, %v6222_v57  ;;  %v8359_v34 = vpop.permute.xlu0 %8358  ;;  %v8281_v57 = vld [vmem:[#allocation2 + $0x3f0] sm:$0xff] }
 0xac4   : > { %8432 = vst.msk [vmem:[#allocation3 + $0xb0] sm:$0xff] %vm1940_vm8, %v8359_v34  ;;  %7991 = vrot.lane.b32.xlu1 %v7896_v41, %s11079_s22  ;;  %v8473_v34 = vld [vmem:[#allocation2 + $0x3f8] sm:$0xff] }
 0xac5   : > { %8564 = vrot.lane.b32.xlu0 %v8471_v31, %s11082_s15 }
 0xac6   : > { %v7596_v51 = vpop.permute.xlu1 %7595  ;;  %v15338_v37 = vpop.f32.mrb[62].mxu1 }
 0xac7   : > { %7666 = vst.msk [vmem:[#allocation3 + $0xc8] sm:$0xff] %vm1167_vm3, %v7596_v51  ;;  %v6412_v42 = vpop.permute.xlu0 %6411  ;;  %v15341_v24 = vpop.f32.mrb[63].mxu1  ;;  %v7063_v51 = vld [vmem:[#allocation2 + $0x1e0] sm:$0xff] }
 0xac8   : > { %6477 = vst.msk [vmem:[#allocation3 + $0xf0] sm:$0xff] %vm2133_vm9, %v6412_v42  ;;  %8184 = vrot.lane.b32.xlu1 %v8089_v52, %s11080_s23 }
 0xac9   : > { %8182 = vrot.lane.b32.xlu0 %v8088_v14, %s11080_s23  ;;  %v6842_v14 = vmax.f32 %v14340_v47, 0.0 }
 0xaca   : > { %v8361_v41 = vpop.permute.xlu1 %8360 }
 0xacb   : > { %8433 = vst.msk [vmem:[#allocation3 + $0xb8] sm:$0xff] %vm1940_vm8, %v8361_v41  ;;  %v7786_v31 = vpop.permute.xlu0 %7785  ;;  %v6841_v41 = vmax.f32 %v14343_v19, 0.0 }
 0xacc   : > { %7857 = vst.msk [vmem:[#allocation3 + $0xc0] sm:$0xff] %vm1360_vm4, %v7786_v31  ;;  %8376 = vrot.lane.b32.xlu1 %v8281_v57, %s11081_s29 }
 0xacd   : > { %8374 = vrot.lane.b32.xlu0 %v8089_v52, %s11081_s29  ;;  %s16374_s29 = sshll.u32 %s11436_s13, 8  ;;  %s16090_s13 = sand.u32 1, %s11064_s25  }
 0xace   : > { %v6414_v54 = vpop.permute.xlu1 %6413  ;;  %s281_s9 = scalar_lea.vmem [#allocation5], %s16090_s13  ;;  %s287_s17 = scalar_lea.vmem [#allocation7], %s16090_s13 }
 0xacf   : > { %6478 = vst.msk [vmem:[#allocation3 + $0xf8] sm:$0xff] %vm2133_vm9, %v6414_v54  ;;  %v8551_v42 = vpop.permute.xlu0 %8550  ;;  %v6509_v8 = vld [vmem:[#allocation3 + $0xf0] sm:$0xff]  ;;  %s10065_s14 = sshll.u32 %s287_s17, 4  ;;  %s16110_s14 = int_to_ptr.vmem [resolvable:$true] %s10065_s14 }
 0xad0   : > { %8624 = vst.msk [vmem:[#allocation3 + $0xb0] sm:$0xff] %vm2133_vm9, %v8551_v42  ;;  %8568 = vrot.lane.b32.xlu1 %v8473_v34, %s11082_s15  ;;  %10733 = vmatprep.mubr.msk.f32.mxu0 %vm2203_vm10, %v6509_v8  ;;  %v8997_v8 = vmax.f32 %v14681_v26, 0.0  ;;  %v8998_v26 = vmax.f32 %v14797_v23, 0.0  ;;  %v9000_v23 = vmax.f32 %v14902_v21, 0.0 }
 0xad1   : > { %7095 = vst.msk [vmem:[#allocation3 + $0xf0] sm:$0xff] %vm298_vm0, %v7063_v51  ;;  %8566 = vrot.lane.b32.xlu0 %v8281_v57, %s11082_s15  ;;  %v8996_v57 = vmax.f32 %v14684_v43, 0.0  ;;  %v6843_v51 = vmax.f32 %v14407_v4, 0.0  ;;  %s10033_s15 = scalar_lea.sflag [#allocation6], %s16090_s13 }
 0xad2   : > { %v7788_v52 = vpop.permute.xlu1 %7787 }
 0xad3   : > { %7858 = vst.msk [vmem:[#allocation3 + $0xc8] sm:$0xff] %vm1360_vm4, %v7788_v52  ;;  %v7214_v54 = vpop.permute.xlu0 %7213 }
 0xad4   : > { %7283 = vst.msk [vmem:[#allocation3 + $0xd0] sm:$0xff] %vm781_vm1, %v7214_v54  ;;  %6907 = vrot.lane.b32.xlu1 %v6842_v14, %s11077_s20 }
 0xad5   : > { %6905 = vrot.lane.b32.xlu0 %v6841_v41, %s11077_s20  ;;  %v6844_v41 = vmax.f32 %v14404_v30, 0.0  ;;  %v9001_v30 = vmax.f32 %v14899_v40, 0.0 }
 0xad6   : > { %v8553_v31 = vpop.permute.xlu1 %8552  ;;  %v6510_v34 = vld [vmem:[#allocation3 + $0xf8] sm:$0xff] }
 0xad7   : > { %8625 = vst.msk [vmem:[#allocation3 + $0xb8] sm:$0xff] %vm2133_vm9, %v8553_v31  ;;  %v7978_v47 = vpop.permute.xlu0 %7977  ;;  %10734 = vmatmul.mubr.msk.f32.gmra.mrb[46].mxu0 %vm2203_vm10, %v6510_v34  ;;  %v8656_v19 = vld [vmem:[#allocation3 + $0xb0] sm:$0xff]  ;;  %v6846_v34 = vmax.f32 %v14459_v16, 0.0  ;;  %v4693_v16 = vmax.f32 %v13906_v35, 0.0 }
 0xad8   : > { %7096 = vst.msk [vmem:[#allocation3 + $0xf8] sm:$0xff] %vm298_vm0, %v15286_v2  ;;  %9062 = vrot.lane.b32.xlu1 %v8997_v8, %s11078_s21  ;;  %10779 = vmatprep.mubr.msk.f32.mxu1 %vm2203_vm10, %v8656_v19  ;;  %v8999_v2 = vmax.f32 %v14794_v18, 0.0  ;;  %v6845_v18 = vmax.f32 %v14462_v27, 0.0  ;;  %v9002_v27 = vmax.f32 %v14995_v59, 0.0  ;;  %vm9374_vm0 = vcmask 80896  }
 0xad9   : > { %8049 = vst.msk [vmem:[#allocation3 + $0xc0] sm:$0xff] %vm1553_vm5, %v7978_v47  ;;  %9060 = vrot.lane.b32.xlu0 %v8996_v57, %s11078_s21  ;;  %v6847_v47 = vmax.f32 %v14561_v6, 0.0  ;;  %v6849_v6 = vmax.f32 %v14670_v36, 0.0 }
 0xada   : > { %v7406_v43 = vpop.permute.xlu1 %7405 }
 0xadb   : > { %7475 = vst.msk [vmem:[#allocation3 + $0xd0] sm:$0xff] %vm974_vm2, %v7406_v43  ;;  %v7216_v42 = vpop.permute.xlu0 %7215 }
 0xadc   : > { %7284 = vst.msk [vmem:[#allocation3 + $0xd8] sm:$0xff] %vm781_vm1, %v7216_v42  ;;  %9064 = vrot.lane.b32.xlu1 %v8998_v26, %s11078_s21  ;;  %v6848_v26 = vmax.f32 %v14557_v61, 0.0  ;;  %v9004_v61 = vmax.f32 %v15091_v7, 0.0  ;;  %v6850_v7 = vmax.f32 %v14667_v39, 0.0 }
 0xadd   : > { %6909 = vrot.lane.b32.xlu0 %v6843_v51, %s11077_s20  ;;  %v9003_v51 = vmax.f32 %v14992_v29, 0.0  ;;  %v4695_v29 = vmax.f32 %v13915_v32, 0.0  ;;  %v9005_v32 = vmax.f32 %v15088_v17, 0.0 }
 0xade   : > { %v8171_v14 = vpop.permute.xlu1 %8170  ;;  %v8657_v52 = vld [vmem:[#allocation3 + $0xb8] sm:$0xff] }
 0xadf   : > { %8242 = vst.msk [vmem:[#allocation3 + $0xc0] sm:$0xff] %vm1747_vm6, %v8171_v14  ;;  %10780 = vmatmul.mubr.msk.f32.gmra.mrb[70].mxu1 %vm2203_vm10, %v8657_v52  ;;  %v7980_v4 = vpop.permute.xlu0 %7979  ;;  %v4694_v14 = vmax.f32 %v13902_v15, 0.0  ;;  %v6851_v15 = vmax.f32 %v14783_v9, 0.0  ;;  %v9006_v9 = vmax.f32 %v15178_v33, 0.0 }
 0xae0   : > { %8050 = vst.msk [vmem:[#allocation3 + $0xc8] sm:$0xff] %vm1553_vm5, %v7980_v4  ;;  %9066 = vrot.lane.b32.xlu1 %v8999_v2, %s11078_s21 }
 0xae1   : > { %6911 = vrot.lane.b32.xlu0 %v6844_v41, %s11077_s20 }
 0xae2   : > { %v7598_v54 = vpop.permute.xlu1 %7597 }
 0xae3   : > { %7667 = vst.msk [vmem:[#allocation3 + $0xd0] sm:$0xff] %vm1167_vm3, %v7598_v54  ;;  %v7408_v8 = vpop.permute.xlu0 %7407 }
 0xae4   : > { %7476 = vst.msk [vmem:[#allocation3 + $0xd8] sm:$0xff] %vm974_vm2, %v7408_v8  ;;  %9068 = vrot.lane.b32.xlu1 %v9000_v23, %s11078_s21 }
 0xae5   : > { %6913 = vrot.lane.b32.xlu0 %v6845_v18, %s11077_s20 }
 0xae6   : > { %v8363_v31 = vpop.permute.xlu1 %8362 }
 0xae7   : > { %8434 = vst.msk [vmem:[#allocation3 + $0xc0] sm:$0xff] %vm1940_vm8, %v8363_v31  ;;  %v8173_v21 = vpop.permute.xlu0 %8172  ;;  %v4697_v31 = vmax.f32 %v13925_v5, 0.0  ;;  %v9007_v5 = vmax.f32 %v15175_v3, 0.0  ;;  %v4699_v3 = vmax.f32 %v13936_v56, 0.0 }
 0xae8   : > { %8243 = vst.msk [vmem:[#allocation3 + $0xc8] sm:$0xff] %vm1747_vm6, %v8173_v21  ;;  %9070 = vrot.lane.b32.xlu1 %v9001_v30, %s11078_s21  ;;  %v4696_v30 = vmax.f32 %v13910_v46, 0.0 }
 0xae9   : > { %6915 = vrot.lane.b32.xlu0 %v6846_v34, %s11077_s20 }
 0xaea   : > { %v7790_v57 = vpop.permute.xlu1 %7789 }
 0xaeb   : > { %7859 = vst.msk [vmem:[#allocation3 + $0xd0] sm:$0xff] %vm1360_vm4, %v7790_v57  ;;  %v7600_v40 = vpop.permute.xlu0 %7599  ;;  %v6853_v57 = vmax.f32 %v14889_v48, 0.0 }
 0xaec   : > { %7668 = vst.msk [vmem:[#allocation3 + $0xd8] sm:$0xff] %vm1167_vm3, %v7600_v40  ;;  %9072 = vrot.lane.b32.xlu1 %v9002_v27, %s11078_s21  ;;  %v6852_v27 = vmax.f32 %v14780_v0, 0.0  ;;  %v9008_v0 = vmax.f32 %v15259_v53, 0.0 }
 0xaed   : > { %6917 = vrot.lane.b32.xlu0 %v6847_v47, %s11077_s20 }
 0xaee   : > { %v8555_v19 = vpop.permute.xlu1 %8554 }
 0xaef   : > { %8626 = vst.msk [vmem:[#allocation3 + $0xc0] sm:$0xff] %vm2133_vm9, %v8555_v19  ;;  %v8365_v59 = vpop.permute.xlu0 %8364  ;;  %v4698_v19 = vmax.f32 %v13920_v1, 0.0  ;;  %v6855_v1 = vmax.f32 %v14982_v12, 0.0  ;;  %v4700_v12 = vmax.f32 %v13930_v38, 0.0 }
 0xaf0   : > { %8435 = vst.msk [vmem:[#allocation3 + $0xc8] sm:$0xff] %vm1940_vm8, %v8365_v59  ;;  %4765 = vrot.lane.b32.xlu1 %v4693_v16, %s11076_s19  ;;  %v6854_v59 = vmax.f32 %v14886_v22, 0.0  ;;  %v9010_v22 = vmax.f32 %v15341_v24, 0.0  ;;  %v6857_v24 = vmax.f32 %v15078_v25, 0.0 }
 0xaf1   : > { %6919 = vrot.lane.b32.xlu0 %v6848_v26, %s11077_s20 }
 0xaf2   : > { %v7792_v43 = vpop.permute.xlu1 %7791 }
 0xaf3   : > { %7860 = vst.msk [vmem:[#allocation3 + $0xd8] sm:$0xff] %vm1360_vm4, %v7792_v43  ;;  %v7218_v35 = vpop.permute.xlu0 %7217 }
 0xaf4   : > { %7285 = vst.msk [vmem:[#allocation3 + $0xe0] sm:$0xff] %vm781_vm1, %v7218_v35  ;;  %6921 = vrot.lane.b32.xlu1 %v6849_v6, %s11077_s20 }
 0xaf5   : > { %9074 = vrot.lane.b32.xlu0 %v9003_v51, %s11078_s21  ;;  %v9009_v51 = vmax.f32 %v15256_v50, 0.0  ;;  %v4701_v50 = vmax.f32 %v13947_v62, 0.0  ;;  %v9011_v62 = vmax.f32 %v15338_v37, 0.0  ;;  %v4703_v37 = vmax.f32 %v13958_v63, 0.0 }
 0xaf6   : > { %v8557_v42 = vpop.permute.xlu1 %8556  ;;  %v8658_v2 = vld [vmem:[#allocation3 + $0xc0] sm:$0xff] }
 0xaf7   : > { %8627 = vst.msk [vmem:[#allocation3 + $0xc8] sm:$0xff] %vm2133_vm9, %v8557_v42  ;;  %v7982_v36 = vpop.permute.xlu0 %7981  ;;  %10782 = vmatprep.mubr.msk.f32.mxu1 %vm2203_vm10, %v8658_v2 }
 0xaf8   : > { %8051 = vst.msk [vmem:[#allocation3 + $0xd0] sm:$0xff] %vm1553_vm5, %v7982_v36  ;;  %9076 = vrot.lane.b32.xlu1 %v9004_v61, %s11078_s21 }
 0xaf9   : > { %4767 = vrot.lane.b32.xlu0 %v4694_v14, %s11076_s19  ;;  %v6856_v14 = vmax.f32 %v14979_v49, 0.0 }
 0xafa   : > { %v7410_v52 = vpop.permute.xlu1 %7409 }
 0xafb   : > { %7477 = vst.msk [vmem:[#allocation3 + $0xe0] sm:$0xff] %vm974_vm2, %v7410_v52  ;;  %v7220_v41 = vpop.permute.xlu0 %7219 }
 0xafc   : > { %7286 = vst.msk [vmem:[#allocation3 + $0xe8] sm:$0xff] %vm781_vm1, %v7220_v41  ;;  %4769 = vrot.lane.b32.xlu1 %v4695_v29, %s11076_s19 }
 0xafd   : > { %6923 = vrot.lane.b32.xlu0 %v6850_v7, %s11077_s20  ;;  %v4702_v7 = vmax.f32 %v13942_v55, 0.0  ;;  %v6859_v55 = vmax.f32 %v15166_v58, 0.0 }
 0xafe   : > { %v8175_v4 = vpop.permute.xlu1 %8174  ;;  %v15429_v23 = vpop.f32.mrb[40].mxu0  ;;  %v8659_v54 = vld [vmem:[#allocation3 + $0xc8] sm:$0xff] }
 0xaff   : > { %8244 = vst.msk [vmem:[#allocation3 + $0xd0] sm:$0xff] %vm1747_vm6, %v8175_v4  ;;  %10783 = vmatmul.mubr.msk.f32.gmra.mrb[72].mxu1 %vm2203_vm10, %v8659_v54  ;;  %v7984_v39 = vpop.permute.xlu0 %7983  ;;  %v15434_v18 = vpop.f32.mrb[41].mxu0 }
 0xb00   : > { %8052 = vst.msk [vmem:[#allocation3 + $0xd8] sm:$0xff] %vm1553_vm5, %v7984_v39  ;;  %6925 = vrot.lane.b32.xlu1 %v6851_v15, %s11077_s20  ;;  %v6858_v15 = vmax.f32 %v15075_v10, 0.0  ;;  %v4704_v39 = vmax.f32 %v13953_v44, 0.0 }
 0xb01   : > { %9078 = vrot.lane.b32.xlu0 %v9005_v32, %s11078_s21 }
 0xb02   : > { %v7602_v8 = vpop.permute.xlu1 %7601 }
 0xb03   : > { %7669 = vst.msk [vmem:[#allocation3 + $0xe0] sm:$0xff] %vm1167_vm3, %v7602_v8  ;;  %v7412_v17 = vpop.permute.xlu0 %7411 }
 0xb04   : > { %7478 = vst.msk [vmem:[#allocation3 + $0xe8] sm:$0xff] %vm974_vm2, %v7412_v17  ;;  %9080 = vrot.lane.b32.xlu1 %v9006_v9, %s11078_s21 }
 0xb05   : > { %4771 = vrot.lane.b32.xlu0 %v4696_v30, %s11076_s19  ;;  %v6860_v30 = vmax.f32 %v15163_v11, 0.0 }
 0xb06   : > { %v8367_v34 = vpop.permute.xlu1 %8366  ;;  %v15446_v21 = vpop.f32.mrb[64].mxu1 }
 0xb07   : > { %8436 = vst.msk [vmem:[#allocation3 + $0xd0] sm:$0xff] %vm1940_vm8, %v8367_v34  ;;  %v8177_v33 = vpop.permute.xlu0 %8176  ;;  %v15450_v46 = vpop.f32.mrb[65].mxu1  ;;  %v9013_v32 = vmax.f32 %v15446_v21, 0.0 }
 0xb08   : > { %8245 = vst.msk [vmem:[#allocation3 + $0xd8] sm:$0xff] %vm1747_vm6, %v8177_v33  ;;  %4773 = vrot.lane.b32.xlu1 %v4697_v31, %s11076_s19  ;;  %v9012_v49 = vmax.f32 %v15450_v46, 0.0 }
 0xb09   : > { %6927 = vrot.lane.b32.xlu0 %v6852_v27, %s11077_s20 }
 0xb0a   : > { %v7794_v47 = vpop.permute.xlu1 %7793 }
 0xb0b   : > { %7861 = vst.msk [vmem:[#allocation3 + $0xe0] sm:$0xff] %vm1360_vm4, %v7794_v47  ;;  %v7604_v40 = vpop.permute.xlu0 %7603 }
 0xb0c   : > { %7670 = vst.msk [vmem:[#allocation3 + $0xe8] sm:$0xff] %vm1167_vm3, %v7604_v40  ;;  %6929 = vrot.lane.b32.xlu1 %v6853_v57, %s11077_s20 }
 0xb0d   : > { %9082 = vrot.lane.b32.xlu0 %v9007_v5, %s11078_s21 }
 0xb0e   : > { %v8559_v16 = vpop.permute.xlu1 %8558 }
 0xb0f   : > { %8628 = vst.msk [vmem:[#allocation3 + $0xd0] sm:$0xff] %vm2133_vm9, %v8559_v16  ;;  %v8369_v48 = vpop.permute.xlu0 %8368 }
 0xb10   : > { %8437 = vst.msk [vmem:[#allocation3 + $0xd8] sm:$0xff] %vm1940_vm8, %v8369_v48  ;;  %9084 = vrot.lane.b32.xlu1 %v9008_v0, %s11078_s21 }
 0xb11   : > { %4775 = vrot.lane.b32.xlu0 %v4698_v19, %s11076_s19 }
 0xb12   : > { %v7796_v26 = vpop.permute.xlu1 %7795 }
 0xb13   : > { %7862 = vst.msk [vmem:[#allocation3 + $0xe8] sm:$0xff] %vm1360_vm4, %v7796_v26  ;;  %v7222_v53 = vpop.permute.xlu0 %7221  ;;  %v4706_v26 = vmax.f32 %v13963_v13, 0.0 }
 0xb14   : > { %7287 = vst.msk [vmem:[#allocation3 + $0xf0] sm:$0xff] %vm781_vm1, %v7222_v53  ;;  %4777 = vrot.lane.b32.xlu1 %v4699_v3, %s11076_s19 }
 0xb15   : > { %6931 = vrot.lane.b32.xlu0 %v6854_v59, %s11077_s20 }
 0xb16   : > { %v8561_v6 = vpop.permute.xlu1 %8560  ;;  %v8660_v43 = vld [vmem:[#allocation3 + $0xd0] sm:$0xff] }
 0xb17   : > { %8629 = vst.msk [vmem:[#allocation3 + $0xd8] sm:$0xff] %vm2133_vm9, %v8561_v6  ;;  %v7986_v56 = vpop.permute.xlu0 %7985  ;;  %10785 = vmatprep.mubr.msk.f32.mxu1 %vm2203_vm10, %v8660_v43  ;;  %v6862_v43 = vmax.f32 %v15241_v20, 0.0 }
 0xb18   : > { %8053 = vst.msk [vmem:[#allocation3 + $0xe0] sm:$0xff] %vm1553_vm5, %v7986_v56  ;;  %6933 = vrot.lane.b32.xlu1 %v6855_v1, %s11077_s20  ;;  %v4705_v1 = vmax.f32 %v13968_v60, 0.0 }
 0xb19   : > { %9086 = vrot.lane.b32.xlu0 %v9009_v51, %s11078_s21  ;;  %v6861_v51 = vmax.f32 %v15246_v28, 0.0 }
 0xb1a   : > { %v7414_v35 = vpop.permute.xlu1 %7413 }
 0xb1b   : > { %7479 = vst.msk [vmem:[#allocation3 + $0xf0] sm:$0xff] %vm974_vm2, %v7414_v35  ;;  %v7224_v61 = vpop.permute.xlu0 %7223 }
 0xb1c   : > { %7288 = vst.msk [vmem:[#allocation3 + $0xf8] sm:$0xff] %vm781_vm1, %v7224_v61  ;;  %9088 = vrot.lane.b32.xlu1 %v9010_v22, %s11078_s21  ;;  %vm9821_vm1 = vcmask 64512  }
 0xb1d   : > { %4779 = vrot.lane.b32.xlu0 %v4700_v12, %s11076_s19 }
 0xb1e   : > { %v8179_v42 = vpop.permute.xlu1 %8178  ;;  %v8661_v2 = vld [vmem:[#allocation3 + $0xd8] sm:$0xff] }
 0xb1f   : > { %8246 = vst.msk [vmem:[#allocation3 + $0xe0] sm:$0xff] %vm1747_vm6, %v8179_v42  ;;  %10786 = vmatmul.mubr.msk.f32.gmra.mrb[74].mxu1 %vm2203_vm10, %v8661_v2  ;;  %v7988_v38 = vpop.permute.xlu0 %7987 }
 0xb20   : > { %8054 = vst.msk [vmem:[#allocation3 + $0xe8] sm:$0xff] %vm1553_vm5, %v7988_v38  ;;  %4781 = vrot.lane.b32.xlu1 %v4701_v50, %s11076_s19 }
 0xb21   : > { %6935 = vrot.lane.b32.xlu0 %v6856_v14, %s11077_s20 }
 0xb22   : > { %v7606_v36 = vpop.permute.xlu1 %7605 }
 0xb23   : > { %7671 = vst.msk [vmem:[#allocation3 + $0xf0] sm:$0xff] %vm1167_vm3, %v7606_v36  ;;  %v7416_v29 = vpop.permute.xlu0 %7415 }
 0xb24   : > { %7480 = vst.msk [vmem:[#allocation3 + $0xf8] sm:$0xff] %vm974_vm2, %v7416_v29  ;;  %6937 = vrot.lane.b32.xlu1 %v6857_v24, %s11077_s20 }
 0xb25   : > { %9090 = vrot.lane.b32.xlu0 %v9011_v62, %s11078_s21 }
 0xb26   : > { %v8371_v52 = vpop.permute.xlu1 %8370 }
 0xb27   : > { %8438 = vst.msk [vmem:[#allocation3 + $0xe0] sm:$0xff] %vm1940_vm8, %v8371_v52  ;;  %v8181_v25 = vpop.permute.xlu0 %8180 }
 0xb28   : > { %8247 = vst.msk [vmem:[#allocation3 + $0xe8] sm:$0xff] %vm1747_vm6, %v8181_v25  ;;  %9092 = vrot.lane.b32.xlu1 %v9012_v49, %s11078_s21 }
 0xb29   : > { %4783 = vrot.lane.b32.xlu0 %v4702_v7, %s11076_s19 }
 0xb2a   : > { %v7798_v41 = vpop.permute.xlu1 %7797 }
 0xb2b   : > { %7863 = vst.msk [vmem:[#allocation3 + $0xf0] sm:$0xff] %vm1360_vm4, %v7798_v41  ;;  %v7608_v4 = vpop.permute.xlu0 %7607 }
 0xb2c   : > { %7672 = vst.msk [vmem:[#allocation3 + $0xf8] sm:$0xff] %vm1167_vm3, %v7608_v4  ;;  %4785 = vrot.lane.b32.xlu1 %v4703_v37, %s11076_s19 }
 0xb2d   : > { %6939 = vrot.lane.b32.xlu0 %v6858_v15, %s11077_s20 }
 0xb2e   : > { %v8563_v54 = vpop.permute.xlu1 %8562 }
 0xb2f   : > { %8630 = vst.msk [vmem:[#allocation3 + $0xe0] sm:$0xff] %vm2133_vm9, %v8563_v54  ;;  %v8373_v63 = vpop.permute.xlu0 %8372 }
 0xb30   : > { %8439 = vst.msk [vmem:[#allocation3 + $0xe8] sm:$0xff] %vm1940_vm8, %v8373_v63  ;;  %6941 = vrot.lane.b32.xlu1 %v6859_v55, %s11077_s20 }
 0xb31   : > { %9094 = vrot.lane.b32.xlu0 %v9013_v32, %s11078_s21 }
 0xb32   : > { %v7990_v10 = vpop.permute.xlu1 %7989 }
 0xb33   : > { %8055 = vst.msk [vmem:[#allocation3 + $0xf0] sm:$0xff] %vm1553_vm5, %v7990_v10  ;;  %v7800_v9 = vpop.permute.xlu0 %7799 }
 0xb34   : > { %7864 = vst.msk [vmem:[#allocation3 + $0xf8] sm:$0xff] %vm1360_vm4, %v7800_v9 }
 0xb35   : > { %4787 = vrot.lane.b32.xlu0 %v4704_v39, %s11076_s19 }
 0xb36   : > { %v7992_v58 = vpop.permute.xlu1 %7991  ;;  %v8662_v8 = vld [vmem:[#allocation3 + $0xe0] sm:$0xff] }
 0xb37   : > { %8056 = vst.msk [vmem:[#allocation3 + $0xf8] sm:$0xff] %vm1553_vm5, %v7992_v58  ;;  %v8565_v17 = vpop.permute.xlu0 %8564  ;;  %10788 = vmatprep.mubr.msk.f32.mxu1 %vm2203_vm10, %v8662_v8 }
 0xb38   : > { %8631 = vst.msk [vmem:[#allocation3 + $0xe8] sm:$0xff] %vm2133_vm9, %v8565_v17 }
 0xb39   : > { %6943 = vrot.lane.b32.xlu0 %v6860_v30, %s11077_s20 }
 0xb3a   : > { %v8185_v44 = vpop.permute.xlu1 %8184 }
 0xb3b   : > { %8249 = vst.msk [vmem:[#allocation3 + $0xf8] sm:$0xff] %vm1747_vm6, %v8185_v44  ;;  %v8183_v31 = vpop.permute.xlu0 %8182  ;;  %v4708_v44 = vmax.f32 %v13976_v45, 0.0 }
 0xb3c   : > { %8248 = vst.msk [vmem:[#allocation3 + $0xf0] sm:$0xff] %vm1747_vm6, %v8183_v31  ;;  %v16362_v31 = vld [vmem:[#allocation35_spill] sm:$0xff] }
 0xb3e   : > { %v8377_v34 = vpop.permute.xlu1 %8376  ;;  %v15528_v21 = vpop.f32.mrb[42].mxu0 }
 0xb3f   : > { %8441 = vst.msk [vmem:[#allocation3 + $0xf8] sm:$0xff] %vm1940_vm8, %v8377_v34  ;;  %v8375_v11 = vpop.permute.xlu0 %8374  ;;  %v15531_v27 = vpop.f32.mrb[43].mxu0  ;;  %v8663_v33 = vld [vmem:[#allocation3 + $0xe8] sm:$0xff]  ;;  %v4707_v34 = vmax.f32 %v16362_v31, 0.0 }
 0xb40   : > { %8440 = vst.msk [vmem:[#allocation3 + $0xf0] sm:$0xff] %vm1940_vm8, %v8375_v11  ;;  %10789 = vmatmul.mubr.msk.f32.gmra.mrb[76].mxu1 %vm2203_vm10, %v8663_v33 }
 0xb42   : > { %v8569_v46 = vpop.permute.xlu1 %8568 }
 0xb43   : > { %8633 = vst.msk [vmem:[#allocation3 + $0xf8] sm:$0xff] %vm2133_vm9, %v8569_v46  ;;  %v8567_v57 = vpop.permute.xlu0 %8566  ;;  %v16363_v46 = vld [vmem:[#allocation14_spill] sm:$0xff] }
 0xb44   : > { %8632 = vst.msk [vmem:[#allocation3 + $0xf0] sm:$0xff] %vm2133_vm9, %v8567_v57  ;;  %v6864_v57 = vmax.f32 %v16363_v46, 0.0 }
 0xb46   : > { %v6908_v47 = vpop.permute.xlu1 %6907  ;;  %v10775_v5 = vpop.f32.mrb[66].mxu1 }
 0xb47   : > { %7002 = vst.msk [vmem:[#allocation4 + $0x8] sm:$0xff] %vm1167_vm3, %v6908_v47  ;;  %v9015_v40 = vmax.f32 %v10775_v5, 0.0  ;;  %v8927_v0 = vpop.f32.mrb[67].mxu1  ;;  %v6906_v16 = vpop.permute.xlu0 %6905  ;;  %v16364_v47 = vld [vmem:[#allocation15_spill] sm:$0xff] }
 0xb48   : > { %v9014_v19 = vmax.f32 %v8927_v0, 0.0  ;;  %7001 = vst.msk [vmem:[#allocation4] sm:$0xff] %vm1167_vm3, %v6906_v16  ;;  %v6863_v5 = vmax.f32 %v16364_v47, 0.0 }
 0xb49   : > { %9098 = vrot.lane.b32.xlu0 %v9015_v40, %s11078_s21 }
 0xb4a   : > { %v9063_v48 = vpop.permute.xlu1 %9062  ;;  %9096 = vrot.lane.b32.xlu1 %v9014_v19, %s11078_s21  ;;  %v8665_v3 = vld [vmem:[#allocation3 + $0xf8] sm:$0xff] }
 0xb4b   : > { %9157 = vst.msk [vmem:[#allocation4 + $0x8] sm:$0xff] %vm1360_vm4, %v9063_v48  ;;  %v9061_v59 = vpop.permute.xlu0 %9060  ;;  %v8664_v53 = vld [vmem:[#allocation3 + $0xf0] sm:$0xff] }
 0xb4c   : > { %9156 = vst.msk [vmem:[#allocation4] sm:$0xff] %vm1360_vm4, %v9061_v59  ;;  %10791 = vmatprep.mubr.msk.f32.mxu1 %vm2203_vm10, %v8664_v53 }
 0xb4d   : > { %4791 = vrot.lane.b32.xlu0 %v4706_v26, %s11076_s19  ;;  %10792 = vmatmul.mubr.msk.f32.gmra.mrb[78].mxu1 %vm2203_vm10, %v8665_v3 }
 0xb4e   : > { %v9065_v6 = vpop.permute.xlu1 %9064  ;;  %4789 = vrot.lane.b32.xlu1 %v4705_v1, %s11076_s19 }
 0xb4f   : > { %v6910_v13 = vpop.permute.xlu0 %6909 }
 0xb50   : > { %7003 = vst.msk [vmem:[#allocation4 + $0x10] sm:$0xff] %vm1167_vm3, %v6910_v13 }
 0xb51   : > { %9158 = vst.msk [vmem:[#allocation4 + $0x10] sm:$0xff] %vm1360_vm4, %v9065_v6  ;;  %6947 = vrot.lane.b32.xlu0 %v6862_v43, %s11077_s20 }
 0xb52   : > { %v9067_v60 = vpop.permute.xlu1 %9066  ;;  %6945 = vrot.lane.b32.xlu1 %v6861_v51, %s11077_s20 }
 0xb53   : > { %v6912_v56 = vpop.permute.xlu0 %6911 }
 0xb54   : > { %7004 = vst.msk [vmem:[#allocation4 + $0x18] sm:$0xff] %vm1167_vm3, %v6912_v56 }
 0xb55   : > { %9159 = vst.msk [vmem:[#allocation4 + $0x18] sm:$0xff] %vm1360_vm4, %v9067_v60 }
 0xb56   : > { %v9069_v22 = vpop.permute.xlu1 %9068 }
 0xb57   : > { %v6914_v35 = vpop.permute.xlu0 %6913 }
 0xb58   : > { %7005 = vst.msk [vmem:[#allocation4 + $0x20] sm:$0xff] %vm1167_vm3, %v6914_v35  ;;  %v16365_v35 = vld [vmem:[#allocation36_spill] sm:$0xff] }
 0xb59   : > { %9160 = vst.msk [vmem:[#allocation4 + $0x20] sm:$0xff] %vm1360_vm4, %v9069_v22 }
 0xb5a   : > { %v9071_v20 = vpop.permute.xlu1 %9070 }
 0xb5b   : > { %v6916_v28 = vpop.permute.xlu0 %6915 }
 0xb5c   : > { %7006 = vst.msk [vmem:[#allocation4 + $0x28] sm:$0xff] %vm1167_vm3, %v6916_v28  ;;  %v16366_v28 = vld [vmem:[#allocation37_spill] sm:$0xff] }
 0xb5d   : > { %9161 = vst.msk [vmem:[#allocation4 + $0x28] sm:$0xff] %vm1360_vm4, %v9071_v20  ;;  %v4710_v20 = vmax.f32 %v16365_v35, 0.0  ;;  %v9372_v35 = vld [vmem:[%s16179_s3] sm:$0xff] }
 0xb5e   : > { %v9073_v12 = vpop.permute.xlu1 %9072 }
 0xb5f   : > { %v6918_v61 = vpop.permute.xlu0 %6917 }
 0xb60   : > { %7007 = vst.msk [vmem:[#allocation4 + $0x30] sm:$0xff] %vm1167_vm3, %v6918_v61  ;;  %v6866_v61 = vmax.f32 %v15429_v23, 0.0 }
 0xb61   : > { %9162 = vst.msk [vmem:[#allocation4 + $0x30] sm:$0xff] %vm1360_vm4, %v9073_v12  ;;  %v4709_v12 = vmax.f32 %v16366_v28, 0.0 }
 0xb62   : > { %v4766_v50 = vpop.permute.xlu1 %4765 }
 0xb63   : > { %4853 = vst.msk [vmem:[#allocation4 + $0x40] sm:$0xff] %vm974_vm2, %v4766_v50  ;;  %v6920_v42 = vpop.permute.xlu0 %6919 }
 0xb64   : > { %7008 = vst.msk [vmem:[#allocation4 + $0x38] sm:$0xff] %vm1167_vm3, %v6920_v42  ;;  %v6865_v42 = vmax.f32 %v15434_v18, 0.0 }
 0xb66   : > { %v6922_v2 = vpop.permute.xlu1 %6921 }
 0xb67   : > { %7009 = vst.msk [vmem:[#allocation4 + $0x40] sm:$0xff] %vm1167_vm3, %v6922_v2  ;;  %v9075_v14 = vpop.permute.xlu0 %9074 }
 0xb68   : > { %9163 = vst.msk [vmem:[#allocation4 + $0x38] sm:$0xff] %vm1360_vm4, %v9075_v14 }
 0xb6a   : > { %v9077_v38 = vpop.permute.xlu1 %9076 }
 0xb6b   : > { %9164 = vst.msk [vmem:[#allocation4 + $0x40] sm:$0xff] %vm1360_vm4, %v9077_v38  ;;  %v4768_v24 = vpop.permute.xlu0 %4767 }
 0xb6c   : > { %4854 = vst.msk [vmem:[#allocation4 + $0x48] sm:$0xff] %vm974_vm2, %v4768_v24 }
 0xb6e   : > { %v4770_v36 = vpop.permute.xlu1 %4769 }
 0xb6f   : > { %4855 = vst.msk [vmem:[#allocation4 + $0x50] sm:$0xff] %vm974_vm2, %v4770_v36  ;;  %v6924_v62 = vpop.permute.xlu0 %6923 }
 0xb70   : > { %7010 = vst.msk [vmem:[#allocation4 + $0x48] sm:$0xff] %vm1167_vm3, %v6924_v62 }
 0xb72   : > { %v6926_v29 = vpop.permute.xlu1 %6925 }
 0xb73   : > { %7011 = vst.msk [vmem:[#allocation4 + $0x50] sm:$0xff] %vm1167_vm3, %v6926_v29  ;;  %v9079_v49 = vpop.permute.xlu0 %9078 }
 0xb74   : > { %9165 = vst.msk [vmem:[#allocation4 + $0x48] sm:$0xff] %vm1360_vm4, %v9079_v49  ;;  %v16367_v49 = vld [vmem:[#allocation38_spill] sm:$0xff] }
 0xb76   : > { %v9081_v52 = vpop.permute.xlu1 %9080 }
 0xb77   : > { %9166 = vst.msk [vmem:[#allocation4 + $0x50] sm:$0xff] %vm1360_vm4, %v9081_v52  ;;  %v4772_v7 = vpop.permute.xlu0 %4771  ;;  %v4712_v52 = vmax.f32 %v16367_v49, 0.0 }
 0xb78   : > { %4856 = vst.msk [vmem:[#allocation4 + $0x58] sm:$0xff] %vm974_vm2, %v4772_v7  ;;  %v16368_v7 = vld [vmem:[#allocation39_spill] sm:$0xff] }
 0xb7a   : > { %v4774_v25 = vpop.permute.xlu1 %4773 }
 0xb7b   : > { %4857 = vst.msk [vmem:[#allocation4 + $0x60] sm:$0xff] %vm974_vm2, %v4774_v25  ;;  %v6928_v37 = vpop.permute.xlu0 %6927  ;;  %v4711_v25 = vmax.f32 %v16368_v7, 0.0 }
 0xb7c   : > { %7012 = vst.msk [vmem:[#allocation4 + $0x58] sm:$0xff] %vm1167_vm3, %v6928_v37  ;;  %v6868_v37 = vmax.f32 %v15528_v21, 0.0 }
 0xb7e   : > { %v6930_v41 = vpop.permute.xlu1 %6929 }
 0xb7f   : > { %7013 = vst.msk [vmem:[#allocation4 + $0x60] sm:$0xff] %vm1167_vm3, %v6930_v41  ;;  %v15578_v15 = vpop.f32.mrb[44].mxu0  ;;  %v9083_v4 = vpop.permute.xlu0 %9082  ;;  %v6867_v41 = vmax.f32 %v15531_v27, 0.0 }
 0xb80   : > { %9167 = vst.msk [vmem:[#allocation4 + $0x58] sm:$0xff] %vm1360_vm4, %v9083_v4  ;;  %v15581_v55 = vpop.f32.mrb[45].mxu0  ;;  %v9292_v4 = vld [vmem:[%s16178_s2] sm:$0xff] }
 0xb81   : > { %v6869_v31 = vmax.f32 %v15581_v55, 0.0  ;;  %v9294_v55 = vld [vmem:[%s16178_s2 + $0x10] sm:$0xf] }
 0xb82   : > { %v9085_v54 = vpop.permute.xlu1 %9084 }
 0xb83   : > { %9168 = vst.msk [vmem:[#allocation4 + $0x60] sm:$0xff] %vm1360_vm4, %v9085_v54  ;;  %v4776_v32 = vpop.permute.xlu0 %4775  ;;  %v9293_v54 = vld [vmem:[%s16178_s2 + $0x8] sm:$0xff] }
 0xb84   : > { %4858 = vst.msk [vmem:[#allocation4 + $0x68] sm:$0xff] %vm974_vm2, %v4776_v32 }
 0xb86   : > { %v4778_v63 = vpop.permute.xlu1 %4777 }
 0xb87   : > { %4859 = vst.msk [vmem:[#allocation4 + $0x70] sm:$0xff] %vm974_vm2, %v4778_v63  ;;  %v10778_v10 = vpop.f32.mrb[68].mxu1  ;;  %v6932_v39 = vpop.permute.xlu0 %6931  ;;  %v11083_v63 = vmov 0.0|0.0  }
 0xb88   : > { %v9017_v9 = vmax.f32 %v10778_v10, 0.0  ;;  %7014 = vst.msk [vmem:[#allocation4 + $0x68] sm:$0xff] %vm1167_vm3, %v6932_v39  ;;  %v8937_v58 = vpop.f32.mrb[69].mxu1  ;;  %10896 = vmatprep.subr.bf16.mxu0 %v11083_v63  ;;  %v10897_v10 = vpack.c.bf16 %v9293_v54, %v9292_v4  ;;  %10899 = vmatprep.subr.bf16.mxu1 %v11083_v63  ;;  %v15724_v54 = vld [vmem:[#allocation4 + $0x30] sm:$0xff] }
 0xb89   : > { %v9016_v8 = vmax.f32 %v8937_v58, 0.0  ;;  %v16370_v58 = vld [vmem:[#allocation40_spill] sm:$0xff] }
 0xb8a   : > { %v6934_v30 = vpop.permute.xlu1 %6933  ;;  %9102 = vrot.lane.b32.xlu0 %v9017_v9, %s11078_s21  ;;  %10898 = vmatpush3.bf16.msra.mxu0 %v10897_v10  ;;  %v16369_v9 = vmov 0.0   ;;  %v15728_v10 = vld [vmem:[#allocation4 + $0x38] sm:$0xff] }
 0xb8b   : > { %7015 = vst.msk [vmem:[#allocation4 + $0x70] sm:$0xff] %vm1167_vm3, %v6934_v30  ;;  %9100 = vrot.lane.b32.xlu1 %v9016_v8, %s11078_s21  ;;  %v9087_v17 = vpop.permute.xlu0 %9086  ;;  %10798 = vmatprep.subr.mxu0 %v16369_v9  ;;  %v4714_v8 = vmax.f32 %v16370_v58, 0.0  ;;  %v16371_v30 = vld [vmem:[#allocation11_spill] sm:$0xff] }
 0xb8c   : > { %9169 = vst.msk [vmem:[#allocation4 + $0x68] sm:$0xff] %vm1360_vm4, %v9087_v17  ;;  %v4713_v17 = vmax.f32 %v16371_v30, 0.0  ;;  %10800 = vmatprep.mubr.msk.f32.mxu0 %vm11084_vm11, %v16369_v9  ;;  %10807 = vmatprep.mubr.msk.f32.mxu1 %vm11084_vm11, %v16369_v9  ;;  %v15734_v58 = vld [vmem:[#allocation4 + $0x40] sm:$0xff]  ;;  %v15736_v30 = vld [vmem:[#allocation4 + $0x48] sm:$0xff] }
 0xb8e   : > { %v9089_v11 = vpop.permute.xlu1 %9088  ;;  %4795 = vrot.lane.b32.xlu0 %v4708_v44, %s11076_s19  ;;  %v6870_v44 = vmax.f32 %v15578_v15, 0.0  ;;  %10799 = vmatpush3.msk.msra.mxu0 %vm2300_vm7, %v9294_v55 }
 0xb8f   : > { %9170 = vst.msk [vmem:[#allocation4 + $0x70] sm:$0xff] %vm1360_vm4, %v9089_v11  ;;  %4793 = vrot.lane.b32.xlu1 %v4707_v34, %s11076_s19  ;;  %v4780_v33 = vpop.permute.xlu0 %4779 }
 0xb90   : > { %4860 = vst.msk [vmem:[#allocation4 + $0x78] sm:$0xff] %vm974_vm2, %v4780_v33 }
 0xb92   : > { %v4782_v40 = vpop.permute.xlu1 %4781  ;;  %6951 = vrot.lane.b32.xlu0 %v6864_v57, %s11077_s20 }
 0xb93   : > { %4861 = vst.msk [vmem:[#allocation4 + $0x80] sm:$0xff] %vm974_vm2, %v4782_v40  ;;  %6949 = vrot.lane.b32.xlu1 %v6863_v5, %s11077_s20  ;;  %v6936_v45 = vpop.permute.xlu0 %6935 }
 0xb94   : > { %7016 = vst.msk [vmem:[#allocation4 + $0x78] sm:$0xff] %vm1167_vm3, %v6936_v45 }
 0xb96   : > { %v6938_v0 = vpop.permute.xlu1 %6937 }
 0xb97   : > { %7017 = vst.msk [vmem:[#allocation4 + $0x80] sm:$0xff] %vm1167_vm3, %v6938_v0  ;;  %v9091_v16 = vpop.permute.xlu0 %9090  ;;  %v16372_v0 = vld [vmem:[#allocation12_spill] sm:$0xff] }
 0xb98   : > { %9171 = vst.msk [vmem:[#allocation4 + $0x78] sm:$0xff] %vm1360_vm4, %v9091_v16  ;;  %v4716_v16 = vmax.f32 %v16372_v0, 0.0 }
 0xb9a   : > { %v9093_v19 = vpop.permute.xlu1 %9092 }
 0xb9b   : > { %9172 = vst.msk [vmem:[#allocation4 + $0x80] sm:$0xff] %vm1360_vm4, %v9093_v19  ;;  %v4784_v48 = vpop.permute.xlu0 %4783  ;;  %v16373_v19 = vld [vmem:[#allocation13_spill] sm:$0xff] }
 0xb9c   : > { %4862 = vst.msk [vmem:[#allocation4 + $0x88] sm:$0xff] %vm974_vm2, %v4784_v48  ;;  %v4715_v48 = vmax.f32 %v16373_v19, 0.0 }
 0xb9e   : > { %v4786_v3 = vpop.permute.xlu1 %4785 }
 0xb9f   : > { %4863 = vst.msk [vmem:[#allocation4 + $0x90] sm:$0xff] %vm974_vm2, %v4786_v3  ;;  %v6940_v26 = vpop.permute.xlu0 %6939 }
 0xba0   : > { %7018 = vst.msk [vmem:[#allocation4 + $0x88] sm:$0xff] %vm1167_vm3, %v6940_v26 }
 0xba2   : > { %v6942_v59 = vpop.permute.xlu1 %6941 }
 0xba3   : > { %7019 = vst.msk [vmem:[#allocation4 + $0x90] sm:$0xff] %vm1167_vm3, %v6942_v59  ;;  %v9095_v53 = vpop.permute.xlu0 %9094 }
 0xba4   : > { %9173 = vst.msk [vmem:[#allocation4 + $0x88] sm:$0xff] %vm1360_vm4, %v9095_v53 }
 0xba7   : > { %v4788_v1 = vpop.permute.xlu0 %4787 }
 0xba8   : > { %4864 = vst.msk [vmem:[#allocation4 + $0x98] sm:$0xff] %vm974_vm2, %v4788_v1 }
 0xbaa   : > { %v15612_v6 = vpop.f32.mrb[46].mxu0 }
 0xbab   : > { %v6944_v43 = vpop.permute.xlu0 %6943  ;;  %v15614_v13 = vpop.f32.mrb[47].mxu0  ;;  %v6872_v3 = vmax.f32 %v15612_v6, 0.0 }
 0xbac   : > { %7020 = vst.msk [vmem:[#allocation4 + $0x98] sm:$0xff] %vm1167_vm3, %v6944_v43  ;;  %v6871_v26 = vmax.f32 %v15614_v13, 0.0 }
 0xbb2   : > { %v10781_v51 = vpop.f32.mrb[70].mxu1 }
 0xbb3   : > { %v9019_v60 = vmax.f32 %v10781_v51, 0.0  ;;  %v8947_v56 = vpop.f32.mrb[71].mxu1 }
 0xbb4   : > { %v9018_v22 = vmax.f32 %v8947_v56, 0.0 }
 0xbb5   : > { %9106 = vrot.lane.b32.xlu0 %v9019_v60, %s11078_s21 }
 0xbb6   : > { %9104 = vrot.lane.b32.xlu1 %v9018_v22, %s11078_s21 }
 0xbb9   : > { %4799 = vrot.lane.b32.xlu0 %v4710_v20, %s11076_s19  ;;  %v9373_v20 = vld [vmem:[%s16179_s3 + $0x8] sm:$0x3] }
 0xbba   : > { %4797 = vrot.lane.b32.xlu1 %v4709_v12, %s11076_s19  ;;  %v10900_v28 = vpack.c.bf16 %v9373_v20, %v9372_v35 }
 0xbbb   : > { %v9099_v50 = vpop.permute.xlu0 %9098 }
 0xbbc   : > { %9175 = vst.msk [vmem:[#allocation4 + $0x98] sm:$0xff] %vm1360_vm4, %v9099_v50  ;;  %v9097_v2 = vpop.permute.xlu1 %9096  ;;  %10902 = vmatpush3.bf16.msk.msra.mxu1 %vm10901_vm14, %v10900_v28 }
 0xbbd   : > { %9174 = vst.msk [vmem:[#allocation4 + $0x90] sm:$0xff] %vm1360_vm4, %v9097_v2  ;;  %6955 = vrot.lane.b32.xlu0 %v6866_v61, %s11077_s20  ;;  %v15700_v2 = vld [vmem:[#allocation4] sm:$0xff] }
 0xbbe   : > { %6953 = vrot.lane.b32.xlu1 %v6865_v42, %s11077_s20  ;;  %v15698_v42 = vld [vmem:[#allocation4 + $0x8] sm:$0xff] }
 0xbbf   : > { %v4792_v14 = vpop.permute.xlu0 %4791 }
 0xbc0   : > { %4866 = vst.msk [vmem:[#allocation4 + $0xa8] sm:$0xff] %vm974_vm2, %v4792_v14  ;;  %v4790_v38 = vpop.permute.xlu1 %4789 }
 0xbc1   : > { %4865 = vst.msk [vmem:[#allocation4 + $0xa0] sm:$0xff] %vm974_vm2, %v4790_v38  ;;  %v15704_v38 = vld [vmem:[#allocation4 + $0x10] sm:$0xff] }
 0xbc3   : > { %v6948_v24 = vpop.permute.xlu0 %6947 }
 0xbc4   : > { %7022 = vst.msk [vmem:[#allocation4 + $0xa8] sm:$0xff] %vm1167_vm3, %v6948_v24  ;;  %v6946_v23 = vpop.permute.xlu1 %6945  ;;  %v9222_v24 = vsel %vm9220_vm15, %v15698_v42, 0.0  ;;  %v15778_v20 = vld [vmem:[#allocation4 + $0x90] sm:$0xff] }
 0xbc5   : > { %7021 = vst.msk [vmem:[#allocation4 + $0xa0] sm:$0xff] %vm1167_vm3, %v6946_v23  ;;  %v9221_v23 = vsel %vm9220_vm15, %v15700_v2, 0.0 }
 0xbc6   : > { %v9223_v49 = vadd.f32 %v9222_v24, %v9221_v23 }
 0xbd2   : > { %v10784_v18 = vpop.f32.mrb[72].mxu1 }
 0xbd3   : > { %v9021_v36 = vmax.f32 %v10784_v18, 0.0  ;;  %v8957_v62 = vpop.f32.mrb[73].mxu1 }
 0xbd4   : > { %v9020_v29 = vmax.f32 %v8957_v62, 0.0 }
 0xbd5   : > { %9110 = vrot.lane.b32.xlu0 %v9021_v36, %s11078_s21  ;;  %v15710_v36 = vld [vmem:[#allocation4 + $0x18] sm:$0xff] }
 0xbd6   : > { %9108 = vrot.lane.b32.xlu1 %v9020_v29, %s11078_s21  ;;  %v9224_v29 = vsel %vm9220_vm15, %v15704_v38, 0.0  ;;  %v9226_v7 = vsel %vm9220_vm15, %v15710_v36, 0.0 }
 0xbd9   : > { %4803 = vrot.lane.b32.xlu0 %v4712_v52, %s11076_s19  ;;  %v15716_v52 = vld [vmem:[#allocation4 + $0x20] sm:$0xff] }
 0xbda   : > { %4801 = vrot.lane.b32.xlu1 %v4711_v25, %s11076_s19  ;;  %v9225_v25 = vadd.f32 %v9224_v29, %v9223_v49 }
 0xbdc   : > { %v9227_v4 = vadd.f32 %v9226_v7, %v9225_v25 }
 0xbdd   : > { %6959 = vrot.lane.b32.xlu0 %v6868_v37, %s11077_s20  ;;  %v15720_v37 = vld [vmem:[#allocation4 + $0x28] sm:$0xff] }
 0xbde   : > { %6957 = vrot.lane.b32.xlu1 %v6867_v41, %s11077_s20  ;;  %v9228_v41 = vsel %vm9220_vm15, %v15716_v52, 0.0 }
 0xbdf   : > { %v9229_v63 = vadd.f32 %v9228_v41, %v9227_v4 }
 0xbf2   : > { %v10787_v32 = vpop.f32.mrb[74].mxu1 }
 0xbf3   : > { %v9023_v21 = vmax.f32 %v10787_v32, 0.0  ;;  %v8967_v39 = vpop.f32.mrb[75].mxu1  ;;  %v9230_v32 = vsel %vm9220_vm15, %v15720_v37, 0.0 }
 0xbf4   : > { %v9022_v27 = vmax.f32 %v8967_v39, 0.0  ;;  %v9231_v39 = vadd.f32 %v9230_v32, %v9229_v63 }
 0xbf5   : > { %9114 = vrot.lane.b32.xlu0 %v9023_v21, %s11078_s21  ;;  %v9232_v21 = vsel %vm9220_vm15, %v15724_v54, 0.0 }
 0xbf6   : > { %9112 = vrot.lane.b32.xlu1 %v9022_v27, %s11078_s21  ;;  %v9234_v27 = vsel %vm9220_vm15, %v15728_v10, 0.0  ;;  %v9233_v9 = vadd.f32 %v9232_v21, %v9231_v39 }
 0xbf9   : > { %4807 = vrot.lane.b32.xlu0 %v4714_v8, %s11076_s19  ;;  %v9235_v8 = vadd.f32 %v9234_v27, %v9233_v9 }
 0xbfa   : > { %4805 = vrot.lane.b32.xlu1 %v4713_v17, %s11076_s19  ;;  %v9236_v17 = vsel %vm9220_vm15, %v15734_v58, 0.0 }
 0xbfc   : > { %v9103_v34 = vpop.permute.xlu0 %9102 }
 0xbfd   : > { %9177 = vst.msk [vmem:[#allocation4 + $0xa8] sm:$0xff] %vm1360_vm4, %v9103_v34  ;;  %v9101_v11 = vpop.permute.xlu1 %9100  ;;  %6963 = vrot.lane.b32.xlu0 %v6870_v44, %s11077_s20  ;;  %v9238_v44 = vsel %vm9220_vm15, %v15736_v30, 0.0  ;;  %v15742_v34 = vld [vmem:[#allocation4 + $0x50] sm:$0xff] }
 0xbfe   : > { %9176 = vst.msk [vmem:[#allocation4 + $0xa0] sm:$0xff] %vm1360_vm4, %v9101_v11  ;;  %6961 = vrot.lane.b32.xlu1 %v6869_v31, %s11077_s20  ;;  %v9237_v31 = vadd.f32 %v9236_v17, %v9235_v8 }
 0xc00   : > { %v4796_v33 = vpop.permute.xlu0 %4795  ;;  %v9239_v11 = vadd.f32 %v9238_v44, %v9237_v31 }
 0xc01   : > { %4868 = vst.msk [vmem:[#allocation4 + $0xb8] sm:$0xff] %vm974_vm2, %v4796_v33  ;;  %v4794_v46 = vpop.permute.xlu1 %4793  ;;  %v15744_v33 = vld [vmem:[#allocation4 + $0x58] sm:$0xff] }
 0xc02   : > { %4867 = vst.msk [vmem:[#allocation4 + $0xb0] sm:$0xff] %vm974_vm2, %v4794_v46  ;;  %v9240_v46 = vsel %vm9220_vm15, %v15742_v34, 0.0 }
 0xc03   : > { %v9241_v55 = vadd.f32 %v9240_v46, %v9239_v11 }
 0xc04   : > { %v6952_v57 = vpop.permute.xlu0 %6951  ;;  %v15792_v49 = vld [vmem:[#allocation4 + $0xa8] sm:$0xff] }
 0xc05   : > { %7024 = vst.msk [vmem:[#allocation4 + $0xb8] sm:$0xff] %vm1167_vm3, %v6952_v57  ;;  %v6950_v15 = vpop.permute.xlu1 %6949  ;;  %v9242_v57 = vsel %vm9220_vm15, %v15744_v33, 0.0  ;;  %v15786_v23 = vld [vmem:[#allocation4 + $0xa0] sm:$0xff]  ;;  %v9262_v41 = vsel %vm9220_vm15, %v15792_v49, 0.0 }
 0xc06   : > { %7023 = vst.msk [vmem:[#allocation4 + $0xb0] sm:$0xff] %vm1167_vm3, %v6950_v15 }
 0xc13   : > { %v10790_v47 = vpop.f32.mrb[76].mxu1 }
 0xc14   : > { %v9025_v5 = vmax.f32 %v10790_v47, 0.0  ;;  %v8977_v40 = vpop.f32.mrb[77].mxu1  ;;  %v15750_v47 = vld [vmem:[#allocation4 + $0x60] sm:$0xff] }
 0xc15   : > { %v9024_v45 = vmax.f32 %v8977_v40, 0.0  ;;  %v9243_v40 = vadd.f32 %v9242_v57, %v9241_v55  ;;  %v9244_v0 = vsel %vm9220_vm15, %v15750_v47, 0.0 }
 0xc16   : > { %9118 = vrot.lane.b32.xlu0 %v9025_v5, %s11078_s21 }
 0xc17   : > { %9116 = vrot.lane.b32.xlu1 %v9024_v45, %s11078_s21  ;;  %v15754_v45 = vld [vmem:[#allocation4 + $0x68] sm:$0xff] }
 0xc1a   : > { %4811 = vrot.lane.b32.xlu0 %v4716_v16, %s11076_s19 }
 0xc1b   : > { %4809 = vrot.lane.b32.xlu1 %v4715_v48, %s11076_s19  ;;  %v9246_v48 = vsel %vm9220_vm15, %v15754_v45, 0.0  ;;  %s15959_s19 = scalar_lea.vmem %s16181_s5, %s16374_s29 }
 0xc1e   : > { %6967 = vrot.lane.b32.xlu0 %v6872_v3, %s11077_s20  ;;  %v9245_v3 = vadd.f32 %v9244_v0, %v9243_v40 }
 0xc1f   : > { %6965 = vrot.lane.b32.xlu1 %v6871_v26, %s11077_s20  ;;  %v15762_v26 = vld [vmem:[#allocation4 + $0x70] sm:$0xff]  ;;  %s10366_s20 = sshll.u32 %s11149_s28, 4 }
 0xc20   : > { %v10793_v59 = vpop.f32.mrb[78].mxu1  ;;  %s16100_s22 = scalar_lea.hbm %s16182_s6, %s10366_s20  ;;  %s16108_s29 = scalar_lea.hbm %s16183_s7, %s10366_s20 }
 0xc21   : > { %v8987_v53 = vpop.f32.mrb[79].mxu1  ;;  %v9027_v43 = vmax.f32 %v10793_v59, 0.0 }
 0xc22   : > { %v9026_v1 = vmax.f32 %v8987_v53, 0.0  ;;  %v9247_v53 = vadd.f32 %v9246_v48, %v9245_v3 }
 0xc24   : > { %9120 = vrot.lane.b32.xlu1 %v9026_v1, %s11078_s21  ;;  %v15764_v1 = vld [vmem:[#allocation4 + $0x78] sm:$0xff] }
 0xc27   : > { %v9107_v51 = vpop.permute.xlu0 %9106 }
 0xc28   : > { %9179 = vst.msk [vmem:[#allocation4 + $0xb8] sm:$0xff] %vm1360_vm4, %v9107_v51  ;;  %v9105_v6 = vpop.permute.xlu1 %9104  ;;  %9122 = vrot.lane.b32.xlu1 %v9027_v43, %s11078_s21  ;;  %v9248_v51 = vsel %vm9220_vm15, %v15762_v26, 0.0  ;;  %s10052_s21 = sshll.u32 %s281_s9, 4  ;;  %s16102_s21 = int_to_ptr.vmem [resolvable:$true] %s10052_s21 }
 0xc29   : > { %9178 = vst.msk [vmem:[#allocation4 + $0xb0] sm:$0xff] %vm1360_vm4, %v9105_v6  ;;  %v9250_v6 = vsel %vm9220_vm15, %v15764_v1, 0.0  ;;  %s10978_s8 = scalar_lea.vmem %s16102_s21, 16 }
 0xc2a   : > { %p10979_p11 = scmp.ne.s32.totalorder %s16102_s21, %s10978_s8 }
 0xc2b   : > { %v4800_v60 = vpop.permute.xlu0 %4799 }
 0xc2c   : > { %4870 = vst.msk [vmem:[#allocation4 + $0xc8] sm:$0xff] %vm974_vm2, %v4800_v60  ;;  %v4798_v13 = vpop.permute.xlu1 %4797  ;;  %v9249_v60 = vadd.f32 %v9248_v51, %v9247_v53  ;;  %p10980_p12 = pnand %p10979_p11, %p11166_p5 }
 0xc2d   : > { %4869 = vst.msk [vmem:[#allocation4 + $0xc0] sm:$0xff] %vm974_vm2, %v4798_v13  ;;  %v15772_v13 = vld [vmem:[#allocation4 + $0x80] sm:$0xff] }
 0xc2e   : > { %v9252_v35 = vsel %vm9220_vm15, %v15772_v13, 0.0  ;;  %p10981_p13 = pneg %p10980_p12 }
 0xc2f   : > { %v6956_v56 = vpop.permute.xlu0 %6955  ;;  %v15800_v32 = vld [vmem:[#allocation4 + $0xb8] sm:$0xff] }
 0xc30   : > { %7026 = vst.msk [vmem:[#allocation4 + $0xc8] sm:$0xff] %vm1167_vm3, %v6956_v56  ;;  %v6954_v22 = vpop.permute.xlu1 %6953  ;;  %v9251_v56 = vadd.f32 %v9250_v6, %v9249_v60  ;;  %v15794_v25 = vld [vmem:[#allocation4 + $0xb0] sm:$0xff]  ;;  %v9266_v8 = vsel %vm9220_vm15, %v15800_v32, 0.0 }
 0xc31   : > { %7025 = vst.msk [vmem:[#allocation4 + $0xc0] sm:$0xff] %vm1167_vm3, %v6954_v22  ;;  %v15774_v22 = vld [vmem:[#allocation4 + $0x88] sm:$0xff]  ;;  %v9264_v4 = vsel %vm9220_vm15, %v15794_v25, 0.0 }
 0xc32   : > { %v9254_v28 = vsel %vm9220_vm15, %v15774_v22, 0.0 }
 0xc47   : > { %v9111_v12 = vpop.permute.xlu0 %9110 }
 0xc48   : > { %9181 = vst.msk [vmem:[#allocation4 + $0xc8] sm:$0xff] %vm1360_vm4, %v9111_v12  ;;  %v9109_v61 = vpop.permute.xlu1 %9108  ;;  %v9253_v12 = vadd.f32 %v9252_v35, %v9251_v56 }
 0xc49   : > { %9180 = vst.msk [vmem:[#allocation4 + $0xc0] sm:$0xff] %vm1360_vm4, %v9109_v61  ;;  %v9256_v61 = vsel %vm9220_vm15, %v15778_v20, 0.0 }
 0xc4b   : > { %v4804_v50 = vpop.permute.xlu0 %4803 }
 0xc4c   : > { %4872 = vst.msk [vmem:[#allocation4 + $0xd8] sm:$0xff] %vm974_vm2, %v4804_v50  ;;  %v4802_v14 = vpop.permute.xlu1 %4801  ;;  %v9255_v50 = vadd.f32 %v9254_v28, %v9253_v12 }
 0xc4d   : > { %4871 = vst.msk [vmem:[#allocation4 + $0xd0] sm:$0xff] %vm974_vm2, %v4802_v14  ;;  %v15784_v14 = vld [vmem:[#allocation4 + $0x98] sm:$0xff] }
 0xc4e   : > { %v9257_v24 = vadd.f32 %v9256_v61, %v9255_v50 }
 0xc4f   : > { %v6960_v18 = vpop.permute.xlu0 %6959  ;;  %v15811_v11 = vld [vmem:[#allocation4 + $0xc8] sm:$0xff] }
 0xc50   : > { %7028 = vst.msk [vmem:[#allocation4 + $0xd8] sm:$0xff] %vm1167_vm3, %v6960_v18  ;;  %v6958_v62 = vpop.permute.xlu1 %6957  ;;  %v9258_v18 = vsel %vm9220_vm15, %v15784_v14, 0.0  ;;  %v15803_v9 = vld [vmem:[#allocation4 + $0xc0] sm:$0xff] }
 0xc51   : > { %7027 = vst.msk [vmem:[#allocation4 + $0xd0] sm:$0xff] %vm1167_vm3, %v6958_v62  ;;  %v9260_v62 = vsel %vm9220_vm15, %v15786_v23, 0.0  ;;  %v9259_v29 = vadd.f32 %v9258_v18, %v9257_v24  ;;  %v9268_v44 = vsel %vm9220_vm15, %v15803_v9, 0.0 }
 0xc53   : > { %v9261_v7 = vadd.f32 %v9260_v62, %v9259_v29 }
 0xc55   : > { %v9263_v63 = vadd.f32 %v9262_v41, %v9261_v7 }
 0xc57   : > { %v9265_v27 = vadd.f32 %v9264_v4, %v9263_v63 }
 0xc59   : > { %v9267_v46 = vadd.f32 %v9266_v8, %v9265_v27 }
 0xc5b   : > { %v9269_v57 = vadd.f32 %v9268_v44, %v9267_v46  ;;  %v9494_v44 = vld [vmem:[%s16180_s4] sm:$0xff] }
 0xc67   : > { %v9115_v15 = vpop.permute.xlu0 %9114 }
 0xc68   : > { %9183 = vst.msk [vmem:[#allocation4 + $0xd8] sm:$0xff] %vm1360_vm4, %v9115_v15  ;;  %v9113_v5 = vpop.permute.xlu1 %9112 }
 0xc69   : > { %9182 = vst.msk [vmem:[#allocation4 + $0xd0] sm:$0xff] %vm1360_vm4, %v9113_v5  ;;  %v9270_v5 = vsel %vm9220_vm15, %v15811_v11, 0.0 }
 0xc6b   : > { %v4808_v16 = vpop.permute.xlu0 %4807 }
 0xc6c   : > { %4874 = vst.msk [vmem:[#allocation4 + $0xe8] sm:$0xff] %vm974_vm2, %v4808_v16  ;;  %v4806_v19 = vpop.permute.xlu1 %4805 }
 0xc6d   : > { %4873 = vst.msk [vmem:[#allocation4 + $0xe0] sm:$0xff] %vm974_vm2, %v4806_v19  ;;  %v9271_v19 = vadd.f32 %v9270_v5, %v9269_v57  ;;  %v9496_v57 = vld [vmem:[%s16180_s4 + $0x10] sm:$0xf] }
 0xc6f   : > { %v6964_v59 = vpop.permute.xlu0 %6963  ;;  %v15822_v16 = vld [vmem:[#allocation4 + $0xd8] sm:$0xff] }
 0xc70   : > { %7030 = vst.msk [vmem:[#allocation4 + $0xe8] sm:$0xff] %vm1167_vm3, %v6964_v59  ;;  %v6962_v43 = vpop.permute.xlu1 %6961  ;;  %v15814_v15 = vld [vmem:[#allocation4 + $0xd0] sm:$0xff]  ;;  %v9274_v53 = vsel %vm9220_vm15, %v15822_v16, 0.0 }
 0xc71   : > { %7029 = vst.msk [vmem:[#allocation4 + $0xe0] sm:$0xff] %vm1167_vm3, %v6962_v43  ;;  %v9272_v0 = vsel %vm9220_vm15, %v15814_v15, 0.0 }
 0xc72   : > { %v9273_v59 = vadd.f32 %v9272_v0, %v9271_v19 }
 0xc74   : > { %v9275_v6 = vadd.f32 %v9274_v53, %v9273_v59 }
 0xc88   : > { %v9119_v21 = vpop.permute.xlu0 %9118 }
 0xc89   : > { %9185 = vst.msk [vmem:[#allocation4 + $0xe8] sm:$0xff] %vm1360_vm4, %v9119_v21  ;;  %v9117_v39 = vpop.permute.xlu1 %9116 }
 0xc8a   : > { %9184 = vst.msk [vmem:[#allocation4 + $0xe0] sm:$0xff] %vm1360_vm4, %v9117_v39 }
 0xc8c   : > { %v4812_v17 = vpop.permute.xlu0 %4811 }
 0xc8d   : > { %4876 = vst.msk [vmem:[#allocation4 + $0xf8] sm:$0xff] %vm974_vm2, %v4812_v17  ;;  %v4810_v31 = vpop.permute.xlu1 %4809 }
 0xc8e   : > { %4875 = vst.msk [vmem:[#allocation4 + $0xf0] sm:$0xff] %vm974_vm2, %v4810_v31  ;;  %v9495_v31 = vld [vmem:[%s16180_s4 + $0x8] sm:$0xff]  ;;  %vm9923_vm2 = vcmask 57344  }
 0xc8f   : > { %v10903_v46 = vpack.c.bf16 %v9495_v31, %v9494_v44 }
 0xc90   : > { %v6968_v55 = vpop.permute.xlu0 %6967  ;;  %v15832_v60 = vld [vmem:[#allocation4 + $0xe8] sm:$0xff] }
 0xc91   : > { %7032 = vst.msk [vmem:[#allocation4 + $0xf8] sm:$0xff] %vm1167_vm3, %v6968_v55  ;;  %v6966_v40 = vpop.permute.xlu1 %6965  ;;  %v15824_v3 = vld [vmem:[#allocation4 + $0xe0] sm:$0xff]  ;;  %v9278_v28 = vsel %vm9220_vm15, %v15832_v60, 0.0  ;;  %10904 = vmatprep.subr.bf16.mxu0 %v10903_v46 }
 0xc92   : > { %7031 = vst.msk [vmem:[#allocation4 + $0xf0] sm:$0xff] %vm1167_vm3, %v6966_v40  ;;  %v9276_v43 = vsel %vm9220_vm15, %v15824_v3, 0.0 }
 0xc93   : > { %v9277_v56 = vadd.f32 %v9276_v43, %v9275_v6 }
 0xc95   : > { %v9279_v61 = vadd.f32 %v9278_v28, %v9277_v56 }
 0xc96   : > { %v9121_v48 = vpop.permute.xlu1 %9120 }
 0xc97   : > { %9186 = vst.msk [vmem:[#allocation4 + $0xf0] sm:$0xff] %vm1360_vm4, %v9121_v48  ;;  %v9458_v48 = vlaneseq }
 0xc99   : > { %v9459_v59 = vshrl.u32 %v9458_v48, 7 }
 0xc9a   : > { %v9123_v51 = vpop.permute.xlu1 %9122 }
 0xc9b   : > { %9187 = vst.msk [vmem:[#allocation4 + $0xf8] sm:$0xff] %vm1360_vm4, %v9123_v51  ;;  %v9460_v53 = vsub.s32 0, %v9459_v59 }
 0xc9e   : > { %v15834_v35 = vld [vmem:[#allocation4 + $0xf0] sm:$0xff] }
 0xc9f   : > { %v9280_v12 = vsel %vm9220_vm15, %v15834_v35, 0.0 }
 0xca0   : > { %v9281_v24 = vadd.f32 %v9280_v12, %v9279_v61 }
 0xca2   : > { %v15840_v50 = vld [vmem:[#allocation4 + $0xf8] sm:$0xff] }
 0xca3   : > { %v9282_v18 = vsel %vm9220_vm15, %v15840_v50, 0.0 }
 0xca4   : > { %v9283_v62 = vadd.f32 %v9282_v18, %v9281_v24 }
 0xca6   : > { %v9284_v29 = vrot.slane %v9283_v62, 4 }
 0xca8   : > { %v9285_v7 = vadd.f32 %v9284_v29, %v9283_v62 }
 0xcaa   : > { %v9286_v41 = vrot.slane %v9285_v7, 2 }
 0xcac   : > { %v9287_v4 = vadd.f32 %v9286_v41, %v9285_v7 }
 0xcae   : > { %v9288_v63 = vrot.slane %v9287_v4, 1 }
 0xcb0   : > { %v9289_v21 = vadd.f32 %v9288_v63, %v9287_v4 }
 0xcb2   : > { %v9291_v39 = vmul.f32 0.00390625, %v9289_v21 }
 0xcb4   : > { %10801 = vmatmul.mubr.msk.f32.vlgmr.msra.gmra.mrb[48].mxu0 %vm9220_vm15, %v9291_v39 }
 0xcb5   : > { %10906 = vmatpush3.bf16.msra.mxu0 %v10903_v46 }
 0xcb6   : > { %10814 = vmatprep.subr.msk.mxu0 %vm2300_vm7, %v9496_v57 }
 0xcb9   : > { %10815 = vmatpush3.msk.msra.mxu0 %vm2300_vm7, %v9496_v57 }
 0xd87   : > { %v9367_v27 = vpop.f32.mrb[48].mxu0 }
 0xd88   : > { %v9371_v8 = vmax.f32 %v9367_v27, 0.0  ;;  %v10802_v17 = vpop.f32.mrb[49].mxu0 }
 0xd8a   : > { %10808 = vmatmul.mubr.msk.f32.vlgmr.msra.gmra.mrb[80].mxu1 %vm9374_vm0, %v9371_v8 }
 0xe5d   : > { %v9448_v55 = vpop.f32.mrb[80].mxu1 }
 0xe5e   : > { %v10332_v5 = vmul.f32 -1.442695, %v9448_v55  ;;  %v10809_v40 = vpop.f32.mrb[81].mxu1 }
 0xe60   : > { %10969 = vpow2.f32 %v10332_v5 }
 0xe6a   : > { %v10970_v0 = vpop.eup %10969 }
 0xe6b   : > { %v9455_v19 = vadd.f32 1.0, %v10970_v0 }
 0xe6d   : > { %10971 = vrcp.f32 %v9455_v19 }
 0xe77   : > { %v10972_v43 = vpop.eup %10971 }
 0xe78   : > { %v15856_v51 = vrot.slane %v10972_v43, %v9460_v53 }
 0xe7a   : > { %v9462_v6 = vmul.f32 %v15856_v51, %v15700_v2  ;;  %v9463_v56 = vmul.f32 %v15856_v51, %v15698_v42  ;;  %v9464_v28 = vmul.f32 %v15856_v51, %v15704_v38  ;;  %v9465_v12 = vmul.f32 %v15856_v51, %v15710_v36 }
 0xe7b   : > { %v9466_v61 = vmul.f32 %v15856_v51, %v15716_v52  ;;  %v9467_v42 = vmul.f32 %v15856_v51, %v15720_v37  ;;  %v9468_v2 = vmul.f32 %v15856_v51, %v15724_v54  ;;  %v9469_v38 = vmul.f32 %v15856_v51, %v15728_v10 }
 0xe7c   : > { %10816 = vmatprep.mubr.msk.f32.mxu0 %vm9220_vm15, %v9462_v6  ;;  %v9470_v36 = vmul.f32 %v15856_v51, %v15734_v58  ;;  %v9471_v52 = vmul.f32 %v15856_v51, %v15736_v30  ;;  %v9472_v37 = vmul.f32 %v15856_v51, %v15742_v34  ;;  %v9473_v54 = vmul.f32 %v15856_v51, %v15744_v33 }
 0xe7d   : > { %10817 = vmatmul.mubr.msk.f32.vlgmr.msra.gmra.mrb[50].mxu0 %vm9220_vm15, %v9463_v56  ;;  %v9474_v10 = vmul.f32 %v15856_v51, %v15750_v47  ;;  %v9475_v58 = vmul.f32 %v15856_v51, %v15754_v45  ;;  %v9476_v30 = vmul.f32 %v15856_v51, %v15762_v26  ;;  %v9477_v34 = vmul.f32 %v15856_v51, %v15764_v1 }
 0xe7e   : > { %10819 = vmatprep.mubr.msk.f32.mxu0 %vm9220_vm15, %v9464_v28  ;;  %v9478_v33 = vmul.f32 %v15856_v51, %v15772_v13  ;;  %v9479_v47 = vmul.f32 %v15856_v51, %v15774_v22  ;;  %v9480_v45 = vmul.f32 %v15856_v51, %v15778_v20  ;;  %v9481_v26 = vmul.f32 %v15856_v51, %v15784_v14 }
 0xe7f   : > { %v9482_v1 = vmul.f32 %v15856_v51, %v15786_v23  ;;  %v9483_v13 = vmul.f32 %v15856_v51, %v15792_v49  ;;  %v9484_v22 = vmul.f32 %v15856_v51, %v15794_v25  ;;  %v9485_v20 = vmul.f32 %v15856_v51, %v15800_v32 }
 0xe80   : > { %v9486_v14 = vmul.f32 %v15856_v51, %v15803_v9  ;;  %v9487_v23 = vmul.f32 %v15856_v51, %v15811_v11  ;;  %v9488_v49 = vmul.f32 %v15856_v51, %v15814_v15  ;;  %v9489_v25 = vmul.f32 %v15856_v51, %v15822_v16 }
 0xe81   : > { %10820 = vmatmul.mubr.msk.f32.gmra.mrb[52].mxu0 %vm9220_vm15, %v9465_v12  ;;  %v9490_v32 = vmul.f32 %v15856_v51, %v15824_v3  ;;  %v9491_v9 = vmul.f32 %v15856_v51, %v15832_v60  ;;  %v9492_v11 = vmul.f32 %v15856_v51, %v15834_v35  ;;  %v9493_v15 = vmul.f32 %v15856_v51, %v15840_v50 }
 0xe82   : > { %10822 = vmatprep.mubr.msk.f32.mxu0 %vm9220_vm15, %v9466_v61 }
 0xe85   : > { %10823 = vmatmul.mubr.msk.f32.gmra.mrb[54].mxu0 %vm9220_vm15, %v9467_v42 }
 0xe86   : > { %10825 = vmatprep.mubr.msk.f32.mxu0 %vm9220_vm15, %v9468_v2 }
 0xe89   : > { %10826 = vmatmul.mubr.msk.f32.gmra.mrb[56].mxu0 %vm9220_vm15, %v9469_v38 }
 0xe8a   : > { %10828 = vmatprep.mubr.msk.f32.mxu0 %vm9220_vm15, %v9470_v36 }
 0xe8d   : > { %10829 = vmatmul.mubr.msk.f32.gmra.mrb[58].mxu0 %vm9220_vm15, %v9471_v52 }
 0xe8e   : > { %10831 = vmatprep.mubr.msk.f32.mxu0 %vm9220_vm15, %v9472_v37 }
 0xe91   : > { %10832 = vmatmul.mubr.msk.f32.gmra.mrb[60].mxu0 %vm9220_vm15, %v9473_v54 }
 0xe92   : > { %10834 = vmatprep.mubr.msk.f32.mxu0 %vm9220_vm15, %v9474_v10 }
 0xe95   : > { %10835 = vmatmul.mubr.msk.f32.gmra.mrb[62].mxu0 %vm9220_vm15, %v9475_v58 }
 0xe96   : > { %10837 = vmatprep.mubr.msk.f32.mxu0 %vm9220_vm15, %v9476_v30 }
 0xe99   : > { %10838 = vmatmul.mubr.msk.f32.gmra.mrb[64].mxu0 %vm9220_vm15, %v9477_v34 }
 0xe9a   : > { %10840 = vmatprep.mubr.msk.f32.mxu0 %vm9220_vm15, %v9478_v33 }
 0xe9d   : > { %10841 = vmatmul.mubr.msk.f32.gmra.mrb[66].mxu0 %vm9220_vm15, %v9479_v47 }
 0xe9e   : > { %10843 = vmatprep.mubr.msk.f32.mxu0 %vm9220_vm15, %v9480_v45 }
 0xea1   : > { %10844 = vmatmul.mubr.msk.f32.gmra.mrb[68].mxu0 %vm9220_vm15, %v9481_v26 }
 0xea2   : > { %10846 = vmatprep.mubr.msk.f32.mxu0 %vm9220_vm15, %v9482_v1 }
 0xea5   : > { %10847 = vmatmul.mubr.msk.f32.gmra.mrb[70].mxu0 %vm9220_vm15, %v9483_v13 }
 0xea6   : > { %10849 = vmatprep.mubr.msk.f32.mxu0 %vm9220_vm15, %v9484_v22 }
 0xea9   : > { %10850 = vmatmul.mubr.msk.f32.gmra.mrb[72].mxu0 %vm9220_vm15, %v9485_v20 }
 0xeaa   : > { %10852 = vmatprep.mubr.msk.f32.mxu0 %vm9220_vm15, %v9486_v14 }
 0xead   : > { %10853 = vmatmul.mubr.msk.f32.gmra.mrb[74].mxu0 %vm9220_vm15, %v9487_v23 }
 0xeae   : > { %10855 = vmatprep.mubr.msk.f32.mxu0 %vm9220_vm15, %v9488_v49 }
 0xeb1   : > { %10856 = vmatmul.mubr.msk.f32.gmra.mrb[76].mxu0 %vm9220_vm15, %v9489_v25 }
 0xeb2   : > { %10858 = vmatprep.mubr.msk.f32.mxu0 %vm9220_vm15, %v9490_v32 }
 0xeb5   : > { %10859 = vmatmul.mubr.msk.f32.gmra.mrb[78].mxu0 %vm9220_vm15, %v9491_v9 }
 0xeb6   : > { %10861 = vmatprep.mubr.msk.f32.mxu0 %vm9220_vm15, %v9492_v11 }
 0xeb9   : > { %10862 = vmatmul.mubr.msk.f32.gmra.mrb[80].mxu0 %vm9220_vm15, %v9493_v15 }
 0xf50   : > { %v10818_v16 = vpop.f32.mrb[50].mxu0 }
 0xf51   : > { %9823 = vst.msk [vmem:[%s15959_s19 + $0x8] sm:$0xff] %vm9821_vm1, %v10818_v16  ;;  %v9855_v3 = vsel %vm9821_vm1, %v10818_v16, 0.0  ;;  %v9926_v60 = vmul.f32 %v10818_v16, %v10818_v16  ;;  %v9662_v35 = vpop.f32.mrb[51].mxu0 }
 0xf52   : > { %9822 = vst.msk [vmem:[%s15959_s19] sm:$0xff] %vm9821_vm1, %v9662_v35  ;;  %v9854_v50 = vsel %vm9821_vm1, %v9662_v35, 0.0  ;;  %v9925_v24 = vmul.f32 %v9662_v35, %v9662_v35 }
 0xf53   : > { %v9958_v18 = vsel %vm9821_vm1, %v9926_v60, 0.0  ;;  %v9856_v62 = vadd.f32 %v9855_v3, %v9854_v50 }
 0xf54   : > { %v9957_v29 = vsel %vm9821_vm1, %v9925_v24, 0.0  ;;  %v10821_v7 = vpop.f32.mrb[52].mxu0 }
 0xf55   : > { %v9959_v41 = vadd.f32 %v9958_v18, %v9957_v29  ;;  %9825 = vst.msk [vmem:[%s15959_s19 + $0x18] sm:$0xff] %vm9821_vm1, %v10821_v7  ;;  %v9672_v4 = vpop.f32.mrb[53].mxu0  ;;  %v9928_v63 = vmul.f32 %v10821_v7, %v10821_v7  ;;  %v9859_v8 = vsel %vm9821_vm1, %v10821_v7, 0.0 }
 0xf56   : > { %9824 = vst.msk [vmem:[%s15959_s19 + $0x10] sm:$0xff] %vm9821_vm1, %v9672_v4  ;;  %v9857_v21 = vsel %vm9821_vm1, %v9672_v4, 0.0  ;;  %v9927_v39 = vmul.f32 %v9672_v4, %v9672_v4 }
 0xf57   : > { %v9858_v27 = vadd.f32 %v9857_v21, %v9856_v62  ;;  %v9962_v55 = vsel %vm9821_vm1, %v9928_v63, 0.0 }
 0xf58   : > { %v9960_v17 = vsel %vm9821_vm1, %v9927_v39, 0.0  ;;  %v10824_v44 = vpop.f32.mrb[54].mxu0 }
 0xf59   : > { %v9961_v31 = vadd.f32 %v9960_v17, %v9959_v41  ;;  %9827 = vst.msk [vmem:[%s15959_s19 + $0x28] sm:$0xff] %vm9821_vm1, %v10824_v44  ;;  %v9682_v46 = vpop.f32.mrb[55].mxu0  ;;  %v9860_v57 = vadd.f32 %v9859_v8, %v9858_v27  ;;  %v9930_v5 = vmul.f32 %v10824_v44, %v10824_v44  ;;  %v9863_v59 = vsel %vm9821_vm1, %v10824_v44, 0.0 }
 0xf5a   : > { %9826 = vst.msk [vmem:[%s15959_s19 + $0x20] sm:$0xff] %vm9821_vm1, %v9682_v46  ;;  %v9861_v40 = vsel %vm9821_vm1, %v9682_v46, 0.0  ;;  %v9929_v0 = vmul.f32 %v9682_v46, %v9682_v46 }
 0xf5b   : > { %v9862_v19 = vadd.f32 %v9861_v40, %v9860_v57  ;;  %v9963_v48 = vadd.f32 %v9962_v55, %v9961_v31  ;;  %v9966_v28 = vsel %vm9821_vm1, %v9930_v5, 0.0 }
 0xf5c   : > { %v9964_v53 = vsel %vm9821_vm1, %v9929_v0, 0.0  ;;  %v10827_v43 = vpop.f32.mrb[56].mxu0 }
 0xf5d   : > { %v9965_v51 = vadd.f32 %v9964_v53, %v9963_v48  ;;  %9829 = vst.msk [vmem:[%s15959_s19 + $0x38] sm:$0xff] %vm9821_vm1, %v10827_v43  ;;  %v9692_v6 = vpop.f32.mrb[57].mxu0  ;;  %v9864_v56 = vadd.f32 %v9863_v59, %v9862_v19  ;;  %v9932_v12 = vmul.f32 %v10827_v43, %v10827_v43  ;;  %v9867_v36 = vsel %vm9821_vm1, %v10827_v43, 0.0 }
 0xf5e   : > { %9828 = vst.msk [vmem:[%s15959_s19 + $0x30] sm:$0xff] %vm9821_vm1, %v9692_v6  ;;  %v9865_v61 = vsel %vm9821_vm1, %v9692_v6, 0.0  ;;  %v9931_v42 = vmul.f32 %v9692_v6, %v9692_v6 }
 0xf5f   : > { %v9866_v2 = vadd.f32 %v9865_v61, %v9864_v56  ;;  %v9967_v38 = vadd.f32 %v9966_v28, %v9965_v51  ;;  %v9970_v30 = vsel %vm9821_vm1, %v9932_v12, 0.0 }
 0xf60   : > { %v9968_v52 = vsel %vm9821_vm1, %v9931_v42, 0.0  ;;  %v10830_v37 = vpop.f32.mrb[58].mxu0 }
 0xf61   : > { %v9969_v54 = vadd.f32 %v9968_v52, %v9967_v38  ;;  %9831 = vst.msk [vmem:[%s15959_s19 + $0x48] sm:$0xff] %vm9821_vm1, %v10830_v37  ;;  %v9702_v10 = vpop.f32.mrb[59].mxu0  ;;  %v9868_v58 = vadd.f32 %v9867_v36, %v9866_v2  ;;  %v9934_v34 = vmul.f32 %v10830_v37, %v10830_v37  ;;  %v9871_v1 = vsel %vm9821_vm1, %v10830_v37, 0.0 }
 0xf62   : > { %9830 = vst.msk [vmem:[%s15959_s19 + $0x40] sm:$0xff] %vm9821_vm1, %v9702_v10  ;;  %v9869_v33 = vsel %vm9821_vm1, %v9702_v10, 0.0  ;;  %v9933_v47 = vmul.f32 %v9702_v10, %v9702_v10 }
 0xf63   : > { %v9870_v45 = vadd.f32 %v9869_v33, %v9868_v58  ;;  %v9971_v26 = vadd.f32 %v9970_v30, %v9969_v54  ;;  %v9974_v49 = vsel %vm9821_vm1, %v9934_v34, 0.0 }
 0xf64   : > { %v9972_v13 = vsel %vm9821_vm1, %v9933_v47, 0.0  ;;  %v10833_v22 = vpop.f32.mrb[60].mxu0 }
 0xf65   : > { %v9973_v20 = vadd.f32 %v9972_v13, %v9971_v26  ;;  %9833 = vst.msk [vmem:[%s15959_s19 + $0x58] sm:$0xff] %vm9821_vm1, %v10833_v22  ;;  %v9712_v14 = vpop.f32.mrb[61].mxu0  ;;  %v9872_v23 = vadd.f32 %v9871_v1, %v9870_v45  ;;  %v9936_v25 = vmul.f32 %v10833_v22, %v10833_v22  ;;  %v9875_v16 = vsel %vm9821_vm1, %v10833_v22, 0.0 }
 0xf66   : > { %9832 = vst.msk [vmem:[%s15959_s19 + $0x50] sm:$0xff] %vm9821_vm1, %v9712_v14  ;;  %v9873_v32 = vsel %vm9821_vm1, %v9712_v14, 0.0  ;;  %v9935_v9 = vmul.f32 %v9712_v14, %v9712_v14 }
 0xf67   : > { %v9874_v11 = vadd.f32 %v9873_v32, %v9872_v23  ;;  %v9975_v15 = vadd.f32 %v9974_v49, %v9973_v20  ;;  %v9978_v18 = vsel %vm9821_vm1, %v9936_v25, 0.0 }
 0xf68   : > { %v9976_v3 = vsel %vm9821_vm1, %v9935_v9, 0.0  ;;  %v10836_v60 = vpop.f32.mrb[62].mxu0 }
 0xf69   : > { %v9977_v35 = vadd.f32 %v9976_v3, %v9975_v15  ;;  %9835 = vst.msk [vmem:[%s15959_s19 + $0x68] sm:$0xff] %vm9821_vm1, %v10836_v60  ;;  %v9722_v50 = vpop.f32.mrb[63].mxu0  ;;  %v9876_v24 = vadd.f32 %v9875_v16, %v9874_v11  ;;  %v9938_v62 = vmul.f32 %v10836_v60, %v10836_v60  ;;  %v9879_v63 = vsel %vm9821_vm1, %v10836_v60, 0.0 }
 0xf6a   : > { %9834 = vst.msk [vmem:[%s15959_s19 + $0x60] sm:$0xff] %vm9821_vm1, %v9722_v50  ;;  %v9877_v29 = vsel %vm9821_vm1, %v9722_v50, 0.0  ;;  %v9937_v7 = vmul.f32 %v9722_v50, %v9722_v50 }
 0xf6b   : > { %v9878_v41 = vadd.f32 %v9877_v29, %v9876_v24  ;;  %v9979_v4 = vadd.f32 %v9978_v18, %v9977_v35  ;;  %v9982_v44 = vsel %vm9821_vm1, %v9938_v62, 0.0 }
 0xf6c   : > { %v9980_v21 = vsel %vm9821_vm1, %v9937_v7, 0.0  ;;  %v10839_v39 = vpop.f32.mrb[64].mxu0 }
 0xf6d   : > { %v9981_v27 = vadd.f32 %v9980_v21, %v9979_v4  ;;  %9837 = vst.msk [vmem:[%s15959_s19 + $0x78] sm:$0xff] %vm9821_vm1, %v10839_v39  ;;  %v9732_v8 = vpop.f32.mrb[65].mxu0  ;;  %v9880_v17 = vadd.f32 %v9879_v63, %v9878_v41  ;;  %v9940_v31 = vmul.f32 %v10839_v39, %v10839_v39  ;;  %v9883_v40 = vsel %vm9821_vm1, %v10839_v39, 0.0 }
 0xf6e   : > { %9836 = vst.msk [vmem:[%s15959_s19 + $0x70] sm:$0xff] %vm9821_vm1, %v9732_v8  ;;  %v9881_v46 = vsel %vm9821_vm1, %v9732_v8, 0.0  ;;  %v9939_v57 = vmul.f32 %v9732_v8, %v9732_v8 }
 0xf6f   : > { %v9882_v55 = vadd.f32 %v9881_v46, %v9880_v17  ;;  %v9983_v5 = vadd.f32 %v9982_v44, %v9981_v27  ;;  %v9986_v43 = vsel %vm9821_vm1, %v9940_v31, 0.0 }
 0xf70   : > { %v9984_v0 = vsel %vm9821_vm1, %v9939_v57, 0.0  ;;  %v10842_v19 = vpop.f32.mrb[66].mxu0 }
 0xf71   : > { %v9985_v48 = vadd.f32 %v9984_v0, %v9983_v5  ;;  %9839 = vst.msk [vmem:[%s15959_s19 + $0x88] sm:$0xff] %vm9821_vm1, %v10842_v19  ;;  %v9742_v59 = vpop.f32.mrb[67].mxu0  ;;  %v9884_v53 = vadd.f32 %v9883_v40, %v9882_v55  ;;  %v9942_v51 = vmul.f32 %v10842_v19, %v10842_v19  ;;  %v9887_v61 = vsel %vm9821_vm1, %v10842_v19, 0.0 }
 0xf72   : > { %9838 = vst.msk [vmem:[%s15959_s19 + $0x80] sm:$0xff] %vm9821_vm1, %v9742_v59  ;;  %v9885_v6 = vsel %vm9821_vm1, %v9742_v59, 0.0  ;;  %v9941_v56 = vmul.f32 %v9742_v59, %v9742_v59 }
 0xf73   : > { %v9886_v28 = vadd.f32 %v9885_v6, %v9884_v53  ;;  %v9987_v12 = vadd.f32 %v9986_v43, %v9985_v48  ;;  %v9990_v37 = vsel %vm9821_vm1, %v9942_v51, 0.0 }
 0xf74   : > { %v9988_v42 = vsel %vm9821_vm1, %v9941_v56, 0.0  ;;  %v10845_v2 = vpop.f32.mrb[68].mxu0 }
 0xf75   : > { %v9989_v38 = vadd.f32 %v9988_v42, %v9987_v12  ;;  %9841 = vst.msk [vmem:[%s15959_s19 + $0x98] sm:$0xff] %vm9821_vm1, %v10845_v2  ;;  %v9752_v36 = vpop.f32.mrb[69].mxu0  ;;  %v9888_v52 = vadd.f32 %v9887_v61, %v9886_v28  ;;  %v9944_v54 = vmul.f32 %v10845_v2, %v10845_v2  ;;  %v9891_v33 = vsel %vm9821_vm1, %v10845_v2, 0.0 }
 0xf76   : > { %9840 = vst.msk [vmem:[%s15959_s19 + $0x90] sm:$0xff] %vm9821_vm1, %v9752_v36  ;;  %v9889_v10 = vsel %vm9821_vm1, %v9752_v36, 0.0  ;;  %v9943_v58 = vmul.f32 %v9752_v36, %v9752_v36 }
 0xf77   : > { %v9890_v30 = vadd.f32 %v9889_v10, %v9888_v52  ;;  %v9991_v34 = vadd.f32 %v9990_v37, %v9989_v38  ;;  %v9994_v22 = vsel %vm9821_vm1, %v9944_v54, 0.0 }
 0xf78   : > { %v9992_v47 = vsel %vm9821_vm1, %v9943_v58, 0.0  ;;  %v10848_v45 = vpop.f32.mrb[70].mxu0 }
 0xf79   : > { %v9993_v26 = vadd.f32 %v9992_v47, %v9991_v34  ;;  %9843 = vst.msk [vmem:[%s15959_s19 + $0xa8] sm:$0xff] %vm9821_vm1, %v10848_v45  ;;  %v9762_v1 = vpop.f32.mrb[71].mxu0  ;;  %v9892_v13 = vadd.f32 %v9891_v33, %v9890_v30  ;;  %v9946_v20 = vmul.f32 %v10848_v45, %v10848_v45  ;;  %v9895_v32 = vsel %vm9821_vm1, %v10848_v45, 0.0 }
 0xf7a   : > { %9842 = vst.msk [vmem:[%s15959_s19 + $0xa0] sm:$0xff] %vm9821_vm1, %v9762_v1  ;;  %v9893_v14 = vsel %vm9821_vm1, %v9762_v1, 0.0  ;;  %v9945_v23 = vmul.f32 %v9762_v1, %v9762_v1 }
 0xf7b   : > { %v9894_v49 = vadd.f32 %v9893_v14, %v9892_v13  ;;  %v9995_v25 = vadd.f32 %v9994_v22, %v9993_v26  ;;  %v9998_v60 = vsel %vm9821_vm1, %v9946_v20, 0.0 }
 0xf7c   : > { %v9996_v9 = vsel %vm9821_vm1, %v9945_v23, 0.0  ;;  %v10851_v11 = vpop.f32.mrb[72].mxu0 }
 0xf7d   : > { %v9997_v15 = vadd.f32 %v9996_v9, %v9995_v25  ;;  %9845 = vst.msk [vmem:[%s15959_s19 + $0xb8] sm:$0xff] %vm9821_vm1, %v10851_v11  ;;  %v9772_v16 = vpop.f32.mrb[73].mxu0  ;;  %v9896_v3 = vadd.f32 %v9895_v32, %v9894_v49  ;;  %v9948_v35 = vmul.f32 %v10851_v11, %v10851_v11  ;;  %v9899_v29 = vsel %vm9821_vm1, %v10851_v11, 0.0 }
 0xf7e   : > { %9844 = vst.msk [vmem:[%s15959_s19 + $0xb0] sm:$0xff] %vm9821_vm1, %v9772_v16  ;;  %v9897_v50 = vsel %vm9821_vm1, %v9772_v16, 0.0  ;;  %v9947_v24 = vmul.f32 %v9772_v16, %v9772_v16 }
 0xf7f   : > { %v9898_v18 = vadd.f32 %v9897_v50, %v9896_v3  ;;  %v9999_v62 = vadd.f32 %v9998_v60, %v9997_v15  ;;  %v10002_v39 = vsel %vm9821_vm1, %v9948_v35, 0.0 }
 0xf80   : > { %v10000_v7 = vsel %vm9821_vm1, %v9947_v24, 0.0  ;;  %v10854_v41 = vpop.f32.mrb[74].mxu0 }
 0xf81   : > { %v10001_v4 = vadd.f32 %v10000_v7, %v9999_v62  ;;  %9847 = vst.msk [vmem:[%s15959_s19 + $0xc8] sm:$0xff] %vm9821_vm1, %v10854_v41  ;;  %v9782_v63 = vpop.f32.mrb[75].mxu0  ;;  %v9900_v21 = vadd.f32 %v9899_v29, %v9898_v18  ;;  %v9950_v27 = vmul.f32 %v10854_v41, %v10854_v41  ;;  %v9903_v46 = vsel %vm9821_vm1, %v10854_v41, 0.0 }
 0xf82   : > { %9846 = vst.msk [vmem:[%s15959_s19 + $0xc0] sm:$0xff] %vm9821_vm1, %v9782_v63  ;;  %v9901_v8 = vsel %vm9821_vm1, %v9782_v63, 0.0  ;;  %v9949_v17 = vmul.f32 %v9782_v63, %v9782_v63 }
 0xf83   : > { %v9902_v44 = vadd.f32 %v9901_v8, %v9900_v21  ;;  %v10003_v31 = vadd.f32 %v10002_v39, %v10001_v4  ;;  %v10006_v19 = vsel %vm9821_vm1, %v9950_v27, 0.0 }
 0xf84   : > { %v10004_v57 = vsel %vm9821_vm1, %v9949_v17, 0.0  ;;  %v10857_v55 = vpop.f32.mrb[76].mxu0 }
 0xf85   : > { %v10005_v5 = vadd.f32 %v10004_v57, %v10003_v31  ;;  %9849 = vst.msk [vmem:[%s15959_s19 + $0xd8] sm:$0xff] %vm9821_vm1, %v10857_v55  ;;  %v9792_v40 = vpop.f32.mrb[77].mxu0  ;;  %v9904_v0 = vadd.f32 %v9903_v46, %v9902_v44  ;;  %v9952_v48 = vmul.f32 %v10857_v55, %v10857_v55  ;;  %v9907_v6 = vsel %vm9821_vm1, %v10857_v55, 0.0 }
 0xf86   : > { %9848 = vst.msk [vmem:[%s15959_s19 + $0xd0] sm:$0xff] %vm9821_vm1, %v9792_v40  ;;  %v9905_v59 = vsel %vm9821_vm1, %v9792_v40, 0.0  ;;  %v9951_v53 = vmul.f32 %v9792_v40, %v9792_v40 }
 0xf87   : > { %v9906_v43 = vadd.f32 %v9905_v59, %v9904_v0  ;;  %v10007_v51 = vadd.f32 %v10006_v19, %v10005_v5  ;;  %v10010_v2 = vsel %vm9821_vm1, %v9952_v48, 0.0 }
 0xf88   : > { %v10008_v56 = vsel %vm9821_vm1, %v9951_v53, 0.0  ;;  %v10860_v28 = vpop.f32.mrb[78].mxu0 }
 0xf89   : > { %v10009_v12 = vadd.f32 %v10008_v56, %v10007_v51  ;;  %9851 = vst.msk [vmem:[%s15959_s19 + $0xe8] sm:$0xff] %vm9821_vm1, %v10860_v28  ;;  %v9802_v61 = vpop.f32.mrb[79].mxu0  ;;  %v9908_v42 = vadd.f32 %v9907_v6, %v9906_v43  ;;  %v9954_v38 = vmul.f32 %v10860_v28, %v10860_v28  ;;  %v9911_v10 = vsel %vm9821_vm1, %v10860_v28, 0.0 }
 0xf8a   : > { %9850 = vst.msk [vmem:[%s15959_s19 + $0xe0] sm:$0xff] %vm9821_vm1, %v9802_v61  ;;  %v9909_v36 = vsel %vm9821_vm1, %v9802_v61, 0.0  ;;  %v9953_v52 = vmul.f32 %v9802_v61, %v9802_v61 }
 0xf8b   : > { %v9910_v37 = vadd.f32 %v9909_v36, %v9908_v42  ;;  %v10011_v54 = vadd.f32 %v10010_v2, %v10009_v12  ;;  %v10014_v26 = vsel %vm9821_vm1, %v9954_v38, 0.0 }
 0xf8c   : > { %v10012_v58 = vsel %vm9821_vm1, %v9953_v52, 0.0  ;;  %v10863_v30 = vpop.f32.mrb[80].mxu0 }
 0xf8d   : > { %v10013_v34 = vadd.f32 %v10012_v58, %v10011_v54  ;;  %9853 = vst.msk [vmem:[%s15959_s19 + $0xf8] sm:$0xff] %vm9821_vm1, %v10863_v30  ;;  %v9956_v33 = vmul.f32 %v10863_v30, %v10863_v30  ;;  %v9812_v47 = vpop.f32.mrb[81].mxu0  ;;  %v9912_v45 = vadd.f32 %v9911_v10, %v9910_v37  ;;  %v9915_v23 = vsel %vm9821_vm1, %v10863_v30, 0.0 }
 0xf8e   : > { %9852 = vst.msk [vmem:[%s15959_s19 + $0xf0] sm:$0xff] %vm9821_vm1, %v9812_v47  ;;  %v9913_v1 = vsel %vm9821_vm1, %v9812_v47, 0.0  ;;  %v9955_v13 = vmul.f32 %v9812_v47, %v9812_v47  ;;  %s11086_s19 = smov [#allocation5]  }
 0xf8f   : > { %v10018_v22 = vsel %vm9821_vm1, %v9956_v33, 0.0  ;;  %v9914_v20 = vadd.f32 %v9913_v1, %v9912_v45  ;;  %v10015_v14 = vadd.f32 %v10014_v26, %v10013_v34  ;;  %s10982_s16 = sshll.u32 %s11086_s19, 4  ;;  %s10983_s16 = int_to_ptr.vmem [resolvable:$false] %s10982_s16 }
 0xf90   : > { %v10016_v49 = vsel %vm9821_vm1, %v9955_v13, 0.0  ;;  %s10984_s18 = scalar_lea.vmem %s10983_s16, 32  ;;  %p10985_p0 = scmp.lt.s32.totalorder %s16102_s21, %s10983_s16 }
 0xf91   : > { %v9916_v25 = vadd.f32 %v9915_v23, %v9914_v20  ;;  %v10017_v32 = vadd.f32 %v10016_v49, %v10015_v14  ;;  %p10986_p1 = scmp.lt.s32.totalorder %s10984_s18, %s10978_s8 }
 0xf93   : > { %v9917_v9 = vrot.slane %v9916_v25, 4  ;;  %v10019_v11 = vadd.f32 %v10018_v22, %v10017_v32  ;;  %p10987_p2 = por %p10986_p1, %p10985_p0 }
 0xf95   : > { %v9918_v15 = vadd.f32 %v9917_v9, %v9916_v25  ;;  %v10020_v16 = vrot.slane %v10019_v11, 4  ;;  %p10988_p3 = pnand %p10987_p2, %p10981_p13 }
 0xf97   : > { %v9919_v3 = vrot.slane %v9918_v15, 2  ;;  %v10021_v60 = vadd.f32 %v10020_v16, %v10019_v11 }
 0xf99   : > { %v9920_v35 = vadd.f32 %v9919_v3, %v9918_v15  ;;  %v10022_v50 = vrot.slane %v10021_v60, 2 }
 0xf9b   : > { %v9921_v24 = vrot.slane %v9920_v35, 1  ;;  %v10023_v18 = vadd.f32 %v10022_v50, %v10021_v60 }
 0xf9d   : > { %v9922_v62 = vadd.f32 %v9921_v24, %v9920_v35  ;;  %v10024_v29 = vrot.slane %v10023_v18, 1 }
 0xf9f   : > { %9924 = vst.msk [vmem:[%s281_s9] sm:$0x1] %vm9923_vm2, %v9922_v62  ;;  %v10025_v7 = vadd.f32 %v10024_v29, %v10023_v18 }
 0xfa0   : > { %10991 = shalt.err (!%p10988_p3)
}
 0xfa1   : > { %s10992_s20 = scalar_lea.hbm %s16100_s22, 16  ;;  %s10996_s23 = scalar_lea.hbm %s16182_s6, 32 }
 0xfa2   : > { %p10993_p4 = scmp.ne.s32.totalorder %s16100_s22, %s10992_s20  ;;  %p10997_p9 = scmp.lt.u32.totalorder %s16100_s22, %s16182_s6 }
 0xfa3   : > { %p10998_p10 = scmp.lt.u32.totalorder %s10996_s23, %s10992_s20  ;;  %p11000_p12 = scmp.lt.u32.totalorder %s10992_s20, %s16100_s22 }
 0xfa4   : > { %p10994_p7 = pnand %p10993_p4, %p11166_p5 }
 0xfa5   : > { %p10999_p11 = por %p10998_p10, %p10997_p9 }
 0xfa6   : > { %p10995_p8 = pneg %p10994_p7 }
 0xfa7   : > { %p11001_p13 = por %p11000_p12, %p10999_p11 }
 0xfa9   : > { %p11002_p0 = pnand %p11001_p13, %p10995_p8 }
 0xfab   : > { %11005 = shalt.err (!%p11002_p0)
}
 0xfac   : > { %10913 = dma.vmem_to_hbm [thread:$0]  (%p11166_p5), %s16102_s21, 16, %s16100_s22, %s10033_s15   ;;  %10026 = vst.msk [vmem:[%s287_s17] sm:$0x1] %vm9923_vm2, %v10025_v7 }
 0xfad   : > { %s10037_s8 = scalar_lea.sflag [#allocation8], %s16090_s13  ;;  %s11006_s18 = scalar_lea.vmem %s16110_s14, 16 }
 0xfae   : > { %p11007_p1 = scmp.ne.s32.totalorder %s16110_s14, %s11006_s18  ;;  %s11087_s20 = smov [#allocation7]  }
 0xfaf   : > { %s11010_s9 = sshll.u32 %s11087_s20, 4  ;;  %s11011_s9 = int_to_ptr.vmem [resolvable:$false] %s11010_s9 }
 0xfb0   : > { %p11008_p2 = pnand %p11007_p1, %p11166_p5  ;;  %s11012_s28 = scalar_lea.vmem %s11011_s9, 32 }
 0xfb1   : > { %p11013_p4 = scmp.lt.s32.totalorder %s16110_s14, %s11011_s9  ;;  %p11014_p7 = scmp.lt.s32.totalorder %s11012_s28, %s11006_s18 }
 0xfb2   : > { %p11009_p3 = pneg %p11008_p2 }
 0xfb3   : > { %p11015_p8 = por %p11014_p7, %p11013_p4 }
 0xfb5   : > { %p11016_p9 = pnand %p11015_p8, %p11009_p3 }
 0xfb7   : > { %11019 = shalt.err (!%p11016_p9)
}
 0xfb8   : > { %s11020_s13 = scalar_lea.hbm %s16108_s29, 16  ;;  %s11024_s22 = scalar_lea.hbm %s16183_s7, 32 }
 0xfb9   : > { %p11021_p10 = scmp.ne.s32.totalorder %s16108_s29, %s11020_s13  ;;  %p11025_p13 = scmp.lt.u32.totalorder %s16108_s29, %s16183_s7 }
 0xfba   : > { %p11026_p0 = scmp.lt.u32.totalorder %s11024_s22, %s11020_s13  ;;  %p11028_p2 = scmp.lt.u32.totalorder %s11020_s13, %s16108_s29 }
 0xfbb   : > { %p11022_p11 = pnand %p11021_p10, %p11166_p5 }
 0xfbc   : > { %p11027_p1 = por %p11026_p0, %p11025_p13 }
 0xfbd   : > { %p11023_p12 = pneg %p11022_p11 }
 0xfbe   : > { %p11029_p3 = por %p11028_p2, %p11027_p1 }
 0xfc0   : > { %p11030_p4 = pnand %p11029_p3, %p11023_p12 }
 0xfc2   : > { %11033 = shalt.err (!%p11030_p4)
}
 0xfc3   : > { %10914 = dma.vmem_to_hbm [thread:$0]  (%p11166_p5), %s16110_s14, 16, %s16108_s29, %s10037_s8  }
 0xfc4 PF: > { %p10924_p7 = scmp.ge.s32.totalorder %s11072_s27, 2  ;;  %s10085_s19 = sand.u32 1, %s11060_s24  }
 0xfc5   : > { %s10086_s16 = scalar_lea.sflag [#allocation6], %s10085_s19 }
 0xfc6   : > { %p10918_p8 = pnand %p10924_p7, %p11170_p6 }
 0xfc8   : > { %11051 = dma.done.wait (!%p10918_p8), %s10086_s16, 16  }
 0xfc9   : > { %11053 = vsyncadd (!%p10918_p8), %s10086_s16, 4294967280  ;;  %s10094_s18 = scalar_lea.sflag [#allocation8], %s10085_s19 }
 0xfca   : > { %11055 = dma.done.wait (!%p10918_p8), %s10094_s18, 16  }
 0xfcb   : > { %11057 = vsyncadd (!%p10918_p8), %s10094_s18, 4294967280  ;;  %p21_p5 = scmp.ge.s32.totalorder %s11153_s30, 4   ;;  %s16375_s24 = smov %s11064_s25 }
 0xfcc   : > { %s16376_s25 = smov %s11068_s26  ;;  %s16377_s26 = smov %s11164_s10 }
 0xfcd   : > { %s16378_s27 = smov %s11153_s30  ;;  %23 = sbr.rel (!%p21_p5) target bundleno = 5 (0x5), region = 115 }
 0xfd4   :  { %10098 = vsyncpa [#allocation6], 1 }
 0xfd5   :  { %10100 = vsyncpa [#allocation6 + $0x1], 1 }
 0xfd6   :  { %10101 = vsyncpa [#allocation8], 1 }
 0xfd7   :  { %10103 = vsyncpa [#allocation8 + $0x1], 1 }

</bundles_post_ra>
